<compile_context>
chip_gen: v7x
topology: tpu7x:2x2x1
jax: 0.10.0
libtpu: 0.0.40
codegen_flags: <defaults>
</compile_context>

<pallas_src>
import functools

import jax
import jax.numpy as jnp
from jax.experimental import pallas as pl
from jax.experimental.pallas import tpu as pltpu


# ----------------------------------------------------------------------------
# Fused Inception kernel (NB batch images per grid step)
# ----------------------------------------------------------------------------
def _build_inception_kernel(NB, H, W, Cin, C1, C2r, C3r, C2, C3, Cp):
    C23r = C2r + C3r
    C23 = C2 + C3
    Ctot = C1 + C23 + Cp
    NBHW = NB * H * W
    taps = [(dh, dw) for dh in range(3) for dw in range(3)]

    def kernel(x_ref, w1_ref, b1_ref, w3_ref, b3_ref, w4_ref, b4_ref,
               o_ref, pad23_ref, padx_ref):
        # ---- border-only (re)fill of the padded scratch buffers ------------
        # (interior is overwritten every step; refilling just the 1-element
        #  frame is cheap and correct regardless of how grid steps are split
        #  across TensorCores)
        z_row = jnp.zeros((NB, 1, W + 2, C23r), pad23_ref.dtype)
        z_col = jnp.zeros((NB, H + 2, 1, C23r), pad23_ref.dtype)
        pad23_ref[:, 0:1, :, :] = z_row
        pad23_ref[:, H + 1:H + 2, :, :] = z_row
        pad23_ref[:, :, 0:1, :] = z_col
        pad23_ref[:, :, W + 1:W + 2, :] = z_col
        m_row = jnp.full((NB, 1, W + 2, Cin), -jnp.inf, padx_ref.dtype)
        m_col = jnp.full((NB, H + 2, 1, Cin), -jnp.inf, padx_ref.dtype)
        padx_ref[:, 0:1, :, :] = m_row
        padx_ref[:, H + 1:H + 2, :, :] = m_row
        padx_ref[:, :, 0:1, :] = m_col
        padx_ref[:, :, W + 1:W + 2, :] = m_col

        x4 = x_ref[...]                                   # (NB,H,W,Cin) bf16
        x2 = x4.reshape(NBHW, Cin)

        # ---- fused 1x1 stage: branch1 + branch2-reduce + branch3-reduce ----
        y1 = jnp.dot(x2, w1_ref[...], preferred_element_type=jnp.float32)
        y1 = jnp.maximum(y1 + b1_ref[...], 0.0)           # (NBHW, C1+C23r)
        br1 = y1[:, :C1]                                  # branch1 output
        t23 = y1[:, C1:].astype(jnp.bfloat16)             # (NBHW, C23r)

        # ---- branch2 + branch3: two 3x3 convs = 9 accumulating MXU passes --
        pad23_ref[:, 1:H + 1, 1:W + 1, :] = t23.reshape(NB, H, W, C23r)

        def tap_dot(k):
            dh, dw = taps[k]
            sh = pad23_ref[:, dh:dh + H, dw:dw + W, :].reshape(NBHW, C23r)
            return jnp.dot(sh, w3_ref[k], preferred_element_type=jnp.float32)

        y23 = tap_dot(0)
        for k in range(1, 9):
            y23 = y23 + tap_dot(k)
        y23 = jnp.maximum(y23 + b3_ref[...], 0.0)         # (NBHW, C2+C3)

        # ---- branch4: separable 3x3/s1/p1 max-pool, then 1x1 conv ----------
        padx_ref[:, 1:H + 1, 1:W + 1, :] = x4
        rmax = jnp.maximum(
            jnp.maximum(padx_ref[:, :, 0:W, :], padx_ref[:, :, 1:W + 1, :]),
            padx_ref[:, :, 2:W + 2, :])                   # (NB,H+2,W,Cin)
        pooled = jnp.maximum(
            jnp.maximum(rmax[:, 0:H, :, :], rmax[:, 1:H + 1, :, :]),
            rmax[:, 2:H + 2, :, :])                       # (NB,H,W,Cin) bf16
        y4 = jnp.dot(pooled.reshape(NBHW, Cin), w4_ref[...],
                     preferred_element_type=jnp.float32)
        y4 = jnp.maximum(y4 + b4_ref[...], 0.0)           # (NBHW, Cp)

        # ---- direct channel-slice writes (no lane-axis concat) -------------
        o_ref[:, :, :, 0:C1] = br1.reshape(NB, H, W, C1).astype(o_ref.dtype)
        o_ref[:, :, :, C1:C1 + C23] = (
            y23.reshape(NB, H, W, C23).astype(o_ref.dtype))
        o_ref[:, :, :, C1 + C23:Ctot] = (
            y4.reshape(NB, H, W, Cp).astype(o_ref.dtype))

    return kernel


# ----------------------------------------------------------------------------
# Forward wrapper (NCHW in / NCHW out, like the PyTorch module)
# ----------------------------------------------------------------------------
@functools.partial(jax.jit, static_argnames=("dims",))
def inception_forward(x_nchw, weights, dims):
    C1, C2r, C3r, C2, C3, Cp = dims
    C23r = C2r + C3r
    C23 = C2 + C3
    N, Cin, H, W = x_nchw.shape
    HW = H * W
    Ctot = C1 + C23 + Cp

    # Images per grid step: target >= 128 matmul rows while keeping >= 2
    # parallel grid steps when N >= 2 (v7x dual TensorCore).
    NB = max(1, min(N, -(-128 // HW)))
    if N >= 2:
        NB = max(1, min(NB, N // 2))
    while N % NB:
        NB -= 1

    x = jnp.transpose(x_nchw, (0, 2, 3, 1)).astype(jnp.bfloat16)   # NHWC bf16

    kernel = _build_inception_kernel(NB, H, W, Cin, C1, C2r, C3r, C2, C3, Cp)

    w_elems = Cin * (C1 + C23r) + 9 * C23r * C23 + Cin * Cp
    flops = 2 * N * HW * w_elems + 8 * N * HW * Cin
    bytes_accessed = (N * HW * Cin * 2 + N * HW * Ctot * 2
                      + w_elems * 2 + (C1 + C23r + C23 + Cp) * 4)

    out = pl.pallas_call(
        kernel,
        out_shape=jax.ShapeDtypeStruct((N, H, W, Ctot), jnp.bfloat16),
        grid=(N // NB,),
        in_specs=[
            pl.BlockSpec((NB, H, W, Cin), lambda n: (n, 0, 0, 0)),
            pl.BlockSpec((Cin, C1 + C23r), lambda n: (0, 0)),
            pl.BlockSpec((1, C1 + C23r), lambda n: (0, 0)),
            pl.BlockSpec((9, C23r, C23), lambda n: (0, 0, 0)),
            pl.BlockSpec((1, C23), lambda n: (0, 0)),
            pl.BlockSpec((Cin, Cp), lambda n: (0, 0)),
            pl.BlockSpec((1, Cp), lambda n: (0, 0)),
        ],
        out_specs=pl.BlockSpec((NB, H, W, Ctot), lambda n: (n, 0, 0, 0)),
        scratch_shapes=[
            pltpu.VMEM((NB, H + 2, W + 2, C23r), jnp.bfloat16),  # 0-padded t23
            pltpu.VMEM((NB, H + 2, W + 2, Cin), jnp.bfloat16),   # -inf padded x
        ],
        compiler_params=pltpu.CompilerParams(
            dimension_semantics=("parallel",)),
        cost_estimate=pl.CostEstimate(
            flops=int(flops), transcendentals=0,
            bytes_accessed=int(bytes_accessed)),
    )(x, weights["w1"], weights["b1"], weights["w3"], weights["b3"],
      weights["w4"], weights["b4"])

    # bf16 -> f32 cast fuses with the layout transpose in XLA.
    return jnp.transpose(out, (0, 3, 1, 2)).astype(jnp.float32)


# ----------------------------------------------------------------------------
# Parameter construction (deterministic), BatchNorm folding, weight packing
# ----------------------------------------------------------------------------
def _fold_bn(w, b, eps=1e-5):
    # Fresh BatchNorm2d (eval mode): gamma=1, beta=0, mean=0, var=1.
    scale = 1.0 / jnp.sqrt(1.0 + eps)
    return w * scale, b * scale


def _conv_params(key, cin, cout, ks):
    kw, kb = jax.random.split(key)
    fan_in = cin * ks * ks
    bound = 1.0 / (fan_in ** 0.5)
    if ks == 1:
        w = jax.random.uniform(kw, (cin, cout), jnp.float32, -bound, bound)
    else:
        w = jax.random.uniform(kw, (ks * ks, cin, cout), jnp.float32,
                               -bound, bound)
    b = jax.random.uniform(kb, (cout,), jnp.float32, -bound, bound)
    return _fold_bn(w, b)


def make_inception_params(key, in_ch, ch1x1, ch3_1_1, ch3_1, ch3_2_1, ch3_2,
                          pool_ch):
    ks = jax.random.split(key, 6)
    b1_w, b1_b = _conv_params(ks[0], in_ch, ch1x1, 1)
    b2_w1, b2_b1 = _conv_params(ks[1], in_ch, ch3_1_1, 1)
    b2_w2, b2_b2 = _conv_params(ks[2], ch3_1_1, ch3_1, 3)
    b3_w1, b3_b1 = _conv_params(ks[3], in_ch, ch3_2_1, 1)
    b3_w2, b3_b2 = _conv_params(ks[4], ch3_2_1, ch3_2, 3)
    b4_w, b4_b = _conv_params(ks[5], in_ch, pool_ch, 1)

    C23r = ch3_1_1 + ch3_2_1
    # Wide 1x1 weight shared by branch1 / branch2-reduce / branch3-reduce.
    w1 = jnp.concatenate([b1_w, b2_w1, b3_w1], axis=1)
    b1 = jnp.concatenate([b1_b, b2_b1, b3_b1])
    # Per-tap block-diagonal weight for the two 3x3 convs: (9, C23r, C2+C3).
    w3 = jnp.zeros((9, C23r, ch3_1 + ch3_2), jnp.float32)
    w3 = w3.at[:, :ch3_1_1, :ch3_1].set(b2_w2)
    w3 = w3.at[:, ch3_1_1:, ch3_1:].set(b3_w2)
    b3 = jnp.concatenate([b2_b2, b3_b2])

    weights = {
        "w1": w1.astype(jnp.bfloat16), "b1": b1.reshape(1, -1),
        "w3": w3.astype(jnp.bfloat16), "b3": b3.reshape(1, -1),
        "w4": b4_w.astype(jnp.bfloat16), "b4": b4_b.reshape(1, -1),
    }
    ref_params = {
        "b1_w": b1_w, "b1_b": b1_b,
        "b2_w1": b2_w1, "b2_b1": b2_b1, "b2_w2": b2_w2, "b2_b2": b2_b2,
        "b3_w1": b3_w1, "b3_b1": b3_b1, "b3_w2": b3_w2, "b3_b2": b3_b2,
        "b4_w": b4_w, "b4_b": b4_b,
    }
    dims = (ch1x1, ch3_1_1, ch3_2_1, ch3_1, ch3_2, pool_ch)
    return weights, ref_params, dims


# ----------------------------------------------------------------------------
# Pure-JAX reference (mirrors the kernel's bf16 cast points, f32 accumulation)
# ----------------------------------------------------------------------------
def _ref_forward(x_nchw, p):
    x = jnp.transpose(x_nchw, (0, 2, 3, 1)).astype(jnp.bfloat16)

    def c1(xin, w, b):
        y = jnp.einsum("nhwc,cd->nhwd", xin, w.astype(jnp.bfloat16),
                       preferred_element_type=jnp.float32)
        return jnp.maximum(y + b, 0.0)

    def c3(xin, w, b):
        w4 = w.reshape(3, 3, w.shape[1], w.shape[2]).astype(jnp.bfloat16)
        y = jax.lax.conv_general_dilated(
            xin, w4, (1, 1), "SAME",
            dimension_numbers=("NHWC", "HWIO", "NHWC"),
            preferred_element_type=jnp.float32)
        return jnp.maximum(y + b, 0.0)

    def mp(xin):
        return jax.lax.reduce_window(xin, jnp.array(-jnp.inf, xin.dtype),
                                     jax.lax.max, (1, 3, 3, 1), (1, 1, 1, 1),
                                     "SAME")

    br1 = c1(x, p["b1_w"], p["b1_b"])
    br2 = c3(c1(x, p["b2_w1"], p["b2_b1"]).astype(jnp.bfloat16),
             p["b2_w2"], p["b2_b2"])
    br3 = c3(c1(x, p["b3_w1"], p["b3_b1"]).astype(jnp.bfloat16),
             p["b3_w2"], p["b3_b2"])
    br4 = c1(mp(x), p["b4_w"], p["b4_b"])
    return jnp.transpose(jnp.concatenate([br1, br2, br3, br4], -1),
                         (0, 3, 1, 2))


if __name__ == "__main__":
    key = jax.random.PRNGKey(0)
    k_x, k_p = jax.random.split(key)

    # Inception config: in=16, ch1x1=8, 3x3 branch A: 8->16, 3x3 branch B:
    # 4->8, pool branch: 8.  Output channels = 8 + 16 + 8 + 8 = 40.
    N, C, H, W = 2, 16, 16, 16
    x = jax.random.normal(k_x, (N, C, H, W), jnp.float32)
    weights, ref_params, dims = make_inception_params(k_p, C, 8, 8, 16, 4, 8, 8)

    out = inception_forward(x, weights, dims=dims)
    out = jax.block_until_ready(out)
    assert out.shape == (N, 40, H, W), out.shape

    ref = _ref_forward(x, ref_params)
    err = float(jnp.max(jnp.abs(out - ref)))
    assert err < 3e-2, err

    print("KERNEL_OK")
</pallas_src>

<mosaic_0001>
module attributes {stable_mosaic.version = 11 : i64} {
  func.func @kernel(%arg0: i32, %arg1: memref<1x16x16x16xbf16, #tpu.memory_space<vmem>>, %arg2: memref<16x20xbf16, #tpu.memory_space<vmem>>, %arg3: memref<1x20xf32, #tpu.memory_space<vmem>>, %arg4: memref<9x12x24xbf16, #tpu.memory_space<vmem>>, %arg5: memref<1x24xf32, #tpu.memory_space<vmem>>, %arg6: memref<16x8xbf16, #tpu.memory_space<vmem>>, %arg7: memref<1x8xf32, #tpu.memory_space<vmem>>, %arg8: memref<1x16x16x40xbf16, #tpu.memory_space<vmem>>, %arg9: memref<1x18x18x12xbf16, #tpu.memory_space<vmem>>, %arg10: memref<1x18x18x16xbf16, #tpu.memory_space<vmem>>) attributes {dimension_semantics = [#tpu.dimension_semantics<parallel>], iteration_bounds = array<i64: 2>, scalar_prefetch = 0 : i64, scratch_operands = 2 : i64, tpu.core_type = #tpu.core_type<tc>, window_params = [{transform_indices = @transform_0, window_bounds = array<i64: 1, 16, 16, 16>}, {pipeline_mode = #tpu.pipeline_mode<synchronous>, transform_indices = @transform_1, window_bounds = array<i64: 16, 20>}, {pipeline_mode = #tpu.pipeline_mode<synchronous>, transform_indices = @transform_2, window_bounds = array<i64: 1, 20>}, {pipeline_mode = #tpu.pipeline_mode<synchronous>, transform_indices = @transform_3, window_bounds = array<i64: 9, 12, 24>}, {pipeline_mode = #tpu.pipeline_mode<synchronous>, transform_indices = @transform_4, window_bounds = array<i64: 1, 24>}, {pipeline_mode = #tpu.pipeline_mode<synchronous>, transform_indices = @transform_5, window_bounds = array<i64: 16, 8>}, {pipeline_mode = #tpu.pipeline_mode<synchronous>, transform_indices = @transform_6, window_bounds = array<i64: 1, 8>}, {transform_indices = @transform_7, window_bounds = array<i64: 1, 16, 16, 40>}]} {
    %cst = arith.constant 0.000000e+00 : bf16
    %0 = vector.broadcast %cst : bf16 to vector<1x1x18x12xbf16>
    %cst_0 = arith.constant 0.000000e+00 : bf16
    %1 = vector.broadcast %cst_0 : bf16 to vector<1x18x1x12xbf16>
    %c0 = arith.constant 0 : index
    %c0_1 = arith.constant 0 : index
    %c0_2 = arith.constant 0 : index
    %c0_3 = arith.constant 0 : index
    %2 = vector.load %arg9[%c0, %c0_1, %c0_2, %c0_3] : memref<1x18x18x12xbf16, #tpu.memory_space<vmem>>, vector<1x1x18x12xbf16>
    tpu.vector_store %arg9[%c0, %c0_1, %c0_2, %c0_3], %0 {strides = array<i32>} : memref<1x18x18x12xbf16, #tpu.memory_space<vmem>>, vector<1x1x18x12xbf16>,
    %c0_4 = arith.constant 0 : index
    %c17 = arith.constant 17 : index
    %c0_5 = arith.constant 0 : index
    %c0_6 = arith.constant 0 : index
    %3 = vector.load %arg9[%c0_4, %c17, %c0_5, %c0_6] : memref<1x18x18x12xbf16, #tpu.memory_space<vmem>>, vector<1x1x18x12xbf16>
    tpu.vector_store %arg9[%c0_4, %c17, %c0_5, %c0_6], %0 {strides = array<i32>} : memref<1x18x18x12xbf16, #tpu.memory_space<vmem>>, vector<1x1x18x12xbf16>,
    %c0_7 = arith.constant 0 : index
    %c0_8 = arith.constant 0 : index
    %c0_9 = arith.constant 0 : index
    %c0_10 = arith.constant 0 : index
    %4 = vector.load %arg9[%c0_7, %c0_8, %c0_9, %c0_10] : memref<1x18x18x12xbf16, #tpu.memory_space<vmem>>, vector<1x18x1x12xbf16>
    tpu.vector_store %arg9[%c0_7, %c0_8, %c0_9, %c0_10], %1 {strides = array<i32>} : memref<1x18x18x12xbf16, #tpu.memory_space<vmem>>, vector<1x18x1x12xbf16>,
    %c0_11 = arith.constant 0 : index
    %c0_12 = arith.constant 0 : index
    %c17_13 = arith.constant 17 : index
    %c0_14 = arith.constant 0 : index
    %5 = vector.load %arg9[%c0_11, %c0_12, %c17_13, %c0_14] : memref<1x18x18x12xbf16, #tpu.memory_space<vmem>>, vector<1x18x1x12xbf16>
    tpu.vector_store %arg9[%c0_11, %c0_12, %c17_13, %c0_14], %1 {strides = array<i32>} : memref<1x18x18x12xbf16, #tpu.memory_space<vmem>>, vector<1x18x1x12xbf16>,
    %cst_15 = arith.constant 0xFF80 : bf16
    %6 = vector.broadcast %cst_15 : bf16 to vector<1x1x18x16xbf16>
    %cst_16 = arith.constant 0xFF80 : bf16
    %7 = vector.broadcast %cst_16 : bf16 to vector<1x18x1x16xbf16>
    %c0_17 = arith.constant 0 : index
    %c0_18 = arith.constant 0 : index
    %c0_19 = arith.constant 0 : index
    %c0_20 = arith.constant 0 : index
    %8 = vector.load %arg10[%c0_17, %c0_18, %c0_19, %c0_20] : memref<1x18x18x16xbf16, #tpu.memory_space<vmem>>, vector<1x1x18x16xbf16>
    tpu.vector_store %arg10[%c0_17, %c0_18, %c0_19, %c0_20], %6 {strides = array<i32>} : memref<1x18x18x16xbf16, #tpu.memory_space<vmem>>, vector<1x1x18x16xbf16>,
    %c0_21 = arith.constant 0 : index
    %c17_22 = arith.constant 17 : index
    %c0_23 = arith.constant 0 : index
    %c0_24 = arith.constant 0 : index
    %9 = vector.load %arg10[%c0_21, %c17_22, %c0_23, %c0_24] : memref<1x18x18x16xbf16, #tpu.memory_space<vmem>>, vector<1x1x18x16xbf16>
    tpu.vector_store %arg10[%c0_21, %c17_22, %c0_23, %c0_24], %6 {strides = array<i32>} : memref<1x18x18x16xbf16, #tpu.memory_space<vmem>>, vector<1x1x18x16xbf16>,
    %c0_25 = arith.constant 0 : index
    %c0_26 = arith.constant 0 : index
    %c0_27 = arith.constant 0 : index
    %c0_28 = arith.constant 0 : index
    %10 = vector.load %arg10[%c0_25, %c0_26, %c0_27, %c0_28] : memref<1x18x18x16xbf16, #tpu.memory_space<vmem>>, vector<1x18x1x16xbf16>
    tpu.vector_store %arg10[%c0_25, %c0_26, %c0_27, %c0_28], %7 {strides = array<i32>} : memref<1x18x18x16xbf16, #tpu.memory_space<vmem>>, vector<1x18x1x16xbf16>,
    %c0_29 = arith.constant 0 : index
    %c0_30 = arith.constant 0 : index
    %c17_31 = arith.constant 17 : index
    %c0_32 = arith.constant 0 : index
    %11 = vector.load %arg10[%c0_29, %c0_30, %c17_31, %c0_32] : memref<1x18x18x16xbf16, #tpu.memory_space<vmem>>, vector<1x18x1x16xbf16>
    tpu.vector_store %arg10[%c0_29, %c0_30, %c17_31, %c0_32], %7 {strides = array<i32>} : memref<1x18x18x16xbf16, #tpu.memory_space<vmem>>, vector<1x18x1x16xbf16>,
    %c0_33 = arith.constant 0 : index
    %c0_34 = arith.constant 0 : index
    %c0_35 = arith.constant 0 : index
    %c0_36 = arith.constant 0 : index
    %12 = vector.load %arg1[%c0_33, %c0_34, %c0_35, %c0_36] : memref<1x16x16x16xbf16, #tpu.memory_space<vmem>>, vector<1x16x16x16xbf16>
    %13 = vector.shape_cast %12 : vector<1x16x16x16xbf16> to vector<256x16xbf16>
    %c0_37 = arith.constant 0 : index
    %c0_38 = arith.constant 0 : index
    %14 = vector.load %arg2[%c0_37, %c0_38] : memref<16x20xbf16, #tpu.memory_space<vmem>>, vector<16x20xbf16>
    %cst_39 = arith.constant dense<0.000000e+00> : vector<256x20xf32>
    %15 = tpu.matmul %13, %14, %cst_39 {dimension_numbers = #tpu.dot_dimension_numbers<[1], [0], [0], [1], [0, 0, 1, 1], [], []>} : vector<256x16xbf16>, vector<16x20xbf16>, vector<256x20xf32> -> vector<256x20xf32>
    %c0_40 = arith.constant 0 : index
    %c0_41 = arith.constant 0 : index
    %16 = vector.load %arg3[%c0_40, %c0_41] : memref<1x20xf32, #tpu.memory_space<vmem>>, vector<1x20xf32>
    %17 = vector.broadcast %16 : vector<1x20xf32> to vector<256x20xf32>
    %18 = arith.addf %15, %17 : vector<256x20xf32>
    %cst_42 = arith.constant 0.000000e+00 : f32
    %19 = vector.broadcast %cst_42 : f32 to vector<256x20xf32>
    %20 = arith.maximumf %18, %19 : vector<256x20xf32>
    %21 = vector.extract_strided_slice %20 {offsets = [0, 0], sizes = [256, 8], strides = [1, 1]} : vector<256x20xf32> to vector<256x8xf32>
    %22 = vector.extract_strided_slice %20 {offsets = [0, 8], sizes = [256, 12], strides = [1, 1]} : vector<256x20xf32> to vector<256x12xf32>
    %23 = arith.truncf %22 : vector<256x12xf32> to vector<256x12xbf16>
    %24 = vector.shape_cast %23 : vector<256x12xbf16> to vector<1x16x16x12xbf16>
    %c0_43 = arith.constant 0 : index
    %c1 = arith.constant 1 : index
    %c1_44 = arith.constant 1 : index
    %c0_45 = arith.constant 0 : index
    %25 = vector.load %arg9[%c0_43, %c1, %c1_44, %c0_45] : memref<1x18x18x12xbf16, #tpu.memory_space<vmem>>, vector<1x16x16x12xbf16>
    tpu.vector_store %arg9[%c0_43, %c1, %c1_44, %c0_45], %24 {strides = array<i32>} : memref<1x18x18x12xbf16, #tpu.memory_space<vmem>>, vector<1x16x16x12xbf16>,
    %c0_46 = arith.constant 0 : index
    %c0_47 = arith.constant 0 : index
    %c0_48 = arith.constant 0 : index
    %c0_49 = arith.constant 0 : index
    %26 = vector.load %arg9[%c0_46, %c0_47, %c0_48, %c0_49] : memref<1x18x18x12xbf16, #tpu.memory_space<vmem>>, vector<1x16x16x12xbf16>
    %27 = vector.shape_cast %26 : vector<1x16x16x12xbf16> to vector<256x12xbf16>
    %c0_50 = arith.constant 0 : index
    %c0_51 = arith.constant 0 : index
    %c0_52 = arith.constant 0 : index
    %28 = vector.load %arg4[%c0_50, %c0_51, %c0_52] : memref<9x12x24xbf16, #tpu.memory_space<vmem>>, vector<1x12x24xbf16>
    %29 = vector.shape_cast %28 : vector<1x12x24xbf16> to vector<12x24xbf16>
    %cst_53 = arith.constant dense<0.000000e+00> : vector<256x24xf32>
    %30 = tpu.matmul %27, %29, %cst_53 {dimension_numbers = #tpu.dot_dimension_numbers<[1], [0], [0], [1], [0, 0, 1, 1], [], []>} : vector<256x12xbf16>, vector<12x24xbf16>, vector<256x24xf32> -> vector<256x24xf32>
    %c0_54 = arith.constant 0 : index
    %c0_55 = arith.constant 0 : index
    %c1_56 = arith.constant 1 : index
    %c0_57 = arith.constant 0 : index
    %31 = vector.load %arg9[%c0_54, %c0_55, %c1_56, %c0_57] : memref<1x18x18x12xbf16, #tpu.memory_space<vmem>>, vector<1x16x16x12xbf16>
    %32 = vector.shape_cast %31 : vector<1x16x16x12xbf16> to vector<256x12xbf16>
    %c1_58 = arith.constant 1 : index
    %c0_59 = arith.constant 0 : index
    %c0_60 = arith.constant 0 : index
    %33 = vector.load %arg4[%c1_58, %c0_59, %c0_60] : memref<9x12x24xbf16, #tpu.memory_space<vmem>>, vector<1x12x24xbf16>
    %34 = vector.shape_cast %33 : vector<1x12x24xbf16> to vector<12x24xbf16>
    %cst_61 = arith.constant dense<0.000000e+00> : vector<256x24xf32>
    %35 = tpu.matmul %32, %34, %cst_61 {dimension_numbers = #tpu.dot_dimension_numbers<[1], [0], [0], [1], [0, 0, 1, 1], [], []>} : vector<256x12xbf16>, vector<12x24xbf16>, vector<256x24xf32> -> vector<256x24xf32>
    %36 = arith.addf %30, %35 : vector<256x24xf32>
    %c0_62 = arith.constant 0 : index
    %c0_63 = arith.constant 0 : index
    %c2 = arith.constant 2 : index
    %c0_64 = arith.constant 0 : index
    %37 = vector.load %arg9[%c0_62, %c0_63, %c2, %c0_64] : memref<1x18x18x12xbf16, #tpu.memory_space<vmem>>, vector<1x16x16x12xbf16>
    %38 = vector.shape_cast %37 : vector<1x16x16x12xbf16> to vector<256x12xbf16>
    %c2_65 = arith.constant 2 : index
    %c0_66 = arith.constant 0 : index
    %c0_67 = arith.constant 0 : index
    %39 = vector.load %arg4[%c2_65, %c0_66, %c0_67] : memref<9x12x24xbf16, #tpu.memory_space<vmem>>, vector<1x12x24xbf16>
    %40 = vector.shape_cast %39 : vector<1x12x24xbf16> to vector<12x24xbf16>
    %cst_68 = arith.constant dense<0.000000e+00> : vector<256x24xf32>
    %41 = tpu.matmul %38, %40, %cst_68 {dimension_numbers = #tpu.dot_dimension_numbers<[1], [0], [0], [1], [0, 0, 1, 1], [], []>} : vector<256x12xbf16>, vector<12x24xbf16>, vector<256x24xf32> -> vector<256x24xf32>
    %42 = arith.addf %36, %41 : vector<256x24xf32>
    %c0_69 = arith.constant 0 : index
    %c1_70 = arith.constant 1 : index
    %c0_71 = arith.constant 0 : index
    %c0_72 = arith.constant 0 : index
    %43 = vector.load %arg9[%c0_69, %c1_70, %c0_71, %c0_72] : memref<1x18x18x12xbf16, #tpu.memory_space<vmem>>, vector<1x16x16x12xbf16>
    %44 = vector.shape_cast %43 : vector<1x16x16x12xbf16> to vector<256x12xbf16>
    %c3 = arith.constant 3 : index
    %c0_73 = arith.constant 0 : index
    %c0_74 = arith.constant 0 : index
    %45 = vector.load %arg4[%c3, %c0_73, %c0_74] : memref<9x12x24xbf16, #tpu.memory_space<vmem>>, vector<1x12x24xbf16>
    %46 = vector.shape_cast %45 : vector<1x12x24xbf16> to vector<12x24xbf16>
    %cst_75 = arith.constant dense<0.000000e+00> : vector<256x24xf32>
    %47 = tpu.matmul %44, %46, %cst_75 {dimension_numbers = #tpu.dot_dimension_numbers<[1], [0], [0], [1], [0, 0, 1, 1], [], []>} : vector<256x12xbf16>, vector<12x24xbf16>, vector<256x24xf32> -> vector<256x24xf32>
    %48 = arith.addf %42, %47 : vector<256x24xf32>
    %c0_76 = arith.constant 0 : index
    %c1_77 = arith.constant 1 : index
    %c1_78 = arith.constant 1 : index
    %c0_79 = arith.constant 0 : index
    %49 = vector.load %arg9[%c0_76, %c1_77, %c1_78, %c0_79] : memref<1x18x18x12xbf16, #tpu.memory_space<vmem>>, vector<1x16x16x12xbf16>
    %50 = vector.shape_cast %49 : vector<1x16x16x12xbf16> to vector<256x12xbf16>
    %c4 = arith.constant 4 : index
    %c0_80 = arith.constant 0 : index
    %c0_81 = arith.constant 0 : index
    %51 = vector.load %arg4[%c4, %c0_80, %c0_81] : memref<9x12x24xbf16, #tpu.memory_space<vmem>>, vector<1x12x24xbf16>
    %52 = vector.shape_cast %51 : vector<1x12x24xbf16> to vector<12x24xbf16>
    %cst_82 = arith.constant dense<0.000000e+00> : vector<256x24xf32>
    %53 = tpu.matmul %50, %52, %cst_82 {dimension_numbers = #tpu.dot_dimension_numbers<[1], [0], [0], [1], [0, 0, 1, 1], [], []>} : vector<256x12xbf16>, vector<12x24xbf16>, vector<256x24xf32> -> vector<256x24xf32>
    %54 = arith.addf %48, %53 : vector<256x24xf32>
    %c0_83 = arith.constant 0 : index
    %c1_84 = arith.constant 1 : index
    %c2_85 = arith.constant 2 : index
    %c0_86 = arith.constant 0 : index
    %55 = vector.load %arg9[%c0_83, %c1_84, %c2_85, %c0_86] : memref<1x18x18x12xbf16, #tpu.memory_space<vmem>>, vector<1x16x16x12xbf16>
    %56 = vector.shape_cast %55 : vector<1x16x16x12xbf16> to vector<256x12xbf16>
    %c5 = arith.constant 5 : index
    %c0_87 = arith.constant 0 : index
    %c0_88 = arith.constant 0 : index
    %57 = vector.load %arg4[%c5, %c0_87, %c0_88] : memref<9x12x24xbf16, #tpu.memory_space<vmem>>, vector<1x12x24xbf16>
    %58 = vector.shape_cast %57 : vector<1x12x24xbf16> to vector<12x24xbf16>
    %cst_89 = arith.constant dense<0.000000e+00> : vector<256x24xf32>
    %59 = tpu.matmul %56, %58, %cst_89 {dimension_numbers = #tpu.dot_dimension_numbers<[1], [0], [0], [1], [0, 0, 1, 1], [], []>} : vector<256x12xbf16>, vector<12x24xbf16>, vector<256x24xf32> -> vector<256x24xf32>
    %60 = arith.addf %54, %59 : vector<256x24xf32>
    %c0_90 = arith.constant 0 : index
    %c2_91 = arith.constant 2 : index
    %c0_92 = arith.constant 0 : index
    %c0_93 = arith.constant 0 : index
    %61 = vector.load %arg9[%c0_90, %c2_91, %c0_92, %c0_93] : memref<1x18x18x12xbf16, #tpu.memory_space<vmem>>, vector<1x16x16x12xbf16>
    %62 = vector.shape_cast %61 : vector<1x16x16x12xbf16> to vector<256x12xbf16>
    %c6 = arith.constant 6 : index
    %c0_94 = arith.constant 0 : index
    %c0_95 = arith.constant 0 : index
    %63 = vector.load %arg4[%c6, %c0_94, %c0_95] : memref<9x12x24xbf16, #tpu.memory_space<vmem>>, vector<1x12x24xbf16>
    %64 = vector.shape_cast %63 : vector<1x12x24xbf16> to vector<12x24xbf16>
    %cst_96 = arith.constant dense<0.000000e+00> : vector<256x24xf32>
    %65 = tpu.matmul %62, %64, %cst_96 {dimension_numbers = #tpu.dot_dimension_numbers<[1], [0], [0], [1], [0, 0, 1, 1], [], []>} : vector<256x12xbf16>, vector<12x24xbf16>, vector<256x24xf32> -> vector<256x24xf32>
    %66 = arith.addf %60, %65 : vector<256x24xf32>
    %c0_97 = arith.constant 0 : index
    %c2_98 = arith.constant 2 : index
    %c1_99 = arith.constant 1 : index
    %c0_100 = arith.constant 0 : index
    %67 = vector.load %arg9[%c0_97, %c2_98, %c1_99, %c0_100] : memref<1x18x18x12xbf16, #tpu.memory_space<vmem>>, vector<1x16x16x12xbf16>
    %68 = vector.shape_cast %67 : vector<1x16x16x12xbf16> to vector<256x12xbf16>
    %c7 = arith.constant 7 : index
    %c0_101 = arith.constant 0 : index
    %c0_102 = arith.constant 0 : index
    %69 = vector.load %arg4[%c7, %c0_101, %c0_102] : memref<9x12x24xbf16, #tpu.memory_space<vmem>>, vector<1x12x24xbf16>
    %70 = vector.shape_cast %69 : vector<1x12x24xbf16> to vector<12x24xbf16>
    %cst_103 = arith.constant dense<0.000000e+00> : vector<256x24xf32>
    %71 = tpu.matmul %68, %70, %cst_103 {dimension_numbers = #tpu.dot_dimension_numbers<[1], [0], [0], [1], [0, 0, 1, 1], [], []>} : vector<256x12xbf16>, vector<12x24xbf16>, vector<256x24xf32> -> vector<256x24xf32>
    %72 = arith.addf %66, %71 : vector<256x24xf32>
    %c0_104 = arith.constant 0 : index
    %c2_105 = arith.constant 2 : index
    %c2_106 = arith.constant 2 : index
    %c0_107 = arith.constant 0 : index
    %73 = vector.load %arg9[%c0_104, %c2_105, %c2_106, %c0_107] : memref<1x18x18x12xbf16, #tpu.memory_space<vmem>>, vector<1x16x16x12xbf16>
    %74 = vector.shape_cast %73 : vector<1x16x16x12xbf16> to vector<256x12xbf16>
    %c8 = arith.constant 8 : index
    %c0_108 = arith.constant 0 : index
    %c0_109 = arith.constant 0 : index
    %75 = vector.load %arg4[%c8, %c0_108, %c0_109] : memref<9x12x24xbf16, #tpu.memory_space<vmem>>, vector<1x12x24xbf16>
    %76 = vector.shape_cast %75 : vector<1x12x24xbf16> to vector<12x24xbf16>
    %cst_110 = arith.constant dense<0.000000e+00> : vector<256x24xf32>
    %77 = tpu.matmul %74, %76, %cst_110 {dimension_numbers = #tpu.dot_dimension_numbers<[1], [0], [0], [1], [0, 0, 1, 1], [], []>} : vector<256x12xbf16>, vector<12x24xbf16>, vector<256x24xf32> -> vector<256x24xf32>
    %78 = arith.addf %72, %77 : vector<256x24xf32>
    %c0_111 = arith.constant 0 : index
    %c0_112 = arith.constant 0 : index
    %79 = vector.load %arg5[%c0_111, %c0_112] : memref<1x24xf32, #tpu.memory_space<vmem>>, vector<1x24xf32>
    %80 = vector.broadcast %79 : vector<1x24xf32> to vector<256x24xf32>
    %81 = arith.addf %78, %80 : vector<256x24xf32>
    %cst_113 = arith.constant 0.000000e+00 : f32
    %82 = vector.broadcast %cst_113 : f32 to vector<256x24xf32>
    %83 = arith.maximumf %81, %82 : vector<256x24xf32>
    %c0_114 = arith.constant 0 : index
    %c1_115 = arith.constant 1 : index
    %c1_116 = arith.constant 1 : index
    %c0_117 = arith.constant 0 : index
    %84 = vector.load %arg10[%c0_114, %c1_115, %c1_116, %c0_117] : memref<1x18x18x16xbf16, #tpu.memory_space<vmem>>, vector<1x16x16x16xbf16>
    tpu.vector_store %arg10[%c0_114, %c1_115, %c1_116, %c0_117], %12 {strides = array<i32>} : memref<1x18x18x16xbf16, #tpu.memory_space<vmem>>, vector<1x16x16x16xbf16>,
    %c0_118 = arith.constant 0 : index
    %c0_119 = arith.constant 0 : index
    %c0_120 = arith.constant 0 : index
    %c0_121 = arith.constant 0 : index
    %85 = vector.load %arg10[%c0_118, %c0_119, %c0_120, %c0_121] : memref<1x18x18x16xbf16, #tpu.memory_space<vmem>>, vector<1x18x16x16xbf16>
    %c0_122 = arith.constant 0 : index
    %c0_123 = arith.constant 0 : index
    %c1_124 = arith.constant 1 : index
    %c0_125 = arith.constant 0 : index
    %86 = vector.load %arg10[%c0_122, %c0_123, %c1_124, %c0_125] : memref<1x18x18x16xbf16, #tpu.memory_space<vmem>>, vector<1x18x16x16xbf16>
    %87 = arith.maximumf %85, %86 : vector<1x18x16x16xbf16>
    %c0_126 = arith.constant 0 : index
    %c0_127 = arith.constant 0 : index
    %c2_128 = arith.constant 2 : index
    %c0_129 = arith.constant 0 : index
    %88 = vector.load %arg10[%c0_126, %c0_127, %c2_128, %c0_129] : memref<1x18x18x16xbf16, #tpu.memory_space<vmem>>, vector<1x18x16x16xbf16>
    %89 = arith.maximumf %87, %88 : vector<1x18x16x16xbf16>
    %90 = vector.extract_strided_slice %89 {offsets = [0, 0, 0, 0], sizes = [1, 16, 16, 16], strides = [1, 1, 1, 1]} : vector<1x18x16x16xbf16> to vector<1x16x16x16xbf16>
    %91 = vector.extract_strided_slice %89 {offsets = [0, 1, 0, 0], sizes = [1, 16, 16, 16], strides = [1, 1, 1, 1]} : vector<1x18x16x16xbf16> to vector<1x16x16x16xbf16>
    %92 = arith.maximumf %90, %91 : vector<1x16x16x16xbf16>
    %93 = vector.extract_strided_slice %89 {offsets = [0, 2, 0, 0], sizes = [1, 16, 16, 16], strides = [1, 1, 1, 1]} : vector<1x18x16x16xbf16> to vector<1x16x16x16xbf16>
    %94 = arith.maximumf %92, %93 : vector<1x16x16x16xbf16>
    %95 = vector.shape_cast %94 : vector<1x16x16x16xbf16> to vector<256x16xbf16>
    %c0_130 = arith.constant 0 : index
    %c0_131 = arith.constant 0 : index
    %96 = vector.load %arg6[%c0_130, %c0_131] : memref<16x8xbf16, #tpu.memory_space<vmem>>, vector<16x8xbf16>
    %cst_132 = arith.constant dense<0.000000e+00> : vector<256x8xf32>
    %97 = tpu.matmul %95, %96, %cst_132 {dimension_numbers = #tpu.dot_dimension_numbers<[1], [0], [0], [1], [0, 0, 1, 1], [], []>} : vector<256x16xbf16>, vector<16x8xbf16>, vector<256x8xf32> -> vector<256x8xf32>
    %c0_133 = arith.constant 0 : index
    %c0_134 = arith.constant 0 : index
    %98 = vector.load %arg7[%c0_133, %c0_134] : memref<1x8xf32, #tpu.memory_space<vmem>>, vector<1x8xf32>
    %99 = vector.broadcast %98 : vector<1x8xf32> to vector<256x8xf32>
    %100 = arith.addf %97, %99 : vector<256x8xf32>
    %cst_135 = arith.constant 0.000000e+00 : f32
    %101 = vector.broadcast %cst_135 : f32 to vector<256x8xf32>
    %102 = arith.maximumf %100, %101 : vector<256x8xf32>
    %103 = vector.shape_cast %21 : vector<256x8xf32> to vector<1x16x16x8xf32>
    %104 = arith.truncf %103 : vector<1x16x16x8xf32> to vector<1x16x16x8xbf16>
    %c0_136 = arith.constant 0 : index
    %c0_137 = arith.constant 0 : index
    %c0_138 = arith.constant 0 : index
    %c0_139 = arith.constant 0 : index
    %105 = vector.load %arg8[%c0_136, %c0_137, %c0_138, %c0_139] : memref<1x16x16x40xbf16, #tpu.memory_space<vmem>>, vector<1x16x16x8xbf16>
    tpu.vector_store %arg8[%c0_136, %c0_137, %c0_138, %c0_139], %104 {strides = array<i32>} : memref<1x16x16x40xbf16, #tpu.memory_space<vmem>>, vector<1x16x16x8xbf16>,
    %106 = vector.shape_cast %83 : vector<256x24xf32> to vector<1x16x16x24xf32>
    %107 = arith.truncf %106 : vector<1x16x16x24xf32> to vector<1x16x16x24xbf16>
    %c0_140 = arith.constant 0 : index
    %c0_141 = arith.constant 0 : index
    %c0_142 = arith.constant 0 : index
    %c8_143 = arith.constant 8 : index
    %108 = vector.load %arg8[%c0_140, %c0_141, %c0_142, %c8_143] : memref<1x16x16x40xbf16, #tpu.memory_space<vmem>>, vector<1x16x16x24xbf16>
    tpu.vector_store %arg8[%c0_140, %c0_141, %c0_142, %c8_143], %107 {strides = array<i32>} : memref<1x16x16x40xbf16, #tpu.memory_space<vmem>>, vector<1x16x16x24xbf16>,
    %109 = vector.shape_cast %102 : vector<256x8xf32> to vector<1x16x16x8xf32>
    %110 = arith.truncf %109 : vector<1x16x16x8xf32> to vector<1x16x16x8xbf16>
    %c0_144 = arith.constant 0 : index
    %c0_145 = arith.constant 0 : index
    %c0_146 = arith.constant 0 : index
    %c32 = arith.constant 32 : index
    %111 = vector.load %arg8[%c0_144, %c0_145, %c0_146, %c32] : memref<1x16x16x40xbf16, #tpu.memory_space<vmem>>, vector<1x16x16x8xbf16>
    tpu.vector_store %arg8[%c0_144, %c0_145, %c0_146, %c32], %110 {strides = array<i32>} : memref<1x16x16x40xbf16, #tpu.memory_space<vmem>>, vector<1x16x16x8xbf16>,
    return
  }
  func.func @transform_0(%arg0: i32) -> (i32, i32, i32, i32) {
    %c0_i32 = arith.constant 0 : i32
    %c0_i32_0 = arith.constant 0 : i32
    %c0_i32_1 = arith.constant 0 : i32
    %c0_i32_2 = arith.constant 0 : i32
    return %arg0, %c0_i32, %c0_i32_0, %c0_i32_1 : i32, i32, i32, i32
  }
  func.func @transform_1(%arg0: i32) -> (i32, i32) {
    %c0_i32 = arith.constant 0 : i32
    %c0_i32_0 = arith.constant 0 : i32
    %c0_i32_1 = arith.constant 0 : i32
    return %c0_i32, %c0_i32_0 : i32, i32
  }
  func.func @transform_2(%arg0: i32) -> (i32, i32) {
    %c0_i32 = arith.constant 0 : i32
    %c0_i32_0 = arith.constant 0 : i32
    %c0_i32_1 = arith.constant 0 : i32
    return %c0_i32, %c0_i32_0 : i32, i32
  }
  func.func @transform_3(%arg0: i32) -> (i32, i32, i32) {
    %c0_i32 = arith.constant 0 : i32
    %c0_i32_0 = arith.constant 0 : i32
    %c0_i32_1 = arith.constant 0 : i32
    %c0_i32_2 = arith.constant 0 : i32
    return %c0_i32, %c0_i32_0, %c0_i32_1 : i32, i32, i32
  }
  func.func @transform_4(%arg0: i32) -> (i32, i32) {
    %c0_i32 = arith.constant 0 : i32
    %c0_i32_0 = arith.constant 0 : i32
    %c0_i32_1 = arith.constant 0 : i32
    return %c0_i32, %c0_i32_0 : i32, i32
  }
  func.func @transform_5(%arg0: i32) -> (i32, i32) {
    %c0_i32 = arith.constant 0 : i32
    %c0_i32_0 = arith.constant 0 : i32
    %c0_i32_1 = arith.constant 0 : i32
    return %c0_i32, %c0_i32_0 : i32, i32
  }
  func.func @transform_6(%arg0: i32) -> (i32, i32) {
    %c0_i32 = arith.constant 0 : i32
    %c0_i32_0 = arith.constant 0 : i32
    %c0_i32_1 = arith.constant 0 : i32
    return %c0_i32, %c0_i32_0 : i32, i32
  }
  func.func @transform_7(%arg0: i32) -> (i32, i32, i32, i32) {
    %c0_i32 = arith.constant 0 : i32
    %c0_i32_0 = arith.constant 0 : i32
    %c0_i32_1 = arith.constant 0 : i32
    %c0_i32_2 = arith.constant 0 : i32
    return %arg0, %c0_i32, %c0_i32_0, %c0_i32_1 : i32, i32, i32, i32
  }
}

</mosaic_0001>

<bundles_post_ra>
// kernel: inception_forward.1
= control target key start
LH: loop header
LB: loop body
LE: loop exit
PB: predicated region body
PF: predicated region fallthrough
CT: control target
= control target key end

     0   :  { %s10112_s24 = smov 0   ;;  %s13564_s0 = inlined_call_operand.vmem [shape: bf16[2,16,16,16], index: 0, kind: input, shape index: {}]   ;;  %s13565_s1 = inlined_call_operand.vmem [shape: bf16[16,20], index: 1, kind: input, shape index: {}]   ;;  %s13566_s2 = inlined_call_operand.vmem [shape: f32[1,20], index: 2, kind: input, shape index: {}]   ;;  %s13567_s3 = inlined_call_operand.vmem [shape: bf16[9,12,24], index: 3, kind: input, shape index: {}]   ;;  %s13568_s4 = inlined_call_operand.vmem [shape: f32[1,24], index: 4, kind: input, shape index: {}]   ;;  %s13569_s5 = inlined_call_operand.vmem [shape: bf16[16,8], index: 5, kind: input, shape index: {}]   ;;  %s13570_s6 = inlined_call_operand.vmem [shape: f32[1,8], index: 6, kind: input, shape index: {}]   ;;  %s13571_s7 = inlined_call_operand.vmem [shape: bf16[2,16,16,40], index: 7, kind: output, shape index: {}]  }
   0x1 LB: > { %s8437_s25 = sadd.s32 4294967295, %s10065_s24   ;;  %p8441_p0 = scmp.ge.s32.totalorder %s10065_s24, 1  ;;  %s10065_s24 = sphi %s10112_s24, %s17_s24  }
   0x2   : > { %p237_p1 = scmp.lt.s32.totalorder %s10065_s24, 3 }
   0x4   : > { %p238_p2 = pnand %p8441_p0, %p237_p1 }
   0x6   : > { %241 = sbr.rel (%p238_p2) target bundleno = 1248 (0x4e0), region = 48 }
   0xd   : > { %v9932_v0 = vld [vmem:[%s13565_s1] sm:$0xff]   ;;  %p269_p3 = scmp.lt.s32.totalorder %s8437_s25, 1  ;;  %vm291_vm0 = vsmask.f32 256  ;;  %vm347_vm1 = vsmask.f32 7938 }
   0xe   : > { %vm406_vm2 = vcmask 122880   ;;  %9277 = vmatprep.subr.bf16.mxu0 %v9932_v0  ;;  %v13633_v1 = vmov 0  ;;  %v417_v2 = vld [vmem:[#allocation3 + $0xc] sm:$0x1]  ;;  %v472_v3 = vld [vmem:[#allocation3 + $0x14] sm:$0x1] }
   0xf   : > { %s13814_s25 = smov (!%p269_p3, %s8437_s25), 1  ;;  %vm10127_vm3 = vmand %vm406_vm2, %vm291_vm0  ;;  %9278 = vmatpush3.bf16.msra.mxu0 %v9932_v0  ;;  %v13636_v5 = vmov 0  ;;  %v420_v6 = vld [vmem:[#allocation3 + $0x18] sm:$0x1]  ;;  %vm650_vm5 = vcmask 130048   ;;  %vm403_vm7 = vcmask 125952  }
  0x10   : > { %v13634_v1 = vsel %vm10127_vm3, 4294967295, %v13633_v1  ;;  %v418_v4 = vsel %vm10127_vm3, 4286644096, %v417_v2  ;;  %vm10135_vm4 = vmand %vm406_vm2, %vm347_vm1  ;;  %s8992_s28 = sshll.u32 %s13814_s25, 7  ;;  %v421_v8 = vsel %vm10127_vm3, 4286644096, %v420_v6 }
  0x11   : > { %13635 = vst [vmem:[#allocation4_spill] sm:$0xff] %v13634_v1  ;;  %v13637_v5 = vsel %vm10135_vm4, 4294967295, %v13636_v5  ;;  %419 = vst [vmem:[#allocation3 + $0xc] sm:$0x1] %v418_v4  ;;  %v473_v7 = vsel %vm10135_vm4, 4286644096, %v472_v3  ;;  %s10149_s8 = scalar_lea.vmem %s13564_s0, %s8992_s28  ;;  %s10412_s13 = scalar_lea.vmem %s13571_s7, %s8992_s28 }
  0x12   : > { %13638 = vst [vmem:[#allocation5_spill] sm:$0xff] %v13637_v5  ;;  %474 = vst [vmem:[#allocation3 + $0x14] sm:$0x1] %v473_v7  ;;  %vm988_vm6 = vsmask.f32 4368  ;;  %vm284_vm10 = vcmask 90112  }
  0x13   : > { %422 = vst [vmem:[#allocation3 + $0x18] sm:$0x1] %v421_v8  ;;  %v475_v9 = vld [vmem:[#allocation3 + $0x20] sm:$0x1]  ;;  %v423_v10 = vld [vmem:[#allocation3 + $0x24] sm:$0x1]  ;;  %vm10160_vm8 = vmand %vm403_vm7, %vm347_vm1 }
  0x14   : > { %v523_v11 = vld [vmem:[%s10149_s8] sm:$0xf]  ;;  %v524_v12 = vld [vmem:[%s10149_s8 + $0x4] sm:$0xf]  ;;  %v476_v13 = vsel %vm10135_vm4, 4286644096, %v475_v9  ;;  %vm10172_vm9 = vmor %vm291_vm0, %vm988_vm6 }
  0x15   : > { %v8447_v14 = vcombine.low %v523_v11, %v524_v12  ;;  %v6205_v15 = vshrl.u32 %v523_v11, 16  ;;  %v6208_v16 = vshll.u32 %v523_v11, 16  ;;  %v6213_v17 = vshrl.u32 %v524_v12, 16  ;;  %477 = vst [vmem:[#allocation3 + $0x20] sm:$0x1] %v476_v13  ;;  %vm10388_vm11 = vmand %vm284_vm10, %vm291_vm0  ;;  %s10068_s14 = smov 120  }
  0x16   : > { %v525_v18 = vld [vmem:[%s10149_s8 + $0x8] sm:$0xf]  ;;  %v6216_v19 = vshll.u32 %v524_v12, 16  ;;  %v526_v20 = vld [vmem:[%s10149_s8 + $0xc] sm:$0xf]  ;;  %vm10396_vm12 = vmand %vm284_vm10, %vm347_vm1  ;;  %vm7899_vm13 = vcmask 60416  }
  0x17   : > { %v6222_v21 = vshrl.u32 %v525_v18, 16  ;;  %v6225_v22 = vshll.u32 %v525_v18, 16  ;;  %9279 = vmatprep.mubr.msk.bf16.mxu0 %vm650_vm5, %v8447_v14  ;;  %v6207_v23 = vrot.slane %v6205_v15, 7  ;;  %v6215_v24 = vrot.slane %v6213_v17, 7  ;;  %v478_v27 = vld [vmem:[#allocation3 + $0x2c] sm:$0x1] }
  0x18   : > { %v8448_v25 = vcombine.low %v525_v18, %v526_v20  ;;  %v6230_v26 = vshrl.u32 %v526_v20, 16  ;;  %v6233_v30 = vshll.u32 %v526_v20, 16  ;;  %v424_v31 = vsel %vm10127_vm3, 4286644096, %v423_v10  ;;  %v6527_v37 = vld [vmem:[#allocation3 + $0xc] sm:$0xf] }
  0x19   : > { %v6224_v29 = vrot.slane %v6222_v21, 7  ;;  %v479_v32 = vsel %vm10135_vm4, 4286644096, %v478_v27  ;;  %v6210_v33 = vor.u32 %v6208_v16, %v6207_v23  ;;  %v6211_v34 = vrot.slane %v6207_v23, 4  ;;  %425 = vst [vmem:[#allocation3 + $0x24] sm:$0x1] %v424_v31 }
  0x1a   : > { %v6218_v35 = vor.u32 %v6216_v19, %v6215_v24  ;;  %v6220_v36 = vrot.slane %v6215_v24, 4  ;;  %9280 = vmatmul.mubr.msk.bf16.vlgmr.msra.gmra.mrb[0].mxu0 %vm650_vm5, %v8448_v25  ;;  %480 = vst [vmem:[#allocation3 + $0x2c] sm:$0x1] %v479_v32  ;;  %v527_v38 = vld [vmem:[%s10149_s8 + $0x10] sm:$0xf]  ;;  %v6232_v43 = vrot.slane %v6230_v26, 7 }
  0x1b   : > { %v6531_v40 = vld [vmem:[#allocation3 + $0x14] sm:$0x1]  ;;  %v6227_v41 = vor.u32 %v6225_v22, %v6224_v29  ;;  %v6228_v42 = vrot.slane %v6224_v29, 4  ;;  %v6534_v44 = vld [vmem:[#allocation3 + $0x18] sm:$0xf]  ;;  %v6528_v46 = vsel %vm10160_vm8, %v6210_v33, %v6527_v37  ;;  %v6239_v49 = vshrl.u32 %v527_v38, 16 }
  0x1c   : > { %v6219_v45 = vsel %vm10172_vm9, %v6211_v34, %v6218_v35  ;;  %v6532_v47 = vsel %vm10127_vm3, %v6220_v36, %v6531_v40  ;;  %v528_v48 = vld [vmem:[%s10149_s8 + $0x14] sm:$0xf]  ;;  %v426_v50 = vld [vmem:[#allocation3 + $0x30] sm:$0x1]  ;;  %6529 = vst [vmem:[#allocation3 + $0xc] sm:$0xf] %v6528_v46  ;;  %v6235_v51 = vor.u32 %v6233_v30, %v6232_v43 }
  0x1d   : > { %6530 = vst.msk [vmem:[#allocation3 + $0x10] sm:$0xf] %vm403_vm7, %v6219_v45  ;;  %6533 = vst [vmem:[#allocation3 + $0x14] sm:$0x1] %v6532_v47  ;;  %v6237_v52 = vrot.slane %v6232_v43, 4  ;;  %v6535_v53 = vsel %vm10160_vm8, %v6227_v41, %v6534_v44  ;;  %v8449_v55 = vcombine.low %v527_v38, %v528_v48  ;;  %v6241_v57 = vrot.slane %v6239_v49, 7 }
  0x1e   : > { %v6538_v54 = vld [vmem:[#allocation3 + $0x20] sm:$0x1]  ;;  %v481_v56 = vld [vmem:[#allocation3 + $0x38] sm:$0x1]  ;;  %6536 = vst [vmem:[#allocation3 + $0x18] sm:$0xf] %v6535_v53  ;;  %v6236_v62 = vsel %vm10172_vm9, %v6228_v42, %v6235_v51 }
  0x1f   : > { %v6242_v58 = vshll.u32 %v527_v38, 16  ;;  %v6247_v59 = vshrl.u32 %v528_v48, 16  ;;  %v6250_v60 = vshll.u32 %v528_v48, 16  ;;  %v529_v61 = vld [vmem:[%s10149_s8 + $0x18] sm:$0xf]  ;;  %v6539_v63 = vsel %vm10127_vm3, %v6237_v52, %v6538_v54  ;;  %9283 = vmatprep.mubr.msk.bf16.mxu0 %vm650_vm5, %v8449_v55  ;;  %s10070_s20 = smov 32  }
  0x20   : > { %v427_v0 = vsel %vm10127_vm3, 4286644096, %v426_v50  ;;  %v482_v2 = vsel %vm10135_vm4, 4286644096, %v481_v56  ;;  %v530_v3 = vld [vmem:[%s10149_s8 + $0x1c] sm:$0xf] }
  0x21   : > { %6537 = vst.msk [vmem:[#allocation3 + $0x1c] sm:$0xf] %vm403_vm7, %v6236_v62  ;;  %6540 = vst [vmem:[#allocation3 + $0x20] sm:$0x1] %v6539_v63  ;;  %v6244_v4 = vor.u32 %v6242_v58, %v6241_v57  ;;  %v6245_v6 = vrot.slane %v6241_v57, 4  ;;  %v6249_v7 = vrot.slane %v6247_v59, 7  ;;  %v8450_v8 = vcombine.low %v529_v61, %v530_v3 }
  0x22   : > { %428 = vst [vmem:[#allocation3 + $0x30] sm:$0x1] %v427_v0  ;;  %483 = vst [vmem:[#allocation3 + $0x38] sm:$0x1] %v482_v2  ;;  %v429_v9 = vld [vmem:[#allocation3 + $0x3c] sm:$0x1] }
  0x23   : > { %v484_v10 = vld [vmem:[#allocation3 + $0x44] sm:$0x1]  ;;  %v6545_v12 = vld [vmem:[#allocation3 + $0x2c] sm:$0x1]  ;;  %v6256_v13 = vshrl.u32 %v529_v61, 16  ;;  %v6259_v14 = vshll.u32 %v529_v61, 16  ;;  %v6252_v15 = vor.u32 %v6250_v60, %v6249_v7  ;;  %9284 = vmatmul.mubr.msk.bf16.gmra.mrb[4].mxu0 %vm650_vm5, %v8450_v8 }
  0x24   : > { %v6541_v11 = vld [vmem:[#allocation3 + $0x24] sm:$0xf]  ;;  %v6254_v16 = vrot.slane %v6249_v7, 4  ;;  %v6264_v18 = vshrl.u32 %v530_v3, 16  ;;  %v531_v19 = vld [vmem:[%s10149_s8 + $0x20] sm:$0xf] }
  0x25   : > { %v6542_v17 = vsel %vm10160_vm8, %v6244_v4, %v6541_v11  ;;  %v532_v20 = vld [vmem:[%s10149_s8 + $0x24] sm:$0xf]  ;;  %v6258_v21 = vrot.slane %v6256_v13, 7  ;;  %v6267_v22 = vshll.u32 %v530_v3, 16  ;;  %v430_v23 = vsel %vm10127_vm3, 4286644096, %v429_v9 }
  0x26   : > { %6543 = vst [vmem:[#allocation3 + $0x24] sm:$0xf] %v6542_v17  ;;  %v485_v24 = vsel %vm10135_vm4, 4286644096, %v484_v10  ;;  %v6253_v25 = vsel %vm10172_vm9, %v6245_v6, %v6252_v15  ;;  %v6546_v26 = vsel %vm10127_vm3, %v6254_v16, %v6545_v12  ;;  %v6266_v27 = vrot.slane %v6264_v18, 7  ;;  %s10071_s23 = smov 8  }
  0x27   : > { %431 = vst [vmem:[#allocation3 + $0x3c] sm:$0x1] %v430_v23  ;;  %486 = vst [vmem:[#allocation3 + $0x44] sm:$0x1] %v485_v24  ;;  %v8451_v29 = vcombine.low %v531_v19, %v532_v20  ;;  %v432_v30 = vld [vmem:[#allocation3 + $0x48] sm:$0x1]  ;;  %v6261_v32 = vor.u32 %v6259_v14, %v6258_v21 }
  0x28   : > { %v487_v31 = vld [vmem:[#allocation3 + $0x50] sm:$0x1]  ;;  %6544 = vst.msk [vmem:[#allocation3 + $0x28] sm:$0xf] %vm403_vm7, %v6253_v25  ;;  %6547 = vst [vmem:[#allocation3 + $0x2c] sm:$0x1] %v6546_v26  ;;  %v6269_v37 = vor.u32 %v6267_v22, %v6266_v27 }
  0x29   : > { %v6262_v33 = vrot.slane %v6258_v21, 4  ;;  %v6273_v34 = vshrl.u32 %v531_v19, 16  ;;  %v6276_v35 = vshll.u32 %v531_v19, 16  ;;  %v533_v36 = vld [vmem:[%s10149_s8 + $0x28] sm:$0xf]  ;;  %v6271_v38 = vrot.slane %v6266_v27, 4  ;;  %9287 = vmatprep.mubr.msk.bf16.mxu0 %vm650_vm5, %v8451_v29 }
  0x2a   : > { %v6281_v40 = vshrl.u32 %v532_v20, 16  ;;  %v6284_v41 = vshll.u32 %v532_v20, 16  ;;  %v534_v42 = vld [vmem:[%s10149_s8 + $0x2c] sm:$0xf]  ;;  %v6548_v43 = vld [vmem:[#allocation3 + $0x30] sm:$0xf] }
  0x2b   : > { %v6552_v44 = vld [vmem:[#allocation3 + $0x38] sm:$0x1]  ;;  %v6275_v45 = vrot.slane %v6273_v34, 7  ;;  %v8452_v46 = vcombine.low %v533_v36, %v534_v42  ;;  %v6290_v47 = vshrl.u32 %v533_v36, 16  ;;  %v6270_v48 = vsel %vm10172_vm9, %v6262_v33, %v6269_v37  ;;  %v435_v52 = vld [vmem:[#allocation3 + $0x54] sm:$0x1] }
  0x2c   : > { %v6549_v49 = vsel %vm10160_vm8, %v6261_v32, %v6548_v43  ;;  %v6553_v50 = vsel %vm10127_vm3, %v6271_v38, %v6552_v44  ;;  %v6283_v51 = vrot.slane %v6281_v40, 7  ;;  %v490_v53 = vld [vmem:[#allocation3 + $0x5c] sm:$0x1]  ;;  %6551 = vst.msk [vmem:[#allocation3 + $0x34] sm:$0xf] %vm403_vm7, %v6270_v48  ;;  %v6293_v61 = vshll.u32 %v533_v36, 16 }
  0x2d   : > { %6550 = vst [vmem:[#allocation3 + $0x30] sm:$0xf] %v6549_v49  ;;  %6554 = vst [vmem:[#allocation3 + $0x38] sm:$0x1] %v6553_v50  ;;  %v6278_v54 = vor.u32 %v6276_v35, %v6275_v45  ;;  %v6279_v55 = vrot.slane %v6275_v45, 4  ;;  %9288 = vmatmul.mubr.msk.bf16.gmra.mrb[8].mxu0 %vm650_vm5, %v8452_v46  ;;  %v6292_v60 = vrot.slane %v6290_v47, 7 }
  0x2e   : > { %v433_v56 = vsel %vm10127_vm3, 4286644096, %v432_v30  ;;  %v488_v57 = vsel %vm10135_vm4, 4286644096, %v487_v31  ;;  %v6286_v58 = vor.u32 %v6284_v41, %v6283_v51  ;;  %v6288_v59 = vrot.slane %v6283_v51, 4 }
  0x2f   : > { %434 = vst [vmem:[#allocation3 + $0x48] sm:$0x1] %v433_v56  ;;  %489 = vst [vmem:[#allocation3 + $0x50] sm:$0x1] %v488_v57  ;;  %v535_v62 = vld [vmem:[%s10149_s8 + $0x30] sm:$0xf]  ;;  %v6295_v8 = vor.u32 %v6293_v61, %v6292_v60 }
  0x30   : > { %v6555_v63 = vld [vmem:[#allocation3 + $0x3c] sm:$0xf]  ;;  %v6559_v0 = vld [vmem:[#allocation3 + $0x44] sm:$0x1]  ;;  %v6298_v2 = vshrl.u32 %v534_v42, 16  ;;  %v6301_v3 = vshll.u32 %v534_v42, 16  ;;  %v6287_v4 = vsel %vm10172_vm9, %v6279_v55, %v6286_v58 }
  0x31   : > { %v6556_v6 = vsel %vm10160_vm8, %v6278_v54, %v6555_v63  ;;  %v6560_v7 = vsel %vm10127_vm3, %v6288_v59, %v6559_v0  ;;  %v536_v9 = vld [vmem:[%s10149_s8 + $0x34] sm:$0xf]  ;;  %v438_v10 = vld [vmem:[#allocation3 + $0x60] sm:$0x1]  ;;  %v493_v11 = vld [vmem:[#allocation3 + $0x68] sm:$0x1] }
  0x32   : > { %6557 = vst [vmem:[#allocation3 + $0x3c] sm:$0xf] %v6556_v6  ;;  %6558 = vst.msk [vmem:[#allocation3 + $0x40] sm:$0xf] %vm403_vm7, %v6287_v4  ;;  %v6296_v12 = vrot.slane %v6292_v60, 4  ;;  %v6300_v13 = vrot.slane %v6298_v2, 7  ;;  %v8453_v16 = vcombine.low %v535_v62, %v536_v9 }
  0x33   : > { %6561 = vst [vmem:[#allocation3 + $0x44] sm:$0x1] %v6560_v7  ;;  %v436_v14 = vsel %vm10127_vm3, 4286644096, %v435_v52  ;;  %v491_v15 = vsel %vm10135_vm4, 4286644096, %v490_v53 }
  0x34   : > { %437 = vst [vmem:[#allocation3 + $0x54] sm:$0x1] %v436_v14  ;;  %492 = vst [vmem:[#allocation3 + $0x5c] sm:$0x1] %v491_v15  ;;  %v6307_v17 = vshrl.u32 %v535_v62, 16  ;;  %v6310_v18 = vshll.u32 %v535_v62, 16  ;;  %v6303_v21 = vor.u32 %v6301_v3, %v6300_v13  ;;  %9291 = vmatprep.mubr.msk.bf16.mxu0 %vm650_vm5, %v8453_v16 }
  0x35   : > { %v6315_v19 = vshrl.u32 %v536_v9, 16  ;;  %v537_v20 = vld [vmem:[%s10149_s8 + $0x38] sm:$0xf]  ;;  %v6305_v22 = vrot.slane %v6300_v13, 4  ;;  %v6318_v23 = vshll.u32 %v536_v9, 16  ;;  %vm281_vm14 = vcmask 93184  }
  0x36   : > { %v439_v24 = vsel %vm10127_vm3, 4286644096, %v438_v10  ;;  %v538_v25 = vld [vmem:[%s10149_s8 + $0x3c] sm:$0xf]  ;;  %v6309_v26 = vrot.slane %v6307_v17, 7  ;;  %v6304_v32 = vsel %vm10172_vm9, %v6296_v12, %v6303_v21  ;;  %v6324_v35 = vshrl.u32 %v537_v20, 16 }
  0x37   : > { %v6317_v27 = vrot.slane %v6315_v19, 7  ;;  %440 = vst [vmem:[#allocation3 + $0x60] sm:$0x1] %v439_v24  ;;  %v494_v29 = vsel %vm10135_vm4, 4286644096, %v493_v11  ;;  %v8454_v30 = vcombine.low %v537_v20, %v538_v25  ;;  %v6327_v36 = vshll.u32 %v537_v20, 16 }
  0x38   : > { %v441_v31 = vld [vmem:[#allocation3 + $0x6c] sm:$0x1]  ;;  %v6562_v33 = vld [vmem:[#allocation3 + $0x48] sm:$0xf]  ;;  %v6566_v34 = vld [vmem:[#allocation3 + $0x50] sm:$0x1]  ;;  %v6312_v40 = vor.u32 %v6310_v18, %v6309_v26 }
  0x39   : > { %495 = vst [vmem:[#allocation3 + $0x68] sm:$0x1] %v494_v29  ;;  %v6563_v37 = vsel %vm10160_vm8, %v6295_v8, %v6562_v33  ;;  %6565 = vst.msk [vmem:[#allocation3 + $0x4c] sm:$0xf] %vm403_vm7, %v6304_v32  ;;  %v6567_v38 = vsel %vm10127_vm3, %v6305_v22, %v6566_v34  ;;  %v6313_v41 = vrot.slane %v6309_v26, 4  ;;  %9292 = vmatmul.mubr.msk.bf16.gmra.mrb[12].mxu0 %vm650_vm5, %v8454_v30  ;;  %v6322_v45 = vrot.slane %v6317_v27, 4 }
  0x3a   : > { %v496_v42 = vld [vmem:[#allocation3 + $0x74] sm:$0x1]  ;;  %v539_v43 = vld [vmem:[%s10149_s8 + $0x40] sm:$0xf]  ;;  %6564 = vst [vmem:[#allocation3 + $0x48] sm:$0xf] %v6563_v37  ;;  %v6320_v44 = vor.u32 %v6318_v23, %v6317_v27 }
  0x3b   : > { %6568 = vst [vmem:[#allocation3 + $0x50] sm:$0x1] %v6567_v38  ;;  %v6326_v46 = vrot.slane %v6324_v35, 7  ;;  %v6332_v47 = vshrl.u32 %v538_v25, 16  ;;  %v540_v48 = vld [vmem:[%s10149_s8 + $0x44] sm:$0xf] }
  0x3c   : > { %v6335_v49 = vshll.u32 %v538_v25, 16  ;;  %v442_v50 = vsel %vm10127_vm3, 4286644096, %v441_v31  ;;  %v497_v51 = vsel %vm10135_vm4, 4286644096, %v496_v42  ;;  %v8455_v52 = vcombine.low %v539_v43, %v540_v48 }
  0x3d   : > { %v6321_v53 = vsel %vm10172_vm9, %v6313_v41, %v6320_v44  ;;  %v6569_v54 = vld [vmem:[#allocation3 + $0x54] sm:$0xf]  ;;  %v6573_v55 = vld [vmem:[#allocation3 + $0x5c] sm:$0x1]  ;;  %v6329_v56 = vor.u32 %v6327_v36, %v6326_v46  ;;  %v6330_v57 = vrot.slane %v6326_v46, 4  ;;  %v6334_v58 = vrot.slane %v6332_v47, 7 }
  0x3e   : > { %443 = vst [vmem:[#allocation3 + $0x6c] sm:$0x1] %v442_v50  ;;  %498 = vst [vmem:[#allocation3 + $0x74] sm:$0x1] %v497_v51  ;;  %v6570_v59 = vsel %vm10160_vm8, %v6312_v40, %v6569_v54  ;;  %v6574_v60 = vsel %vm10127_vm3, %v6322_v45, %v6573_v55  ;;  %9295 = vmatprep.mubr.msk.bf16.mxu0 %vm650_vm5, %v8455_v52  ;;  %v6341_v61 = vshrl.u32 %v539_v43, 16  ;;  %v6344_v62 = vshll.u32 %v539_v43, 16 }
  0x3f   : > { %6572 = vst.msk [vmem:[#allocation3 + $0x58] sm:$0xf] %vm403_vm7, %v6321_v53  ;;  %v444_v63 = vld [vmem:[#allocation3 + $0x78] sm:$0x1]  ;;  %v499_v0 = vld [vmem:[#allocation3 + $0x80] sm:$0x1]  ;;  %v6337_v2 = vor.u32 %v6335_v49, %v6334_v58 }
  0x40   : > { %6571 = vst [vmem:[#allocation3 + $0x54] sm:$0xf] %v6570_v59  ;;  %6575 = vst [vmem:[#allocation3 + $0x5c] sm:$0x1] %v6574_v60  ;;  %v6339_v3 = vrot.slane %v6334_v58, 4  ;;  %v6349_v6 = vshrl.u32 %v540_v48, 16 }
  0x41   : > { %v6576_v4 = vld [vmem:[#allocation3 + $0x60] sm:$0xf]  ;;  %v6352_v7 = vshll.u32 %v540_v48, 16  ;;  %v6580_v9 = vld [vmem:[#allocation3 + $0x68] sm:$0x1]  ;;  %v6343_v10 = vrot.slane %v6341_v61, 7  ;;  %v6338_v12 = vsel %vm10172_vm9, %v6330_v57, %v6337_v2 }
  0x42   : > { %v6577_v8 = vsel %vm10160_vm8, %v6329_v56, %v6576_v4  ;;  %v445_v11 = vsel %vm10127_vm3, 4286644096, %v444_v63  ;;  %v6581_v13 = vsel %vm10127_vm3, %v6339_v3, %v6580_v9  ;;  %v6351_v14 = vrot.slane %v6349_v6, 7  ;;  %v541_v16 = vld [vmem:[%s10149_s8 + $0x48] sm:$0xf] }
  0x43   : > { %6578 = vst [vmem:[#allocation3 + $0x60] sm:$0xf] %v6577_v8  ;;  %446 = vst [vmem:[#allocation3 + $0x78] sm:$0x1] %v445_v11  ;;  %v500_v15 = vsel %vm10135_vm4, 4286644096, %v499_v0  ;;  %v6346_v17 = vor.u32 %v6344_v62, %v6343_v10 }
  0x44   : > { %6579 = vst.msk [vmem:[#allocation3 + $0x64] sm:$0xf] %vm403_vm7, %v6338_v12  ;;  %6582 = vst [vmem:[#allocation3 + $0x68] sm:$0x1] %v6581_v13  ;;  %v6347_v18 = vrot.slane %v6343_v10, 4  ;;  %v6358_v20 = vshrl.u32 %v541_v16, 16  ;;  %v6354_v22 = vor.u32 %v6352_v7, %v6351_v14 }
  0x45   : > { %501 = vst [vmem:[#allocation3 + $0x80] sm:$0x1] %v500_v15  ;;  %v542_v19 = vld [vmem:[%s10149_s8 + $0x4c] sm:$0xf]  ;;  %v6361_v21 = vshll.u32 %v541_v16, 16  ;;  %v6356_v23 = vrot.slane %v6351_v14, 4 }
  0x46   : > { %v8456_v24 = vcombine.low %v541_v16, %v542_v19  ;;  %v6366_v25 = vshrl.u32 %v542_v19, 16  ;;  %v447_v26 = vld [vmem:[#allocation3 + $0x84] sm:$0x1]  ;;  %v502_v27 = vld [vmem:[#allocation3 + $0x8c] sm:$0x1]  ;;  %v6360_v31 = vrot.slane %v6358_v20, 7  ;;  %v6355_v33 = vsel %vm10172_vm9, %v6347_v18, %v6354_v22 }
  0x47   : > { %v6583_v29 = vld [vmem:[#allocation3 + $0x6c] sm:$0xf]  ;;  %v6587_v30 = vld [vmem:[#allocation3 + $0x74] sm:$0x1]  ;;  %v6369_v32 = vshll.u32 %v542_v19, 16  ;;  %vm2063_vm15 = vcmask 1045504  }
  0x48   : > { %v6584_v34 = vsel %vm10160_vm8, %v6346_v17, %v6583_v29  ;;  %v6588_v35 = vsel %vm10127_vm3, %v6356_v23, %v6587_v30  ;;  %9296 = vmatmul.mubr.msk.bf16.gmra.mrb[16].mxu0 %vm650_vm5, %v8456_v24  ;;  %v6368_v36 = vrot.slane %v6366_v25, 7  ;;  %v543_v37 = vld [vmem:[%s10149_s8 + $0x50] sm:$0xf]  ;;  %v544_v38 = vld [vmem:[%s10149_s8 + $0x54] sm:$0xf]  ;;  %v6363_v40 = vor.u32 %v6361_v21, %v6360_v31 }
  0x49   : > { %6585 = vst [vmem:[#allocation3 + $0x6c] sm:$0xf] %v6584_v34  ;;  %6586 = vst.msk [vmem:[#allocation3 + $0x70] sm:$0xf] %vm403_vm7, %v6355_v33  ;;  %v6364_v41 = vrot.slane %v6360_v31, 4  ;;  %v8457_v46 = vcombine.low %v543_v37, %v544_v38  ;;  %v6375_v47 = vshrl.u32 %v543_v37, 16 }
  0x4a   : > { %6589 = vst [vmem:[#allocation3 + $0x74] sm:$0x1] %v6588_v35  ;;  %v448_v42 = vsel %vm10127_vm3, 4286644096, %v447_v26  ;;  %v503_v43 = vsel %vm10135_vm4, 4286644096, %v502_v27  ;;  %v6371_v44 = vor.u32 %v6369_v32, %v6368_v36 }
  0x4b   : > { %v6373_v45 = vrot.slane %v6368_v36, 4  ;;  %449 = vst [vmem:[#allocation3 + $0x84] sm:$0x1] %v448_v42  ;;  %504 = vst [vmem:[#allocation3 + $0x8c] sm:$0x1] %v503_v43  ;;  %v6378_v51 = vshll.u32 %v543_v37, 16  ;;  %9299 = vmatprep.mubr.msk.bf16.mxu0 %vm650_vm5, %v8457_v46 }
  0x4c   : > { %v450_v48 = vld [vmem:[#allocation3 + $0x90] sm:$0x1]  ;;  %v505_v49 = vld [vmem:[#allocation3 + $0x98] sm:$0x1]  ;;  %v6383_v52 = vshrl.u32 %v544_v38, 16  ;;  %v6386_v53 = vshll.u32 %v544_v38, 16  ;;  %v6372_v54 = vsel %vm10172_vm9, %v6364_v41, %v6371_v44 }
  0x4d   : > { %v6590_v50 = vld [vmem:[#allocation3 + $0x78] sm:$0xf]  ;;  %v6594_v56 = vld [vmem:[#allocation3 + $0x80] sm:$0x1]  ;;  %v6377_v57 = vrot.slane %v6375_v47, 7 }
  0x4e   : > { %v6591_v55 = vsel %vm10160_vm8, %v6363_v40, %v6590_v50  ;;  %v451_v58 = vsel %vm10127_vm3, 4286644096, %v450_v48  ;;  %6593 = vst.msk [vmem:[#allocation3 + $0x7c] sm:$0xf] %vm403_vm7, %v6372_v54  ;;  %v6595_v59 = vsel %vm10127_vm3, %v6373_v45, %v6594_v56  ;;  %v6385_v60 = vrot.slane %v6383_v52, 7 }
  0x4f   : > { %6592 = vst [vmem:[#allocation3 + $0x78] sm:$0xf] %v6591_v55  ;;  %452 = vst [vmem:[#allocation3 + $0x90] sm:$0x1] %v451_v58  ;;  %v506_v61 = vsel %vm10135_vm4, 4286644096, %v505_v49  ;;  %v6380_v63 = vor.u32 %v6378_v51, %v6377_v57 }
  0x50   : > { %v545_v62 = vld [vmem:[%s10149_s8 + $0x58] sm:$0xf]  ;;  %6596 = vst [vmem:[#allocation3 + $0x80] sm:$0x1] %v6595_v59  ;;  %v6381_v0 = vrot.slane %v6377_v57, 4  ;;  %v6388_v6 = vor.u32 %v6386_v53, %v6385_v60  ;;  %v6390_v7 = vrot.slane %v6385_v60, 4 }
  0x51   : > { %507 = vst [vmem:[#allocation3 + $0x98] sm:$0x1] %v506_v61  ;;  %v546_v2 = vld [vmem:[%s10149_s8 + $0x5c] sm:$0xf]  ;;  %v6392_v3 = vshrl.u32 %v545_v62, 16  ;;  %v6395_v4 = vshll.u32 %v545_v62, 16 }
  0x52   : > { %v8458_v8 = vcombine.low %v545_v62, %v546_v2  ;;  %v6400_v9 = vshrl.u32 %v546_v2, 16  ;;  %v453_v10 = vld [vmem:[#allocation3 + $0x9c] sm:$0x1]  ;;  %v508_v11 = vld [vmem:[#allocation3 + $0xa4] sm:$0x1]  ;;  %v6403_v13 = vshll.u32 %v546_v2, 16  ;;  %v6389_v16 = vsel %vm10172_vm9, %v6381_v0, %v6388_v6 }
  0x53   : > { %v6394_v12 = vrot.slane %v6392_v3, 7  ;;  %v454_v14 = vsel %vm10127_vm3, 4286644096, %v453_v10  ;;  %v509_v15 = vsel %vm10135_vm4, 4286644096, %v508_v11 }
  0x54   : > { %v6597_v17 = vld [vmem:[#allocation3 + $0x84] sm:$0xf]  ;;  %v6601_v18 = vld [vmem:[#allocation3 + $0x8c] sm:$0x1]  ;;  %9300 = vmatmul.mubr.msk.bf16.gmra.mrb[20].mxu0 %vm650_vm5, %v8458_v8  ;;  %v6402_v19 = vrot.slane %v6400_v9, 7 }
  0x55   : > { %455 = vst [vmem:[#allocation3 + $0x9c] sm:$0x1] %v454_v14  ;;  %510 = vst [vmem:[#allocation3 + $0xa4] sm:$0x1] %v509_v15  ;;  %v6598_v20 = vsel %vm10160_vm8, %v6380_v63, %v6597_v17  ;;  %v6602_v21 = vsel %vm10127_vm3, %v6390_v7, %v6601_v18  ;;  %v6397_v22 = vor.u32 %v6395_v4, %v6394_v12  ;;  %v6398_v23 = vrot.slane %v6394_v12, 4 }
  0x56   : > { %6600 = vst.msk [vmem:[#allocation3 + $0x88] sm:$0xf] %vm403_vm7, %v6389_v16  ;;  %v547_v24 = vld [vmem:[%s10149_s8 + $0x60] sm:$0xf]  ;;  %v548_v25 = vld [vmem:[%s10149_s8 + $0x64] sm:$0xf]  ;;  %v6405_v26 = vor.u32 %v6403_v13, %v6402_v19 }
  0x57   : > { %6599 = vst [vmem:[#allocation3 + $0x84] sm:$0xf] %v6598_v20  ;;  %6603 = vst [vmem:[#allocation3 + $0x8c] sm:$0x1] %v6602_v21  ;;  %v6407_v27 = vrot.slane %v6402_v19, 4  ;;  %v8459_v29 = vcombine.low %v547_v24, %v548_v25  ;;  %v6409_v30 = vshrl.u32 %v547_v24, 16 }
  0x58   : > { %v456_v31 = vld [vmem:[#allocation3 + $0xa8] sm:$0x1]  ;;  %v511_v32 = vld [vmem:[#allocation3 + $0xb0] sm:$0x1]  ;;  %v6412_v34 = vshll.u32 %v547_v24, 16  ;;  %v6417_v35 = vshrl.u32 %v548_v25, 16  ;;  %v6406_v37 = vsel %vm10172_vm9, %v6398_v23, %v6405_v26 }
  0x59   : > { %v6604_v33 = vld [vmem:[#allocation3 + $0x90] sm:$0xf]  ;;  %v6420_v36 = vshll.u32 %v548_v25, 16  ;;  %v6608_v40 = vld [vmem:[#allocation3 + $0x98] sm:$0x1]  ;;  %9303 = vmatprep.mubr.msk.bf16.mxu0 %vm650_vm5, %v8459_v29  ;;  %v6411_v41 = vrot.slane %v6409_v30, 7 }
  0x5a   : > { %v6605_v38 = vsel %vm10160_vm8, %v6397_v22, %v6604_v33  ;;  %v457_v42 = vsel %vm10127_vm3, 4286644096, %v456_v31  ;;  %6607 = vst.msk [vmem:[#allocation3 + $0x94] sm:$0xf] %vm403_vm7, %v6406_v37  ;;  %v6609_v43 = vsel %vm10127_vm3, %v6407_v27, %v6608_v40  ;;  %v6419_v44 = vrot.slane %v6417_v35, 7 }
  0x5b   : > { %6606 = vst [vmem:[#allocation3 + $0x90] sm:$0xf] %v6605_v38  ;;  %458 = vst [vmem:[#allocation3 + $0xa8] sm:$0x1] %v457_v42  ;;  %v512_v45 = vsel %vm10135_vm4, 4286644096, %v511_v32  ;;  %v6414_v47 = vor.u32 %v6412_v34, %v6411_v41 }
  0x5c   : > { %v549_v46 = vld [vmem:[%s10149_s8 + $0x68] sm:$0xf]  ;;  %6610 = vst [vmem:[#allocation3 + $0x98] sm:$0x1] %v6609_v43  ;;  %v6415_v48 = vrot.slane %v6411_v41, 4  ;;  %v6422_v52 = vor.u32 %v6420_v36, %v6419_v44  ;;  %v6424_v53 = vrot.slane %v6419_v44, 4 }
  0x5d   : > { %513 = vst [vmem:[#allocation3 + $0xb0] sm:$0x1] %v512_v45  ;;  %v550_v49 = vld [vmem:[%s10149_s8 + $0x6c] sm:$0xf]  ;;  %v6426_v50 = vshrl.u32 %v549_v46, 16  ;;  %v6429_v51 = vshll.u32 %v549_v46, 16 }
  0x5e   : > { %v6611_v54 = vld [vmem:[#allocation3 + $0x9c] sm:$0xf]  ;;  %v6615_v55 = vld [vmem:[#allocation3 + $0xa4] sm:$0x1]  ;;  %v8460_v56 = vcombine.low %v549_v46, %v550_v49  ;;  %v6434_v57 = vshrl.u32 %v550_v49, 16  ;;  %v6437_v60 = vshll.u32 %v550_v49, 16  ;;  %v6423_v63 = vsel %vm10172_vm9, %v6415_v48, %v6422_v52 }
  0x5f   : > { %v6612_v58 = vsel %vm10160_vm8, %v6414_v47, %v6611_v54  ;;  %v6428_v59 = vrot.slane %v6426_v50, 7  ;;  %v459_v61 = vld [vmem:[#allocation3 + $0xb4] sm:$0x1]  ;;  %v514_v62 = vld [vmem:[#allocation3 + $0xbc] sm:$0x1]  ;;  %v6616_v0 = vsel %vm10127_vm3, %v6424_v53, %v6615_v55 }
  0x60   : > { %6613 = vst [vmem:[#allocation3 + $0x9c] sm:$0xf] %v6612_v58  ;;  %9304 = vmatmul.mubr.msk.bf16.gmra.mrb[24].mxu0 %vm650_vm5, %v8460_v56  ;;  %v6436_v2 = vrot.slane %v6434_v57, 7  ;;  %v460_v3 = vsel %vm10127_vm3, 4286644096, %v459_v61  ;;  %v13643_v58 = vmov 0 }
  0x61   : > { %v551_v4 = vld [vmem:[%s10149_s8 + $0x70] sm:$0xf]  ;;  %6614 = vst.msk [vmem:[#allocation3 + $0xa0] sm:$0xf] %vm403_vm7, %v6423_v63  ;;  %6617 = vst [vmem:[#allocation3 + $0xa4] sm:$0x1] %v6616_v0  ;;  %v6431_v6 = vor.u32 %v6429_v51, %v6428_v59 }
  0x62   : > { %v6432_v7 = vrot.slane %v6428_v59, 4  ;;  %461 = vst [vmem:[#allocation3 + $0xb4] sm:$0x1] %v460_v3  ;;  %v515_v8 = vsel %vm10135_vm4, 4286644096, %v514_v62  ;;  %v6443_v10 = vshrl.u32 %v551_v4, 16  ;;  %v6439_v11 = vor.u32 %v6437_v60, %v6436_v2 }
  0x63   : > { %v552_v9 = vld [vmem:[%s10149_s8 + $0x74] sm:$0xf]  ;;  %v6441_v12 = vrot.slane %v6436_v2, 4  ;;  %516 = vst [vmem:[#allocation3 + $0xbc] sm:$0x1] %v515_v8  ;;  %v6446_v14 = vshll.u32 %v551_v4, 16 }
  0x64   : > { %v8461_v13 = vcombine.low %v551_v4, %v552_v9  ;;  %v462_v15 = vld [vmem:[#allocation3 + $0xc0] sm:$0x1]  ;;  %v517_v16 = vld [vmem:[#allocation3 + $0xc8] sm:$0x1]  ;;  %v6445_v18 = vrot.slane %v6443_v10, 7  ;;  %v6451_v19 = vshrl.u32 %v552_v9, 16  ;;  %v6440_v21 = vsel %vm10172_vm9, %v6432_v7, %v6439_v11 }
  0x65   : > { %v6618_v17 = vld [vmem:[#allocation3 + $0xa8] sm:$0xf]  ;;  %v6454_v20 = vshll.u32 %v552_v9, 16  ;;  %v6622_v23 = vld [vmem:[#allocation3 + $0xb0] sm:$0x1]  ;;  %v13644_v58 = vsel %vm10388_vm11, 4294967295, %v13643_v58 }
  0x66   : > { %v6619_v22 = vsel %vm10160_vm8, %v6431_v6, %v6618_v17  ;;  %9307 = vmatprep.mubr.msk.bf16.mxu0 %vm650_vm5, %v8461_v13  ;;  %v463_v24 = vsel %vm10127_vm3, 4286644096, %v462_v15  ;;  %v518_v25 = vsel %vm10135_vm4, 4286644096, %v517_v16  ;;  %6621 = vst.msk [vmem:[#allocation3 + $0xac] sm:$0xf] %vm403_vm7, %v6440_v21  ;;  %v6623_v26 = vsel %vm10127_vm3, %v6441_v12, %v6622_v23 }
  0x67   : > { %6620 = vst [vmem:[#allocation3 + $0xa8] sm:$0xf] %v6619_v22  ;;  %v6448_v27 = vor.u32 %v6446_v14, %v6445_v18  ;;  %v6449_v29 = vrot.slane %v6445_v18, 4  ;;  %v6453_v30 = vrot.slane %v6451_v19, 7  ;;  %464 = vst [vmem:[#allocation3 + $0xc0] sm:$0x1] %v463_v24 }
  0x68   : > { %519 = vst [vmem:[#allocation3 + $0xc8] sm:$0x1] %v518_v25  ;;  %v553_v31 = vld [vmem:[%s10149_s8 + $0x78] sm:$0xf]  ;;  %v554_v32 = vld [vmem:[%s10149_s8 + $0x7c] sm:$0xf] }
  0x69   : > { %6624 = vst [vmem:[#allocation3 + $0xb0] sm:$0x1] %v6623_v26  ;;  %v8462_v33 = vcombine.low %v553_v31, %v554_v32  ;;  %v6460_v34 = vshrl.u32 %v553_v31, 16  ;;  %v6463_v35 = vshll.u32 %v553_v31, 16  ;;  %v6468_v36 = vshrl.u32 %v554_v32, 16  ;;  %13645 = vst [vmem:[#allocation6_spill] sm:$0xff] %v13644_v58 }
  0x6a   : > { %v6456_v37 = vor.u32 %v6454_v20, %v6453_v30  ;;  %v6458_v38 = vrot.slane %v6453_v30, 4  ;;  %v6471_v40 = vshll.u32 %v554_v32, 16  ;;  %v6625_v41 = vld [vmem:[#allocation3 + $0xb4] sm:$0xf]  ;;  %v6629_v46 = vld [vmem:[#allocation3 + $0xbc] sm:$0x1] }
  0x6b   : > { %9308 = vmatmul.mubr.msk.bf16.gmra.mrb[28].mxu0 %vm650_vm5, %v8462_v33  ;;  %v6462_v42 = vrot.slane %v6460_v34, 7  ;;  %v6470_v43 = vrot.slane %v6468_v36, 7  ;;  %v6626_v45 = vsel %vm10160_vm8, %v6448_v27, %v6625_v41  ;;  %v10384_v57 = vld [vmem:[%s13566_s2] ss:$0 sm:$0xff]  ;;  %v299_v28 = vld [vmem:[#allocation2 + $0x18] sm:$0x1] }
  0x6c   : > { %v6457_v44 = vsel %vm10172_vm9, %v6449_v29, %v6456_v37  ;;  %6627 = vst [vmem:[#allocation3 + $0xb4] sm:$0xf] %v6626_v45  ;;  %v6630_v47 = vsel %vm10127_vm3, %v6458_v38, %v6629_v46  ;;  %v300_v59 = vsel %vm10388_vm11, 0, %v299_v28  ;;  %v13646_v61 = vmov 0  ;;  %v355_v62 = vld [vmem:[#allocation2 + $0x20] sm:$0x1] }
  0x6d   : > { %6628 = vst.msk [vmem:[#allocation3 + $0xb8] sm:$0xf] %vm403_vm7, %v6457_v44  ;;  %v6465_v48 = vor.u32 %v6463_v35, %v6462_v42  ;;  %v6466_v49 = vrot.slane %v6462_v42, 4  ;;  %v6473_v50 = vor.u32 %v6471_v40, %v6470_v43  ;;  %6631 = vst [vmem:[#allocation3 + $0xbc] sm:$0x1] %v6630_v47  ;;  %v6475_v51 = vrot.slane %v6470_v43, 4 }
  0x6e   : > { %v6632_v53 = vld [vmem:[#allocation3 + $0xc0] sm:$0xf]  ;;  %301 = vst [vmem:[#allocation2 + $0x18] sm:$0x1] %v300_v59  ;;  %v13647_v61 = vsel %vm10396_vm12, 4294967295, %v13646_v61  ;;  %v356_v2 = vsel %vm10396_vm12, 0, %v355_v62 }
  0x6f   : > { %v6474_v52 = vsel %vm10172_vm9, %v6466_v49, %v6473_v50  ;;  %v6636_v54 = vld [vmem:[#allocation3 + $0xc8] sm:$0x1]  ;;  %v6633_v55 = vsel %vm10160_vm8, %v6465_v48, %v6632_v53  ;;  %13648 = vst [vmem:[#allocation7_spill] sm:$0xff] %v13647_v61  ;;  %357 = vst [vmem:[#allocation2 + $0x20] sm:$0x1] %v356_v2  ;;  %v10067_v19 = vmov 0  }
  0x70   : > { %6635 = vst.msk [vmem:[#allocation3 + $0xc4] sm:$0xf] %vm403_vm7, %v6474_v52  ;;  %v6637_v56 = vsel %vm10127_vm3, %v6475_v51, %v6636_v54  ;;  %6634 = vst [vmem:[#allocation3 + $0xc0] sm:$0xf] %v6633_v55  ;;  %v296_v6 = vld [vmem:[#allocation2 + $0xc] sm:$0x1] }
  0x71   : > { %6638 = vst [vmem:[#allocation3 + $0xc8] sm:$0x1] %v6637_v56  ;;  %v297_v10 = vsel %vm10388_vm11, 0, %v296_v6  ;;  %282 = vst.msk [vmem:[#allocation2] sm:$0xf] %vm281_vm14, %v10067_v19 }
  0x72   : > { %298 = vst [vmem:[#allocation2 + $0xc] sm:$0x1] %v297_v10  ;;  %283 = vst.msk [vmem:[#allocation2 + $0x4] sm:$0xf] %vm281_vm14, %v10067_v19  ;;  %vm1571_vm0 = vsmask.f32 3328 }
  0x73   : > { %285 = vst.msk [vmem:[#allocation2 + $0x8] sm:$0x1] %vm284_vm10, %v10067_v19  ;;  %289 = vst.msk [vmem:[#allocation2 + $0xd4] sm:$0x1] %vm284_vm10, %v10067_v19  ;;  %vm1572_vm6 = vsmask.f32 7440 }
  0x74   : > { %287 = vst.msk [vmem:[#allocation2 + $0xcc] sm:$0xf] %vm281_vm14, %v10067_v19  ;;  %288 = vst.msk [vmem:[#allocation2 + $0xd0] sm:$0xf] %vm281_vm14, %v10067_v19  ;;  %v311_v1 = vld [vmem:[#allocation2 + $0x48] sm:$0x1] }
  0x75   : > { %vm10709_vm8 = vmor %vm1571_vm0, %vm1572_vm6 }
  0x76   : > { %vm10826_vm10 = vmand %vm281_vm14, %vm347_vm1  ;;  %vm2573_vm1 = vcmask 1042432  }
  0xed   : > { %v9281_v60 = vpop.f32.mrb[0].mxu0 }
  0xee   : > { %v742_v63 = vadd.f32 %v9281_v60, %v10384_v57  ;;  %v733_v0 = vpop.f32.mrb[1].mxu0 }
  0xef   : > { %v734_v3 = vadd.f32 %v10384_v57, %v733_v0  ;;  %v9282_v4 = vpop.f32.mrb[2].mxu0 }
  0xf0   : > { %v862_v7 = vmax.f32 %v742_v63, 0.0  ;;  %v745_v8 = vadd.f32 %v9282_v4, %v10384_v57  ;;  %v736_v9 = vpop.f32.mrb[3].mxu0 }
  0xf1   : > { %v860_v11 = vmax.f32 %v734_v3, 0.0  ;;  %v737_v12 = vadd.f32 %v10384_v57, %v736_v9 }
  0xf2   : > { %v8996_v13 = vpack.c.bf16 %v862_v7, %v862_v7  ;;  %v863_v14 = vmax.f32 %v745_v8, 0.0 }
  0xf3   : > { %v8994_v15 = vpack.c.bf16 %v860_v11, %v860_v11  ;;  %v861_v16 = vmax.f32 %v737_v12, 0.0 }
  0xf4   : > { %7902 = vst.msk [vmem:[%s10412_s13 + $0x8] sm:$0xf] %vm7899_vm13, %v8996_v13  ;;  %v8997_v17 = vpack.c.bf16 %v863_v14, %v863_v14  ;;  %v1008_v18 = vshrl.u32 %v8996_v13, 16  ;;  %v1011_v26 = vshll.u32 %v8996_v13, 16 }
  0xf5   : > { %v991_v20 = vshrl.u32 %v8994_v15, 16  ;;  %7900 = vst.msk [vmem:[%s10412_s13] sm:$0xf] %vm7899_vm13, %v8994_v15  ;;  %v8995_v21 = vpack.c.bf16 %v861_v16, %v861_v16  ;;  %v994_v33 = vshll.u32 %v8994_v15, 16 }
  0xf6   : > { %v9285_v22 = vpop.f32.mrb[4].mxu0  ;;  %7903 = vst.msk [vmem:[%s10412_s13 + $0xc] sm:$0xf] %vm7899_vm13, %v8997_v17  ;;  %v1010_v25 = vrot.slane %v1008_v18, 7  ;;  %v1016_v27 = vshrl.u32 %v8997_v17, 16  ;;  %v1019_v29 = vshll.u32 %v8997_v17, 16 }
  0xf7   : > { %v758_v23 = vadd.f32 %v9285_v22, %v10384_v57  ;;  %v749_v24 = vpop.f32.mrb[5].mxu0  ;;  %v999_v30 = vshrl.u32 %v8995_v21, 16  ;;  %7901 = vst.msk [vmem:[%s10412_s13 + $0x4] sm:$0xf] %vm7899_vm13, %v8995_v21  ;;  %v993_v38 = vrot.slane %v991_v20, 7  ;;  %v1002_v44 = vshll.u32 %v8995_v21, 16 }
  0xf8   : > { %v750_v31 = vadd.f32 %v10384_v57, %v749_v24  ;;  %v9286_v32 = vpop.f32.mrb[6].mxu0  ;;  %v1013_v37 = vor.u32 %v1011_v26, %v1010_v25  ;;  %v1018_v43 = vrot.slane %v1016_v27, 7  ;;  %v1014_v47 = vrot.slane %v1010_v25, 4 }
  0xf9   : > { %v866_v34 = vmax.f32 %v758_v23, 0.0  ;;  %v761_v35 = vadd.f32 %v9286_v32, %v10384_v57  ;;  %v752_v36 = vpop.f32.mrb[7].mxu0  ;;  %v10432_v40 = vrot.slane %v999_v30, 7  ;;  %v996_v54 = vor.u32 %v994_v33, %v993_v38 }
  0xfa   : > { %v864_v41 = vmax.f32 %v750_v31, 0.0  ;;  %v753_v42 = vadd.f32 %v10384_v57, %v752_v36  ;;  %1268 = vrot.lane.b32.xlu0 %v1013_v37, %s10068_s14  ;;  %v1023_v50 = vrot.slane %v1018_v43, 4  ;;  %v1021_v51 = vor.u32 %v1019_v29, %v1018_v43 }
  0xfb   : > { %v10435_v45 = vpack.c.bf16 %v866_v34, %v866_v34  ;;  %v867_v46 = vmax.f32 %v761_v35, 0.0  ;;  %v1004_v55 = vor.u32 %v1002_v44, %v10432_v40  ;;  %v997_v3 = vrot.slane %v993_v38, 4 }
  0xfc   : > { %v10438_v48 = vpack.c.bf16 %v864_v41, %v864_v41  ;;  %v865_v49 = vmax.f32 %v753_v42, 0.0  ;;  %1272 = vrot.lane.b32.xlu1 %v1023_v50, %s10068_s14  ;;  %v1022_v60 = vsel %vm10172_vm9, %v1014_v47, %v1021_v51  ;;  %v1006_v30 = vrot.slane %v10432_v40, 4 }
  0xfd   : > { %v1042_v52 = vshrl.u32 %v10435_v45, 16  ;;  %7906 = vst.msk [vmem:[%s10412_s13 + $0x18] sm:$0xf] %vm7899_vm13, %v10435_v45  ;;  %v9001_v53 = vpack.c.bf16 %v867_v46, %v867_v46  ;;  %v1005_v14 = vsel %vm10172_vm9, %v997_v3, %v1004_v55 }
  0xfe   : > { %v1025_v56 = vshrl.u32 %v10438_v48, 16  ;;  %7904 = vst.msk [vmem:[%s10412_s13 + $0x10] sm:$0xf] %vm7899_vm13, %v10438_v48  ;;  %v8999_v28 = vpack.c.bf16 %v865_v49, %v865_v49  ;;  %1262 = vrot.lane.b32.xlu0 %v996_v54, %s10068_s14  ;;  %v1028_v40 = vshll.u32 %v10438_v48, 16 }
  0xff   : > { %v10452_v62 = vrot.slane %v1042_v52, 7  ;;  %v1050_v63 = vshrl.u32 %v9001_v53, 16  ;;  %7907 = vst.msk [vmem:[%s10412_s13 + $0x1c] sm:$0xf] %vm7899_vm13, %v9001_v53  ;;  %v1053_v6 = vshll.u32 %v9001_v53, 16 }
 0x100   : > { %v9289_v59 = vpop.f32.mrb[8].mxu0  ;;  %v1027_v4 = vrot.slane %v1025_v56, 7  ;;  %v1033_v7 = vshrl.u32 %v8999_v28, 16  ;;  %7905 = vst.msk [vmem:[%s10412_s13 + $0x14] sm:$0xf] %vm7899_vm13, %v8999_v28  ;;  %v1036_v16 = vshll.u32 %v8999_v28, 16  ;;  %1264 = vrot.lane.b32.xlu1 %v1005_v14, %s10068_s14 }
 0x101   : > { %v774_v0 = vadd.f32 %v9289_v59, %v10384_v57  ;;  %v765_v2 = vpop.f32.mrb[9].mxu0  ;;  %v10461_v10 = vrot.slane %v1050_v63, 7  ;;  %v1048_v22 = vrot.slane %v10452_v62, 4 }
 0x102   : > { %v766_v8 = vadd.f32 %v10384_v57, %v765_v2  ;;  %v9290_v9 = vpop.f32.mrb[10].mxu0  ;;  %v10466_v15 = vrot.slane %v1033_v7, 7  ;;  %1270 = vrot.lane.b32.xlu0 %v1022_v60, %s10068_s14  ;;  %v1031_v21 = vrot.slane %v1027_v4, 4  ;;  %v1030_v49 = vor.u32 %v1028_v40, %v1027_v4 }
 0x103   : > { %v870_v11 = vmax.f32 %v774_v0, 0.0  ;;  %v777_v12 = vadd.f32 %v9290_v9, %v10384_v57  ;;  %v768_v13 = vpop.f32.mrb[11].mxu0  ;;  %v1055_v26 = vor.u32 %v1053_v6, %v10461_v10 }
 0x104   : > { %v868_v17 = vmax.f32 %v766_v8, 0.0  ;;  %v769_v18 = vadd.f32 %v10384_v57, %v768_v13  ;;  %v1038_v25 = vor.u32 %v1036_v16, %v10466_v15 }
 0x105   : > { %v9004_v19 = vpack.c.bf16 %v870_v11, %v870_v11  ;;  %v871_v20 = vmax.f32 %v777_v12, 0.0  ;;  %v10487_v35 = vsel %vm10172_vm9, %v1048_v22, %v1055_v26 }
 0x106   : > { %v10472_v23 = vpack.c.bf16 %v868_v17, %v868_v17  ;;  %v869_v24 = vmax.f32 %v769_v18, 0.0  ;;  %v1039_v34 = vsel %vm10172_vm9, %v1031_v21, %v1038_v25  ;;  %1266 = vrot.lane.b32.xlu0 %v1006_v30, %s10068_s14 }
 0x107   : > { %v1076_v27 = vshrl.u32 %v9004_v19, 16  ;;  %7910 = vst.msk [vmem:[%s10412_s13 + $0x28] sm:$0xf] %vm7899_vm13, %v9004_v19  ;;  %v9005_v29 = vpack.c.bf16 %v871_v20, %v871_v20  ;;  %1276 = vrot.lane.b32.xlu1 %v1039_v34, %s10068_s14  ;;  %v1079_v48 = vshll.u32 %v9004_v19, 16 }
 0x108   : > { %v1059_v31 = vshrl.u32 %v10472_v23, 16  ;;  %7908 = vst.msk [vmem:[%s10412_s13 + $0x20] sm:$0xf] %vm7899_vm13, %v10472_v23  ;;  %v9003_v32 = vpack.c.bf16 %v869_v24, %v869_v24 }
 0x109   : > { %v1084_v36 = vshrl.u32 %v9005_v29, 16  ;;  %7911 = vst.msk [vmem:[%s10412_s13 + $0x2c] sm:$0xf] %vm7899_vm13, %v9005_v29  ;;  %v1078_v53 = vrot.slane %v1076_v27, 7  ;;  %v1087_v2 = vshll.u32 %v9005_v29, 16 }
 0x10a   : > { %v1067_v41 = vshrl.u32 %v9003_v32, 16  ;;  %7909 = vst.msk [vmem:[%s10412_s13 + $0x24] sm:$0xf] %vm7899_vm13, %v9003_v32  ;;  %v10499_v50 = vrot.slane %v1059_v31, 7  ;;  %v1070_v55 = vshll.u32 %v9003_v32, 16  ;;  %1274 = vrot.lane.b32.xlu0 %v1030_v49, %s10068_s14 }
 0x10b   : > { %v10502_v54 = vrot.slane %v1084_v36, 7  ;;  %v10509_v63 = vor.u32 %v1079_v48, %v1078_v53  ;;  %v1082_v12 = vrot.slane %v1078_v53, 4  ;;  %v352_v31 = vld [vmem:[#allocation2 + $0x14] sm:$0x1] }
 0x10c   : > { %v9293_v33 = vpop.f32.mrb[12].mxu0  ;;  %v10511_v0 = vrot.slane %v1067_v41, 7  ;;  %v1065_v8 = vrot.slane %v10499_v50, 4 }
 0x10d   : > { %v790_v37 = vadd.f32 %v9293_v33, %v10384_v57  ;;  %v781_v38 = vpop.f32.mrb[13].mxu0  ;;  %v1089_v13 = vor.u32 %v1087_v2, %v10502_v54 }
 0x10e   : > { %v782_v42 = vadd.f32 %v10384_v57, %v781_v38  ;;  %v9294_v43 = vpop.f32.mrb[14].mxu0  ;;  %v1072_v9 = vor.u32 %v1070_v55, %v10511_v0  ;;  %v302_v38 = vld [vmem:[#allocation2 + $0x24] sm:$0x1] }
 0x10f   : > { %v874_v44 = vmax.f32 %v790_v37, 0.0  ;;  %v793_v46 = vadd.f32 %v9294_v43, %v10384_v57  ;;  %v784_v47 = vpop.f32.mrb[15].mxu0  ;;  %v10538_v20 = vsel %vm10172_vm9, %v1082_v12, %v1089_v13  ;;  %v303_v55 = vsel %vm10388_vm11, 0, %v302_v38 }
 0x110   : > { %v872_v51 = vmax.f32 %v782_v42, 0.0  ;;  %v785_v52 = vadd.f32 %v10384_v57, %v784_v47  ;;  %v10530_v16 = vsel %vm10172_vm9, %v1065_v8, %v1072_v9  ;;  %304 = vst [vmem:[#allocation2 + $0x24] sm:$0x1] %v303_v55 }
 0x111   : > { %v10504_v56 = vpack.c.bf16 %v874_v44, %v874_v44  ;;  %v875_v28 = vmax.f32 %v793_v46, 0.0  ;;  %v9949_v44 = vld [vmem:[%s13567_s3 + $0x8] sm:$0x3f]  }
 0x112   : > { %v10507_v59 = vpack.c.bf16 %v872_v51, %v872_v51  ;;  %v873_v60 = vmax.f32 %v785_v52, 0.0  ;;  %v353_v51 = vsel %vm10396_vm12, 0, %v352_v31  ;;  %9909 = vmatprep.subr.msk.bf16.mxu0 %vm2063_vm15, %v9949_v44 }
 0x113   : > { %v1110_v3 = vshrl.u32 %v10504_v56, 16  ;;  %7914 = vst.msk [vmem:[%s10412_s13 + $0x38] sm:$0xf] %vm7899_vm13, %v10504_v56  ;;  %v9009_v4 = vpack.c.bf16 %v875_v28, %v875_v28  ;;  %354 = vst [vmem:[#allocation2 + $0x14] sm:$0x1] %v353_v51 }
 0x114   : > { %v1093_v6 = vshrl.u32 %v10507_v59, 16  ;;  %7912 = vst.msk [vmem:[%s10412_s13 + $0x30] sm:$0xf] %vm7899_vm13, %v10507_v59  ;;  %v9007_v7 = vpack.c.bf16 %v873_v60, %v873_v60  ;;  %v293_v28 = vld [vmem:[#allocation2] sm:$0x1] }
 0x115   : > { %v1118_v11 = vshrl.u32 %v9009_v4, 16  ;;  %7915 = vst.msk [vmem:[%s10412_s13 + $0x3c] sm:$0xf] %vm7899_vm13, %v9009_v4  ;;  %v10540_v21 = vrot.slane %v1110_v3, 7  ;;  %v1121_v27 = vshll.u32 %v9009_v4, 16  ;;  %v294_v13 = vsel %vm10388_vm11, 0, %v293_v28 }
 0x116   : > { %v1101_v14 = vshrl.u32 %v9007_v7, 16  ;;  %7913 = vst.msk [vmem:[%s10412_s13 + $0x34] sm:$0xf] %vm7899_vm13, %v9007_v7  ;;  %v10532_v17 = vrot.slane %v1093_v6, 7  ;;  %v1104_v22 = vshll.u32 %v9007_v7, 16  ;;  %v2065_v7 = vsel %vm2063_vm15, %v9949_v44, 0 }
 0x117   : > { %v10534_v18 = vrot.slane %v1118_v11, 7  ;;  %v1116_v42 = vrot.slane %v10540_v21, 4  ;;  %9312 = vmatpush3.bf16.msra.mxu0 %v2065_v7  ;;  %295 = vst [vmem:[#allocation2] sm:$0x1] %v294_v13 }
 0x118   : > { %v10543_v26 = vrot.slane %v1101_v14, 7  ;;  %v1099_v36 = vrot.slane %v10532_v17, 4 }
 0x119   : > { %v1123_v43 = vor.u32 %v1121_v27, %v10534_v18 }
 0x11a   : > { %v1106_v37 = vor.u32 %v1104_v22, %v10543_v26 }
 0x11b   : > { %v9297_v19 = vpop.f32.mrb[16].mxu0  ;;  %v10563_v48 = vsel %vm10172_vm9, %v1116_v42, %v1123_v43 }
 0x11c   : > { %v806_v24 = vadd.f32 %v9297_v19, %v10384_v57  ;;  %v797_v25 = vpop.f32.mrb[17].mxu0  ;;  %v10557_v49 = vsel %vm10172_vm9, %v1099_v36, %v1106_v37 }
 0x11d   : > { %v798_v29 = vadd.f32 %v10384_v57, %v797_v25  ;;  %v9298_v30 = vpop.f32.mrb[18].mxu0 }
 0x11e   : > { %v878_v32 = vmax.f32 %v806_v24, 0.0  ;;  %v809_v33 = vadd.f32 %v9298_v30, %v10384_v57  ;;  %v800_v34 = vpop.f32.mrb[19].mxu0 }
 0x11f   : > { %v876_v40 = vmax.f32 %v798_v29, 0.0  ;;  %v801_v41 = vadd.f32 %v10384_v57, %v800_v34 }
 0x120   : > { %v9012_v46 = vpack.c.bf16 %v878_v32, %v878_v32  ;;  %v879_v47 = vmax.f32 %v809_v33, 0.0 }
 0x121   : > { %v9010_v52 = vpack.c.bf16 %v876_v40, %v876_v40  ;;  %v877_v53 = vmax.f32 %v801_v41, 0.0  ;;  %v10589_v40 = vld [vmem:[%s13567_s3 + $0x18] sm:$0x3f]  }
 0x122   : > { %v1144_v60 = vshrl.u32 %v9012_v46, 16  ;;  %7918 = vst.msk [vmem:[%s10412_s13 + $0x48] sm:$0xf] %vm7899_vm13, %v9012_v46  ;;  %v9013_v2 = vpack.c.bf16 %v879_v47, %v879_v47  ;;  %v1147_v6 = vshll.u32 %v9012_v46, 16  ;;  %9913 = vmatprep.subr.msk.bf16.mxu1 %vm2063_vm15, %v10589_v40 }
 0x123   : > { %v1127_v3 = vshrl.u32 %v9010_v52, 16  ;;  %7916 = vst.msk [vmem:[%s10412_s13 + $0x40] sm:$0xf] %vm7899_vm13, %v9010_v52  ;;  %v9011_v4 = vpack.c.bf16 %v877_v53, %v877_v53  ;;  %v1130_v12 = vshll.u32 %v9010_v52, 16  ;;  %v349_v53 = vld [vmem:[#allocation2 + $0x8] sm:$0x1] }
 0x124   : > { %v1152_v8 = vshrl.u32 %v9013_v2, 16  ;;  %7919 = vst.msk [vmem:[%s10412_s13 + $0x4c] sm:$0xf] %vm7899_vm13, %v9013_v2  ;;  %v1146_v11 = vrot.slane %v1144_v60, 7  ;;  %v1155_v14 = vshll.u32 %v9013_v2, 16 }
 0x125   : > { %v1135_v19 = vshrl.u32 %v9011_v4, 16  ;;  %7917 = vst.msk [vmem:[%s10412_s13 + $0x44] sm:$0xf] %vm7899_vm13, %v9011_v4  ;;  %v1129_v25 = vrot.slane %v1127_v3, 7  ;;  %v1138_v29 = vshll.u32 %v9011_v4, 16 }
 0x126   : > { %v10580_v27 = vrot.slane %v1152_v8, 7  ;;  %v1149_v32 = vor.u32 %v1147_v6, %v1146_v11  ;;  %v1150_v43 = vrot.slane %v1146_v11, 4  ;;  %v350_v8 = vsel %vm10396_vm12, 0, %v349_v53 }
 0x127   : > { %v9301_v9 = vpop.f32.mrb[20].mxu0  ;;  %v10583_v33 = vrot.slane %v1135_v19, 7  ;;  %v1132_v38 = vor.u32 %v1130_v12, %v1129_v25  ;;  %v1133_v51 = vrot.slane %v1129_v25, 4  ;;  %351 = vst [vmem:[#allocation2 + $0x8] sm:$0x1] %v350_v8 }
 0x128   : > { %v822_v22 = vadd.f32 %v9301_v9, %v10384_v57  ;;  %v813_v24 = vpop.f32.mrb[21].mxu0  ;;  %1316 = vrot.lane.b32.xlu1 %v1149_v32, %s10068_s14  ;;  %v1157_v44 = vor.u32 %v1155_v14, %v10580_v27 }
 0x129   : > { %v814_v30 = vadd.f32 %v10384_v57, %v813_v24  ;;  %v9302_v31 = vpop.f32.mrb[22].mxu0  ;;  %1310 = vrot.lane.b32.xlu0 %v1132_v38, %s10068_s14  ;;  %v1140_v52 = vor.u32 %v1138_v29, %v10583_v33 }
 0x12a   : > { %v882_v34 = vmax.f32 %v822_v22, 0.0  ;;  %v825_v36 = vadd.f32 %v9302_v31, %v10384_v57  ;;  %v816_v37 = vpop.f32.mrb[23].mxu0  ;;  %v1158_v60 = vsel %vm10172_vm9, %v1150_v43, %v1157_v44 }
 0x12b   : > { %v880_v41 = vmax.f32 %v814_v30, 0.0  ;;  %v817_v42 = vadd.f32 %v10384_v57, %v816_v37  ;;  %v1141_v4 = vsel %vm10172_vm9, %v1133_v51, %v1140_v52 }
 0x12c   : > { %v9016_v46 = vpack.c.bf16 %v882_v34, %v882_v34  ;;  %v883_v47 = vmax.f32 %v825_v36, 0.0  ;;  %1318 = vrot.lane.b32.xlu1 %v1158_v60, %s10068_s14 }
 0x12d   : > { %v9014_v55 = vpack.c.bf16 %v880_v41, %v880_v41  ;;  %v881_v28 = vmax.f32 %v817_v42, 0.0  ;;  %1312 = vrot.lane.b32.xlu0 %v1141_v4, %s10068_s14 }
 0x12e   : > { %v1178_v2 = vshrl.u32 %v9016_v46, 16  ;;  %7922 = vst.msk [vmem:[%s10412_s13 + $0x58] sm:$0xf] %vm7899_vm13, %v9016_v46  ;;  %v9017_v3 = vpack.c.bf16 %v883_v47, %v883_v47  ;;  %v1181_v13 = vshll.u32 %v9016_v46, 16 }
 0x12f   : > { %v1161_v6 = vshrl.u32 %v9014_v55, 16  ;;  %7920 = vst.msk [vmem:[%s10412_s13 + $0x50] sm:$0xf] %vm7899_vm13, %v9014_v55  ;;  %v9015_v7 = vpack.c.bf16 %v881_v28, %v881_v28  ;;  %v1164_v25 = vshll.u32 %v9014_v55, 16 }
 0x130   : > { %v1186_v9 = vshrl.u32 %v9017_v3, 16  ;;  %7923 = vst.msk [vmem:[%s10412_s13 + $0x5c] sm:$0xf] %vm7899_vm13, %v9017_v3  ;;  %v1180_v12 = vrot.slane %v1178_v2, 7  ;;  %v1189_v30 = vshll.u32 %v9017_v3, 16 }
 0x131   : > { %v1169_v14 = vshrl.u32 %v9015_v7, 16  ;;  %7921 = vst.msk [vmem:[%s10412_s13 + $0x54] sm:$0xf] %vm7899_vm13, %v9015_v7  ;;  %v1163_v24 = vrot.slane %v1161_v6, 7  ;;  %v1172_v37 = vshll.u32 %v9015_v7, 16 }
 0x132   : > { %v10615_v29 = vrot.slane %v1186_v9, 7  ;;  %v1183_v34 = vor.u32 %v1181_v13, %v1180_v12  ;;  %v1184_v46 = vrot.slane %v1180_v12, 4 }
 0x133   : > { %v9305_v11 = vpop.f32.mrb[24].mxu0  ;;  %v10618_v36 = vrot.slane %v1169_v14, 7  ;;  %v1167_v53 = vrot.slane %v1163_v24, 4  ;;  %v1166_v3 = vor.u32 %v1164_v25, %v1163_v24  ;;  %v1045_v14 = vshll.u32 %v10435_v45, 16 }
 0x134   : > { %v838_v19 = vadd.f32 %v9305_v11, %v10384_v57  ;;  %v829_v22 = vpop.f32.mrb[25].mxu0  ;;  %1328 = vrot.lane.b32.xlu0 %v1183_v34, %s10068_s14  ;;  %v1191_v47 = vor.u32 %v1189_v30, %v10615_v29 }
 0x135   : > { %v830_v31 = vadd.f32 %v10384_v57, %v829_v22  ;;  %v9306_v32 = vpop.f32.mrb[26].mxu0  ;;  %v1174_v55 = vor.u32 %v1172_v37, %v10618_v36 }
 0x136   : > { %v886_v38 = vmax.f32 %v838_v19, 0.0  ;;  %v841_v41 = vadd.f32 %v9306_v32, %v10384_v57  ;;  %v832_v42 = vpop.f32.mrb[27].mxu0  ;;  %v1192_v2 = vsel %vm10172_vm9, %v1184_v46, %v1191_v47 }
 0x137   : > { %v884_v43 = vmax.f32 %v830_v31, 0.0  ;;  %v833_v44 = vadd.f32 %v10384_v57, %v832_v42  ;;  %1330 = vrot.lane.b32.xlu1 %v1192_v2, %s10068_s14  ;;  %v1175_v7 = vsel %vm10172_vm9, %v1167_v53, %v1174_v55 }
 0x138   : > { %v9020_v51 = vpack.c.bf16 %v886_v38, %v886_v38  ;;  %v887_v52 = vmax.f32 %v841_v41, 0.0  ;;  %1322 = vrot.lane.b32.xlu0 %v1166_v3, %s10068_s14 }
 0x139   : > { %v9018_v28 = vpack.c.bf16 %v884_v43, %v884_v43  ;;  %v885_v60 = vmax.f32 %v833_v44, 0.0 }
 0x13a   : > { %v1212_v4 = vshrl.u32 %v9020_v51, 16  ;;  %7926 = vst.msk [vmem:[%s10412_s13 + $0x68] sm:$0xf] %vm7899_vm13, %v9020_v51  ;;  %v9021_v6 = vpack.c.bf16 %v887_v52, %v887_v52  ;;  %v1215_v8 = vshll.u32 %v9020_v51, 16 }
 0x13b   : > { %v1195_v9 = vshrl.u32 %v9018_v28, 16  ;;  %7924 = vst.msk [vmem:[%s10412_s13 + $0x60] sm:$0xf] %vm7899_vm13, %v9018_v28  ;;  %v9019_v11 = vpack.c.bf16 %v885_v60, %v885_v60  ;;  %v1198_v13 = vshll.u32 %v9018_v28, 16  ;;  %1324 = vrot.lane.b32.xlu1 %v1175_v7, %s10068_s14 }
 0x13c   : > { %v1220_v19 = vshrl.u32 %v9021_v6, 16  ;;  %v1223_v22 = vshll.u32 %v9021_v6, 16  ;;  %7927 = vst.msk [vmem:[%s10412_s13 + $0x6c] sm:$0xf] %vm7899_vm13, %v9021_v6  ;;  %v1214_v30 = vrot.slane %v1212_v4, 7 }
 0x13d   : > { %v1203_v31 = vshrl.u32 %v9019_v11, 16  ;;  %v1206_v32 = vshll.u32 %v9019_v11, 16  ;;  %7925 = vst.msk [vmem:[%s10412_s13 + $0x64] sm:$0xf] %vm7899_vm13, %v9019_v11  ;;  %v1197_v38 = vrot.slane %v1195_v9, 7 }
 0x13e   : > { %v9309_v12 = vpop.f32.mrb[28].mxu0  ;;  %v10642_v41 = vrot.slane %v1220_v19, 7  ;;  %v1217_v44 = vor.u32 %v1215_v8, %v1214_v30  ;;  %v1218_v28 = vrot.slane %v1214_v30, 4  ;;  %v1047_v19 = vor.u32 %v1045_v14, %v10452_v62 }
 0x13f   : > { %v854_v24 = vadd.f32 %v9309_v12, %v10384_v57  ;;  %v845_v25 = vpop.f32.mrb[29].mxu0  ;;  %v10646_v46 = vrot.slane %v1203_v31, 7  ;;  %v1201_v4 = vrot.slane %v1197_v38, 4  ;;  %1282 = vrot.lane.b32.xlu1 %v10487_v35, %s10068_s14  ;;  %v1200_v8 = vor.u32 %v1198_v13, %v1197_v38  ;;  %v10669_v31 = vld [vmem:[#allocation2 + $0x4] sm:$0xf] }
 0x140   : > { %v846_v34 = vadd.f32 %v10384_v57, %v845_v25  ;;  %v9310_v37 = vpop.f32.mrb[30].mxu0  ;;  %1340 = vrot.lane.b32.xlu0 %v1217_v44, %s10068_s14  ;;  %v1225_v60 = vor.u32 %v1223_v22, %v10642_v41  ;;  %v308_v44 = vld [vmem:[#allocation2 + $0x3c] sm:$0x1] }
 0x141   : > { %v890_v42 = vmax.f32 %v854_v24, 0.0  ;;  %v857_v45 = vadd.f32 %v9310_v37, %v10384_v57  ;;  %v848_v43 = vpop.f32.mrb[31].mxu0  ;;  %v1208_v6 = vor.u32 %v1206_v32, %v10646_v46  ;;  %v10664_v24 = vld [vmem:[#allocation2] sm:$0xf] }
 0x142   : > { %v888_v47 = vmax.f32 %v846_v34, 0.0  ;;  %v849_v51 = vadd.f32 %v10384_v57, %v848_v43  ;;  %v1226_v9 = vsel %vm10172_vm9, %v1218_v28, %v1225_v60  ;;  %13649 = vst [vmem:[#allocation8_spill] sm:$0xff] %v10664_v24  ;;  %v329_v28 = vld [vmem:[#allocation2 + $0x90] sm:$0x1] }
 0x143   : > { %v9024_v53 = vpack.c.bf16 %v890_v42, %v890_v42  ;;  %v891_v55 = vmax.f32 %v857_v45, 0.0  ;;  %v1209_v22 = vsel %vm10172_vm9, %v1201_v4, %v1208_v6  ;;  %1342 = vrot.lane.b32.xlu1 %v1226_v9, %s10068_s14  ;;  %v1575_v42 = vshrl.u32 %v10664_v24, 16  ;;  %v323_v45 = vld [vmem:[#allocation2 + $0x78] sm:$0x1]  ;;  %v326_v6 = vld [vmem:[#allocation2 + $0x84] sm:$0x1] }
 0x144   : > { %v9022_v2 = vpack.c.bf16 %v888_v47, %v888_v47  ;;  %v889_v3 = vmax.f32 %v849_v51, 0.0  ;;  %1334 = vrot.lane.b32.xlu0 %v1200_v8, %s10068_s14  ;;  %v1555_v51 = vld [vmem:[#allocation2 + $0x8] sm:$0x1]  ;;  %v1584_v4 = vshll.u32 %v10669_v31, 16  ;;  %v1588_v9 = vshrl.u32 %v10669_v31, 16 }
 0x145   : > { %v1246_v7 = vshrl.u32 %v9024_v53, 16  ;;  %7930 = vst.msk [vmem:[%s10412_s13 + $0x78] sm:$0xf] %vm7899_vm13, %v9024_v53  ;;  %v9025_v57 = vpack.c.bf16 %v891_v55, %v891_v55  ;;  %v1249_v13 = vshll.u32 %v9024_v53, 16  ;;  %v1578_v53 = vshll.u32 %v10664_v24, 16 }
 0x146   : > { %v1229_v11 = vshrl.u32 %v9022_v2, 16  ;;  %7928 = vst.msk [vmem:[%s10412_s13 + $0x70] sm:$0xf] %vm7899_vm13, %v9022_v2  ;;  %v9023_v12 = vpack.c.bf16 %v889_v3, %v889_v3  ;;  %v1232_v37 = vshll.u32 %v9022_v2, 16  ;;  %v320_v55 = vld [vmem:[#allocation2 + $0x6c] sm:$0x1] }
 0x147   : > { %v1254_v25 = vshrl.u32 %v9025_v57, 16  ;;  %v1257_v30 = vshll.u32 %v9025_v57, 16  ;;  %7931 = vst.msk [vmem:[%s10412_s13 + $0x7c] sm:$0xf] %vm7899_vm13, %v9025_v57  ;;  %v1248_v35 = vrot.slane %v1246_v7, 7  ;;  %v1577_v2 = vrot.slane %v1575_v42, 4  ;;  %1336 = vrot.lane.b32.xlu1 %v1209_v22, %s10068_s14 }
 0x148   : > { %v1237_v32 = vshrl.u32 %v9023_v12, 16  ;;  %v1240_v34 = vshll.u32 %v9023_v12, 16  ;;  %7929 = vst.msk [vmem:[%s10412_s13 + $0x74] sm:$0xf] %vm7899_vm13, %v9023_v12  ;;  %v1231_v62 = vrot.slane %v1229_v11, 7  ;;  %1280 = vrot.lane.b32.xlu0 %v1047_v19, %s10068_s14  ;;  %v1580_v8 = vrot.slane %v1578_v53, 5 }
 0x149   : > { %v10673_v14 = vrot.slane %v1254_v25, 7  ;;  %v1252_v38 = vrot.slane %v1248_v35, 4  ;;  %v1251_v60 = vor.u32 %v1249_v13, %v1248_v35  ;;  %v335_v7 = vld [vmem:[#allocation2 + $0xa8] sm:$0x1]  ;;  %v332_v11 = vld [vmem:[#allocation2 + $0x9c] sm:$0x1] }
 0x14a   : > { %v10677_v43 = vrot.slane %v1237_v32, 7  ;;  %v1235_v47 = vrot.slane %v1231_v62, 4  ;;  %v305_v12 = vld [vmem:[#allocation2 + $0x30] sm:$0x1]  ;;  %v341_v25 = vld [vmem:[#allocation2 + $0xc0] sm:$0x1]  ;;  %v1234_v19 = vor.u32 %v1232_v37, %v1231_v62  ;;  %v1581_v53 = vor.u32 %v1580_v8, %v1577_v2 }
 0x14b   : > { %v1259_v3 = vor.u32 %v1257_v30, %v10673_v14  ;;  %v338_v32 = vld [vmem:[#allocation2 + $0xb4] sm:$0x1]  ;;  %v1586_v35 = vrot.slane %v1584_v4, 5  ;;  %v1594_v13 = vshll.u32 %v1555_v51, 16  ;;  %v358_v42 = vld [vmem:[#allocation2 + $0x2c] sm:$0x1] }
 0x14c   : > { %v1242_v57 = vor.u32 %v1240_v34, %v10677_v43  ;;  %v1590_v52 = vrot.slane %v1588_v9, 4  ;;  %v324_v5 = vsel %vm10388_vm11, 0, %v323_v45  ;;  %v361_v24 = vld [vmem:[#allocation2 + $0x38] sm:$0x1]  ;;  %1352 = vrot.lane.b32.xlu0 %v1251_v60, %s10068_s14  ;;  %v321_v62 = vsel %vm10388_vm11, 0, %v320_v55  ;;  %1346 = vrot.lane.b32.xlu1 %v1234_v19, %s10068_s14 }
 0x14d   : > { %v1260_v30 = vsel %vm10172_vm9, %v1252_v38, %v1259_v3  ;;  %v1596_v22 = vrot.slane %v1594_v13, 5  ;;  %325 = vst [vmem:[#allocation2 + $0x78] sm:$0x1] %v324_v5  ;;  %v330_v37 = vsel %vm10388_vm11, 0, %v329_v28  ;;  %v327_v39 = vsel %vm10388_vm11, 0, %v326_v6 }
 0x14e   : > { %v1243_v34 = vsel %vm10172_vm9, %v1235_v47, %v1242_v57  ;;  %v364_v38 = vld [vmem:[#allocation2 + $0x44] sm:$0x1]  ;;  %v1582_v47 = vrot.slane %v1581_v53, 4  ;;  %v1591_v51 = vor.u32 %v1590_v52, %v1586_v35  ;;  %322 = vst [vmem:[#allocation2 + $0x6c] sm:$0x1] %v321_v62  ;;  %v10702_v45 = vsel %vm2063_vm15, %v10589_v40, 0 }
 0x14f   : > { %331 = vst [vmem:[#allocation2 + $0x90] sm:$0x1] %v330_v37  ;;  %328 = vst [vmem:[#allocation2 + $0x84] sm:$0x1] %v327_v39  ;;  %v336_v5 = vsel %vm10388_vm11, 0, %v335_v7  ;;  %v13651_v28 = vmov 0  ;;  %9652 = vmatpush3.bf16.msra.mxu1 %v10702_v45 }
 0x150   : > { %13650 = vst [vmem:[#allocation9_spill] sm:$0xff] %v10702_v45  ;;  %v314_v55 = vld [vmem:[#allocation2 + $0x54] sm:$0x1]  ;;  %v13652_v28 = vsel %vm10709_vm8, 4294967295, %v13651_v28  ;;  %337 = vst [vmem:[#allocation2 + $0xa8] sm:$0x1] %v336_v5  ;;  %v1587_v2 = vsel %vm10709_vm8, %v1582_v47, %v1586_v35  ;;  %1354 = vrot.lane.b32.xlu1 %v1260_v30, %s10068_s14 }
 0x151   : > { %13653 = vst [vmem:[#allocation10_spill] sm:$0xff] %v13652_v28  ;;  %v333_v52 = vsel %vm10388_vm11, 0, %v332_v11  ;;  %v306_v40 = vsel %vm10388_vm11, 0, %v305_v12  ;;  %v342_v60 = vsel %vm10388_vm11, 0, %v341_v25  ;;  %v339_v3 = vsel %vm10388_vm11, 0, %v338_v32 }
 0x152   : > { %v1592_v4 = vrot.slane %v1591_v51, 4  ;;  %334 = vst [vmem:[#allocation2 + $0x9c] sm:$0x1] %v333_v52  ;;  %307 = vst [vmem:[#allocation2 + $0x30] sm:$0x1] %v306_v40  ;;  %v359_v6 = vsel %vm10396_vm12, 0, %v358_v42 }
 0x153   : > { %343 = vst [vmem:[#allocation2 + $0xc0] sm:$0x1] %v342_v60  ;;  %340 = vst [vmem:[#allocation2 + $0xb4] sm:$0x1] %v339_v3  ;;  %v309_v7 = vsel %vm10388_vm11, 0, %v308_v44  ;;  %v13654_v57 = vrot.slane %v10466_v15, 4 }
 0x154   : > { %360 = vst [vmem:[#allocation2 + $0x2c] sm:$0x1] %v359_v6  ;;  %310 = vst [vmem:[#allocation2 + $0x3c] sm:$0x1] %v309_v7  ;;  %v312_v8 = vsel %vm10388_vm11, 0, %v311_v1  ;;  %v362_v9 = vsel %vm10396_vm12, 0, %v361_v24  ;;  %v1597_v44 = vsel %vm10709_vm8, %v1592_v4, %v1596_v22  ;;  %1348 = vrot.lane.b32.xlu1 %v1243_v34, %s10068_s14 }
 0x155   : > { %1278 = vrot.lane.b32.xlu0 %v13654_v57, %s10068_s14  ;;  %v365_v11 = vsel %vm10396_vm12, 0, %v364_v38  ;;  %v315_v12 = vsel %vm10388_vm11, 0, %v314_v55  ;;  %vm2014_vm9 = vcmask 97280   ;;  %313 = vst [vmem:[#allocation2 + $0x48] sm:$0x1] %v312_v8  ;;  %v13655_v24 = vshll.u32 %v10472_v23, 16 }
 0x156   : > { %363 = vst [vmem:[#allocation2 + $0x38] sm:$0x1] %v362_v9  ;;  %366 = vst [vmem:[#allocation2 + $0x44] sm:$0x1] %v365_v11  ;;  %v10744_v1 = vld [vmem:[%s13567_s3 + $0x20] sm:$0x3f]   ;;  %v8514_v32 = vcombine.low %v1587_v2, %v1597_v44 }
 0x157   : > { %316 = vst [vmem:[#allocation2 + $0x54] sm:$0x1] %v315_v12  ;;  %v317_v15 = vld [vmem:[#allocation2 + $0x60] sm:$0x1]  ;;  %v1064_v25 = vor.u32 %v13655_v24, %v10499_v50  ;;  %9914 = vmatprep.subr.msk.bf16.mxu1 %vm2063_vm15, %v10744_v1  ;;  %v367_v35 = vld [vmem:[#allocation2 + $0x50] sm:$0x1] }
 0x158   : > { %v318_v19 = vsel %vm10388_vm11, 0, %v317_v15  ;;  %9313 = vmatprep.mubr.msk.bf16.mxu0 %vm2014_vm9, %v8514_v32  ;;  %v368_v30 = vsel %vm10396_vm12, 0, %v367_v35  ;;  %v370_v23 = vld [vmem:[#allocation2 + $0x5c] sm:$0x1]  ;;  %v1057_v50 = vrot.slane %v10461_v10, 4  ;;  %v1074_v53 = vrot.slane %v10511_v0, 4 }
 0x159   : > { %319 = vst [vmem:[#allocation2 + $0x60] sm:$0x1] %v318_v19  ;;  %1286 = vrot.lane.b32.xlu0 %v1064_v25, %s10068_s14  ;;  %369 = vst [vmem:[#allocation2 + $0x50] sm:$0x1] %v368_v30  ;;  %v10765_v13 = vld [vmem:[%s13567_s3] sm:$0x3f]  }
 0x15a   : > { %v371_v42 = vsel %vm10396_vm12, 0, %v370_v23  ;;  %1284 = vrot.lane.b32.xlu1 %v1057_v50, %s10068_s14  ;;  %9910 = vmatprep.subr.msk.bf16.mxu0 %vm2063_vm15, %v10765_v13  ;;  %v1096_v10 = vshll.u32 %v10507_v59, 16  ;;  %v1113_v0 = vshll.u32 %v10504_v56, 16  ;;  %v382_v62 = vld [vmem:[#allocation2 + $0x8c] sm:$0x1]  ;;  %v1108_v56 = vrot.slane %v10543_v26, 4 }
 0x15b   : > { %372 = vst [vmem:[#allocation2 + $0x5c] sm:$0x1] %v371_v42  ;;  %v383_v37 = vsel %vm10396_vm12, 0, %v382_v62  ;;  %v379_v38 = vld [vmem:[#allocation2 + $0x80] sm:$0x1]  ;;  %v1142_v47 = vrot.slane %v10583_v33, 4 }
 0x15c   : > { %v1098_v34 = vor.u32 %v1096_v10, %v10532_v17  ;;  %v1115_v59 = vor.u32 %v1113_v0, %v10540_v21  ;;  %384 = vst [vmem:[#allocation2 + $0x8c] sm:$0x1] %v383_v37  ;;  %v373_v17 = vld [vmem:[#allocation2 + $0x68] sm:$0x1]  ;;  %v394_v51 = vld [vmem:[#allocation2 + $0xbc] sm:$0x1] }
 0x15d   : > { %1292 = vrot.lane.b32.xlu0 %v10509_v63, %s10068_s14  ;;  %v376_v63 = vld [vmem:[#allocation2 + $0x74] sm:$0x1]  ;;  %v374_v39 = vsel %vm10396_vm12, 0, %v373_v17  ;;  %v395_v26 = vsel %vm10396_vm12, 0, %v394_v51  ;;  %v385_v5 = vld [vmem:[#allocation2 + $0x98] sm:$0x1] }
 0x15e   : > { %1288 = vrot.lane.b32.xlu1 %v10530_v16, %s10068_s14  ;;  %v377_v22 = vsel %vm10396_vm12, 0, %v376_v63  ;;  %v1091_v16 = vrot.slane %v10502_v54, 4  ;;  %375 = vst [vmem:[#allocation2 + $0x68] sm:$0x1] %v374_v39  ;;  %v380_v54 = vsel %vm10396_vm12, 0, %v379_v38  ;;  %v386_v55 = vsel %vm10396_vm12, 0, %v385_v5 }
 0x15f   : > { %378 = vst [vmem:[#allocation2 + $0x74] sm:$0x1] %v377_v22  ;;  %381 = vst [vmem:[#allocation2 + $0x80] sm:$0x1] %v380_v54  ;;  %v1176_v52 = vrot.slane %v10618_v36, 4  ;;  %v1125_v40 = vrot.slane %v10534_v18, 4 }
 0x160   : > { %396 = vst [vmem:[#allocation2 + $0xbc] sm:$0x1] %v395_v26  ;;  %387 = vst [vmem:[#allocation2 + $0x98] sm:$0x1] %v386_v55  ;;  %v1210_v60 = vrot.slane %v10646_v46, 4  ;;  %v1244_v36 = vrot.slane %v10677_v43, 4 }
 0x161   : > { %1290 = vrot.lane.b32.xlu0 %v1074_v53, %s10068_s14  ;;  %v397_v3 = vld [vmem:[#allocation2 + $0xc8] sm:$0x1]  ;;  %v1193_v2 = vrot.slane %v10615_v29, 4  ;;  %v1227_v43 = vrot.slane %v10642_v41, 4  ;;  %v1420_v6 = vld [vmem:[#allocation2 + $0x20] sm:$0x1] }
 0x162   : > { %1294 = vrot.lane.b32.xlu1 %v10538_v20, %s10068_s14  ;;  %v388_v20 = vld [vmem:[#allocation2 + $0xa4] sm:$0x1]  ;;  %v398_v18 = vsel %vm10396_vm12, 0, %v397_v3  ;;  %v1409_v7 = vld [vmem:[#allocation2 + $0xc] sm:$0xf]  ;;  %v1261_v57 = vrot.slane %v10673_v14, 4 }
 0x163   : > { %v389_v21 = vsel %vm10396_vm12, 0, %v388_v20  ;;  %399 = vst [vmem:[#allocation2 + $0xc8] sm:$0x1] %v398_v18  ;;  %v1413_v14 = vld [vmem:[#allocation2 + $0x14] sm:$0x1]  ;;  %v2362_v3 = vsel %vm2063_vm15, %v10765_v13, 0 }
 0x164   : > { %390 = vst [vmem:[#allocation2 + $0xa4] sm:$0x1] %v389_v21  ;;  %v1423_v23 = vld [vmem:[#allocation2 + $0x24] sm:$0xf]  ;;  %vm2574_vm13 = vcmask 1046532  }
 0x165   : > { %1298 = vrot.lane.b32.xlu0 %v1098_v34, %s10068_s14  ;;  %vm10939_vm0 = vmor %vm2573_vm1, %vm2574_vm13 }
 0x166   : > { %1296 = vrot.lane.b32.xlu1 %v1091_v16, %s10068_s14 }
 0x169   : > { %1304 = vrot.lane.b32.xlu0 %v1115_v59, %s10068_s14 }
 0x16a   : > { %1300 = vrot.lane.b32.xlu1 %v10557_v49, %s10068_s14  ;;  %v391_v49 = vld [vmem:[#allocation2 + $0xb0] sm:$0x1] }
 0x16b   : > { %v392_v33 = vsel %vm10396_vm12, 0, %v391_v49 }
 0x16c   : > { %393 = vst [vmem:[#allocation2 + $0xb0] sm:$0x1] %v392_v33  ;;  %v1269_v4 = vpop.permute.xlu0 %1268 }
 0x16d   : > { %1302 = vrot.lane.b32.xlu0 %v1108_v56, %s10068_s14 }
 0x16e   : > { %1306 = vrot.lane.b32.xlu1 %v10563_v48, %s10068_s14  ;;  %v1159_v48 = vrot.slane %v10580_v27, 4  ;;  %v1416_v27 = vld [vmem:[#allocation2 + $0x18] sm:$0xf]  ;;  %v1273_v8 = vpop.permute.xlu1 %1272 }
 0x16f   : > { %v1417_v29 = vsel %vm10826_vm10, %v1269_v4, %v1416_v27  ;;  %v1421_v9 = vsel %vm10388_vm11, %v1273_v8, %v1420_v6 }
 0x170   : > { %1418 = vst [vmem:[#allocation2 + $0x18] sm:$0xf] %v1417_v29  ;;  %v1263_v11 = vpop.permute.xlu0 %1262  ;;  %1422 = vst [vmem:[#allocation2 + $0x20] sm:$0x1] %v1421_v9 }
 0x171   : > { %1314 = vrot.lane.b32.xlu0 %v1142_v47, %s10068_s14  ;;  %v1410_v41 = vsel %vm10826_vm10, %v1263_v11, %v1409_v7 }
 0x172   : > { %1308 = vrot.lane.b32.xlu1 %v1125_v40, %s10068_s14  ;;  %1411 = vst [vmem:[#allocation2 + $0xc] sm:$0xf] %v1410_v41  ;;  %v1265_v12 = vpop.permute.xlu1 %1264  ;;  %v10885_v41 = vld [vmem:[%s13567_s3 + $0x28] sm:$0x3f]  }
 0x173   : > { %1412 = vst.msk [vmem:[#allocation2 + $0x10] sm:$0xf] %vm281_vm14, %v1265_v12 }
 0x174   : > { %v1271_v44 = vpop.permute.xlu0 %1270 }
 0x175   : > { %1326 = vrot.lane.b32.xlu0 %v1176_v52, %s10068_s14  ;;  %1419 = vst.msk [vmem:[#allocation2 + $0x1c] sm:$0xf] %vm281_vm14, %v1271_v44 }
 0x176   : > { %1320 = vrot.lane.b32.xlu1 %v1159_v48, %s10068_s14 }
 0x177   : > { %v10842_v15 = vld [vmem:[#allocation2 + $0x18] sm:$0xf]  ;;  %v1557_v53 = vld [vmem:[#allocation2 + $0x20] sm:$0x1] }
 0x178   : > { %13658 = vst [vmem:[#allocation11_spill] sm:$0xff] %v10842_v15  ;;  %v1623_v24 = vshrl.u32 %v10842_v15, 16  ;;  %v1267_v32 = vpop.permute.xlu0 %1266  ;;  %v1626_v30 = vshll.u32 %v10842_v15, 16  ;;  %v1642_v47 = vshll.u32 %v1557_v53, 16  ;;  %v3355_v4 = vld [vmem:[#allocation2 + $0x18] sm:$0xf] }
 0x179   : > { %1338 = vrot.lane.b32.xlu0 %v1210_v60, %s10068_s14  ;;  %v1277_v25 = vpop.permute.xlu1 %1276  ;;  %v1414_v19 = vsel %vm10388_vm11, %v1267_v32, %v1413_v14  ;;  %v10848_v35 = vld [vmem:[#allocation2 + $0xc] sm:$0xf]  ;;  %v10891_v32 = vld [vmem:[#allocation2 + $0x18] sm:$0xe] }
 0x17a   : > { %1332 = vrot.lane.b32.xlu1 %v1193_v2, %s10068_s14  ;;  %1426 = vst.msk [vmem:[#allocation2 + $0x28] sm:$0xf] %vm281_vm14, %v1277_v25  ;;  %13659 = vst [vmem:[#allocation12_spill] sm:$0xff] %v10848_v35  ;;  %v1599_v50 = vshrl.u32 %v10848_v35, 16  ;;  %v1602_v42 = vshll.u32 %v10848_v35, 16  ;;  %v1625_v63 = vrot.slane %v1623_v24, 4 }
 0x17b   : > { %1415 = vst [vmem:[#allocation2 + $0x14] sm:$0x1] %v1414_v19  ;;  %v10853_v10 = vld [vmem:[#allocation2 + $0x10] sm:$0xf]  ;;  %v3352_v34 = vld [vmem:[#allocation2 + $0xc] sm:$0xf] }
 0x17c   : > { %13660 = vst [vmem:[#allocation13_spill] sm:$0xff] %v10853_v10  ;;  %v1275_v22 = vpop.permute.xlu0 %1274  ;;  %v1601_v0 = vrot.slane %v1599_v50, 4  ;;  %v1604_v62 = vrot.slane %v1602_v42, 5  ;;  %v1608_v59 = vshll.u32 %v10853_v10, 16  ;;  %v1612_v37 = vshrl.u32 %v10853_v10, 16 }
 0x17d   : > { %1350 = vrot.lane.b32.xlu0 %v1244_v36, %s10068_s14  ;;  %v10857_v16 = vld [vmem:[#allocation2 + $0x1c] sm:$0xf]  ;;  %v1424_v17 = vsel %vm10826_vm10, %v1275_v22, %v1423_v23  ;;  %v1628_v39 = vrot.slane %v1626_v30, 5  ;;  %v3401_v5 = vshrl.u32 %v3352_v34, 16  ;;  %v3404_v55 = vshll.u32 %v3352_v34, 16 }
 0x17e   : > { %1344 = vrot.lane.b32.xlu1 %v1227_v43, %s10068_s14  ;;  %13661 = vst [vmem:[#allocation14_spill] sm:$0xff] %v10857_v16  ;;  %v1632_v56 = vshll.u32 %v10857_v16, 16  ;;  %v1636_v20 = vshrl.u32 %v10857_v16, 16  ;;  %1425 = vst [vmem:[#allocation2 + $0x24] sm:$0xf] %v1424_v17  ;;  %v1605_v21 = vor.u32 %v1604_v62, %v1601_v0  ;;  %v1610_v38 = vrot.slane %v1608_v59, 5 }
 0x17f   : > { %v1614_v54 = vrot.slane %v1612_v37, 4  ;;  %v10865_v33 = vld [vmem:[#allocation2 + $0x10] sm:$0xf]  ;;  %v1629_v60 = vor.u32 %v1628_v39, %v1625_v63  ;;  %v10871_v36 = vsel %vm2063_vm15, %v10744_v1, 0  ;;  %v1644_v27 = vrot.slane %v1642_v47, 5 }
 0x180   : > { %v1634_v51 = vrot.slane %v1632_v56, 5  ;;  %v1638_v26 = vrot.slane %v1636_v20, 4  ;;  %v1606_v2 = vrot.slane %v1605_v21, 4  ;;  %v3403_v6 = vrot.slane %v3401_v5, 4  ;;  %v10878_v8 = vld [vmem:[#allocation2 + $0x1c] sm:$0xf] }
 0x181   : > { %v1615_v52 = vor.u32 %v1614_v54, %v1610_v38  ;;  %v10863_v49 = vld [vmem:[#allocation2 + $0x28] sm:$0xf]  ;;  %v3406_v7 = vrot.slane %v3404_v55, 5  ;;  %v3414_v13 = vshrl.u32 %v10865_v33, 16  ;;  %v1630_v12 = vrot.slane %v1629_v60, 4 }
 0x182   : > { %1356 = vrot.lane.b32.xlu1 %v1261_v57, %s10068_s14  ;;  %13662 = vst [vmem:[#allocation15_spill] sm:$0xff] %v10863_v49  ;;  %v10867_v40 = vld [vmem:[#allocation2 + $0x14] sm:$0x1]  ;;  %v1639_v48 = vor.u32 %v1638_v26, %v1634_v51  ;;  %v1656_v43 = vshll.u32 %v10863_v49, 16  ;;  %v3410_v57 = vshll.u32 %v10865_v33, 16  ;;  %v1660_v11 = vshrl.u32 %v10863_v49, 16 }
 0x183   : > { %v1618_v18 = vshll.u32 %v10867_v40, 16  ;;  %v1616_v9 = vrot.slane %v1615_v52, 4  ;;  %v10889_v14 = vld [vmem:[#allocation2 + $0x14] sm:$0x1]  ;;  %v3425_v24 = vshrl.u32 %v3355_v4, 16  ;;  %v3428_v25 = vshll.u32 %v3355_v4, 16 }
 0x184   : > { %v1640_v29 = vrot.slane %v1639_v48, 4  ;;  %v1611_v19 = vsel %vm10709_vm8, %v1606_v2, %v1610_v38  ;;  %v10899_v50 = vrot.slane %v1656_v43, 5  ;;  %v3434_v42 = vshll.u32 %v10878_v8, 16  ;;  %v10904_v0 = vld [vmem:[#allocation2 + $0x28] sm:$0xf] }
 0x185   : > { %v1620_v1 = vrot.slane %v1618_v18, 5  ;;  %v10897_v23 = vld [vmem:[#allocation2 + $0x24] sm:$0xf]  ;;  %v1635_v63 = vsel %vm10709_vm8, %v1630_v12, %v1634_v51  ;;  %v3407_v34 = vor.u32 %v3406_v7, %v3403_v6  ;;  %v10906_v59 = vrot.slane %v1660_v11, 4  ;;  %v4084_v60 = vld [vmem:[#allocation2 + $0xc] sm:$0xe] }
 0x186   : > { %v1645_v44 = vsel %vm10709_vm8, %v1640_v29, %v1644_v27  ;;  %13663 = vst [vmem:[#allocation16_spill] sm:$0xff] %v10897_v23  ;;  %v3358_v22 = vld [vmem:[#allocation2 + $0x24] sm:$0xf]  ;;  %v10908_v37 = vrot.slane %v3410_v57, 5  ;;  %v3416_v17 = vrot.slane %v3414_v13, 4  ;;  %v1647_v39 = vshrl.u32 %v10897_v23, 16 }
 0x187   : > { %v1621_v30 = vsel %vm10709_vm8, %v1616_v9, %v1620_v1  ;;  %v8516_v62 = vcombine.low %v1635_v63, %v1645_v44  ;;  %v1650_v56 = vshll.u32 %v10897_v23, 16  ;;  %v3420_v20 = vshll.u32 %v10889_v14, 16  ;;  %v1472_v27 = vld [vmem:[#allocation2 + $0x78] sm:$0xf]  ;;  %v1465_v7 = vld [vmem:[#allocation2 + $0x6c] sm:$0xf] }
 0x188   : > { %v8515_v53 = vcombine.low %v1611_v19, %v1621_v30  ;;  %v3438_v21 = vshrl.u32 %v10878_v8, 16  ;;  %v10916_v38 = vrot.slane %v3425_v24, 4  ;;  %v3449_v54 = vshrl.u32 %v3358_v22, 16  ;;  %v3357_v12 = vld [vmem:[#allocation2 + $0x20] sm:$0x1] }
 0x189   : > { %v10920_v47 = vsel %vm2063_vm15, %v10885_v41, 0  ;;  %v8702_v51 = vrot.slane %v10891_v32, 9  ;;  %v10923_v26 = vrot.slane %v3428_v25, 5  ;;  %v10925_v5 = vrot.slane %v3434_v42, 5 }
 0x18a   : > { %9314 = vmatmul.mubr.msk.bf16.vlgmr.msra.gmra.mrb[32].mxu0 %vm2014_vm9, %v8515_v53  ;;  %v3440_v55 = vrot.slane %v3438_v21, 4  ;;  %v3452_v52 = vshll.u32 %v3358_v22, 16  ;;  %v1663_v48 = vor.u32 %v10906_v59, %v10899_v50  ;;  %v3417_v2 = vor.u32 %v3416_v17, %v10908_v37 }
 0x18b   : > { %9317 = vmatprep.mubr.msk.bf16.mxu0 %vm2014_vm9, %v8516_v62  ;;  %9346 = vmatpush3.bf16.msra.mxu0 %v2362_v3  ;;  %v10929_v3 = vrot.slane %v3407_v34, 4  ;;  %v3458_v18 = vshll.u32 %v10904_v0, 16  ;;  %v1649_v43 = vrot.slane %v1647_v39, 4  ;;  %v1652_v4 = vrot.slane %v1650_v56, 5 }
 0x18c   : > { %v3422_v29 = vrot.slane %v3420_v20, 5  ;;  %v3462_v6 = vshrl.u32 %v10904_v0, 16  ;;  %v3451_v57 = vrot.slane %v3449_v54, 4  ;;  %v8701_v9 = vrot.slane %v4084_v60, 9  ;;  %v2526_v20 = vld [vmem:[#allocation2 + $0xc] sm:$0xe] }
 0x18d   : > { %v4150_v1 = vrot.slane %v10865_v33, 5  ;;  %v4153_v11 = vrot.slane %v10889_v14, 5  ;;  %v3441_v44 = vor.u32 %v3440_v55, %v10925_v5  ;;  %v3454_v24 = vrot.slane %v3452_v52, 5  ;;  %v1493_v55 = vld [vmem:[#allocation2 + $0x9c] sm:$0xf] }
 0x18e   : > { %v10949_v30 = vrot.slane %v3458_v18, 5  ;;  %v3464_v42 = vrot.slane %v3462_v6, 4  ;;  %v3418_v34 = vrot.slane %v3417_v2, 4  ;;  %v3431_v22 = vor.u32 %v10923_v26, %v10916_v38 }
 0x18f   : > { %v4152_v53 = vrot.slane %v4150_v1, 4  ;;  %v4157_v62 = vrot.slane %v10878_v8, 5  ;;  %v1653_v59 = vor.u32 %v1652_v4, %v1649_v43  ;;  %v3444_v17 = vshll.u32 %v3357_v12, 16  ;;  %v10979_v43 = vld [vmem:[#allocation2 + $0x24] sm:$0xe] }
 0x190   : > { %v10958_v39 = vsel %vm10939_vm0, %v8701_v9, %v4150_v1  ;;  %v3455_v54 = vor.u32 %v3454_v24, %v3451_v57  ;;  %v4160_v26 = vrot.slane %v3357_v12, 5  ;;  %v3423_v52 = vsel %vm10709_vm8, %v3418_v34, %v3422_v29  ;;  %v9962_v1 = vld [vmem:[%s13567_s3 + $0x10] sm:$0x3f]  }
 0x191   : > { %13666 = vst [vmem:[#allocation17_spill] sm:$0xff] %v10958_v39  ;;  %v10962_v56 = vsel %vm10939_vm0, %v4152_v53, %v4153_v11  ;;  %v4159_v38 = vrot.slane %v4157_v62, 4  ;;  %v3442_v60 = vrot.slane %v3441_v44, 4  ;;  %v3465_v2 = vor.u32 %v3464_v42, %v10949_v30  ;;  %v10998_v44 = vld [vmem:[#allocation2 + $0x18] sm:$0xe]  ;;  %9911 = vmatprep.subr.msk.bf16.mxu0 %vm2063_vm15, %v9962_v1 }
 0x192   : > { %13667 = vst [vmem:[#allocation18_spill] sm:$0xff] %v10962_v56  ;;  %v10972_v18 = vsel %vm10939_vm0, %v8702_v51, %v4157_v62  ;;  %v8581_v4 = vrot.slane %v2526_v20, 9  ;;  %v2585_v6 = vrot.slane %v10853_v10, 5  ;;  %v2588_v29 = vrot.slane %v10867_v40, 5 }
 0x193   : > { %13668 = vst [vmem:[#allocation19_spill] sm:$0xff] %v10972_v18  ;;  %v10983_v57 = vrot.slane %v1663_v48, 4  ;;  %v3413_v51 = vsel %vm10709_vm8, %v10929_v3, %v10908_v37  ;;  %v3432_v9 = vrot.slane %v3431_v22, 4  ;;  %v3446_v12 = vrot.slane %v3444_v17, 5 }
 0x194   : > { %v10996_v40 = vrot.slane %v3455_v54, 4  ;;  %v2587_v48 = vrot.slane %v2585_v6, 4  ;;  %v11005_v3 = vrot.slane %v3465_v2, 4  ;;  %v8703_v42 = vrot.slane %v10979_v43, 9 }
 0x195   : > { %v3437_v37 = vsel %vm10709_vm8, %v3432_v9, %v10925_v5  ;;  %v11019_v5 = vsel %vm10939_vm0, %v8581_v4, %v2585_v6  ;;  %v13678_v43 = vrot.slane %v10998_v44, 9 }
 0x196   : > { %13672 = vst [vmem:[#allocation23_spill] sm:$0xff] %v11019_v5  ;;  %v11023_v62 = vsel %vm10939_vm0, %v2587_v48, %v2588_v29 }
 0x197   : > { %13673 = vst [vmem:[#allocation24_spill] sm:$0xff] %v11023_v62 }
 0x19a   : > { %v1317_v13 = vpop.permute.xlu1 %1316 }
 0x19b   : > { %v1473_v33 = vsel %vm10826_vm10, %v1317_v13, %v1472_v27  ;;  %v1311_v14 = vpop.permute.xlu0 %1310  ;;  %v10977_v27 = vsel %vm10939_vm0, %v4159_v38, %v4160_v26  ;;  %v10994_v13 = vrot.slane %v1653_v59, 4  ;;  %v1479_v59 = vld [vmem:[#allocation2 + $0x84] sm:$0xf] }
 0x19c   : > { %1474 = vst [vmem:[#allocation2 + $0x78] sm:$0xf] %v1473_v33  ;;  %v1466_v63 = vsel %vm10826_vm10, %v1311_v14, %v1465_v7  ;;  %13669 = vst [vmem:[#allocation20_spill] sm:$0xff] %v10977_v27  ;;  %v1486_v7 = vld [vmem:[#allocation2 + $0x90] sm:$0xf]  ;;  %v11000_v33 = vcombine.low %v3413_v51, %v3423_v52 }
 0x19d   : > { %1467 = vst [vmem:[#allocation2 + $0x6c] sm:$0xf] %v1466_v63  ;;  %v3447_v63 = vsel %vm10709_vm8, %v3442_v60, %v3446_v12 }
 0x19e   : > { %v1319_v21 = vpop.permute.xlu1 %1318  ;;  %v11037_v29 = vcombine.low %v3437_v37, %v3447_v63 }
 0x19f   : > { %1475 = vst.msk [vmem:[#allocation2 + $0x7c] sm:$0xf] %vm281_vm14, %v1319_v21  ;;  %v1313_v8 = vpop.permute.xlu0 %1312 }
 0x1a0   : > { %1468 = vst.msk [vmem:[#allocation2 + $0x70] sm:$0xf] %vm281_vm14, %v1313_v8  ;;  %v4164_v8 = vrot.slane %v10904_v0, 5 }
 0x1a3   : > { %v11007_v14 = vld [vmem:[#allocation2 + $0x78] sm:$0xf] }
 0x1a4   : > { %13670 = vst [vmem:[#allocation21_spill] sm:$0xff] %v11007_v14  ;;  %v3376_v34 = vld [vmem:[#allocation2 + $0x6c] sm:$0xf]  ;;  %v1815_v26 = vshrl.u32 %v11007_v14, 16  ;;  %v1818_v11 = vshll.u32 %v11007_v14, 16 }
 0x1a5   : > { %v11015_v22 = vld [vmem:[#allocation2 + $0x6c] sm:$0xf]  ;;  %v3593_v17 = vshrl.u32 %v3376_v34, 16  ;;  %v3596_v20 = vshll.u32 %v3376_v34, 16 }
 0x1a6   : > { %v1329_v24 = vpop.permute.xlu0 %1328  ;;  %13671 = vst [vmem:[#allocation22_spill] sm:$0xff] %v11015_v22  ;;  %v1791_v21 = vshrl.u32 %v11015_v22, 16  ;;  %v1794_v54 = vshll.u32 %v11015_v22, 16  ;;  %v9952_v1 = vld [vmem:[#allocation2 + $0x78] sm:$0xff]  }
 0x1a7   : > { %v1487_v53 = vsel %vm10826_vm10, %v1329_v24, %v1486_v7  ;;  %v9951_v4 = vld [vmem:[#allocation2 + $0x6c] sm:$0xff]   ;;  %v3595_v51 = vrot.slane %v3593_v17, 4  ;;  %v3598_v12 = vrot.slane %v3596_v20, 5  ;;  %v11050_v52 = vld [vmem:[#allocation2 + $0x7c] sm:$0xf] }
 0x1a8   : > { %1488 = vst [vmem:[#allocation2 + $0x90] sm:$0xf] %v1487_v53  ;;  %v3377_v7 = vld [vmem:[#allocation2 + $0x70] sm:$0xf]  ;;  %9431 = vmatprep.mubr.msk.bf16.mxu1 %vm2014_vm9, %v9951_v4  ;;  %v1793_v37 = vrot.slane %v1791_v21, 4  ;;  %v1796_v63 = vrot.slane %v1794_v54, 5 }
 0x1a9   : > { %v1331_v38 = vpop.permute.xlu1 %1330  ;;  %v3602_v48 = vshll.u32 %v3377_v7, 16  ;;  %v3606_v24 = vshrl.u32 %v3377_v7, 16  ;;  %v11045_v53 = vld [vmem:[#allocation2 + $0x70] sm:$0xf]  ;;  %13675 = vst [vmem:[#allocation26_spill] sm:$0xff] %v11050_v52  ;;  %9432 = vmatmul.mubr.msk.bf16.vlgmr.msra.gmra.mrb[0].mxu1 %vm2014_vm9, %v9952_v1  ;;  %v3599_v20 = vor.u32 %v3598_v12, %v3595_v51  ;;  %v1817_v4 = vrot.slane %v1815_v26, 4 }
 0x1aa   : > { %1489 = vst.msk [vmem:[#allocation2 + $0x94] sm:$0xf] %vm281_vm14, %v1331_v38  ;;  %v1323_v2 = vpop.permute.xlu0 %1322  ;;  %13674 = vst [vmem:[#allocation25_spill] sm:$0xff] %v11045_v53  ;;  %v1800_v34 = vshll.u32 %v11045_v53, 16  ;;  %v1804_v38 = vshrl.u32 %v11045_v53, 16  ;;  %9448 = vmatpush3.bf16.msra.mxu1 %v10871_v36  ;;  %v1824_v51 = vshll.u32 %v11050_v52, 16  ;;  %v11079_v36 = vsel %vm10939_vm0, %v8703_v42, %v4164_v8 }
 0x1ab   : > { %v1480_v9 = vsel %vm10826_vm10, %v1323_v2, %v1479_v59  ;;  %v1500_v59 = vld [vmem:[#allocation2 + $0xa8] sm:$0xf]  ;;  %v11053_v2 = vrot.slane %v3602_v48, 5  ;;  %v3608_v7 = vrot.slane %v3606_v24, 4  ;;  %9915 = vmatprep.subr.msk.bf16.mxu1 %vm2063_vm15, %v10885_v41  ;;  %v1828_v1 = vshrl.u32 %v11050_v52, 16  ;;  %v13676_v48 = vld [vmem:[#allocation8_spill] sm:$0xff] }
 0x1ac   : > { %1481 = vst [vmem:[#allocation2 + $0x84] sm:$0xf] %v1480_v9  ;;  %v13578_v9 = vrot.slane %v10857_v16, 5  ;;  %v11058_v21 = vrot.slane %v1800_v34, 5  ;;  %v1806_v54 = vrot.slane %v1804_v38, 4  ;;  %v1797_v38 = vor.u32 %v1796_v63, %v1793_v37  ;;  %13677 = vst [vmem:[#allocation8_spill] sm:$0xff] %v11079_v36 }
 0x1ad   : > { %v1325_v17 = vpop.permute.xlu1 %1324  ;;  %v3379_v12 = vld [vmem:[#allocation2 + $0x78] sm:$0xf]  ;;  %v3609_v34 = vor.u32 %v3608_v7, %v11053_v2  ;;  %v3380_v32 = vld [vmem:[#allocation2 + $0x7c] sm:$0xf]  ;;  %v11073_v6 = vrot.slane %v1824_v51, 5  ;;  %v1830_v60 = vrot.slane %v1828_v1, 4 }
 0x1ae   : > { %1482 = vst.msk [vmem:[#allocation2 + $0x88] sm:$0xf] %vm281_vm14, %v1325_v17  ;;  %v1820_v17 = vrot.slane %v1818_v11, 5  ;;  %v1807_v0 = vor.u32 %v1806_v54, %v11058_v21  ;;  %v3617_v37 = vshrl.u32 %v3379_v12, 16  ;;  %v11084_v63 = vrot.slane %v4164_v8, 4 }
 0x1af   : > { %v1430_v7 = vld [vmem:[#allocation2 + $0x30] sm:$0xf]  ;;  %v3620_v54 = vshll.u32 %v3379_v12, 16  ;;  %v3626_v51 = vshll.u32 %v3380_v32, 16  ;;  %v11092_v42 = vsel %vm10939_vm0, %v13678_v43, %v13578_v9  ;;  %v11096_v1 = vrot.slane %v3609_v34, 4 }
 0x1b0   : > { %v1821_v11 = vor.u32 %v1820_v17, %v1817_v4  ;;  %13679 = vst [vmem:[#allocation27_spill] sm:$0xff] %v11092_v42  ;;  %v11098_v8 = vrot.slane %v1797_v38, 4  ;;  %v3619_v17 = vrot.slane %v3617_v37, 4  ;;  %v11100_v24 = vrot.slane %v1807_v0, 4 }
 0x1b1   : > { %v1283_v41 = vpop.permute.xlu1 %1282  ;;  %v9954_v4 = vld [vmem:[#allocation2 + $0x90] sm:$0xff]   ;;  %v1831_v43 = vor.u32 %v1830_v60, %v11073_v6  ;;  %v3622_v9 = vrot.slane %v3620_v54, 5  ;;  %v1514_v60 = vld [vmem:[#allocation2 + $0xc0] sm:$0xf] }
 0x1b2   : > { %v1341_v19 = vpop.permute.xlu0 %1340  ;;  %1433 = vst.msk [vmem:[#allocation2 + $0x34] sm:$0xf] %vm281_vm14, %v1283_v41  ;;  %v11102_v44 = vrot.slane %v1821_v11, 4 }
 0x1b3   : > { %v1501_v26 = vsel %vm10826_vm10, %v1341_v19, %v1500_v59  ;;  %v11082_v19 = vrot.slane %v3599_v20, 4  ;;  %v3382_v12 = vld [vmem:[#allocation2 + $0x84] sm:$0xf]  ;;  %v3623_v54 = vor.u32 %v3622_v9, %v3619_v17 }
 0x1b4   : > { %1502 = vst [vmem:[#allocation2 + $0xa8] sm:$0xf] %v1501_v26  ;;  %v3630_v26 = vshrl.u32 %v3380_v32, 16  ;;  %v3641_v38 = vshrl.u32 %v3382_v12, 16  ;;  %v3644_v37 = vshll.u32 %v3382_v12, 16 }
 0x1b5   : > { %v1343_v32 = vpop.permute.xlu1 %1342  ;;  %v9953_v41 = vld [vmem:[#allocation2 + $0x84] sm:$0xff]  }
 0x1b6   : > { %v1335_v59 = vpop.permute.xlu0 %1334  ;;  %1503 = vst.msk [vmem:[#allocation2 + $0xac] sm:$0xf] %vm281_vm14, %v1343_v32  ;;  %v3383_v34 = vld [vmem:[#allocation2 + $0x88] sm:$0xf]  ;;  %9435 = vmatprep.mubr.msk.bf16.mxu1 %vm2014_vm9, %v9953_v41  ;;  %v11117_v32 = vrot.slane %v3626_v51, 5  ;;  %v3632_v61 = vrot.slane %v3630_v26, 4 }
 0x1b7   : > { %v1494_v20 = vsel %vm10826_vm10, %v1335_v59, %v1493_v55  ;;  %v11110_v59 = vld [vmem:[#allocation2 + $0x84] sm:$0xf]  ;;  %v3650_v45 = vshll.u32 %v3383_v34, 16  ;;  %v11119_v55 = vld [vmem:[#allocation2 + $0x94] sm:$0xf]  ;;  %9436 = vmatmul.mubr.msk.bf16.gmra.mrb[4].mxu1 %vm2014_vm9, %v9954_v4  ;;  %v3643_v62 = vrot.slane %v3641_v38, 4 }
 0x1b8   : > { %1495 = vst [vmem:[#allocation2 + $0x9c] sm:$0xf] %v1494_v20  ;;  %13680 = vst [vmem:[#allocation28_spill] sm:$0xff] %v11110_v59  ;;  %v11112_v20 = vld [vmem:[#allocation2 + $0x90] sm:$0xf]  ;;  %v3646_v5 = vrot.slane %v3644_v37, 5  ;;  %v3633_v9 = vor.u32 %v3632_v61, %v11117_v32 }
 0x1b9   : > { %13681 = vst [vmem:[#allocation29_spill] sm:$0xff] %v11112_v20  ;;  %13682 = vst [vmem:[#allocation30_spill] sm:$0xff] %v11119_v55  ;;  %v3654_v42 = vshrl.u32 %v3383_v34, 16  ;;  %v1337_v0 = vpop.permute.xlu1 %1336  ;;  %v1530_v52 = vld [vmem:[#allocation2 + $0x34] sm:$0xf]  ;;  %v11128_v51 = vrot.slane %v1831_v43, 4 }
 0x1ba   : > { %v1281_v11 = vpop.permute.xlu0 %1280  ;;  %v3362_v41 = vld [vmem:[#allocation2 + $0x34] sm:$0xf]  ;;  %v1839_v26 = vshrl.u32 %v11110_v59, 16  ;;  %1496 = vst.msk [vmem:[#allocation2 + $0xa0] sm:$0xf] %vm281_vm14, %v1337_v0  ;;  %v1680_v4 = vshll.u32 %v1530_v52, 16 }
 0x1bb   : > { %v1431_v12 = vsel %vm10826_vm10, %v1281_v11, %v1430_v7  ;;  %v1684_v17 = vshrl.u32 %v1530_v52, 16  ;;  %v3482_v34 = vshll.u32 %v3362_v41, 16  ;;  %v3486_v38 = vshrl.u32 %v3362_v41, 16  ;;  %v1507_v11 = vld [vmem:[#allocation2 + $0xb4] sm:$0xf] }
 0x1bc   : > { %1432 = vst [vmem:[#allocation2 + $0x30] sm:$0xf] %v1431_v12  ;;  %v11138_v43 = vrot.slane %v3623_v54, 4  ;;  %v11141_v14 = vld [vmem:[#allocation2 + $0x88] sm:$0xf]  ;;  %v3647_v7 = vor.u32 %v3646_v5, %v3643_v62  ;;  %v11147_v53 = vrot.slane %v3650_v45, 5 }
 0x1bd   : > { %13683 = vst [vmem:[#allocation31_spill] sm:$0xff] %v11141_v14  ;;  %v1427_v41 = vld [vmem:[#allocation2 + $0x2c] sm:$0x1]  ;;  %v3656_v22 = vrot.slane %v3654_v42, 4  ;;  %v11149_v12 = vrot.slane %v1680_v4, 5  ;;  %v1686_v54 = vrot.slane %v1684_v17, 4 }
 0x1be   : > { %v1353_v37 = vpop.permute.xlu0 %1352  ;;  %v1347_v49 = vpop.permute.xlu1 %1346  ;;  %v11151_v23 = vrot.slane %v3482_v34, 5  ;;  %v11153_v61 = vrot.slane %v3486_v38, 4  ;;  %v1841_v27 = vrot.slane %v1839_v26, 4  ;;  %v1848_v5 = vshll.u32 %v11141_v14, 16  ;;  %v1437_v62 = vld [vmem:[#allocation2 + $0x3c] sm:$0xf] }
 0x1bf   : > { %v1515_v52 = vsel %vm10826_vm10, %v1353_v37, %v1514_v60  ;;  %v1508_v0 = vsel %vm10826_vm10, %v1347_v49, %v1507_v11  ;;  %v1842_v60 = vshll.u32 %v11110_v59, 16  ;;  %v11163_v4 = vrot.slane %v3633_v9, 4  ;;  %v9956_v49 = vld [vmem:[#allocation2 + $0xa8] sm:$0xff]   ;;  %v4094_v28 = vld [vmem:[#allocation2 + $0x84] sm:$0xe] }
 0x1c0   : > { %1516 = vst [vmem:[#allocation2 + $0xc0] sm:$0xf] %v1515_v52  ;;  %1509 = vst [vmem:[#allocation2 + $0xb4] sm:$0xf] %v1508_v0  ;;  %v1852_v17 = vshrl.u32 %v11141_v14, 16  ;;  %v11170_v37 = vrot.slane %v3647_v7, 4  ;;  %v3657_v11 = vor.u32 %v3656_v22, %v11147_v53  ;;  %v1687_v16 = vor.u32 %v1686_v54, %v11149_v12 }
 0x1c1   : > { %v1844_v0 = vrot.slane %v1842_v60, 5  ;;  %v9955_v42 = vld [vmem:[#allocation2 + $0x9c] sm:$0xff]  }
 0x1c2   : > { %v1355_v52 = vpop.permute.xlu1 %1354  ;;  %9439 = vmatprep.mubr.msk.bf16.mxu1 %vm2014_vm9, %v9955_v42 }
 0x1c3   : > { %v1529_v34 = vld [vmem:[#allocation2 + $0x30] sm:$0xf]  ;;  %1517 = vst.msk [vmem:[#allocation2 + $0xc4] sm:$0xf] %vm281_vm14, %v1355_v52  ;;  %v1845_v7 = vor.u32 %v1844_v0, %v1841_v27  ;;  %9440 = vmatmul.mubr.msk.bf16.gmra.mrb[8].mxu1 %vm2014_vm9, %v9956_v49  ;;  %v1876_v49 = vshrl.u32 %v11119_v55, 16 }
 0x1c4   : > { %v3361_v38 = vld [vmem:[#allocation2 + $0x30] sm:$0xf]  ;;  %v1671_v9 = vshrl.u32 %v1529_v34, 16  ;;  %v1674_v18 = vshll.u32 %v1529_v34, 16  ;;  %v1854_v34 = vrot.slane %v1852_v17, 4 }
 0x1c5   : > { %v3473_v15 = vshrl.u32 %v3361_v38, 16  ;;  %v3476_v14 = vshll.u32 %v3361_v38, 16  ;;  %v11183_v38 = vrot.slane %v3657_v11, 4  ;;  %v11186_v10 = vrot.slane %v1845_v7, 4 }
 0x1c6   : > { %v1673_v60 = vrot.slane %v1671_v9, 4  ;;  %v1349_v27 = vpop.permute.xlu1 %1348  ;;  %v1441_v9 = vld [vmem:[#allocation2 + $0x44] sm:$0x1] }
 0x1c7   : > { %v1279_v45 = vpop.permute.xlu0 %1278  ;;  %v3475_v59 = vrot.slane %v3473_v15, 4  ;;  %v3478_v52 = vrot.slane %v3476_v14, 5  ;;  %v1872_v15 = vshll.u32 %v11119_v55, 16  ;;  %1510 = vst.msk [vmem:[#allocation2 + $0xb8] sm:$0xf] %vm281_vm14, %v1349_v27 }
 0x1c8   : > { %v1428_v26 = vsel %vm10388_vm11, %v1279_v45, %v1427_v41  ;;  %v3489_v41 = vor.u32 %v11153_v61, %v11151_v23  ;;  %v11177_v45 = vrot.slane %v1848_v5, 5  ;;  %v1863_v61 = vshrl.u32 %v11112_v20, 16  ;;  %v1444_v5 = vld [vmem:[#allocation2 + $0x48] sm:$0xf] }
 0x1c9   : > { %1429 = vst [vmem:[#allocation2 + $0x2c] sm:$0x1] %v1428_v26  ;;  %v1676_v26 = vrot.slane %v1674_v18, 5  ;;  %v1866_v18 = vshll.u32 %v11112_v20, 16  ;;  %v3479_v42 = vor.u32 %v3478_v52, %v3475_v59 }
 0x1ca   : > { %v1855_v14 = vor.u32 %v1854_v34, %v11177_v45  ;;  %v1865_v17 = vrot.slane %v1863_v61, 4  ;;  %v1878_v61 = vrot.slane %v1876_v49, 4 }
 0x1cb   : > { %v1287_v22 = vpop.permute.xlu0 %1286  ;;  %v1677_v0 = vor.u32 %v1676_v26, %v1673_v60  ;;  %v11195_v60 = vrot.slane %v1687_v16, 4  ;;  %v1868_v7 = vrot.slane %v1866_v18, 5  ;;  %v11197_v26 = vrot.slane %v1872_v15, 5 }
 0x1cc   : > { %v1438_v54 = vsel %vm10826_vm10, %v1287_v22, %v1437_v62  ;;  %v1434_v62 = vld [vmem:[#allocation2 + $0x38] sm:$0x1]  ;;  %v11201_v52 = vrot.slane %v3479_v42, 4  ;;  %v1285_v16 = vpop.permute.xlu1 %1284  ;;  %v11207_v15 = vrot.slane %v3489_v41, 4  ;;  %v9959_v42 = vld [vmem:[#allocation2 + $0xc0] sm:$0xff]  }
 0x1cd   : > { %1439 = vst [vmem:[#allocation2 + $0x3c] sm:$0xf] %v1438_v54  ;;  %v11193_v22 = vrot.slane %v1677_v0, 4  ;;  %v3385_v54 = vld [vmem:[#allocation2 + $0x90] sm:$0xf]  ;;  %v1869_v55 = vor.u32 %v1868_v7, %v1865_v17  ;;  %v1879_v34 = vor.u32 %v1878_v61, %v11197_v26 }
 0x1ce   : > { %v3665_v41 = vshrl.u32 %v3385_v54, 16  ;;  %v3668_v35 = vshll.u32 %v3385_v54, 16  ;;  %v9958_v54 = vld [vmem:[#allocation2 + $0xb4] sm:$0xff]  }
 0x1cf   : > { %v1293_v11 = vpop.permute.xlu0 %1292  ;;  %v11242_v56 = vrot.slane %v1879_v34, 4  ;;  %9443 = vmatprep.mubr.msk.bf16.mxu1 %vm2014_vm9, %v9958_v54 }
 0x1d0   : > { %v1445_v27 = vsel %vm10826_vm10, %v1293_v11, %v1444_v5  ;;  %v1558_v20 = vld [vmem:[#allocation2 + $0x2c] sm:$0x1]  ;;  %v1435_v5 = vsel %vm10388_vm11, %v1285_v16, %v1434_v62  ;;  %v11215_v11 = vrot.slane %v1855_v14, 4  ;;  %v11228_v16 = vrot.slane %v1869_v55, 4  ;;  %9444 = vmatmul.mubr.msk.bf16.gmra.mrb[12].mxu1 %vm2014_vm9, %v9959_v42 }
 0x1d1   : > { %v3360_v59 = vld [vmem:[#allocation2 + $0x2c] sm:$0x1]  ;;  %1446 = vst [vmem:[#allocation2 + $0x48] sm:$0xf] %v1445_v27  ;;  %v1666_v0 = vshll.u32 %v1558_v20, 16  ;;  %v13684_v55 = vsel %vm10709_vm8, %v10994_v13, %v10899_v50  ;;  %v11249_v39 = vrot.slane %v3668_v35, 5  ;;  %v13685_v13 = vsel %vm10709_vm8, %v10996_v40, %v10949_v30  ;;  %9449 = vmatprep.mubr.msk.bf16.mxu1 %vm2014_vm9, %v11000_v33 }
 0x1d2   : > { %v3468_v18 = vshll.u32 %v3360_v59, 16  ;;  %1436 = vst [vmem:[#allocation2 + $0x38] sm:$0x1] %v1435_v5  ;;  %v1451_v27 = vld [vmem:[#allocation2 + $0x54] sm:$0xf] }
 0x1d3   : > { %v1291_v49 = vpop.permute.xlu0 %1290  ;;  %v1668_v20 = vrot.slane %v1666_v0, 5  ;;  %v1289_v0 = vpop.permute.xlu1 %1288 }
 0x1d4   : > { %v3470_v59 = vrot.slane %v3468_v18, 5  ;;  %v1442_v17 = vsel %vm10388_vm11, %v1291_v49, %v1441_v9  ;;  %v1531_v7 = vld [vmem:[#allocation2 + $0x3c] sm:$0xf]  ;;  %1440 = vst.msk [vmem:[#allocation2 + $0x40] sm:$0xf] %vm281_vm14, %v1289_v0  ;;  %v11247_v0 = vrot.slane %v3665_v41, 4 }
 0x1d5   : > { %v3364_v61 = vld [vmem:[#allocation2 + $0x3c] sm:$0xf]  ;;  %1443 = vst [vmem:[#allocation2 + $0x44] sm:$0x1] %v1442_v17  ;;  %v1669_v9 = vsel %vm10709_vm8, %v10983_v57, %v1668_v20  ;;  %v1695_v5 = vshrl.u32 %v1531_v7, 16  ;;  %v1698_v49 = vshll.u32 %v1531_v7, 16 }
 0x1d6   : > { %v3471_v18 = vsel %vm10709_vm8, %v11005_v3, %v3470_v59  ;;  %v8517_v17 = vcombine.low %v13684_v55, %v1669_v9  ;;  %v3497_v14 = vshrl.u32 %v3364_v61, 16  ;;  %v3500_v62 = vshll.u32 %v3364_v61, 16  ;;  %v1458_v20 = vld [vmem:[#allocation2 + $0x60] sm:$0xf]  ;;  %v11245_v7 = vld [vmem:[#allocation2 + $0x94] sm:$0xf] }
 0x1d7   : > { %v1299_v57 = vpop.permute.xlu0 %1298  ;;  %v1697_v3 = vrot.slane %v1695_v5, 4  ;;  %v1700_v59 = vrot.slane %v1698_v49, 5  ;;  %v8670_v34 = vcombine.low %v13685_v13, %v3471_v18  ;;  %v1295_v35 = vpop.permute.xlu1 %1294 }
 0x1d8   : > { %v1452_v50 = vsel %vm10826_vm10, %v1299_v57, %v1451_v27  ;;  %9318 = vmatmul.mubr.msk.bf16.gmra.mrb[36].mxu0 %vm2014_vm9, %v8517_v17  ;;  %v3499_v61 = vrot.slane %v3497_v14, 4  ;;  %v3502_v9 = vrot.slane %v3500_v62, 5  ;;  %v11260_v54 = vld [vmem:[#allocation2 + $0x48] sm:$0xf]  ;;  %v1448_v27 = vld [vmem:[#allocation2 + $0x50] sm:$0x1]  ;;  %9450 = vmatmul.mubr.msk.bf16.vlgmr.msra.gmra.mrb[16].mxu1 %vm2014_vm9, %v11037_v29 }
 0x1d9   : > { %13686 = vst [vmem:[#allocation32_spill] sm:$0xff] %v11260_v54  ;;  %v11262_v41 = vld [vmem:[#allocation2 + $0x48] sm:$0xf]  ;;  %1453 = vst [vmem:[#allocation2 + $0x54] sm:$0xf] %v1452_v50  ;;  %v1701_v5 = vor.u32 %v1700_v59, %v1697_v3  ;;  %v1719_v42 = vshrl.u32 %v11260_v54, 16  ;;  %9453 = vmatprep.mubr.msk.bf16.mxu1 %vm2014_vm9, %v8670_v34  ;;  %9482 = vmatpush3.bf16.msra.mxu1 %v10920_v47 }
 0x1da   : > { %v1722_v49 = vshll.u32 %v11260_v54, 16  ;;  %1447 = vst.msk [vmem:[#allocation2 + $0x4c] sm:$0xf] %vm281_vm14, %v1295_v35  ;;  %v1559_v40 = vld [vmem:[#allocation2 + $0x38] sm:$0x1]  ;;  %v3503_v14 = vor.u32 %v3502_v9, %v3499_v61 }
 0x1db   : > { %v11270_v62 = vld [vmem:[#allocation2 + $0x38] sm:$0x1]  ;;  %v1305_v17 = vpop.permute.xlu0 %1304  ;;  %v1455_v57 = vld [vmem:[#allocation2 + $0x5c] sm:$0x1]  ;;  %v1690_v3 = vshll.u32 %v1559_v40, 16  ;;  %v11278_v59 = vrot.slane %v1701_v5, 4  ;;  %v1297_v55 = vpop.permute.xlu1 %1296 }
 0x1dc   : > { %v3492_v50 = vshll.u32 %v11270_v62, 16  ;;  %v1721_v13 = vrot.slane %v1719_v42, 4  ;;  %v1459_v61 = vsel %vm10826_vm10, %v1305_v17, %v1458_v20  ;;  %v1560_v9 = vld [vmem:[#allocation2 + $0x44] sm:$0x1]  ;;  %v11285_v18 = vrot.slane %v3503_v14, 4 }
 0x1dd   : > { %v11283_v35 = vld [vmem:[#allocation2 + $0x44] sm:$0x1]  ;;  %v1724_v30 = vrot.slane %v1722_v49, 5  ;;  %1460 = vst [vmem:[#allocation2 + $0x60] sm:$0xf] %v1459_v61  ;;  %v1692_v40 = vrot.slane %v1690_v3, 5  ;;  %v1449_v46 = vsel %vm10388_vm11, %v1297_v55, %v1448_v27 }
 0x1de   : > { %v11289_v5 = vld [vmem:[#allocation2 + $0x40] sm:$0xf]  ;;  %v1714_v54 = vshll.u32 %v1560_v9, 16  ;;  %v3494_v36 = vrot.slane %v3492_v50, 5  ;;  %v3516_v42 = vshll.u32 %v11283_v35, 16 }
 0x1df   : > { %13687 = vst [vmem:[#allocation33_spill] sm:$0xff] %v11289_v5  ;;  %v1704_v20 = vshll.u32 %v11289_v5, 16  ;;  %v1708_v14 = vshrl.u32 %v11289_v5, 16  ;;  %v11296_v49 = vld [vmem:[#allocation2 + $0x40] sm:$0xf]  ;;  %v1725_v17 = vor.u32 %v1724_v30, %v1721_v13  ;;  %v1303_v61 = vpop.permute.xlu0 %1302  ;;  %v1693_v50 = vsel %vm10709_vm8, %v11195_v60, %v1692_v40  ;;  %v1301_v33 = vpop.permute.xlu1 %1300 }
 0x1e0   : > { %v11301_v3 = vld [vmem:[%s13567_s3 + $0x30] sm:$0x3f]   ;;  %1450 = vst [vmem:[#allocation2 + $0x50] sm:$0x1] %v1449_v46  ;;  %v1716_v9 = vrot.slane %v1714_v54, 5  ;;  %v3495_v27 = vsel %vm10709_vm8, %v11207_v15, %v3494_v36  ;;  %v3506_v55 = vshll.u32 %v11296_v49, 16  ;;  %v1456_v30 = vsel %vm10388_vm11, %v1303_v61, %v1455_v57 }
 0x1e1   : > { %13688 = vst [vmem:[#allocation34_spill] sm:$0xff] %v11301_v3  ;;  %v13689_v13 = vsel %vm10709_vm8, %v11193_v22, %v11149_v12  ;;  %v1469_v60 = vld [vmem:[#allocation2 + $0x74] sm:$0x1]  ;;  %v1706_v54 = vrot.slane %v1704_v20, 5  ;;  %v1710_v40 = vrot.slane %v1708_v14, 4  ;;  %v13690_v36 = vsel %vm10709_vm8, %v11201_v52, %v11151_v23  ;;  %9916 = vmatprep.subr.msk.bf16.mxu1 %vm2063_vm15, %v11301_v3 }
 0x1e2   : > { %v8518_v46 = vcombine.low %v13689_v13, %v1693_v50  ;;  %1457 = vst [vmem:[#allocation2 + $0x5c] sm:$0x1] %v1456_v30  ;;  %v8671_v15 = vcombine.low %v13690_v36, %v3495_v27  ;;  %v3508_v29 = vrot.slane %v3506_v55, 5  ;;  %v3510_v57 = vshrl.u32 %v11296_v49, 16  ;;  %v11326_v5 = vld [vmem:[#allocation2 + $0x4c] sm:$0xf] }
 0x1e3   : > { %v3518_v61 = vrot.slane %v3516_v42, 5  ;;  %13691 = vst [vmem:[#allocation35_spill] sm:$0xff] %v11326_v5  ;;  %1454 = vst.msk [vmem:[#allocation2 + $0x58] sm:$0xf] %vm281_vm14, %v1301_v33  ;;  %v1707_v12 = vsel %vm10709_vm8, %v11278_v59, %v1706_v54  ;;  %v1711_v22 = vor.u32 %v1710_v40, %v1706_v54  ;;  %v11334_v34 = vrot.slane %v1725_v17, 4  ;;  %v1315_v47 = vpop.permute.xlu0 %1314 }
 0x1e4   : > { %9321 = vmatprep.mubr.msk.bf16.mxu0 %vm2014_vm9, %v8518_v46  ;;  %v1728_v23 = vshll.u32 %v11326_v5, 16  ;;  %v11337_v52 = vld [vmem:[#allocation2 + $0x4c] sm:$0xf]  ;;  %v11339_v42 = vld [vmem:[#allocation2 + $0x54] sm:$0xf]  ;;  %v3509_v33 = vsel %vm10709_vm8, %v11285_v18, %v3508_v29  ;;  %v3512_v20 = vrot.slane %v3510_v57, 4  ;;  %v1470_v50 = vsel %vm10388_vm11, %v1315_v47, %v1469_v60  ;;  %v1307_v46 = vpop.permute.xlu1 %1306  ;;  %9454 = vmatmul.mubr.msk.bf16.gmra.mrb[20].mxu1 %vm2014_vm9, %v8671_v15 }
 0x1e5   : > { %13692 = vst [vmem:[#allocation36_spill] sm:$0xff] %v11337_v52  ;;  %13693 = vst [vmem:[#allocation37_spill] sm:$0xff] %v11339_v42  ;;  %v1732_v59 = vshrl.u32 %v11326_v5, 16  ;;  %v13694_v14 = vshrl.u32 %v11262_v41, 16  ;;  %v1712_v27 = vrot.slane %v1711_v22, 4  ;;  %v13695_v30 = vshll.u32 %v11262_v41, 16 }
 0x1e6   : > { %v1730_v55 = vrot.slane %v1728_v23, 5  ;;  %1471 = vst [vmem:[#allocation2 + $0x74] sm:$0x1] %v1470_v50  ;;  %v1483_v54 = vld [vmem:[#allocation2 + $0x8c] sm:$0x1]  ;;  %v3513_v40 = vor.u32 %v3512_v20, %v3508_v29  ;;  %v3530_v18 = vshll.u32 %v11337_v52, 16 }
 0x1e7   : > { %v3523_v17 = vrot.slane %v13694_v14, 4  ;;  %v3526_v13 = vrot.slane %v13695_v30, 5  ;;  %v1734_v36 = vrot.slane %v1732_v59, 4  ;;  %v3534_v57 = vshrl.u32 %v11337_v52, 16  ;;  %1461 = vst.msk [vmem:[#allocation2 + $0x64] sm:$0xf] %vm281_vm14, %v1307_v46  ;;  %v1327_v47 = vpop.permute.xlu0 %1326 }
 0x1e8   : > { %v1717_v14 = vsel %vm10709_vm8, %v1712_v27, %v1716_v9  ;;  %v1561_v60 = vld [vmem:[#allocation2 + $0x50] sm:$0x1]  ;;  %v1731_v41 = vsel %vm10709_vm8, %v11334_v34, %v1730_v55  ;;  %v1743_v29 = vshrl.u32 %v11339_v42, 16  ;;  %v1462_v20 = vld [vmem:[#allocation2 + $0x68] sm:$0x1]  ;;  %v3514_v50 = vrot.slane %v3513_v40, 4  ;;  %v1309_v5 = vpop.permute.xlu1 %1308 }
 0x1e9   : > { %v11361_v22 = vld [vmem:[#allocation2 + $0x50] sm:$0x1]  ;;  %v3527_v23 = vor.u32 %v3526_v13, %v3523_v17  ;;  %v8519_v59 = vcombine.low %v1707_v12, %v1717_v14  ;;  %v1735_v30 = vor.u32 %v1734_v36, %v1730_v55  ;;  %v1738_v3 = vshll.u32 %v1561_v60, 16  ;;  %v1497_v9 = vld [vmem:[#allocation2 + $0xa4] sm:$0x1] }
 0x1ea   : > { %v1484_v46 = vsel %vm10388_vm11, %v1327_v47, %v1483_v54  ;;  %v3532_v52 = vrot.slane %v3530_v18, 5  ;;  %v3536_v34 = vrot.slane %v3534_v57, 4  ;;  %v3519_v17 = vsel %vm10709_vm8, %v3514_v50, %v3518_v61  ;;  %v1476_v12 = vld [vmem:[#allocation2 + $0x80] sm:$0x1]  ;;  %v11371_v36 = vld [vmem:[#allocation2 + $0x58] sm:$0xf] }
 0x1eb   : > { %v3528_v27 = vrot.slane %v3527_v23, 4  ;;  %1485 = vst [vmem:[#allocation2 + $0x8c] sm:$0x1] %v1484_v46  ;;  %9322 = vmatmul.mubr.msk.bf16.gmra.mrb[40].mxu0 %vm2014_vm9, %v8519_v59  ;;  %v1736_v13 = vrot.slane %v1735_v30, 4  ;;  %v1740_v55 = vrot.slane %v1738_v3, 5  ;;  %v3540_v40 = vshll.u32 %v11361_v22, 16  ;;  %v1339_v23 = vpop.permute.xlu0 %1338 }
 0x1ec   : > { %13696 = vst [vmem:[#allocation38_spill] sm:$0xff] %v11371_v36  ;;  %v1463_v15 = vsel %vm10388_vm11, %v1309_v5, %v1462_v20  ;;  %v8672_v54 = vcombine.low %v3509_v33, %v3519_v17  ;;  %v3537_v57 = vor.u32 %v3536_v34, %v3532_v52  ;;  %v1562_v14 = vld [vmem:[#allocation2 + $0x5c] sm:$0x1]  ;;  %v3370_v60 = vld [vmem:[#allocation2 + $0x54] sm:$0xf]  ;;  %v1745_v47 = vrot.slane %v1743_v29, 4  ;;  %v1321_v30 = vpop.permute.xlu1 %1320 }
 0x1ed   : > { %v3533_v18 = vsel %vm10709_vm8, %v3528_v27, %v3532_v52  ;;  %1464 = vst [vmem:[#allocation2 + $0x68] sm:$0x1] %v1463_v15  ;;  %v1741_v61 = vsel %vm10709_vm8, %v1736_v13, %v1740_v55  ;;  %v3542_v3 = vrot.slane %v3540_v40, 5  ;;  %v1746_v59 = vshll.u32 %v11339_v42, 16  ;;  %v1511_v20 = vld [vmem:[#allocation2 + $0xbc] sm:$0x1] }
 0x1ee   : > { %9457 = vmatprep.mubr.msk.bf16.mxu1 %vm2014_vm9, %v8672_v54  ;;  %v1498_v5 = vsel %vm10388_vm11, %v1339_v23, %v1497_v9  ;;  %v8520_v33 = vcombine.low %v1731_v41, %v1741_v61  ;;  %v3538_v50 = vrot.slane %v3537_v57, 4  ;;  %v1752_v52 = vshll.u32 %v11371_v36, 16  ;;  %v1490_v46 = vld [vmem:[#allocation2 + $0x98] sm:$0x1]  ;;  %v11392_v40 = vld [vmem:[#allocation2 + $0x5c] sm:$0x1] }
 0x1ef   : > { %1499 = vst [vmem:[#allocation2 + $0xa4] sm:$0x1] %v1498_v5  ;;  %v1748_v27 = vrot.slane %v1746_v59, 5  ;;  %v1756_v34 = vshrl.u32 %v11371_v36, 16  ;;  %v1762_v17 = vshll.u32 %v1562_v14, 16  ;;  %v3545_v13 = vshrl.u32 %v3370_v60, 16  ;;  %v1351_v57 = vpop.permute.xlu0 %1350 }
 0x1f0   : > { %v11385_v29 = vld [vmem:[#allocation2 + $0x58] sm:$0xf]  ;;  %v1477_v55 = vsel %vm10388_vm11, %v1321_v30, %v1476_v12  ;;  %9325 = vmatprep.mubr.msk.bf16.mxu0 %vm2014_vm9, %v8520_v33  ;;  %v3543_v41 = vsel %vm10709_vm8, %v3538_v50, %v3542_v3  ;;  %v1754_v9 = vrot.slane %v1752_v52, 5  ;;  %v3548_v15 = vshll.u32 %v3370_v60, 16  ;;  %v11394_v54 = vld [vmem:[#allocation2 + $0x60] sm:$0xf]  ;;  %v1333_v3 = vpop.permute.xlu1 %1332 }
 0x1f1   : > { %13697 = vst [vmem:[#allocation39_spill] sm:$0xff] %v11394_v54  ;;  %1478 = vst [vmem:[#allocation2 + $0x80] sm:$0x1] %v1477_v55  ;;  %v8673_v14 = vcombine.low %v3533_v18, %v3543_v41  ;;  %v1749_v23 = vor.u32 %v1748_v27, %v1745_v47  ;;  %v1758_v61 = vrot.slane %v1756_v34, 4  ;;  %v1764_v59 = vrot.slane %v1762_v17, 5 }
 0x1f2   : > { %v1512_v12 = vsel %vm10388_vm11, %v1351_v57, %v1511_v20  ;;  %v3547_v5 = vrot.slane %v3545_v13, 4  ;;  %v3550_v33 = vrot.slane %v3548_v15, 5  ;;  %v3554_v30 = vshll.u32 %v11385_v29, 16  ;;  %v11402_v47 = vld [vmem:[#allocation2 + $0x64] sm:$0xf] }
 0x1f3   : > { %1513 = vst [vmem:[#allocation2 + $0xbc] sm:$0x1] %v1512_v12  ;;  %9458 = vmatmul.mubr.msk.bf16.gmra.mrb[24].mxu1 %vm2014_vm9, %v8673_v14  ;;  %v1750_v60 = vrot.slane %v1749_v23, 4  ;;  %v1759_v50 = vor.u32 %v1758_v61, %v1754_v9  ;;  %v3558_v52 = vshrl.u32 %v11385_v29, 16  ;;  %v3564_v18 = vshll.u32 %v11392_v40, 16  ;;  %13698 = vst [vmem:[#allocation40_spill] sm:$0xff] %v11402_v47 }
 0x1f4   : > { %v1491_v27 = vsel %vm10388_vm11, %v1333_v3, %v1490_v46  ;;  %v1504_v20 = vld [vmem:[#allocation2 + $0xb0] sm:$0x1]  ;;  %v3551_v34 = vor.u32 %v3550_v33, %v3547_v5  ;;  %v3556_v17 = vrot.slane %v3554_v30, 5  ;;  %v11406_v13 = vld [vmem:[#allocation2 + $0x68] sm:$0x1]  ;;  %v1767_v55 = vshrl.u32 %v11394_v54, 16  ;;  %v1345_v5 = vpop.permute.xlu1 %1344 }
 0x1f5   : > { %13699 = vst [vmem:[#allocation41_spill] sm:$0xff] %v11406_v13  ;;  %1492 = vst [vmem:[#allocation2 + $0x98] sm:$0x1] %v1491_v27  ;;  %v1755_v41 = vsel %vm10709_vm8, %v1750_v60, %v1754_v9  ;;  %v1760_v15 = vrot.slane %v1759_v50, 4  ;;  %v3560_v57 = vrot.slane %v3558_v52, 4  ;;  %v3566_v14 = vrot.slane %v3564_v18, 5 }
 0x1f6   : > { %v3552_v23 = vrot.slane %v3551_v34, 4  ;;  %v1769_v61 = vrot.slane %v1767_v55, 4  ;;  %v1770_v12 = vshll.u32 %v11394_v54, 16  ;;  %v1776_v46 = vshll.u32 %v11402_v47, 16  ;;  %v3373_v3 = vld [vmem:[#allocation2 + $0x60] sm:$0xf] }
 0x1f7   : > { %v1765_v33 = vsel %vm10709_vm8, %v1760_v15, %v1764_v59  ;;  %v3561_v30 = vor.u32 %v3560_v57, %v3556_v17  ;;  %v1780_v27 = vshrl.u32 %v11402_v47, 16  ;;  %v1786_v42 = vshll.u32 %v11406_v13, 16  ;;  %v11417_v9 = vld [vmem:[#allocation2 + $0x64] sm:$0xf]  ;;  %v11423_v34 = vld [vmem:[#allocation2 + $0x68] sm:$0x1] }
 0x1f8   : > { %v1505_v60 = vsel %vm10388_vm11, %v1345_v5, %v1504_v20  ;;  %v8521_v50 = vcombine.low %v1755_v41, %v1765_v33  ;;  %v3557_v52 = vsel %vm10709_vm8, %v3552_v23, %v3556_v17  ;;  %v1772_v18 = vrot.slane %v1770_v12, 5  ;;  %v1518_v59 = vld [vmem:[#allocation2 + $0xc8] sm:$0x1]  ;;  %v1357_v17 = vpop.permute.xlu1 %1356  ;;  %v11431_v33 = vld [vmem:[#allocation2 + $0x74] sm:$0x1] }
 0x1f9   : > { %1506 = vst [vmem:[#allocation2 + $0xb0] sm:$0x1] %v1505_v60  ;;  %v3562_v55 = vrot.slane %v3561_v30, 4  ;;  %v1778_v15 = vrot.slane %v1776_v46, 5  ;;  %v1782_v57 = vrot.slane %v1780_v27, 4  ;;  %v1788_v54 = vrot.slane %v1786_v42, 5 }
 0x1fa   : > { %9326 = vmatmul.mubr.msk.bf16.gmra.mrb[44].mxu0 %vm2014_vm9, %v8521_v50  ;;  %v1773_v13 = vor.u32 %v1772_v18, %v1769_v61  ;;  %v3569_v47 = vshrl.u32 %v3373_v3, 16  ;;  %v3572_v36 = vshll.u32 %v3373_v3, 16  ;;  %v3578_v20 = vshll.u32 %v11417_v9, 16  ;;  %13700 = vst [vmem:[#allocation42_spill] sm:$0xff] %v11431_v33  ;;  %v11433_v46 = vld [vmem:[#allocation2 + $0x74] sm:$0x1] }
 0x1fb   : > { %v3567_v41 = vsel %vm10709_vm8, %v3562_v55, %v3566_v14  ;;  %v1783_v23 = vor.u32 %v1782_v57, %v1778_v15  ;;  %v3582_v12 = vshrl.u32 %v11417_v9, 16  ;;  %v3588_v5 = vshll.u32 %v11423_v34, 16  ;;  %v11437_v27 = vld [vmem:[#allocation2 + $0x80] sm:$0x1]  ;;  %v11439_v60 = vld [vmem:[#allocation2 + $0x8c] sm:$0x1] }
 0x1fc   : > { %v8674_v42 = vcombine.low %v3557_v52, %v3567_v41  ;;  %v1519_v61 = vsel %vm10388_vm11, %v1357_v17, %v1518_v59  ;;  %v1774_v3 = vrot.slane %v1773_v13, 4  ;;  %v3571_v30 = vrot.slane %v3569_v47, 4  ;;  %v11441_v57 = vld [vmem:[#allocation2 + $0x80] sm:$0x1]  ;;  %v11448_v59 = vld [vmem:[#allocation2 + $0x8c] sm:$0x1] }
 0x1fd   : > { %1520 = vst [vmem:[#allocation2 + $0xc8] sm:$0x1] %v1519_v61  ;;  %v1784_v14 = vrot.slane %v1783_v23, 4  ;;  %v3574_v50 = vrot.slane %v3572_v36, 5  ;;  %v3580_v18 = vrot.slane %v3578_v20, 5  ;;  %v3584_v55 = vrot.slane %v3582_v12, 4 }
 0x1fe   : > { %9461 = vmatprep.mubr.msk.bf16.mxu1 %vm2014_vm9, %v8674_v42  ;;  %v1779_v52 = vsel %vm10709_vm8, %v1774_v3, %v1778_v15  ;;  %v3590_v41 = vrot.slane %v3588_v5, 5  ;;  %v3612_v13 = vshll.u32 %v11431_v33, 16  ;;  %v1810_v47 = vshll.u32 %v11433_v46, 16 }
 0x1ff   : > { %v1789_v17 = vsel %vm10709_vm8, %v1784_v14, %v1788_v54  ;;  %v3575_v36 = vor.u32 %v3574_v50, %v3571_v30  ;;  %v3585_v20 = vor.u32 %v3584_v55, %v3580_v18  ;;  %v1834_v23 = vshll.u32 %v11437_v27, 16  ;;  %v11463_v55 = vld [vmem:[#allocation2 + $0x98] sm:$0x1] }
 0x200   : > { %v8522_v12 = vcombine.low %v1779_v52, %v1789_v17  ;;  %v3614_v61 = vrot.slane %v3612_v13, 5  ;;  %v1812_v42 = vrot.slane %v1810_v47, 5  ;;  %v3636_v58 = vshll.u32 %v11441_v57, 16 }
 0x201   : > { %v3576_v15 = vrot.slane %v3575_v36, 4  ;;  %v3586_v5 = vrot.slane %v3585_v20, 4  ;;  %v1836_v3 = vrot.slane %v1834_v23, 5  ;;  %v3660_v33 = vshll.u32 %v11439_v60, 16  ;;  %v11485_v20 = vld [vmem:[#allocation2 + $0x98] sm:$0x1] }
 0x202   : > { %9329 = vmatprep.mubr.msk.bf16.mxu0 %vm2014_vm9, %v8522_v12  ;;  %v3615_v54 = vsel %vm10709_vm8, %v11096_v1, %v3614_v61  ;;  %v1813_v30 = vsel %vm10709_vm8, %v11100_v24, %v1812_v42  ;;  %v3638_v14 = vrot.slane %v3636_v58, 5  ;;  %v1858_v50 = vshll.u32 %v11448_v59, 16  ;;  %v11499_v23 = vld [vmem:[#allocation2 + $0xa0] sm:$0xf]  ;;  %v11511_v42 = vld [vmem:[#allocation2 + $0xa4] sm:$0x1] }
 0x203   : > { %v3581_v52 = vsel %vm10709_vm8, %v3576_v15, %v3580_v18  ;;  %v3591_v13 = vsel %vm10709_vm8, %v3586_v5, %v3590_v41  ;;  %v13701_v1 = vsel %vm10709_vm8, %v11082_v19, %v11053_v2  ;;  %v13702_v58 = vsel %vm10709_vm8, %v11098_v8, %v11058_v21  ;;  %v11513_v15 = vld [vmem:[#allocation2 + $0x9c] sm:$0xf] }
 0x204   : > { %v8676_v47 = vcombine.low %v13701_v1, %v3615_v54  ;;  %v8523_v24 = vcombine.low %v13702_v58, %v1813_v30  ;;  %v8675_v17 = vcombine.low %v3581_v52, %v3591_v13  ;;  %v1837_v18 = vsel %vm10709_vm8, %v11128_v51, %v1836_v3  ;;  %13707 = vst [vmem:[#allocation43_spill] sm:$0xff] %v11513_v15  ;;  %v11537_v13 = vld [vmem:[#allocation2 + $0xa0] sm:$0xf] }
 0x205   : > { %v3639_v41 = vsel %vm10709_vm8, %v11163_v4, %v3638_v14  ;;  %v3662_v36 = vrot.slane %v3660_v33, 5  ;;  %v13703_v2 = vsel %vm10709_vm8, %v11102_v44, %v11073_v6  ;;  %v13704_v19 = vsel %vm10709_vm8, %v11138_v43, %v11117_v32  ;;  %v3388_v33 = vld [vmem:[#allocation2 + $0x9c] sm:$0xf] }
 0x206   : > { %9330 = vmatmul.mubr.msk.bf16.gmra.mrb[48].mxu0 %vm2014_vm9, %v8523_v24  ;;  %v8524_v21 = vcombine.low %v13703_v2, %v1837_v18  ;;  %v8677_v8 = vcombine.low %v13704_v19, %v3639_v41  ;;  %v1860_v51 = vrot.slane %v1858_v50, 5  ;;  %v1882_v4 = vshll.u32 %v11463_v55, 16  ;;  %9462 = vmatmul.mubr.msk.bf16.gmra.mrb[28].mxu1 %vm2014_vm9, %v8675_v17  ;;  %v11546_v18 = vld [vmem:[#allocation2 + $0xa4] sm:$0x1] }
 0x207   : > { %v3663_v12 = vsel %vm10709_vm8, %v11183_v38, %v3662_v36  ;;  %v13705_v6 = vor.u32 %v11249_v39, %v11247_v0  ;;  %v13706_v61 = vshll.u32 %v11245_v7, 16  ;;  %v3678_v43 = vshrl.u32 %v11245_v7, 16  ;;  %9465 = vmatprep.mubr.msk.bf16.mxu1 %vm2014_vm9, %v8676_v47  ;;  %v11549_v36 = vld [vmem:[#allocation2 + $0xa8] sm:$0xf] }
 0x208   : > { %9333 = vmatprep.mubr.msk.bf16.mxu0 %vm2014_vm9, %v8524_v21  ;;  %v13708_v38 = vsel %vm10709_vm8, %v11170_v37, %v11147_v53  ;;  %v1861_v0 = vsel %vm10709_vm8, %v11215_v11, %v1860_v51  ;;  %v1884_v5 = vrot.slane %v1882_v4, 5  ;;  %v3684_v7 = vshll.u32 %v11485_v20, 16  ;;  %13711 = vst [vmem:[#allocation44_spill] sm:$0xff] %v11549_v36 }
 0x209   : > { %v3672_v44 = vrot.slane %v13705_v6, 4  ;;  %v3676_v32 = vrot.slane %v13706_v61, 5  ;;  %v8678_v39 = vcombine.low %v13708_v38, %v3663_v12  ;;  %v13709_v3 = vsel %vm10709_vm8, %v11186_v10, %v11177_v45 }
 0x20a   : > { %v8525_v54 = vcombine.low %v13709_v3, %v1861_v0  ;;  %v3680_v14 = vrot.slane %v3678_v43, 4  ;;  %v3689_v50 = vshrl.u32 %v3388_v33, 16  ;;  %v1885_v53 = vsel %vm10709_vm8, %v11242_v56, %v1884_v5 }
 0x20b   : > { %v3677_v30 = vsel %vm10709_vm8, %v3672_v44, %v3676_v32  ;;  %v3686_v37 = vrot.slane %v3684_v7, 5  ;;  %v3692_v11 = vshll.u32 %v3388_v33, 16  ;;  %v3698_v52 = vshll.u32 %v11499_v23, 16  ;;  %v3391_v7 = vld [vmem:[#allocation2 + $0xa8] sm:$0xf] }
 0x20c   : > { %v13710_v10 = vsel %vm10709_vm8, %v11228_v16, %v11197_v26  ;;  %v3681_v1 = vor.u32 %v3680_v14, %v3676_v32  ;;  %v3691_v47 = vrot.slane %v3689_v50, 4  ;;  %v3702_v58 = vshrl.u32 %v11499_v23, 16  ;;  %v11553_v16 = vld [vmem:[#allocation2 + $0xac] sm:$0xf]  ;;  %v11563_v14 = vld [vmem:[#allocation2 + $0xb0] sm:$0x1] }
 0x20d   : > { %v8526_v45 = vcombine.low %v13710_v10, %v1885_v53  ;;  %v3694_v24 = vrot.slane %v3692_v11, 5  ;;  %v3700_v17 = vrot.slane %v3698_v52, 5  ;;  %v3708_v56 = vshll.u32 %v11511_v42, 16  ;;  %v11567_v53 = vld [vmem:[#allocation2 + $0xac] sm:$0xf] }
 0x20e   : > { %v1887_v41 = vshrl.u32 %v11513_v15, 16  ;;  %v3682_v2 = vrot.slane %v3681_v1, 4  ;;  %v3704_v21 = vrot.slane %v3702_v58, 4  ;;  %v1890_v19 = vshll.u32 %v11513_v15, 16  ;;  %9334 = vmatmul.mubr.msk.bf16.gmra.mrb[52].mxu0 %vm2014_vm9, %v8525_v54  ;;  %9466 = vmatmul.mubr.msk.bf16.gmra.mrb[0].mxu1 %vm2014_vm9, %v8677_v8 }
 0x20f   : > { %v1896_v26 = vshll.u32 %v11537_v13, 16  ;;  %v3695_v51 = vor.u32 %v3694_v24, %v3691_v47  ;;  %v3710_v4 = vrot.slane %v3708_v56, 5  ;;  %v1900_v12 = vshrl.u32 %v11537_v13, 16  ;;  %9337 = vmatprep.mubr.msk.bf16.mxu0 %vm2014_vm9, %v8526_v45  ;;  %9469 = vmatprep.mubr.msk.bf16.mxu1 %vm2014_vm9, %v8678_v39 }
 0x210   : > { %v1889_v33 = vrot.slane %v1887_v41, 4  ;;  %v3687_v6 = vsel %vm10709_vm8, %v3682_v2, %v3686_v37  ;;  %v3705_v44 = vor.u32 %v3704_v21, %v3700_v17  ;;  %v1892_v61 = vrot.slane %v1890_v19, 5  ;;  %v3394_v19 = vld [vmem:[#allocation2 + $0xb4] sm:$0xf] }
 0x211   : > { %v1898_v32 = vrot.slane %v1896_v26, 5  ;;  %v8679_v43 = vcombine.low %v3677_v30, %v3687_v6  ;;  %v3696_v38 = vrot.slane %v3695_v51, 4  ;;  %v1902_v0 = vrot.slane %v1900_v12, 4 }
 0x212   : > { %v1906_v5 = vshll.u32 %v11546_v18, 16  ;;  %v3706_v3 = vrot.slane %v3705_v44, 4  ;;  %v1893_v54 = vor.u32 %v1892_v61, %v1889_v33  ;;  %v1911_v8 = vshrl.u32 %v11549_v36, 16 }
 0x213   : > { %v1914_v50 = vshll.u32 %v11549_v36, 16  ;;  %v3701_v37 = vsel %vm10709_vm8, %v3696_v38, %v3700_v17  ;;  %v1903_v39 = vor.u32 %v1902_v0, %v1898_v32  ;;  %v1920_v11 = vshll.u32 %v11553_v16, 16  ;;  %v11584_v38 = vld [vmem:[#allocation2 + $0xb8] sm:$0xf] }
 0x214   : > { %v1908_v30 = vrot.slane %v1906_v5, 5  ;;  %v3711_v52 = vsel %vm10709_vm8, %v3706_v3, %v3710_v4  ;;  %v1894_v10 = vrot.slane %v1893_v54, 4  ;;  %v1913_v45 = vrot.slane %v1911_v8, 4  ;;  %v11580_v4 = vld [vmem:[#allocation2 + $0xb0] sm:$0x1] }
 0x215   : > { %v1916_v1 = vrot.slane %v1914_v50, 5  ;;  %v8680_v47 = vcombine.low %v3701_v37, %v3711_v52  ;;  %v1904_v58 = vrot.slane %v1903_v39, 4  ;;  %v1922_v24 = vrot.slane %v1920_v11, 5  ;;  %v11592_v11 = vld [vmem:[#allocation2 + $0xbc] sm:$0x1] }
 0x216   : > { %v1924_v56 = vshrl.u32 %v11553_v16, 16  ;;  %v1899_v41 = vsel %vm10709_vm8, %v1894_v10, %v1898_v32  ;;  %v1930_v17 = vshll.u32 %v11563_v14, 16  ;;  %v3713_v21 = vshrl.u32 %v3391_v7, 16  ;;  %9470 = vmatmul.mubr.msk.bf16.gmra.mrb[4].mxu1 %vm2014_vm9, %v8679_v43 }
 0x217   : > { %v1917_v2 = vor.u32 %v1916_v1, %v1913_v45  ;;  %v1909_v26 = vsel %vm10709_vm8, %v1904_v58, %v1908_v30  ;;  %v3716_v33 = vshll.u32 %v3391_v7, 16  ;;  %v3722_v12 = vshll.u32 %v11567_v53, 16  ;;  %9473 = vmatprep.mubr.msk.bf16.mxu1 %vm2014_vm9, %v8680_v47  ;;  %v11596_v58 = vld [vmem:[#allocation2 + $0xb4] sm:$0xf] }
 0x218   : > { %v1926_v51 = vrot.slane %v1924_v56, 4  ;;  %v8527_v6 = vcombine.low %v1899_v41, %v1909_v26  ;;  %v1932_v61 = vrot.slane %v1930_v17, 5  ;;  %v3715_v32 = vrot.slane %v3713_v21, 4  ;;  %13712 = vst [vmem:[#allocation45_spill] sm:$0xff] %v11596_v58  ;;  %v11600_v17 = vld [vmem:[#allocation2 + $0xb8] sm:$0xf] }
 0x219   : > { %v1918_v44 = vrot.slane %v1917_v2, 4  ;;  %v3718_v5 = vrot.slane %v3716_v33, 5  ;;  %v3724_v3 = vrot.slane %v3722_v12, 5  ;;  %v3726_v54 = vshrl.u32 %v11567_v53, 16  ;;  %v3397_v33 = vld [vmem:[#allocation2 + $0xc0] sm:$0xf] }
 0x21a   : > { %v1927_v0 = vor.u32 %v1926_v51, %v1922_v24  ;;  %9338 = vmatmul.mubr.msk.bf16.gmra.mrb[56].mxu0 %vm2014_vm9, %v8527_v6  ;;  %v3732_v43 = vshll.u32 %v11580_v4, 16  ;;  %v3737_v8 = vshrl.u32 %v3394_v19, 16  ;;  %v3740_v50 = vshll.u32 %v3394_v19, 16 }
 0x21b   : > { %v1923_v7 = vsel %vm10709_vm8, %v1918_v44, %v1922_v24  ;;  %v3719_v39 = vor.u32 %v3718_v5, %v3715_v32  ;;  %v3728_v30 = vrot.slane %v3726_v54, 4  ;;  %v3746_v52 = vshll.u32 %v11584_v38, 16 }
 0x21c   : > { %v1928_v37 = vrot.slane %v1927_v0, 4  ;;  %v3734_v10 = vrot.slane %v3732_v43, 5  ;;  %v3739_v45 = vrot.slane %v3737_v8, 4  ;;  %v3742_v1 = vrot.slane %v3740_v50, 5 }
 0x21d   : > { %v3750_v47 = vshrl.u32 %v11584_v38, 16  ;;  %v3720_v56 = vrot.slane %v3719_v39, 4  ;;  %v3729_v41 = vor.u32 %v3728_v30, %v3724_v3  ;;  %v3748_v2 = vrot.slane %v3746_v52, 5 }
 0x21e   : > { %v1933_v24 = vsel %vm10709_vm8, %v1928_v37, %v1932_v61  ;;  %v3743_v19 = vor.u32 %v3742_v1, %v3739_v45  ;;  %v3756_v51 = vshll.u32 %v11592_v11, 16  ;;  %v1935_v44 = vshrl.u32 %v11596_v58, 16  ;;  %v11607_v61 = vld [vmem:[#allocation2 + $0xc4] sm:$0xf] }
 0x21f   : > { %v8528_v21 = vcombine.low %v1923_v7, %v1933_v24  ;;  %v3752_v26 = vrot.slane %v3750_v47, 4  ;;  %v3725_v12 = vsel %vm10709_vm8, %v3720_v56, %v3724_v3  ;;  %v3730_v6 = vrot.slane %v3729_v41, 4  ;;  %v11610_v7 = vld [vmem:[#allocation2 + $0xbc] sm:$0x1]  ;;  %v4087_v41 = vld [vmem:[#allocation2 + $0x30] sm:$0xe] }
 0x220   : > { %v1938_v32 = vshll.u32 %v11596_v58, 16  ;;  %v3744_v0 = vrot.slane %v3743_v19, 4  ;;  %v3758_v54 = vrot.slane %v3756_v51, 5  ;;  %13713 = vst [vmem:[#allocation46_spill] sm:$0xff] %v11610_v7  ;;  %v1944_v43 = vshll.u32 %v11600_v17, 16 }
 0x221   : > { %9341 = vmatprep.mubr.msk.bf16.mxu0 %vm2014_vm9, %v8528_v21  ;;  %v3753_v5 = vor.u32 %v3752_v26, %v3748_v2  ;;  %v3735_v8 = vsel %vm10709_vm8, %v3730_v6, %v3734_v10  ;;  %v1937_v3 = vrot.slane %v1935_v44, 4  ;;  %v1948_v37 = vshrl.u32 %v11600_v17, 16  ;;  %v11622_v21 = vld [vmem:[#allocation2 + $0xc8] sm:$0x1] }
 0x222   : > { %v1940_v50 = vrot.slane %v1938_v32, 5  ;;  %v8681_v39 = vcombine.low %v3725_v12, %v3735_v8  ;;  %v3749_v30 = vsel %vm10709_vm8, %v3744_v0, %v3748_v2  ;;  %v1946_v45 = vrot.slane %v1944_v43, 5 }
 0x223   : > { %v3754_v52 = vrot.slane %v3753_v5, 4  ;;  %v1950_v47 = vrot.slane %v1948_v37, 4  ;;  %v1954_v24 = vshll.u32 %v11610_v7, 16  ;;  %v3761_v56 = vshrl.u32 %v3397_v33, 16 }
 0x224   : > { %v1941_v1 = vor.u32 %v1940_v50, %v1937_v3  ;;  %9474 = vmatmul.mubr.msk.bf16.gmra.mrb[8].mxu1 %vm2014_vm9, %v8681_v39  ;;  %v3764_v19 = vshll.u32 %v3397_v33, 16  ;;  %v3770_v26 = vshll.u32 %v11607_v61, 16  ;;  %v3774_v2 = vshrl.u32 %v11607_v61, 16  ;;  %v10002_v39 = vld [vmem:[#allocation2 + $0x2c] sm:$0x1]  ;;  %v13724_v3 = vld [vmem:[#allocation37_spill] sm:$0xff] }
 0x225   : > { %v3759_v10 = vsel %vm10709_vm8, %v3754_v52, %v3758_v54  ;;  %v1951_v6 = vor.u32 %v1950_v47, %v1946_v45  ;;  %v1956_v44 = vrot.slane %v1954_v24, 5  ;;  %v3763_v32 = vrot.slane %v3761_v56, 4  ;;  %v10003_v24 = vld [vmem:[#allocation2 + $0x34] sm:$0xf] }
 0x226   : > { %v8682_v51 = vcombine.low %v3749_v30, %v3759_v10  ;;  %v1942_v12 = vrot.slane %v1941_v1, 4  ;;  %v3766_v0 = vrot.slane %v3764_v19, 5  ;;  %v3772_v5 = vrot.slane %v3770_v26, 5 }
 0x227   : > { %v3776_v43 = vrot.slane %v3774_v2, 4  ;;  %v1952_v8 = vrot.slane %v1951_v6, 4  ;;  %v3780_v33 = vshll.u32 %v11622_v21, 16  ;;  %v4167_v30 = vrot.slane %v10002_v39, 5 }
 0x228   : > { %9477 = vmatprep.mubr.msk.bf16.mxu1 %vm2014_vm9, %v8682_v51  ;;  %v1947_v54 = vsel %vm10709_vm8, %v1942_v12, %v1946_v45  ;;  %v3767_v50 = vor.u32 %v3766_v0, %v3763_v32  ;;  %v8704_v52 = vrot.slane %v4087_v41, 9  ;;  %v4171_v56 = vrot.slane %v10003_v24, 5  ;;  %v11640_v51 = vld [vmem:[#allocation2 + $0x34] sm:$0xf]  ;;  %v11642_v12 = vld [vmem:[#allocation2 + $0x30] sm:$0xf] }
 0x229   : > { %v3777_v37 = vor.u32 %v3776_v43, %v3772_v5  ;;  %v1957_v1 = vsel %vm10709_vm8, %v1952_v8, %v1956_v44  ;;  %v3782_v47 = vrot.slane %v3780_v33, 5  ;;  %v4174_v10 = vrot.slane %v11270_v62, 5  ;;  %v4088_v44 = vld [vmem:[#allocation2 + $0x3c] sm:$0xe]  ;;  %v10006_v43 = vld [vmem:[%s13567_s3 + $0x10] sm:$0x3f]  }
 0x22a   : > { %v8529_v45 = vcombine.low %v1947_v54, %v1957_v1  ;;  %v3768_v19 = vrot.slane %v3767_v50, 4  ;;  %v11638_v2 = vsel %vm10939_vm0, %v11084_v63, %v4167_v30  ;;  %v4173_v6 = vrot.slane %v4171_v56, 4  ;;  %v4089_v1 = vld [vmem:[#allocation2 + $0x48] sm:$0xe]  ;;  %v10008_v62 = vld [vmem:[#allocation2 + $0x70] sm:$0xf] }
 0x22b   : > { %v3778_v26 = vrot.slane %v3777_v37, 4  ;;  %v2793_v54 = vsel %vm2063_vm15, %v10006_v43, 0  ;;  %v4178_v8 = vrot.slane %v11296_v49, 5  ;;  %v13714_v50 = vcombine.low %v13676_v48, %v10669_v31  ;;  %v13715_v37 = vld [vmem:[#allocation8_spill] sm:$0xff]  ;;  %v13716_v31 = vld [vmem:[#allocation33_spill] sm:$0xff] }
 0x22c   : > { %9342 = vmatmul.mubr.msk.bf16.gmra.mrb[60].mxu0 %vm2014_vm9, %v8529_v45  ;;  %v3773_v63 = vsel %vm10709_vm8, %v3768_v19, %v3772_v5  ;;  %v8721_v5 = vcombine.low %v13715_v37, %v11638_v2  ;;  %v11668_v39 = vsel %vm10939_vm0, %v8704_v52, %v4171_v56  ;;  %v11672_v30 = vsel %vm10939_vm0, %v4173_v6, %v4174_v10  ;;  %v11675_v45 = vld [vmem:[#allocation2 + $0x3c] sm:$0xf]  ;;  %v4090_v19 = vld [vmem:[#allocation2 + $0x54] sm:$0xe]  ;;  %v13717_v56 = vld [vmem:[#allocation35_spill] sm:$0xff] }
 0x22d   : > { %v3783_v0 = vsel %vm10709_vm8, %v3778_v26, %v3782_v47  ;;  %9347 = vmatprep.mubr.msk.bf16.mxu0 %vm2014_vm9, %v13714_v50  ;;  %v8705_v47 = vrot.slane %v4088_v44, 9  ;;  %v4180_v49 = vrot.slane %v4178_v8, 4  ;;  %v4181_v24 = vrot.slane %v11283_v35, 5  ;;  %v13718_v26 = vld [vmem:[#allocation32_spill] sm:$0xff]  ;;  %v13721_v35 = vld [vmem:[#allocation18_spill] sm:$0xff]  ;;  %v13729_v41 = vld [vmem:[#allocation13_spill] sm:$0xff] }
 0x22e   : > { %v8683_v33 = vcombine.low %v3773_v63, %v3783_v0  ;;  %v13719_v2 = vld [vmem:[#allocation36_spill] sm:$0xff]  ;;  %v4192_v44 = vrot.slane %v11385_v29, 5  ;;  %v13720_v63 = vld [vmem:[#allocation17_spill] sm:$0xff]  ;;  %v8706_v50 = vrot.slane %v4089_v1, 9  ;;  %v4188_v37 = vrot.slane %v11361_v22, 5  ;;  %v13723_v29 = vld [vmem:[#allocation38_spill] sm:$0xff] }
 0x22f   : > { %v4185_v6 = vrot.slane %v13719_v2, 5  ;;  %v13722_v0 = vcombine.low %v13720_v63, %v13721_v35  ;;  %v11692_v43 = vsel %vm10939_vm0, %v8705_v47, %v4178_v8  ;;  %v8707_v32 = vrot.slane %v4090_v19, 9  ;;  %v13725_v63 = vld [vmem:[#allocation40_spill] sm:$0xff]  ;;  %v13726_v35 = vld [vmem:[#allocation39_spill] sm:$0xff]  ;;  %v4091_v10 = vld [vmem:[#allocation2 + $0x60] sm:$0xe] }
 0x230   : > { %9478 = vmatmul.mubr.msk.bf16.gmra.mrb[12].mxu1 %vm2014_vm9, %v8683_v33  ;;  %v11696_v33 = vsel %vm10939_vm0, %v4180_v49, %v4181_v24  ;;  %v4195_v2 = vrot.slane %v11392_v40, 5  ;;  %v4194_v48 = vrot.slane %v4192_v44, 4  ;;  %v4199_v49 = vrot.slane %v11417_v9, 5  ;;  %v4092_v1 = vld [vmem:[#allocation2 + $0x6c] sm:$0xe]  ;;  %v13727_v40 = vld [vmem:[#allocation34_spill] sm:$0xff] }
 0x231   : > { %9483 = vmatprep.mubr.msk.bf16.mxu1 %vm2014_vm9, %v13722_v0  ;;  %v4187_v47 = vrot.slane %v4185_v6, 4  ;;  %v11709_v22 = vsel %vm10939_vm0, %v8707_v32, %v4192_v44  ;;  %v4730_v24 = vsel %vm2063_vm15, %v13727_v40, 0  ;;  %v4202_v19 = vrot.slane %v11423_v34, 5  ;;  %v13728_v52 = vld [vmem:[#allocation12_spill] sm:$0xff]  ;;  %v4093_v40 = vld [vmem:[#allocation2 + $0x78] sm:$0xe] }
 0x232   : > { %v4206_v0 = vrot.slane %v10008_v62, 5  ;;  %v13730_v58 = vcombine.low %v13728_v52, %v13729_v41  ;;  %v11724_v32 = vsel %vm10939_vm0, %v4194_v48, %v4195_v2  ;;  %v8708_v44 = vrot.slane %v4091_v10, 9  ;;  %v13731_v34 = vld [vmem:[#allocation11_spill] sm:$0xff]  ;;  %v13732_v62 = vld [vmem:[#allocation14_spill] sm:$0xff]  ;;  %v11736_v48 = vld [vmem:[%s13567_s3 + $0x38] sm:$0x3f]  }
 0x233   : > { %v11720_v9 = vsel %vm10939_vm0, %v4187_v47, %v4188_v37  ;;  %v4201_v8 = vrot.slane %v4199_v49, 4  ;;  %v13733_v36 = vcombine.low %v13731_v34, %v13732_v62  ;;  %v8709_v41 = vrot.slane %v4092_v1, 9  ;;  %v13734_v37 = vld [vmem:[#allocation42_spill] sm:$0xff]  ;;  %v10010_v34 = vld [vmem:[%s13567_s3 + $0x18] sm:$0x3f]  }
 0x234   : > { %9348 = vmatmul.mubr.msk.bf16.vlgmr.msra.gmra.mrb[32].mxu0 %vm2014_vm9, %v13730_v58  ;;  %v4208_v52 = vrot.slane %v4206_v0, 4  ;;  %v4209_v47 = vrot.slane %v13734_v37, 5  ;;  %v4216_v1 = vrot.slane %v11441_v57, 5  ;;  %v13735_v37 = vld [vmem:[#allocation19_spill] sm:$0xff]  ;;  %v13736_v58 = vld [vmem:[#allocation20_spill] sm:$0xff] }
 0x235   : > { %9380 = vmatpush3.bf16.msra.mxu0 %v2793_v54  ;;  %9351 = vmatprep.mubr.msk.bf16.mxu0 %vm2014_vm9, %v13733_v36  ;;  %v11740_v54 = vsel %vm10939_vm0, %v8708_v44, %v4199_v49  ;;  %v11744_v10 = vsel %vm10939_vm0, %v4201_v8, %v4202_v19  ;;  %v10009_v36 = vld [vmem:[#allocation2 + $0x7c] sm:$0xf]  ;;  %v13737_v15 = vcombine.low %v13735_v37, %v13736_v58  ;;  %v8711_v19 = vrot.slane %v4094_v28, 9  ;;  %v10011_v57 = vld [vmem:[#allocation2 + $0x88] sm:$0xf] }
 0x236   : > { %v4213_v2 = vrot.slane %v10009_v36, 5  ;;  %9912 = vmatprep.subr.msk.bf16.mxu0 %vm2063_vm15, %v10010_v34  ;;  %v11759_v8 = vsel %vm10939_vm0, %v4208_v52, %v4209_v47  ;;  %v4220_v44 = vrot.slane %v10011_v57, 5  ;;  %v11764_v36 = vsel %vm10939_vm0, %v8706_v50, %v4185_v6  ;;  %v11771_v37 = vld [vmem:[#allocation2 + $0x90] sm:$0xe]  ;;  %v4096_v52 = vld [vmem:[#allocation2 + $0x9c] sm:$0xe] }
 0x237   : > { %v8710_v58 = vrot.slane %v4093_v40, 9  ;;  %v4223_v34 = vrot.slane %v11439_v60, 5  ;;  %v11777_v6 = vld [vmem:[#allocation2 + $0x94] sm:$0xf]  ;;  %v4234_v40 = vrot.slane %v11499_v23, 5  ;;  %v8712_v49 = vrot.slane %v11771_v37, 9 }
 0x238   : > { %9484 = vmatmul.mubr.msk.bf16.vlgmr.msra.gmra.mrb[16].mxu1 %vm2014_vm9, %v13737_v15  ;;  %v11768_v15 = vsel %vm10939_vm0, %v8709_v41, %v4206_v0  ;;  %v4215_v47 = vrot.slane %v4213_v2, 4  ;;  %v4222_v0 = vrot.slane %v4220_v44, 4  ;;  %v4097_v41 = vld [vmem:[#allocation2 + $0xa8] sm:$0xe]  ;;  %v8713_v28 = vrot.slane %v4096_v52, 9 }
 0x239   : > { %9487 = vmatprep.mubr.msk.bf16.mxu1 %vm2014_vm9, %v8721_v5  ;;  %9516 = vmatpush3.bf16.msra.mxu1 %v4730_v24  ;;  %v11784_v60 = vsel %vm10939_vm0, %v8710_v58, %v4213_v2  ;;  %v4230_v24 = vrot.slane %v11485_v20, 5  ;;  %v11794_v5 = vsel %vm10939_vm0, %v8711_v19, %v4220_v44  ;;  %v4098_v50 = vld [vmem:[#allocation2 + $0xb4] sm:$0xe]  ;;  %v13739_v58 = vld [vmem:[#allocation15_spill] sm:$0xff]  ;;  %v13741_v23 = vrot.slane %v11777_v6, 5 }
 0x23a   : > { %9917 = vmatprep.subr.msk.bf16.mxu1 %vm2063_vm15, %v11736_v48  ;;  %v11790_v57 = vsel %vm10939_vm0, %v4215_v47, %v4216_v1  ;;  %v13738_v2 = vld [vmem:[#allocation16_spill] sm:$0xff]  ;;  %v11803_v20 = vsel %vm10939_vm0, %v4222_v0, %v4223_v34  ;;  %v4236_v47 = vrot.slane %v4234_v40, 4  ;;  %v4237_v19 = vrot.slane %v11511_v42, 5  ;;  %v4099_v0 = vld [vmem:[#allocation2 + $0xc0] sm:$0xe] }
 0x23b   : > { %v13740_v7 = vcombine.low %v13738_v2, %v13739_v58  ;;  %v4229_v1 = vrot.slane %v13741_v23, 4  ;;  %v13742_v44 = vcombine.low %v11642_v12, %v11640_v51  ;;  %v11814_v37 = vsel %vm10939_vm0, %v8713_v28, %v4234_v40  ;;  %v2525_v23 = vld [vmem:[#allocation2] sm:$0xe] }
 0x23c   : > { %v4241_v52 = vrot.slane %v11567_v53, 5  ;;  %v4244_v34 = vrot.slane %v11580_v4, 5  ;;  %v11824_v42 = vsel %vm10939_vm0, %v4236_v47, %v4237_v19  ;;  %v8715_v12 = vrot.slane %v4098_v50, 9  ;;  %v10013_v19 = vld [vmem:[#allocation2 + $0x4] sm:$0xf]  ;;  %v13758_v53 = vld [vmem:[#allocation25_spill] sm:$0xff] }
 0x23d   : > { %9352 = vmatmul.mubr.msk.bf16.gmra.mrb[36].mxu0 %vm2014_vm9, %v13740_v7  ;;  %v8714_v7 = vrot.slane %v4097_v41, 9  ;;  %v11820_v2 = vsel %vm10939_vm0, %v4229_v1, %v4230_v24  ;;  %v4248_v58 = vrot.slane %v11584_v38, 5  ;;  %v13743_v28 = vcombine.low %v11668_v39, %v11672_v30 }
 0x23e   : > { %9355 = vmatprep.mubr.msk.bf16.mxu0 %vm2014_vm9, %v13742_v44  ;;  %v4243_v24 = vrot.slane %v4241_v52, 4  ;;  %v4251_v40 = vrot.slane %v11592_v11, 5  ;;  %v13744_v50 = vcombine.low %v11692_v43, %v11696_v33  ;;  %v8716_v30 = vrot.slane %v4099_v0, 9  ;;  %v2528_v43 = vld [vmem:[#allocation2 + $0x24] sm:$0xe] }
 0x23f   : > { %v11835_v4 = vsel %vm10939_vm0, %v8714_v7, %v4241_v52  ;;  %v11844_v38 = vsel %vm10939_vm0, %v8715_v12, %v4248_v58  ;;  %v4250_v39 = vrot.slane %v4248_v58, 4  ;;  %v4255_v41 = vrot.slane %v11607_v61, 5  ;;  %v10014_v12 = vld [vmem:[#allocation2 + $0x8] sm:$0x1]  ;;  %v10022_v33 = vld [vmem:[#allocation2 + $0x50] sm:$0x1] }
 0x240   : > { %9488 = vmatmul.mubr.msk.bf16.gmra.mrb[20].mxu1 %vm2014_vm9, %v13743_v28  ;;  %v11849_v1 = vsel %vm10939_vm0, %v4243_v24, %v4244_v34  ;;  %v4258_v47 = vrot.slane %v11622_v21, 5  ;;  %v8580_v11 = vrot.slane %v2525_v23, 9  ;;  %v2578_v44 = vrot.slane %v10013_v19, 5  ;;  %v2532_v34 = vld [vmem:[#allocation2 + $0x54] sm:$0xe] }
 0x241   : > { %9491 = vmatprep.mubr.msk.bf16.mxu1 %vm2014_vm9, %v13744_v50  ;;  %v11856_v7 = vsel %vm10939_vm0, %v4250_v39, %v4251_v40  ;;  %v11860_v61 = vsel %vm10939_vm0, %v8716_v30, %v4255_v41  ;;  %v4257_v52 = vrot.slane %v4255_v41, 4  ;;  %v2581_v58 = vrot.slane %v10014_v12, 5  ;;  %v10015_v50 = vld [vmem:[#allocation2 + $0x20] sm:$0x1]  ;;  %v2529_v41 = vld [vmem:[#allocation2 + $0x30] sm:$0xe] }
 0x242   : > { %v11866_v21 = vsel %vm10939_vm0, %v8580_v11, %v2578_v44  ;;  %v2580_v0 = vrot.slane %v2578_v44, 4  ;;  %v13745_v23 = vcombine.low %v11675_v45, %v13716_v31  ;;  %v13746_v24 = vrot.slane %v13732_v62, 5  ;;  %v10017_v62 = vld [vmem:[#allocation2 + $0x2c] sm:$0x1]  ;;  %v10021_v45 = vld [vmem:[#allocation2 + $0x44] sm:$0x1] }
 0x243   : > { %v11874_v28 = vsel %vm10939_vm0, %v4257_v52, %v4258_v47  ;;  %v2595_v39 = vrot.slane %v10015_v50, 5  ;;  %v8583_v30 = vrot.slane %v2528_v43, 9  ;;  %v13747_v11 = vcombine.low %v13718_v26, %v13717_v56  ;;  %v10016_v47 = vld [vmem:[#allocation2 + $0x28] sm:$0xf] }
 0x244   : > { %v2594_v40 = vrot.slane %v13746_v24, 4  ;;  %v11886_v31 = vsel %vm10939_vm0, %v2580_v0, %v2581_v58  ;;  %v2599_v19 = vrot.slane %v10016_v47, 5  ;;  %v2602_v44 = vrot.slane %v10017_v62, 5  ;;  %v10018_v24 = vld [vmem:[#allocation2 + $0x38] sm:$0x1] }
 0x245   : > { %9356 = vmatmul.mubr.msk.bf16.gmra.mrb[40].mxu0 %vm2014_vm9, %v13745_v23  ;;  %v8728_v43 = vcombine.low %v11784_v60, %v11790_v57  ;;  %v13748_v52 = vrot.slane %v11777_v6, 5  ;;  %v2606_v0 = vrot.slane %v11640_v51, 5  ;;  %v13749_v12 = vcombine.low %v11764_v36, %v11720_v9  ;;  %v2531_v47 = vld [vmem:[#allocation2 + $0x48] sm:$0xe] }
 0x246   : > { %9359 = vmatprep.mubr.msk.bf16.mxu0 %vm2014_vm9, %v13747_v11  ;;  %v11898_v26 = vsel %vm10939_vm0, %v2594_v40, %v2595_v39  ;;  %v8729_v58 = vcombine.low %v11794_v5, %v11803_v20  ;;  %v2601_v23 = vrot.slane %v2599_v19, 4  ;;  %v8584_v6 = vrot.slane %v2529_v41, 9  ;;  %v10019_v40 = vld [vmem:[#allocation2 + $0x40] sm:$0xf]  ;;  %v13751_v41 = vld [vmem:[#allocation27_spill] sm:$0xff] }
 0x247   : > { %v11894_v56 = vsel %vm10939_vm0, %v8712_v49, %v13748_v52  ;;  %v2609_v50 = vrot.slane %v10018_v24, 5  ;;  %v2530_v49 = vld [vmem:[#allocation2 + $0x3c] sm:$0xe]  ;;  %v13750_v11 = vcombine.low %v11709_v22, %v11724_v32  ;;  %v2608_v36 = vrot.slane %v2606_v0, 4  ;;  %v10020_v32 = vld [vmem:[#allocation2 + $0x4c] sm:$0xf] }
 0x248   : > { %9492 = vmatmul.mubr.msk.bf16.gmra.mrb[24].mxu1 %vm2014_vm9, %v13749_v12  ;;  %v2613_v39 = vrot.slane %v10019_v40, 5  ;;  %v11919_v52 = vsel %vm10939_vm0, %v8583_v30, %v2599_v19  ;;  %v11923_v22 = vsel %vm10939_vm0, %v2601_v23, %v2602_v44  ;;  %v2620_v12 = vrot.slane %v10020_v32, 5  ;;  %v2533_v23 = vld [vmem:[#allocation2 + $0x60] sm:$0xe]  ;;  %v13770_v60 = vld [vmem:[#allocation31_spill] sm:$0xff] }
 0x249   : > { %9495 = vmatprep.mubr.msk.bf16.mxu1 %vm2014_vm9, %v13750_v11  ;;  %v11927_v24 = vsel %vm10939_vm0, %v2608_v36, %v2609_v50  ;;  %v8585_v11 = vrot.slane %v2530_v49, 9  ;;  %v2616_v9 = vrot.slane %v10021_v45, 5  ;;  %v11931_v62 = vsel %vm10939_vm0, %v8584_v6, %v2606_v0  ;;  %v10023_v6 = vld [vmem:[#allocation2 + $0x58] sm:$0xf] }
 0x24a   : > { %v2615_v40 = vrot.slane %v2613_v39, 4  ;;  %v8586_v30 = vrot.slane %v2531_v47, 9  ;;  %v2622_v19 = vrot.slane %v2620_v12, 4  ;;  %v2623_v44 = vrot.slane %v10022_v33, 5 }
 0x24b   : > { %v13752_v32 = vcombine.low %v13724_v3, %v13723_v29  ;;  %v11941_v45 = vsel %vm10939_vm0, %v8585_v11, %v2613_v39  ;;  %v2627_v49 = vrot.slane %v10023_v6, 5  ;;  %v13753_v33 = vcombine.low %v13726_v35, %v13725_v63 }
 0x24c   : > { %v11945_v0 = vsel %vm10939_vm0, %v2615_v40, %v2616_v9  ;;  %v11955_v29 = vsel %vm10939_vm0, %v2622_v19, %v2623_v44  ;;  %v8587_v36 = vrot.slane %v2532_v34, 9  ;;  %v2634_v39 = vrot.slane %v13725_v63, 5  ;;  %v13754_v40 = vld [vmem:[#allocation41_spill] sm:$0xff]  ;;  %v2534_v44 = vld [vmem:[#allocation2 + $0x6c] sm:$0xe] }
 0x24d   : > { %9360 = vmatmul.mubr.msk.bf16.gmra.mrb[44].mxu0 %vm2014_vm9, %v13752_v32  ;;  %v11960_v9 = vsel %vm10939_vm0, %v8586_v30, %v2620_v12  ;;  %v2629_v47 = vrot.slane %v2627_v49, 4  ;;  %v8588_v11 = vrot.slane %v2533_v23, 9  ;;  %v2637_v35 = vrot.slane %v13754_v40, 5  ;;  %v10024_v12 = vld [vmem:[#allocation2 + $0x5c] sm:$0x1] }
 0x24e   : > { %9363 = vmatprep.mubr.msk.bf16.mxu0 %vm2014_vm9, %v13753_v33  ;;  %v13755_v32 = vcombine.low %v11740_v54, %v11744_v10  ;;  %v11973_v63 = vsel %vm10939_vm0, %v8587_v36, %v2627_v49  ;;  %v2630_v30 = vrot.slane %v10024_v12, 5  ;;  %v2535_v23 = vld [vmem:[#allocation2 + $0x78] sm:$0xe]  ;;  %v13756_v6 = vcombine.low %v11768_v15, %v11759_v8  ;;  %v10025_v33 = vld [vmem:[#allocation2 + $0x70] sm:$0xf] }
 0x24f   : > { %v11981_v54 = vsel %vm10939_vm0, %v8588_v11, %v2634_v39  ;;  %v2636_v10 = vrot.slane %v2634_v39, 4  ;;  %v2641_v40 = vrot.slane %v10025_v33, 5  ;;  %v2536_v49 = vld [vmem:[#allocation2 + $0x84] sm:$0xe]  ;;  %v11990_v12 = vsel %vm2063_vm15, %v11736_v48, 0 }
 0x250   : > { %9496 = vmatmul.mubr.msk.bf16.gmra.mrb[28].mxu1 %vm2014_vm9, %v13755_v32  ;;  %v2644_v32 = vrot.slane %v11433_v46, 5  ;;  %v11986_v36 = vsel %vm10939_vm0, %v2629_v47, %v2630_v30  ;;  %v10026_v8 = vld [vmem:[#allocation2 + $0x7c] sm:$0xf]  ;;  %v8589_v11 = vrot.slane %v2534_v44, 9  ;;  %v8590_v46 = vrot.slane %v2535_v23, 9  ;;  %v13757_v48 = vld [vmem:[#allocation22_spill] sm:$0xff] }
 0x251   : > { %9499 = vmatprep.mubr.msk.bf16.mxu1 %vm2014_vm9, %v13756_v6  ;;  %v2648_v15 = vrot.slane %v10026_v8, 5  ;;  %v2651_v6 = vrot.slane %v11437_v27, 5  ;;  %v11995_v39 = vsel %vm10939_vm0, %v2636_v10, %v2637_v35  ;;  %v2643_v33 = vrot.slane %v2641_v40, 4  ;;  %v2537_v34 = vld [vmem:[#allocation2 + $0x90] sm:$0xe]  ;;  %v13761_v8 = vld [vmem:[#allocation26_spill] sm:$0xff] }
 0x252   : > { %v8591_v3 = vrot.slane %v2536_v49, 9  ;;  %v10027_v47 = vld [vmem:[#allocation2 + $0x88] sm:$0xf]  ;;  %v2658_v50 = vrot.slane %v11448_v59, 5  ;;  %v13759_v51 = vcombine.low %v13757_v48, %v13758_v53  ;;  %v10028_v44 = vld [vmem:[#allocation2 + $0x94] sm:$0xf]  ;;  %v12015_v59 = vsel %vm10939_vm0, %v8589_v11, %v2641_v40 }
 0x253   : > { %v2650_v19 = vrot.slane %v2648_v15, 4  ;;  %v2655_v30 = vrot.slane %v10027_v47, 5  ;;  %v12006_v35 = vsel %vm10939_vm0, %v2643_v33, %v2644_v32  ;;  %v2662_v23 = vrot.slane %v10028_v44, 5  ;;  %v13760_v49 = vld [vmem:[#allocation21_spill] sm:$0xff]  ;;  %v2539_v40 = vld [vmem:[#allocation2 + $0xa8] sm:$0xe] }
 0x254   : > { %v2665_v10 = vrot.slane %v11463_v55, 5  ;;  %v13762_v47 = vcombine.low %v13760_v49, %v13761_v8  ;;  %v8592_v32 = vrot.slane %v2537_v34, 9  ;;  %v2538_v33 = vld [vmem:[#allocation2 + $0x9c] sm:$0xe]  ;;  %v12027_v44 = vsel %vm10939_vm0, %v8590_v46, %v2648_v15  ;;  %v4925_v11 = vld [vmem:[#allocation2 + $0x18] sm:$0xf] }
 0x255   : > { %9364 = vmatmul.mubr.msk.bf16.gmra.mrb[48].mxu0 %vm2014_vm9, %v13759_v51  ;;  %v12019_v53 = vsel %vm10939_vm0, %v2650_v19, %v2651_v6  ;;  %v2657_v51 = vrot.slane %v2655_v30, 4  ;;  %v2664_v49 = vrot.slane %v2662_v23, 4  ;;  %v12035_v19 = vsel %vm10939_vm0, %v8591_v3, %v2655_v30  ;;  %v344_v3 = vld [vmem:[#allocation2 + $0xcc] sm:$0x1]  ;;  %v2540_v46 = vld [vmem:[#allocation2 + $0xb4] sm:$0xe] }
 0x256   : > { %9367 = vmatprep.mubr.msk.bf16.mxu0 %vm2014_vm9, %v13762_v47  ;;  %v2669_v6 = vrot.slane %v11537_v13, 5  ;;  %v2672_v15 = vrot.slane %v11546_v18, 5  ;;  %v12058_v5 = vsel %vm10939_vm0, %v8592_v32, %v2662_v23  ;;  %v2679_v8 = vrot.slane %v11563_v14, 5  ;;  %v4928_v18 = vld [vmem:[#allocation2 + $0x24] sm:$0xf]  ;;  %v13769_v30 = vld [vmem:[#allocation28_spill] sm:$0xff] }
 0x257   : > { %v12039_v34 = vsel %vm10939_vm0, %v2657_v51, %v2658_v50  ;;  %v12051_v57 = vsel %vm10939_vm0, %v2664_v49, %v2665_v10  ;;  %v2676_v50 = vrot.slane %v11553_v16, 5  ;;  %13765 = vst [vmem:[#allocation35_spill] sm:$0xff] %v12058_v5  ;;  %v2683_v47 = vrot.slane %v11600_v17, 5  ;;  %v4926_v51 = vld [vmem:[#allocation2 + $0x1c] sm:$0xf]  ;;  %v13772_v48 = vld [vmem:[#allocation46_spill] sm:$0xff] }
 0x258   : > { %9500 = vmatmul.mubr.msk.bf16.gmra.mrb[0].mxu1 %vm2014_vm9, %v8728_v43  ;;  %13763 = vst [vmem:[#allocation8_spill] sm:$0xff] %v12039_v34  ;;  %13764 = vst [vmem:[#allocation33_spill] sm:$0xff] %v12051_v57  ;;  %v8593_v43 = vrot.slane %v2538_v33, 9  ;;  %v2671_v20 = vrot.slane %v2669_v6, 4  ;;  %v345_v32 = vsel %vm10388_vm11, 0, %v344_v3  ;;  %v4974_v49 = vshrl.u32 %v4925_v11, 16 }
 0x259   : > { %9503 = vmatprep.mubr.msk.bf16.mxu1 %vm2014_vm9, %v8729_v58  ;;  %v8594_v58 = vrot.slane %v2539_v40, 9  ;;  %v4977_v40 = vshll.u32 %v4925_v11, 16  ;;  %v13771_v55 = vcombine.low %v13769_v30, %v13770_v60  ;;  %346 = vst [vmem:[#allocation2 + $0xcc] sm:$0x1] %v345_v32  ;;  %v13773_v23 = vld [vmem:[#allocation29_spill] sm:$0xff]  ;;  %v13774_v3 = vld [vmem:[#allocation30_spill] sm:$0xff] }
 0x25a   : > { %v12064_v10 = vsel %vm10939_vm0, %v8593_v43, %v2669_v6  ;;  %v12070_v33 = vsel %vm10939_vm0, %v2671_v20, %v2672_v15  ;;  %v2678_v6 = vrot.slane %v2676_v50, 4  ;;  %v8595_v43 = vrot.slane %v2540_v46, 9  ;;  %v4927_v20 = vld [vmem:[#allocation2 + $0x20] sm:$0x1]  ;;  %v4929_v57 = vld [vmem:[#allocation2 + $0x28] sm:$0xf] }
 0x25b   : > { %13766 = vst [vmem:[#allocation32_spill] sm:$0xff] %v12064_v10  ;;  %13767 = vst [vmem:[#allocation36_spill] sm:$0xff] %v12070_v33  ;;  %v12080_v14 = vsel %vm10939_vm0, %v8594_v58, %v2676_v50  ;;  %v2686_v15 = vrot.slane %v13772_v48, 5  ;;  %v13775_v27 = vcombine.low %v13773_v23, %v13774_v3  ;;  %v4976_v11 = vrot.slane %v4974_v49, 4  ;;  %v4930_v46 = vld [vmem:[#allocation2 + $0x2c] sm:$0x1] }
 0x25c   : > { %v4983_v30 = vshll.u32 %v4926_v51, 16  ;;  %v12091_v50 = vsel %vm10939_vm0, %v2678_v6, %v2679_v8  ;;  %v2685_v58 = vrot.slane %v2683_v47, 4  ;;  %v4987_v48 = vshrl.u32 %v4926_v51, 16  ;;  %v13780_v34 = vld [vmem:[#allocation44_spill] sm:$0xff] }
 0x25d   : > { %9368 = vmatmul.mubr.msk.bf16.gmra.mrb[52].mxu0 %vm2014_vm9, %v13771_v55  ;;  %v4979_v55 = vrot.slane %v4977_v40, 5  ;;  %v4998_v32 = vshrl.u32 %v4928_v18, 16  ;;  %v13776_v23 = vcombine.low %v11894_v56, %v11820_v2  ;;  %v4993_v60 = vshll.u32 %v4927_v20, 16  ;;  %v4931_v40 = vld [vmem:[#allocation2 + $0x30] sm:$0xf] }
 0x25e   : > { %9371 = vmatprep.mubr.msk.bf16.mxu0 %vm2014_vm9, %v13775_v27  ;;  %v4985_v3 = vrot.slane %v4983_v30, 5  ;;  %v5001_v49 = vshll.u32 %v4928_v18, 16  ;;  %v13777_v33 = vcombine.low %v11814_v37, %v11824_v42  ;;  %v12103_v8 = vsel %vm10939_vm0, %v8595_v43, %v2683_v47 }
 0x25f   : > { %v4980_v27 = vor.u32 %v4979_v55, %v4976_v11  ;;  %v4989_v51 = vrot.slane %v4987_v48, 4  ;;  %v5000_v6 = vrot.slane %v4998_v32, 4  ;;  %v5007_v10 = vshll.u32 %v4929_v57, 16  ;;  %v4932_v11 = vld [vmem:[#allocation2 + $0x34] sm:$0xf]  ;;  %v13778_v48 = vld [vmem:[#allocation43_spill] sm:$0xff] }
 0x260   : > { %9504 = vmatmul.mubr.msk.bf16.gmra.mrb[4].mxu1 %vm2014_vm9, %v13776_v23  ;;  %v12107_v2 = vsel %vm10939_vm0, %v2685_v58, %v2686_v15  ;;  %v5003_v56 = vrot.slane %v5001_v49, 5  ;;  %v5011_v20 = vshrl.u32 %v4929_v57, 16  ;;  %v5017_v18 = vshll.u32 %v4930_v46, 16  ;;  %v4933_v58 = vld [vmem:[#allocation2 + $0x38] sm:$0x1] }
 0x261   : > { %9507 = vmatprep.mubr.msk.bf16.mxu1 %vm2014_vm9, %v13777_v33  ;;  %v4990_v55 = vor.u32 %v4989_v51, %v4985_v3  ;;  %v5009_v30 = vrot.slane %v5007_v10, 5  ;;  %v5022_v37 = vshrl.u32 %v4931_v40, 16  ;;  %v5025_v42 = vshll.u32 %v4931_v40, 16  ;;  %v4934_v33 = vld [vmem:[#allocation2 + $0x3c] sm:$0xf] }
 0x262   : > { %v4981_v23 = vrot.slane %v4980_v27, 4  ;;  %v4995_v5 = vrot.slane %v4993_v60, 5  ;;  %v5004_v47 = vor.u32 %v5003_v56, %v5000_v6  ;;  %v5013_v43 = vrot.slane %v5011_v20, 4 }
 0x263   : > { %v13779_v32 = vcombine.low %v13778_v48, %v11537_v13  ;;  %v4991_v15 = vrot.slane %v4990_v55, 4  ;;  %v5024_v49 = vrot.slane %v5022_v37, 4  ;;  %v5027_v57 = vrot.slane %v5025_v42, 5  ;;  %v4935_v55 = vld [vmem:[#allocation2 + $0x40] sm:$0xf] }
 0x264   : > { %v5031_v46 = vshll.u32 %v4932_v11, 16  ;;  %v13781_v10 = vcombine.low %v13780_v34, %v11553_v16  ;;  %v5005_v40 = vrot.slane %v5004_v47, 4  ;;  %v5014_v27 = vor.u32 %v5013_v43, %v5009_v30 }
 0x265   : > { %9372 = vmatmul.mubr.msk.bf16.gmra.mrb[56].mxu0 %vm2014_vm9, %v13779_v32  ;;  %v5019_v60 = vrot.slane %v5017_v18, 5  ;;  %v5035_v51 = vshrl.u32 %v4932_v11, 16  ;;  %v4996_v56 = vsel %vm10709_vm8, %v4991_v15, %v4995_v5  ;;  %v5028_v13 = vor.u32 %v5027_v57, %v5024_v49  ;;  %v4937_v32 = vld [vmem:[#allocation2 + $0x48] sm:$0xf] }
 0x266   : > { %9375 = vmatprep.mubr.msk.bf16.mxu0 %vm2014_vm9, %v13781_v10  ;;  %v12119_v20 = vrot.slane %v5031_v46, 5  ;;  %v5046_v48 = vshrl.u32 %v4934_v33, 16  ;;  %v13783_v37 = vcombine.low %v11835_v4, %v11849_v1  ;;  %v4986_v16 = vsel %vm10709_vm8, %v4981_v23, %v4985_v3  ;;  %v4936_v1 = vld [vmem:[#allocation2 + $0x44] sm:$0x1] }
 0x267   : > { %v5015_v34 = vrot.slane %v5014_v27, 4  ;;  %v5037_v42 = vrot.slane %v5035_v51, 4  ;;  %v5041_v18 = vshll.u32 %v4933_v58, 16  ;;  %v13784_v11 = vcombine.low %v11844_v38, %v11856_v7  ;;  %v4938_v7 = vld [vmem:[#allocation2 + $0x4c] sm:$0xf] }
 0x268   : > { %9508 = vmatmul.mubr.msk.bf16.gmra.mrb[8].mxu1 %vm2014_vm9, %v13783_v37  ;;  %v8612_v5 = vcombine.low %v12080_v14, %v12091_v50  ;;  %v8613_v47 = vcombine.low %v12103_v8, %v12107_v2  ;;  %v12135_v4 = vcombine.low %v4986_v16, %v4996_v56  ;;  %v5049_v43 = vshll.u32 %v4934_v33, 16  ;;  %v4940_v56 = vld [vmem:[#allocation2 + $0x54] sm:$0xf]  ;;  %v6679_v50 = vld [vmem:[#allocation3 + $0x38] sm:$0x1] }
 0x269   : > { %9511 = vmatprep.mubr.msk.bf16.mxu1 %vm2014_vm9, %v13784_v11  ;;  %v5020_v3 = vsel %vm10709_vm8, %v5015_v34, %v5019_v60  ;;  %v12139_v23 = vrot.slane %v5028_v13, 4  ;;  %v5055_v15 = vshll.u32 %v4935_v55, 16  ;;  %v5059_v38 = vshrl.u32 %v4935_v55, 16  ;;  %v13785_v60 = vld [vmem:[#allocation45_spill] sm:$0xff] }
 0x26a   : > { %v5010_v58 = vsel %vm10709_vm8, %v5005_v40, %v5009_v30  ;;  %v5038_v49 = vor.u32 %v5037_v42, %v12119_v20  ;;  %v5048_v57 = vrot.slane %v5046_v48, 4  ;;  %v5051_v46 = vrot.slane %v5049_v43, 5  ;;  %v4939_v30 = vld [vmem:[#allocation2 + $0x50] sm:$0x1]  ;;  %v4941_v11 = vld [vmem:[#allocation2 + $0x58] sm:$0xf] }
 0x26b   : > { %v12144_v10 = vrot.slane %v5041_v18, 5  ;;  %v12146_v27 = vrot.slane %v5055_v15, 5  ;;  %v5061_v33 = vrot.slane %v5059_v38, 4  ;;  %v5070_v51 = vshrl.u32 %v4937_v32, 16  ;;  %v9975_v43 = vld [vmem:[#allocation2 + $0x18] sm:$0xff]  }
 0x26c   : > { %v13786_v13 = vcombine.low %v13785_v60, %v11600_v17  ;;  %v12152_v55 = vcombine.low %v5010_v58, %v5020_v3  ;;  %v5065_v37 = vshll.u32 %v4936_v1, 16  ;;  %v5073_v40 = vshll.u32 %v4937_v32, 16  ;;  %v12492_v2 = vld [vmem:[#allocation3 + $0x40] sm:$0xf] }
 0x26d   : > { %v5079_v16 = vshll.u32 %v4938_v7, 16  ;;  %v13787_v48 = vcombine.low %v11866_v21, %v11886_v31  ;;  %v5034_v34 = vsel %vm10709_vm8, %v12139_v23, %v12119_v20  ;;  %v5062_v17 = vor.u32 %v5061_v33, %v12146_v27  ;;  %v4943_v20 = vld [vmem:[#allocation2 + $0x60] sm:$0xf]  ;;  %v4942_v33 = vld [vmem:[#allocation2 + $0x5c] sm:$0x1] }
 0x26e   : > { %9376 = vmatmul.mubr.msk.bf16.gmra.mrb[60].mxu0 %vm2014_vm9, %v13786_v13  ;;  %v5072_v42 = vrot.slane %v5070_v51, 4  ;;  %v5083_v18 = vshrl.u32 %v4938_v7, 16  ;;  %v5039_v1 = vrot.slane %v5038_v49, 4  ;;  %v5052_v3 = vor.u32 %v5051_v46, %v5048_v57  ;;  %v4944_v13 = vld [vmem:[#allocation2 + $0x64] sm:$0xf] }
 0x26f   : > { %9381 = vmatprep.mubr.msk.bf16.mxu0 %vm2014_vm9, %v13787_v48  ;;  %v5075_v32 = vrot.slane %v5073_v40, 5  ;;  %v5081_v15 = vrot.slane %v5079_v16, 5  ;;  %v13788_v21 = vcombine.low %v11860_v61, %v11874_v28  ;;  %v5063_v31 = vrot.slane %v5062_v17, 4 }
 0x270   : > { %v5085_v38 = vrot.slane %v5083_v18, 4  ;;  %v5089_v58 = vshll.u32 %v4939_v30, 16  ;;  %v5094_v60 = vshrl.u32 %v4940_v56, 16  ;;  %v5067_v23 = vrot.slane %v5065_v37, 5  ;;  %v12174_v30 = vld [vmem:[%s13569_s5] sm:$0xff]   ;;  %v13789_v18 = vld [vmem:[#allocation23_spill] sm:$0xff] }
 0x271   : > { %9512 = vmatmul.mubr.msk.bf16.gmra.mrb[12].mxu1 %vm2014_vm9, %v13788_v21  ;;  %v5076_v7 = vor.u32 %v5075_v32, %v5072_v42  ;;  %v5097_v51 = vshll.u32 %v4940_v56, 16  ;;  %v5103_v49 = vshll.u32 %v4941_v11, 16  ;;  %v5044_v57 = vsel %vm10709_vm8, %v5039_v1, %v12144_v10  ;;  %v9976_v32 = vld [vmem:[#allocation2 + $0x24] sm:$0xff]  }
 0x272   : > { %9517 = vmatprep.mubr.msk.bf16.mxu1 %vm2014_vm9, %v9975_v43  ;;  %v5086_v46 = vor.u32 %v5085_v38, %v5081_v15  ;;  %v5091_v61 = vrot.slane %v5089_v58, 5  ;;  %v5096_v28 = vrot.slane %v5094_v60, 4  ;;  %v5053_v40 = vrot.slane %v5052_v3, 4  ;;  %v13790_v43 = vld [vmem:[#allocation24_spill] sm:$0xff]  ;;  %v4946_v58 = vld [vmem:[#allocation2 + $0x6c] sm:$0xf] }
 0x273   : > { %v5068_v37 = vsel %vm10709_vm8, %v5063_v31, %v5067_v23  ;;  %v5099_v16 = vrot.slane %v5097_v51, 5  ;;  %v12178_v56 = vrot.slane %v5103_v49, 5  ;;  %v5107_v17 = vshrl.u32 %v4941_v11, 16  ;;  %v13792_v60 = vld [vmem:[#allocation9_spill] sm:$0xff]  ;;  %v4945_v49 = vld [vmem:[#allocation2 + $0x68] sm:$0x1] }
 0x274   : > { %v5087_v48 = vrot.slane %v5086_v46, 4  ;;  %v5113_v42 = vshll.u32 %v4942_v33, 16  ;;  %v5118_v10 = vshrl.u32 %v4943_v20, 16  ;;  %v13791_v1 = vcombine.low %v13789_v18, %v13790_v43 }
 0x275   : > { %v5058_v3 = vsel %vm10709_vm8, %v5053_v40, %v12146_v27  ;;  %v5077_v21 = vrot.slane %v5076_v7, 4  ;;  %v5121_v38 = vshll.u32 %v4943_v20, 16  ;;  %v5127_v31 = vshll.u32 %v4944_v13, 16  ;;  %v10001_v27 = vld [vmem:[%s13567_s3 + $0x40] sm:$0x3f]   ;;  %v9977_v20 = vld [vmem:[#allocation2 + $0x30] sm:$0xff]  }
 0x276   : > { %9382 = vmatmul.mubr.msk.bf16.vlgmr.msra.gmra.mrb[32].mxu0 %vm2014_vm9, %v13791_v1  ;;  %v13793_v11 = vcombine.low %v13751_v41, %v11898_v26  ;;  %v5092_v23 = vsel %vm10709_vm8, %v5087_v48, %v5091_v61  ;;  %v5100_v33 = vor.u32 %v5099_v16, %v5096_v28  ;;  %v5109_v51 = vrot.slane %v5107_v17, 4  ;;  %v4947_v61 = vld [vmem:[#allocation2 + $0x70] sm:$0xf] }
 0x277   : > { %9414 = vmatpush3.bf16.msra.mxu0 %v13792_v60  ;;  %v5120_v46 = vrot.slane %v5118_v10, 4  ;;  %v12198_v7 = vcombine.low %v5034_v34, %v5044_v57  ;;  %v12200_v40 = vcombine.low %v5058_v3, %v5068_v37  ;;  %v5082_v26 = vsel %vm10709_vm8, %v5077_v21, %v5081_v15 }
 0x278   : > { %9385 = vmatprep.mubr.msk.bf16.mxu0 %vm2014_vm9, %v13793_v11  ;;  %9617 = vmatprep.subr.bf16.mxu0 %v12174_v30  ;;  %v5123_v41 = vrot.slane %v5121_v38, 5  ;;  %v5110_v28 = vor.u32 %v5109_v51, %v12178_v56  ;;  %v12206_v16 = vrot.slane %v5113_v42, 5  ;;  %v12208_v48 = vrot.slane %v5127_v31, 5  ;;  %v4948_v42 = vld [vmem:[#allocation2 + $0x74] sm:$0x1] }
 0x279   : > { %9518 = vmatmul.mubr.msk.bf16.vlgmr.msra.gmra.mrb[16].mxu1 %vm2014_vm9, %v9976_v32  ;;  %v5131_v17 = vshrl.u32 %v4944_v13, 16  ;;  %v12212_v34 = vcombine.low %v5082_v26, %v5092_v23  ;;  %v5137_v57 = vshll.u32 %v4945_v49, 16  ;;  %v5142_v37 = vshrl.u32 %v4946_v58, 16  ;;  %v4950_v11 = vld [vmem:[#allocation2 + $0x7c] sm:$0xf] }
 0x27a   : > { %9521 = vmatprep.mubr.msk.bf16.mxu1 %vm2014_vm9, %v9977_v20  ;;  %9550 = vmatpush3.bf16.msra.mxu1 %v11990_v12  ;;  %v5145_v15 = vshll.u32 %v4946_v58, 16  ;;  %v12214_v10 = vrot.slane %v5100_v33, 4  ;;  %v5124_v18 = vor.u32 %v5123_v41, %v5120_v46  ;;  %v5151_v1 = vshll.u32 %v4947_v61, 16  ;;  %v4949_v12 = vld [vmem:[#allocation2 + $0x78] sm:$0xf]  ;;  %v9978_v26 = vld [vmem:[#allocation2 + $0x3c] sm:$0xff]  }
 0x27b   : > { %v5133_v43 = vrot.slane %v5131_v17, 4  ;;  %9918 = vmatprep.subr.msk.bf16.mxu1 %vm2063_vm15, %v10001_v27  ;;  %v12218_v32 = vsel %vm2063_vm15, %v10001_v27, 0  ;;  %v5144_v13 = vrot.slane %v5142_v37, 4  ;;  %v5155_v21 = vshrl.u32 %v4947_v61, 16  ;;  %v4951_v27 = vld [vmem:[#allocation2 + $0x80] sm:$0x1] }
 0x27c   : > { %v5147_v3 = vrot.slane %v5145_v15, 5  ;;  %v5106_v38 = vsel %vm10709_vm8, %v12214_v10, %v12178_v56  ;;  %v12224_v31 = vrot.slane %v5110_v28, 4  ;;  %v12227_v60 = vrot.slane %v5151_v1, 5  ;;  %v12253_v1 = vld [vmem:[#allocation3 + $0x10] sm:$0xf] }
 0x27d   : > { %v5134_v58 = vor.u32 %v5133_v43, %v12208_v48  ;;  %v13794_v23 = vcombine.low %v11919_v52, %v11923_v22  ;;  %v12233_v33 = vrot.slane %v5137_v57, 5  ;;  %v5157_v49 = vrot.slane %v5155_v21, 4  ;;  %v9979_v22 = vld [vmem:[#allocation2 + $0x48] sm:$0xff]   ;;  %v12246_v43 = vld [vmem:[#allocation3 + $0xc] sm:$0xf] }
 0x27e   : > { %v5148_v51 = vor.u32 %v5147_v3, %v5144_v13  ;;  %v5161_v46 = vshll.u32 %v4948_v42, 16  ;;  %v13795_v20 = vcombine.low %v11931_v62, %v11927_v24  ;;  %v12239_v41 = vrot.slane %v5124_v18, 4 }
 0x27f   : > { %9386 = vmatmul.mubr.msk.bf16.gmra.mrb[36].mxu0 %vm2014_vm9, %v13794_v23  ;;  %v12241_v61 = vrot.slane %v5134_v58, 4  ;;  %v5166_v28 = vshrl.u32 %v4949_v12, 16  ;;  %v5169_v52 = vshll.u32 %v4949_v12, 16  ;;  %v5158_v57 = vor.u32 %v5157_v49, %v12227_v60 }
 0x280   : > { %9389 = vmatprep.mubr.msk.bf16.mxu0 %vm2014_vm9, %v13795_v20  ;;  %v12243_v17 = vrot.slane %v5148_v51, 4  ;;  %v5175_v37 = vshll.u32 %v4950_v11, 16  ;;  %v5179_v15 = vshrl.u32 %v4950_v11, 16  ;;  %v5116_v62 = vsel %vm10709_vm8, %v12224_v31, %v12206_v16  ;;  %v12268_v11 = vld [vmem:[#allocation3 + $0x14] sm:$0x1] }
 0x281   : > { %9522 = vmatmul.mubr.msk.bf16.gmra.mrb[20].mxu1 %vm2014_vm9, %v9978_v26  ;;  %v5168_v24 = vrot.slane %v5166_v28, 4  ;;  %v5171_v18 = vrot.slane %v5169_v52, 5  ;;  %v5185_v42 = vshll.u32 %v4951_v27, 16  ;;  %v5130_v13 = vsel %vm10709_vm8, %v12239_v41, %v12208_v48  ;;  %v12273_v48 = vld [vmem:[#allocation3 + $0x18] sm:$0xf] }
 0x282   : > { %9525 = vmatprep.mubr.msk.bf16.mxu1 %vm2014_vm9, %v9979_v22  ;;  %v5140_v3 = vsel %vm10709_vm8, %v12241_v61, %v12233_v33  ;;  %v5163_v21 = vrot.slane %v5161_v46, 5  ;;  %v5177_v12 = vrot.slane %v5175_v37, 5  ;;  %v5154_v16 = vsel %vm10709_vm8, %v12243_v17, %v12227_v60  ;;  %v12281_v26 = vld [vmem:[#allocation3 + $0x1c] sm:$0xf] }
 0x283   : > { %v5172_v31 = vor.u32 %v5171_v18, %v5168_v24  ;;  %v5181_v58 = vrot.slane %v5179_v15, 4  ;;  %v5159_v23 = vrot.slane %v5158_v57, 4  ;;  %v10069_v51 = vmov 4286644096   ;;  %v9980_v37 = vld [vmem:[#allocation2 + $0x54] sm:$0xff]  }
 0x284   : > { %404 = vst.msk [vmem:[#allocation3] sm:$0xf] %vm403_vm7, %v10069_v51  ;;  %405 = vst.msk [vmem:[#allocation3 + $0x4] sm:$0xf] %vm403_vm7, %v10069_v51  ;;  %v6718_v33 = vshrl.u32 %v12246_v43, 16  ;;  %v6721_v49 = vshll.u32 %v12246_v43, 16  ;;  %v13796_v61 = vcombine.low %v11941_v45, %v11945_v0  ;;  %v13797_v57 = vcombine.low %v11960_v9, %v11955_v29 }
 0x285   : > { %407 = vst.msk [vmem:[#allocation3 + $0x8] sm:$0x1] %vm406_vm2, %v10069_v51  ;;  %v6727_v60 = vshll.u32 %v12253_v1, 16  ;;  %411 = vst.msk [vmem:[#allocation3 + $0xd4] sm:$0x1] %vm406_vm2, %v10069_v51  ;;  %v5173_v46 = vrot.slane %v5172_v31, 4  ;;  %v5182_v27 = vor.u32 %v5181_v58, %v5177_v12  ;;  %v5164_v15 = vsel %vm10709_vm8, %v5159_v23, %v5163_v21 }
 0x286   : > { %409 = vst.msk [vmem:[#allocation3 + $0xcc] sm:$0xf] %vm403_vm7, %v10069_v51  ;;  %410 = vst.msk [vmem:[#allocation3 + $0xd0] sm:$0xf] %vm403_vm7, %v10069_v51  ;;  %v5187_v20 = vrot.slane %v5185_v42, 5  ;;  %v6731_v41 = vshrl.u32 %v12253_v1, 16 }
 0x287   : > { %9390 = vmatmul.mubr.msk.bf16.gmra.mrb[40].mxu0 %vm2014_vm9, %v13796_v61  ;;  %v6720_v28 = vrot.slane %v6718_v33, 4  ;;  %v6723_v52 = vrot.slane %v6721_v49, 5  ;;  %v12288_v22 = vrot.slane %v6727_v60, 5  ;;  %v6737_v17 = vshll.u32 %v12268_v11, 16  ;;  %v9981_v0 = vld [vmem:[#allocation2 + $0x60] sm:$0xff]  }
 0x288   : > { %9393 = vmatprep.mubr.msk.bf16.mxu0 %vm2014_vm9, %v13797_v57  ;;  %v5183_v24 = vrot.slane %v5182_v27, 4  ;;  %v6733_v18 = vrot.slane %v6731_v41, 4  ;;  %v6742_v45 = vshrl.u32 %v12273_v48, 16  ;;  %v5178_v42 = vsel %vm10709_vm8, %v5173_v46, %v5177_v12  ;;  %v12305_v9 = vld [vmem:[#allocation3 + $0x24] sm:$0xf] }
 0x289   : > { %v6724_v31 = vor.u32 %v6723_v52, %v6720_v28  ;;  %v6745_v58 = vshll.u32 %v12273_v48, 16  ;;  %v6751_v51 = vshll.u32 %v12281_v26, 16  ;;  %9526 = vmatmul.mubr.msk.bf16.gmra.mrb[24].mxu1 %vm2014_vm9, %v9980_v37  ;;  %v6755_v33 = vshrl.u32 %v12281_v26, 16  ;;  %v12310_v12 = vld [vmem:[#allocation3 + $0x20] sm:$0x1] }
 0x28a   : > { %v5188_v29 = vsel %vm10709_vm8, %v5183_v24, %v5187_v20  ;;  %v6734_v21 = vor.u32 %v6733_v18, %v12288_v22  ;;  %v6744_v23 = vrot.slane %v6742_v45, 4  ;;  %9529 = vmatprep.mubr.msk.bf16.mxu1 %vm2014_vm9, %v9981_v0  ;;  %v6739_v60 = vrot.slane %v6737_v17, 5 }
 0x28b   : > { %v6725_v49 = vrot.slane %v6724_v31, 4  ;;  %v6747_v46 = vrot.slane %v6745_v58, 5  ;;  %v6753_v27 = vrot.slane %v6751_v51, 5  ;;  %v12317_v20 = vcombine.low %v5106_v38, %v5116_v62  ;;  %v414_v52 = vld [vmem:[#allocation3] sm:$0x1] }
 0x28c   : > { %v12319_v41 = vcombine.low %v5130_v13, %v5140_v3  ;;  %v12321_v61 = vcombine.low %v5154_v16, %v5164_v15  ;;  %v12323_v28 = vcombine.low %v5178_v42, %v5188_v29  ;;  %v469_v57 = vld [vmem:[#allocation3 + $0x8] sm:$0x1]  ;;  %v12325_v37 = vld [vmem:[#allocation3 + $0x4] sm:$0xf]  ;;  %v415_v24 = vsel %vm10127_vm3, 4286644096, %v414_v52 }
 0x28d   : > { %v470_v45 = vsel %vm10135_vm4, 4286644096, %v469_v57  ;;  %v6703_v56 = vshll.u32 %v12325_v37, 16  ;;  %v6707_v10 = vshrl.u32 %v12325_v37, 16  ;;  %416 = vst [vmem:[#allocation3] sm:$0x1] %v415_v24  ;;  %v6730_v62 = vsel %vm10709_vm8, %v6725_v49, %v12288_v22 }
 0x28e   : > { %471 = vst [vmem:[#allocation3 + $0x8] sm:$0x1] %v470_v45  ;;  %v12333_v38 = vld [vmem:[#allocation3 + $0x28] sm:$0xf]  ;;  %v6735_v13 = vrot.slane %v6734_v21, 4  ;;  %v6748_v3 = vor.u32 %v6747_v46, %v6744_v23  ;;  %v6757_v16 = vrot.slane %v6755_v33, 4  ;;  %v13800_v15 = vcombine.low %v11973_v63, %v11986_v36 }
 0x28f   : > { %v12342_v0 = vrot.slane %v6703_v56, 5  ;;  %v6709_v42 = vrot.slane %v6707_v10, 4  ;;  %v6761_v31 = vshll.u32 %v12310_v12, 16  ;;  %v6766_v58 = vshrl.u32 %v12305_v9, 16  ;;  %v9983_v22 = vld [vmem:[#allocation2 + $0x6c] sm:$0xff]   ;;  %v9984_v33 = vld [vmem:[#allocation2 + $0x78] sm:$0xff]  }
 0x290   : > { %9394 = vmatmul.mubr.msk.bf16.gmra.mrb[44].mxu0 %vm2014_vm9, %v13800_v15  ;;  %v13801_v51 = vcombine.low %v11981_v54, %v11995_v39  ;;  %v12350_v29 = vld [vmem:[#allocation3 + $0x2c] sm:$0x1]  ;;  %v6740_v63 = vsel %vm10709_vm8, %v6735_v13, %v6739_v60  ;;  %v6749_v36 = vrot.slane %v6748_v3, 4  ;;  %v6758_v21 = vor.u32 %v6757_v16, %v6753_v27  ;;  %v7197_v45 = vld [vmem:[#allocation3] sm:$0xe] }
 0x291   : > { %v6769_v23 = vshll.u32 %v12305_v9, 16  ;;  %v6710_v49 = vor.u32 %v6709_v42, %v12342_v0  ;;  %v6763_v46 = vrot.slane %v6761_v31, 5  ;;  %v6768_v52 = vrot.slane %v6766_v58, 4  ;;  %9530 = vmatmul.mubr.msk.bf16.gmra.mrb[28].mxu1 %vm2014_vm9, %v9983_v22  ;;  %v7198_v31 = vld [vmem:[#allocation3 + $0xc] sm:$0xe] }
 0x292   : > { %9397 = vmatprep.mubr.msk.bf16.mxu0 %vm2014_vm9, %v13801_v51  ;;  %v6775_v57 = vshll.u32 %v12333_v38, 16  ;;  %v6754_v54 = vsel %vm10709_vm8, %v6749_v36, %v6753_v27  ;;  %v6759_v39 = vrot.slane %v6758_v21, 4  ;;  %v6779_v60 = vshrl.u32 %v12333_v38, 16  ;;  %9533 = vmatprep.mubr.msk.bf16.mxu1 %vm2014_vm9, %v9984_v33 }
 0x293   : > { %v6771_v24 = vrot.slane %v6769_v23, 5  ;;  %v6711_v56 = vrot.slane %v6710_v49, 4  ;;  %v6785_v13 = vshll.u32 %v12350_v29, 16  ;;  %v12364_v3 = vmax.bf16 %v6730_v62, %v12246_v43 }
 0x294   : > { %v6777_v10 = vrot.slane %v6775_v57, 5  ;;  %v6764_v16 = vsel %vm10709_vm8, %v6759_v39, %v6763_v46  ;;  %v6781_v42 = vrot.slane %v6779_v60, 4  ;;  %v7164_v27 = vmax.bf16 %v6740_v63, %v12253_v1  ;;  %v6639_v58 = vld [vmem:[#allocation3] sm:$0xf] }
 0x295   : > { %v6772_v15 = vor.u32 %v6771_v24, %v6768_v52  ;;  %v6675_v51 = vld [vmem:[#allocation3 + $0x8] sm:$0x1]  ;;  %v6787_v22 = vrot.slane %v6785_v13, 5  ;;  %v7165_v36 = vmax.bf16 %v6754_v54, %v12273_v48  ;;  %v12371_v21 = vmax.bf16 %v6764_v16, %v12281_v26  ;;  %v9985_v54 = vld [vmem:[#allocation2 + $0x84] sm:$0xff]  }
 0x296   : > { %v8874_v23 = vrot.slane %v7197_v45, 9  ;;  %v6694_v33 = vshrl.u32 %v6639_v58, 16  ;;  %v6697_v43 = vshll.u32 %v6639_v58, 16  ;;  %v6713_v62 = vshll.u32 %v6675_v51, 16 }
 0x297   : > { %v6773_v49 = vrot.slane %v6772_v15, 4  ;;  %v13802_v46 = vcombine.low %v12015_v59, %v12006_v35  ;;  %v6782_v63 = vor.u32 %v6781_v42, %v6777_v10  ;;  %v7271_v52 = vrot.slane %v12325_v37, 5  ;;  %v7199_v35 = vld [vmem:[#allocation3 + $0x18] sm:$0xe] }
 0x298   : > { %v7274_v57 = vrot.slane %v6675_v51, 5  ;;  %v8875_v39 = vrot.slane %v7198_v31, 9  ;;  %v13803_v48 = vcombine.low %v12027_v44, %v12019_v53  ;;  %v6696_v24 = vrot.slane %v6694_v33, 4  ;;  %v9986_v59 = vld [vmem:[#allocation2 + $0x90] sm:$0xff]   ;;  %v7200_v51 = vld [vmem:[#allocation3 + $0x24] sm:$0xe] }
 0x299   : > { %9398 = vmatmul.mubr.msk.bf16.gmra.mrb[48].mxu0 %vm2014_vm9, %v13802_v46  ;;  %v6699_v60 = vrot.slane %v6697_v43, 5  ;;  %v6715_v45 = vrot.slane %v6713_v62, 5  ;;  %v6778_v13 = vsel %vm10709_vm8, %v6773_v49, %v6777_v10  ;;  %v6783_v16 = vrot.slane %v6782_v63, 4  ;;  %9534 = vmatmul.mubr.msk.bf16.gmra.mrb[0].mxu1 %vm2014_vm9, %v9985_v54 }
 0x29a   : > { %9401 = vmatprep.mubr.msk.bf16.mxu0 %vm2014_vm9, %v13803_v48  ;;  %v7167_v15 = vmax.bf16 %v6778_v13, %v12305_v9  ;;  %v7272_v42 = vsel %vm10939_vm0, %v8874_v23, %v7271_v52  ;;  %v7273_v31 = vrot.slane %v7271_v52, 4  ;;  %v7278_v33 = vrot.slane %v12253_v1, 5  ;;  %9537 = vmatprep.mubr.msk.bf16.mxu1 %vm2014_vm9, %v9986_v59  ;;  %v13807_v13 = vld [vmem:[#allocation33_spill] sm:$0xff] }
 0x29b   : > { %v6700_v53 = vor.u32 %v6699_v60, %v6696_v24  ;;  %v6716_v44 = vsel %vm10709_vm8, %v6711_v56, %v6715_v45  ;;  %v7281_v10 = vrot.slane %v12268_v11, 5  ;;  %v6788_v9 = vsel %vm10709_vm8, %v6783_v16, %v6787_v22  ;;  %v4952_v24 = vld [vmem:[#allocation2 + $0x84] sm:$0xf]  ;;  %v13806_v45 = vld [vmem:[#allocation35_spill] sm:$0xff] }
 0x29c   : > { %v7162_v43 = vmax.bf16 %v6716_v44, %v12325_v37  ;;  %v7275_v23 = vsel %vm10939_vm0, %v7273_v31, %v7274_v57  ;;  %v8876_v62 = vrot.slane %v7199_v35, 9  ;;  %v7168_v46 = vmax.bf16 %v6788_v9, %v12333_v38 }
 0x29d   : > { %v6701_v49 = vrot.slane %v6700_v53, 4  ;;  %v7279_v56 = vsel %vm10939_vm0, %v8875_v39, %v7278_v33  ;;  %v7280_v1 = vrot.slane %v7278_v33, 4  ;;  %v7285_v11 = vrot.slane %v12281_v26, 5  ;;  %v13804_v39 = vld [vmem:[#allocation8_spill] sm:$0xff]  ;;  %v4953_v33 = vld [vmem:[#allocation2 + $0x88] sm:$0xf] }
 0x29e   : > { %v7288_v63 = vrot.slane %v12310_v12, 5  ;;  %v8877_v52 = vrot.slane %v7200_v51, 9  ;;  %v7292_v22 = vrot.slane %v12333_v38, 5  ;;  %v7295_v48 = vrot.slane %v12350_v29, 5  ;;  %v9987_v29 = vld [vmem:[#allocation2 + $0x9c] sm:$0xff]  }
 0x29f   : > { %v6706_v37 = vsel %vm10709_vm8, %v6701_v49, %v12342_v0  ;;  %v7282_v57 = vsel %vm10939_vm0, %v7280_v1, %v7281_v10  ;;  %v7432_v54 = vmax.bf16 %v7275_v23, %v7162_v43  ;;  %v13805_v60 = vcombine.low %v12035_v19, %v13804_v39  ;;  %v4955_v49 = vld [vmem:[#allocation2 + $0x90] sm:$0xf] }
 0x2a0   : > { %v7161_v26 = vmax.bf16 %v6706_v37, %v6639_v58  ;;  %v7286_v12 = vsel %vm10939_vm0, %v8876_v62, %v7285_v11  ;;  %v7287_v38 = vrot.slane %v7285_v11, 4  ;;  %v7293_v0 = vsel %vm10939_vm0, %v8877_v52, %v7292_v22  ;;  %v9988_v58 = vld [vmem:[#allocation2 + $0xa8] sm:$0xff]  }
 0x2a1   : > { %9402 = vmatmul.mubr.msk.bf16.gmra.mrb[52].mxu0 %vm2014_vm9, %v13805_v60  ;;  %v13808_v35 = vcombine.low %v13806_v45, %v13807_v13  ;;  %v7294_v59 = vrot.slane %v7292_v22, 4  ;;  %v7433_v16 = vmax.bf16 %v7279_v56, %v12364_v3  ;;  %v7434_v19 = vmax.bf16 %v7282_v57, %v7164_v27  ;;  %9538 = vmatmul.mubr.msk.bf16.gmra.mrb[4].mxu1 %vm2014_vm9, %v9987_v29  ;;  %v4956_v57 = vld [vmem:[#allocation2 + $0x94] sm:$0xf] }
 0x2a2   : > { %v12423_v31 = vmax.bf16 %v7286_v12, %v7165_v36  ;;  %v7289_v53 = vsel %vm10939_vm0, %v7287_v38, %v7288_v63  ;;  %v7431_v44 = vmax.bf16 %v7272_v42, %v7161_v26  ;;  %v12427_v51 = vmax.bf16 %v7293_v0, %v7167_v15  ;;  %v4954_v36 = vld [vmem:[#allocation2 + $0x8c] sm:$0x1]  ;;  %9541 = vmatprep.mubr.msk.bf16.mxu1 %vm2014_vm9, %v9988_v58  ;;  %v13809_v60 = vld [vmem:[#allocation32_spill] sm:$0xff] }
 0x2a3   : > { %9405 = vmatprep.mubr.msk.bf16.mxu0 %vm2014_vm9, %v13808_v35  ;;  %v5190_v10 = vshrl.u32 %v4952_v24, 16  ;;  %v7296_v9 = vsel %vm10939_vm0, %v7294_v59, %v7295_v48  ;;  %v12433_v43 = vmax.bf16 %v7289_v53, %v12371_v21  ;;  %v7468_v3 = vmax.bf16 %v7434_v19, %v7432_v54  ;;  %v4957_v54 = vld [vmem:[#allocation2 + $0x98] sm:$0x1]  ;;  %v13810_v26 = vld [vmem:[#allocation36_spill] sm:$0xff]  ;;  %v12454_v35 = vld [vmem:[#allocation3 + $0x30] sm:$0xf] }
 0x2a4   : > { %v7469_v27 = vmax.bf16 %v12423_v31, %v7433_v16  ;;  %v12437_v23 = vmax.bf16 %v7296_v9, %v7168_v46  ;;  %v7467_v15 = vmax.bf16 %v7433_v16, %v7431_v44  ;;  %v5193_v62 = vshll.u32 %v4952_v24, 16  ;;  %v9989_v29 = vld [vmem:[#allocation2 + $0xb4] sm:$0xff]   ;;  %v9990_v53 = vld [vmem:[#allocation2 + $0xc0] sm:$0xff]  }
 0x2a5   : > { %v5192_v42 = vrot.slane %v5190_v10, 4  ;;  %v7470_v56 = vmax.bf16 %v12433_v43, %v7434_v19  ;;  %v7500_v1 = vmax.bf16 %v7468_v3, %v12433_v43  ;;  %v5199_v21 = vshll.u32 %v4953_v33, 16  ;;  %v12462_v3 = vld [vmem:[#allocation3 + $0x34] sm:$0xf] }
 0x2a6   : > { %v12442_v11 = vmax.bf16 %v7469_v27, %v12427_v51  ;;  %v7499_v63 = vmax.bf16 %v7467_v15, %v12423_v31  ;;  %v5195_v52 = vrot.slane %v5193_v62, 5  ;;  %v5203_v22 = vshrl.u32 %v4953_v33, 16 }
 0x2a7   : > { %v5209_v37 = vshll.u32 %v4954_v36, 16  ;;  %v12446_v46 = vmax.bf16 %v7470_v56, %v12437_v23  ;;  %v5201_v48 = vrot.slane %v5199_v21, 5  ;;  %v5214_v24 = vshrl.u32 %v4955_v49, 16 }
 0x2a8   : > { %v5217_v39 = vshll.u32 %v4955_v49, 16  ;;  %v13811_v12 = vcombine.low %v13809_v60, %v13810_v26  ;;  %v12452_v38 = vcombine.low %v7499_v63, %v7500_v1  ;;  %v5196_v0 = vor.u32 %v5195_v52, %v5192_v42  ;;  %v7201_v52 = vld [vmem:[#allocation3 + $0x30] sm:$0xe] }
 0x2a9   : > { %v5205_v45 = vrot.slane %v5203_v22, 4  ;;  %v5211_v13 = vrot.slane %v5209_v37, 5  ;;  %v8894_v59 = vcombine.low %v12442_v11, %v12446_v46  ;;  %v5216_v16 = vrot.slane %v5214_v24, 4  ;;  %9542 = vmatmul.mubr.msk.bf16.gmra.mrb[8].mxu1 %vm2014_vm9, %v9989_v29  ;;  %v9991_v24 = vld [vmem:[#allocation2 + $0xc] sm:$0xff]  }
 0x2aa   : > { %9406 = vmatmul.mubr.msk.bf16.gmra.mrb[56].mxu0 %vm2014_vm9, %v13811_v12  ;;  %v5219_v19 = vrot.slane %v5217_v39, 5  ;;  %v5223_v58 = vshll.u32 %v4956_v57, 16  ;;  %v5197_v44 = vrot.slane %v5196_v0, 4  ;;  %v5227_v10 = vshrl.u32 %v4956_v57, 16  ;;  %9545 = vmatprep.mubr.msk.bf16.mxu1 %vm2014_vm9, %v9990_v53  ;;  %v9992_v39 = vld [vmem:[#allocation2 + $0xcc] sm:$0xff]  }
 0x2ab   : > { %9409 = vmatprep.mubr.msk.bf16.mxu0 %vm2014_vm9, %v8612_v5  ;;  %v5206_v33 = vor.u32 %v5205_v45, %v5201_v48  ;;  %v5233_v9 = vshll.u32 %v4957_v54, 16  ;;  %v6790_v5 = vshrl.u32 %v12454_v35, 16  ;;  %v6793_v36 = vshll.u32 %v12454_v35, 16  ;;  %v12478_v0 = vld [vmem:[#allocation3 + $0x3c] sm:$0xf] }
 0x2ac   : > { %v5220_v27 = vor.u32 %v5219_v19, %v5216_v16  ;;  %v5225_v14 = vrot.slane %v5223_v58, 5  ;;  %v5202_v15 = vsel %vm10709_vm8, %v5197_v44, %v5201_v48  ;;  %v5229_v62 = vrot.slane %v5227_v10, 4 }
 0x2ad   : > { %v5207_v42 = vrot.slane %v5206_v33, 4  ;;  %v5235_v49 = vrot.slane %v5233_v9, 5  ;;  %v6792_v1 = vrot.slane %v6790_v5, 4  ;;  %v6795_v21 = vrot.slane %v6793_v36, 5  ;;  %v7202_v5 = vld [vmem:[#allocation3 + $0x3c] sm:$0xe] }
 0x2ae   : > { %v5221_v56 = vrot.slane %v5220_v27, 4  ;;  %v6799_v63 = vshll.u32 %v12462_v3, 16  ;;  %v5230_v37 = vor.u32 %v5229_v62, %v5225_v14  ;;  %v6803_v57 = vshrl.u32 %v12462_v3, 16 }
 0x2af   : > { %v5212_v22 = vsel %vm10709_vm8, %v5207_v42, %v5211_v13  ;;  %v6809_v54 = vshll.u32 %v6679_v50, 16  ;;  %v6796_v26 = vor.u32 %v6795_v21, %v6792_v1  ;;  %v8878_v16 = vrot.slane %v7201_v52, 9  ;;  %v9994_v21 = vld [vmem:[#allocation2 + $0x18] sm:$0xff]  }
 0x2b0   : > { %v12474_v60 = vcombine.low %v5202_v15, %v5212_v22  ;;  %v5226_v48 = vsel %vm10709_vm8, %v5221_v56, %v5225_v14  ;;  %v6801_v12 = vrot.slane %v6799_v63, 5  ;;  %v5231_v45 = vrot.slane %v5230_v37, 4  ;;  %v9995_v37 = vld [vmem:[#allocation2 + $0x24] sm:$0xff]  }
 0x2b1   : > { %v6805_v13 = vrot.slane %v6803_v57, 4  ;;  %v6811_v29 = vrot.slane %v6809_v54, 5  ;;  %v6797_v19 = vrot.slane %v6796_v26, 4  ;;  %v7299_v58 = vrot.slane %v12462_v3, 5  ;;  %9546 = vmatmul.mubr.msk.bf16.gmra.mrb[12].mxu1 %vm2014_vm9, %v9992_v39 }
 0x2b2   : > { %9410 = vmatmul.mubr.msk.bf16.gmra.mrb[60].mxu0 %vm2014_vm9, %v8613_v47  ;;  %v7302_v53 = vrot.slane %v6679_v50, 5  ;;  %v7471_v44 = vmax.bf16 %v12427_v51, %v12423_v31  ;;  %v5236_v33 = vsel %vm10709_vm8, %v5231_v45, %v5235_v49  ;;  %v7472_v8 = vmax.bf16 %v12437_v23, %v12433_v43  ;;  %v6680_v47 = vld [vmem:[#allocation3 + $0x44] sm:$0x1]  ;;  %9551 = vmatprep.mubr.msk.bf16.mxu1 %vm2014_vm9, %v12135_v4 }
 0x2b3   : > { %9415 = vmatprep.mubr.msk.bf16.mxu0 %vm2014_vm9, %v9991_v24  ;;  %v6806_v10 = vor.u32 %v6805_v13, %v6801_v12  ;;  %v6814_v9 = vshrl.u32 %v12478_v0, 16  ;;  %v12496_v27 = vcombine.low %v5226_v48, %v5236_v33  ;;  %v6802_v14 = vsel %vm10709_vm8, %v6797_v19, %v6801_v12 }
 0x2b4   : > { %v7300_v31 = vsel %vm10939_vm0, %v8878_v16, %v7299_v58  ;;  %v7301_v50 = vrot.slane %v7299_v58, 4  ;;  %v7169_v36 = vmax.bf16 %v6802_v14, %v12454_v35  ;;  %v6817_v42 = vshll.u32 %v12478_v0, 16  ;;  %v4958_v35 = vld [vmem:[#allocation2 + $0x9c] sm:$0xf]  ;;  %v4959_v16 = vld [vmem:[#allocation2 + $0xa0] sm:$0xf] }
 0x2b5   : > { %v6807_v43 = vrot.slane %v6806_v10, 4  ;;  %v6816_v15 = vrot.slane %v6814_v9, 4  ;;  %v6823_v49 = vshll.u32 %v12492_v2, 16  ;;  %v6827_v56 = vshrl.u32 %v12492_v2, 16  ;;  %v4960_v9 = vld [vmem:[#allocation2 + $0xa4] sm:$0x1] }
 0x2b6   : > { %v7303_v62 = vsel %vm10939_vm0, %v7301_v50, %v7302_v53  ;;  %v6833_v1 = vshll.u32 %v6680_v47, 16  ;;  %v12512_v52 = vmax.bf16 %v7300_v31, %v7169_v36  ;;  %v6819_v4 = vrot.slane %v6817_v42, 5  ;;  %v4961_v50 = vld [vmem:[#allocation2 + $0xa8] sm:$0xf]  ;;  %v4962_v36 = vld [vmem:[#allocation2 + $0xac] sm:$0xf] }
 0x2b7   : > { %v6812_v63 = vsel %vm10709_vm8, %v6807_v43, %v6811_v29  ;;  %v8879_v22 = vrot.slane %v7202_v5, 9  ;;  %v6825_v54 = vrot.slane %v6823_v49, 5  ;;  %v6829_v24 = vrot.slane %v6827_v56, 4  ;;  %v9997_v56 = vld [vmem:[#allocation2 + $0x3c] sm:$0xff]  }
 0x2b8   : > { %v7170_v57 = vmax.bf16 %v6812_v63, %v12462_v3  ;;  %v6835_v39 = vrot.slane %v6833_v1, 5  ;;  %v12517_v48 = vmax.bf16 %v7471_v44, %v12512_v52  ;;  %v6820_v26 = vor.u32 %v6819_v4, %v6816_v15  ;;  %v4963_v63 = vld [vmem:[#allocation2 + $0xb0] sm:$0x1] }
 0x2b9   : > { %v7306_v12 = vrot.slane %v12492_v2, 5  ;;  %v7309_v45 = vrot.slane %v6680_v47, 5  ;;  %v6830_v29 = vor.u32 %v6829_v24, %v6825_v54  ;;  %v7473_v3 = vmax.bf16 %v12512_v52, %v12427_v51  ;;  %9552 = vmatmul.mubr.msk.bf16.vlgmr.msra.gmra.mrb[16].mxu1 %vm2014_vm9, %v12152_v55 }
 0x2ba   : > { %9416 = vmatmul.mubr.msk.bf16.vlgmr.msra.gmra.mrb[32].mxu0 %vm2014_vm9, %v9994_v21  ;;  %v12522_v13 = vmax.bf16 %v7303_v62, %v7170_v57  ;;  %v5238_v19 = vshrl.u32 %v4958_v35, 16  ;;  %v6821_v58 = vrot.slane %v6820_v26, 4  ;;  %v5241_v33 = vshll.u32 %v4958_v35, 16  ;;  %9555 = vmatprep.mubr.msk.bf16.mxu1 %vm2014_vm9, %v12198_v7 }
 0x2bb   : > { %9618 = vmatpush3.bf16.msra.mxu0 %v12174_v30  ;;  %9419 = vmatprep.mubr.msk.bf16.mxu0 %vm2014_vm9, %v9995_v37  ;;  %v7307_v53 = vsel %vm10939_vm0, %v8879_v22, %v7306_v12  ;;  %v7308_v44 = vrot.slane %v7306_v12, 4  ;;  %v6831_v10 = vrot.slane %v6830_v29, 4  ;;  %v5251_v7 = vshrl.u32 %v4959_v16, 16  ;;  %v12559_v12 = vld [vmem:[#allocation3 + $0x4c] sm:$0xf] }
 0x2bc   : > { %v12531_v30 = vmax.bf16 %v7472_v8, %v12522_v13  ;;  %v7474_v47 = vmax.bf16 %v12522_v13, %v12437_v23  ;;  %v5240_v51 = vrot.slane %v5238_v19, 4  ;;  %9584 = vmatpush3.bf16.msra.mxu1 %v12218_v32  ;;  %v6826_v14 = vsel %vm10709_vm8, %v6821_v58, %v6825_v54  ;;  %v9996_v32 = vld [vmem:[#allocation2 + $0x30] sm:$0xff]   ;;  %v12553_v54 = vld [vmem:[#allocation3 + $0x48] sm:$0xf] }
 0x2bd   : > { %v7310_v55 = vsel %vm10939_vm0, %v7308_v44, %v7309_v45  ;;  %v5243_v31 = vrot.slane %v5241_v33, 5  ;;  %v5247_v8 = vshll.u32 %v4959_v16, 16  ;;  %v6836_v23 = vsel %vm10709_vm8, %v6831_v10, %v6835_v39  ;;  %v6681_v44 = vld [vmem:[#allocation3 + $0x50] sm:$0x1] }
 0x2be   : > { %v8895_v5 = vcombine.low %v12517_v48, %v12531_v30  ;;  %v7171_v43 = vmax.bf16 %v6826_v14, %v12478_v0  ;;  %v7172_v15 = vmax.bf16 %v6836_v23, %v12492_v2  ;;  %v5257_v49 = vshll.u32 %v4960_v9, 16  ;;  %v7203_v14 = vld [vmem:[#allocation3 + $0x48] sm:$0xe] }
 0x2bf   : > { %v5244_v42 = vor.u32 %v5243_v31, %v5240_v51  ;;  %v5249_v62 = vrot.slane %v5247_v8, 5  ;;  %v5253_v21 = vrot.slane %v5251_v7, 4  ;;  %v5262_v4 = vshrl.u32 %v4961_v50, 16 }
 0x2c0   : > { %v12548_v1 = vmax.bf16 %v7307_v53, %v7171_v43  ;;  %v5265_v22 = vshll.u32 %v4961_v50, 16  ;;  %v12551_v35 = vmax.bf16 %v7310_v55, %v7172_v15  ;;  %v5259_v37 = vrot.slane %v5257_v49, 5  ;;  %v9998_v50 = vld [vmem:[#allocation2 + $0x48] sm:$0xff]  }
 0x2c1   : > { %v5245_v0 = vrot.slane %v5244_v42, 4  ;;  %v5271_v57 = vshll.u32 %v4962_v36, 16  ;;  %v5254_v24 = vor.u32 %v5253_v21, %v5249_v62  ;;  %v5264_v39 = vrot.slane %v5262_v4, 4  ;;  %9556 = vmatmul.mubr.msk.bf16.gmra.mrb[20].mxu1 %vm2014_vm9, %v12200_v40  ;;  %v6653_v4 = vld [vmem:[#allocation3 + $0x54] sm:$0xf] }
 0x2c2   : > { %9420 = vmatmul.mubr.msk.bf16.gmra.mrb[36].mxu0 %vm2014_vm9, %v9996_v32  ;;  %v12557_v2 = vmax.bf16 %v7473_v3, %v12548_v1  ;;  %v5267_v26 = vrot.slane %v5265_v22, 5  ;;  %v12562_v45 = vmax.bf16 %v7474_v47, %v12551_v35  ;;  %v5275_v19 = vshrl.u32 %v4962_v36, 16  ;;  %9559 = vmatprep.mubr.msk.bf16.mxu1 %vm2014_vm9, %v12212_v34  ;;  %v9999_v36 = vld [vmem:[#allocation2 + $0x54] sm:$0xff]  }
 0x2c3   : > { %9423 = vmatprep.mubr.msk.bf16.mxu0 %vm2014_vm9, %v9997_v56  ;;  %v5250_v29 = vsel %vm10709_vm8, %v5245_v0, %v5249_v62  ;;  %v5273_v16 = vrot.slane %v5271_v57, 5  ;;  %v5255_v58 = vrot.slane %v5254_v24, 4  ;;  %v5281_v3 = vshll.u32 %v4963_v63, 16  ;;  %v6654_v24 = vld [vmem:[#allocation3 + $0x58] sm:$0xf] }
 0x2c4   : > { %v5268_v53 = vor.u32 %v5267_v26, %v5264_v39  ;;  %v6838_v33 = vshrl.u32 %v12553_v54, 16  ;;  %v8896_v10 = vcombine.low %v12557_v2, %v12562_v45  ;;  %v5277_v47 = vrot.slane %v5275_v19, 4 }
 0x2c5   : > { %v6841_v9 = vshll.u32 %v12553_v54, 16  ;;  %v6847_v51 = vshll.u32 %v12559_v12, 16  ;;  %v5260_v40 = vsel %vm10709_vm8, %v5255_v58, %v5259_v37  ;;  %v5283_v31 = vrot.slane %v5281_v3, 5 }
 0x2c6   : > { %v5269_v55 = vrot.slane %v5268_v53, 4  ;;  %v6840_v8 = vrot.slane %v6838_v33, 4  ;;  %v12577_v23 = vcombine.low %v5250_v29, %v5260_v40  ;;  %v5278_v43 = vor.u32 %v5277_v47, %v5273_v16  ;;  %v6682_v53 = vld [vmem:[#allocation3 + $0x5c] sm:$0x1] }
 0x2c7   : > { %v6843_v34 = vrot.slane %v6841_v9, 5  ;;  %v6849_v7 = vrot.slane %v6847_v51, 5  ;;  %v6851_v15 = vshrl.u32 %v12559_v12, 16  ;;  %v6857_v42 = vshll.u32 %v6681_v44, 16 }
 0x2c8   : > { %v5274_v32 = vsel %vm10709_vm8, %v5269_v55, %v5273_v16  ;;  %v8880_v62 = vrot.slane %v7203_v14, 9  ;;  %v5279_v49 = vrot.slane %v5278_v43, 4  ;;  %v7313_v21 = vrot.slane %v12559_v12, 5  ;;  %v10000_v55 = vld [vmem:[#allocation2 + $0x60] sm:$0xff]  }
 0x2c9   : > { %v6844_v56 = vor.u32 %v6843_v34, %v6840_v8  ;;  %v7316_v63 = vrot.slane %v6681_v44, 5  ;;  %v6853_v22 = vrot.slane %v6851_v15, 4  ;;  %v6859_v0 = vrot.slane %v6857_v42, 5  ;;  %9560 = vmatmul.mubr.msk.bf16.gmra.mrb[24].mxu1 %vm2014_vm9, %v12317_v20  ;;  %v7204_v44 = vld [vmem:[#allocation3 + $0x54] sm:$0xe] }
 0x2ca   : > { %9424 = vmatmul.mubr.msk.bf16.gmra.mrb[40].mxu0 %vm2014_vm9, %v9998_v50  ;;  %v7475_v37 = vmax.bf16 %v12548_v1, %v12512_v52  ;;  %v7476_v57 = vmax.bf16 %v12551_v35, %v12522_v13  ;;  %v5284_v39 = vsel %vm10709_vm8, %v5279_v49, %v5283_v31  ;;  %v7314_v29 = vsel %vm10939_vm0, %v8880_v62, %v7313_v21  ;;  %v4965_v49 = vld [vmem:[#allocation2 + $0xb8] sm:$0xf] }
 0x2cb   : > { %9427 = vmatprep.mubr.msk.bf16.mxu0 %vm2014_vm9, %v9999_v36  ;;  %v6845_v26 = vrot.slane %v6844_v56, 4  ;;  %v7315_v16 = vrot.slane %v7313_v21, 4  ;;  %v12595_v19 = vcombine.low %v5274_v32, %v5284_v39  ;;  %v6854_v58 = vor.u32 %v6853_v22, %v6849_v7  ;;  %9563 = vmatprep.mubr.msk.bf16.mxu1 %vm2014_vm9, %v12319_v41  ;;  %v4964_v32 = vld [vmem:[#allocation2 + $0xb4] sm:$0xf] }
 0x2cc   : > { %v6862_v52 = vshrl.u32 %v6653_v4, 16  ;;  %v6865_v3 = vshll.u32 %v6653_v4, 16  ;;  %v6871_v47 = vshll.u32 %v6654_v24, 16  ;;  %v6875_v9 = vshrl.u32 %v6654_v24, 16 }
 0x2cd   : > { %v6850_v13 = vsel %vm10709_vm8, %v6845_v26, %v6849_v7  ;;  %v7317_v33 = vsel %vm10939_vm0, %v7315_v16, %v7316_v63  ;;  %v6855_v51 = vrot.slane %v6854_v58, 4  ;;  %v6881_v50 = vshll.u32 %v6682_v53, 16 }
 0x2ce   : > { %v7173_v20 = vmax.bf16 %v6850_v13, %v12553_v54  ;;  %v6864_v14 = vrot.slane %v6862_v52, 4  ;;  %v6867_v40 = vrot.slane %v6865_v3, 5  ;;  %v6873_v31 = vrot.slane %v6871_v47, 5  ;;  %v4967_v3 = vld [vmem:[#allocation2 + $0xc0] sm:$0xf] }
 0x2cf   : > { %v6877_v8 = vrot.slane %v6875_v9, 4  ;;  %v8881_v43 = vrot.slane %v7204_v44, 9  ;;  %v6860_v41 = vsel %vm10709_vm8, %v6855_v51, %v6859_v0  ;;  %v7320_v36 = vrot.slane %v6654_v24, 5  ;;  %v4968_v9 = vld [vmem:[#allocation2 + $0xc4] sm:$0xf] }
 0x2d0   : > { %v12606_v34 = vmax.bf16 %v7314_v29, %v7173_v20  ;;  %v6868_v7 = vor.u32 %v6867_v40, %v6864_v14  ;;  %v7174_v15 = vmax.bf16 %v6860_v41, %v12559_v12  ;;  %v6883_v42 = vrot.slane %v6881_v50, 5  ;;  %v4966_v29 = vld [vmem:[#allocation2 + $0xbc] sm:$0x1] }
 0x2d1   : > { %v6878_v54 = vor.u32 %v6877_v8, %v6873_v31  ;;  %v7323_v62 = vrot.slane %v6682_v53, 5  ;;  %v7321_v63 = vsel %vm10939_vm0, %v8881_v43, %v7320_v36  ;;  %v7322_v22 = vrot.slane %v7320_v36, 4  ;;  %9564 = vmatmul.mubr.msk.bf16.gmra.mrb[28].mxu1 %vm2014_vm9, %v12321_v61  ;;  %v12649_v43 = vld [vmem:[#allocation3 + $0x60] sm:$0xf] }
 0x2d2   : > { %9428 = vmatmul.mubr.msk.bf16.gmra.mrb[44].mxu0 %vm2014_vm9, %v10000_v55  ;;  %v12613_v56 = vmax.bf16 %v7475_v37, %v12606_v34  ;;  %v6869_v21 = vrot.slane %v6868_v7, 4  ;;  %v12617_v0 = vmax.bf16 %v7317_v33, %v7174_v15  ;;  %v7477_v12 = vmax.bf16 %v12606_v34, %v12548_v1  ;;  %9567 = vmatprep.mubr.msk.bf16.mxu1 %vm2014_vm9, %v12323_v28 }
 0x2d3   : > { %9619 = vmatprep.mubr.msk.bf16.mxu0 %vm650_vm5, %v12452_v38  ;;  %v6879_v39 = vrot.slane %v6878_v54, 4  ;;  %v5286_v26 = vshrl.u32 %v4964_v32, 16  ;;  %v7324_v37 = vsel %vm10939_vm0, %v7322_v22, %v7323_v62  ;;  %v5289_v16 = vshll.u32 %v4964_v32, 16  ;;  %v6656_v54 = vld [vmem:[#allocation3 + $0x64] sm:$0xf] }
 0x2d4   : > { %v6874_v38 = vsel %vm10709_vm8, %v6869_v21, %v6873_v31  ;;  %v5295_v58 = vshll.u32 %v4965_v49, 16  ;;  %v12630_v53 = vmax.bf16 %v7476_v57, %v12617_v0  ;;  %v7478_v61 = vmax.bf16 %v12617_v0, %v12551_v35 }
 0x2d5   : > { %v6884_v1 = vsel %vm10709_vm8, %v6879_v39, %v6883_v42  ;;  %v7175_v52 = vmax.bf16 %v6874_v38, %v6653_v4  ;;  %v5288_v13 = vrot.slane %v5286_v26, 4  ;;  %v5291_v33 = vrot.slane %v5289_v16, 5  ;;  %v4969_v4 = vld [vmem:[#allocation2 + $0xc8] sm:$0x1]  ;;  %v7205_v26 = vld [vmem:[#allocation3 + $0x60] sm:$0xe] }
 0x2d6   : > { %v7176_v44 = vmax.bf16 %v6884_v1, %v6654_v24  ;;  %v5297_v47 = vrot.slane %v5295_v58, 5  ;;  %v8897_v51 = vcombine.low %v12613_v56, %v12630_v53  ;;  %v5299_v57 = vshrl.u32 %v4965_v49, 16 }
 0x2d7   : > { %v12638_v28 = vmax.bf16 %v7321_v63, %v7175_v52  ;;  %v5305_v20 = vshll.u32 %v4966_v29, 16  ;;  %v5292_v40 = vor.u32 %v5291_v33, %v5288_v13  ;;  %v5310_v55 = vshrl.u32 %v4967_v3, 16  ;;  %v12672_v52 = vld [vmem:[#allocation3 + $0x6c] sm:$0xf] }
 0x2d8   : > { %v12640_v14 = vmax.bf16 %v7324_v37, %v7176_v44  ;;  %v5313_v31 = vshll.u32 %v4967_v3, 16  ;;  %v5301_v24 = vrot.slane %v5299_v57, 4  ;;  %v5319_v50 = vshll.u32 %v4968_v9, 16 }
 0x2d9   : > { %v12647_v35 = vmax.bf16 %v7477_v12, %v12638_v28  ;;  %v5307_v8 = vrot.slane %v5305_v20, 5  ;;  %v5293_v7 = vrot.slane %v5292_v40, 4  ;;  %v5312_v11 = vrot.slane %v5310_v55, 4  ;;  %9568 = vmatmul.mubr.msk.bf16.gmra.mrb[0].mxu1 %vm2014_vm9, %v12474_v60  ;;  %v12681_v20 = vld [vmem:[#allocation3 + $0x70] sm:$0xf] }
 0x2da   : > { %9620 = vmatmul.mubr.msk.bf16.vlgmr.msra.gmra.mrb[64].mxu0 %vm650_vm5, %v8894_v59  ;;  %v12656_v41 = vmax.bf16 %v7478_v61, %v12640_v14  ;;  %v5315_v46 = vrot.slane %v5313_v31, 5  ;;  %v5302_v59 = vor.u32 %v5301_v24, %v5297_v47  ;;  %v5321_v36 = vrot.slane %v5319_v50, 5  ;;  %9571 = vmatprep.mubr.msk.bf16.mxu1 %vm2014_vm9, %v12496_v27  ;;  %v6684_v31 = vld [vmem:[#allocation3 + $0x74] sm:$0x1] }
 0x2db   : > { %9623 = vmatprep.mubr.msk.bf16.mxu0 %vm650_vm5, %v8895_v5  ;;  %v5323_v32 = vshrl.u32 %v4968_v9, 16  ;;  %v5329_v15 = vshll.u32 %v4969_v4, 16  ;;  %v5298_v48 = vsel %vm10709_vm8, %v5293_v7, %v5297_v47  ;;  %v6683_v5 = vld [vmem:[#allocation3 + $0x68] sm:$0x1]  ;;  %v6886_v62 = vshrl.u32 %v12649_v43, 16 }
 0x2dc   : > { %v8898_v42 = vcombine.low %v12647_v35, %v12656_v41  ;;  %v5316_v30 = vor.u32 %v5315_v46, %v5312_v11  ;;  %v5303_v49 = vrot.slane %v5302_v59, 4  ;;  %v6889_v63 = vshll.u32 %v12649_v43, 16  ;;  %v7206_v7 = vld [vmem:[#allocation3 + $0x6c] sm:$0xe] }
 0x2dd   : > { %v5325_v56 = vrot.slane %v5323_v32, 4  ;;  %v5331_v21 = vrot.slane %v5329_v15, 5  ;;  %v6888_v60 = vrot.slane %v6886_v62, 4  ;;  %v6895_v39 = vshll.u32 %v6656_v54, 16 }
 0x2de   : > { %v5317_v22 = vrot.slane %v5316_v30, 4  ;;  %v6899_v12 = vshrl.u32 %v6656_v54, 16  ;;  %v5308_v38 = vsel %vm10709_vm8, %v5303_v49, %v5307_v8  ;;  %v6891_v29 = vrot.slane %v6889_v63, 5  ;;  %v4970_v63 = vld [vmem:[#allocation2 + $0xcc] sm:$0xf] }
 0x2df   : > { %v5326_v37 = vor.u32 %v5325_v56, %v5321_v36  ;;  %v6905_v16 = vshll.u32 %v6683_v5, 16  ;;  %v8802_v58 = vcombine.low %v5298_v48, %v5308_v38  ;;  %v6897_v53 = vrot.slane %v6895_v39, 5 }
 0x2e0   : > { %v5322_v27 = vsel %vm10709_vm8, %v5317_v22, %v5321_v36  ;;  %v6901_v1 = vrot.slane %v6899_v12, 4  ;;  %v6892_v3 = vor.u32 %v6891_v29, %v6888_v60  ;;  %v8882_v13 = vrot.slane %v7205_v26, 9  ;;  %v12716_v26 = vld [vmem:[#allocation2 + $0xd0] sm:$0xf] }
 0x2e1   : > { %v5327_v61 = vrot.slane %v5326_v37, 4  ;;  %v6907_v44 = vrot.slane %v6905_v16, 5  ;;  %v7327_v47 = vrot.slane %v6656_v54, 5  ;;  %v7330_v9 = vrot.slane %v6683_v5, 5  ;;  %9572 = vmatmul.mubr.msk.bf16.gmra.mrb[4].mxu1 %vm2014_vm9, %v12577_v23 }
 0x2e2   : > { %9624 = vmatmul.mubr.msk.bf16.gmra.mrb[68].mxu0 %vm650_vm5, %v8896_v10  ;;  %v6902_v33 = vor.u32 %v6901_v1, %v6897_v53  ;;  %v7479_v57 = vmax.bf16 %v12638_v28, %v12606_v34  ;;  %v6893_v2 = vrot.slane %v6892_v3, 4  ;;  %v7480_v45 = vmax.bf16 %v12640_v14, %v12617_v0  ;;  %9575 = vmatprep.mubr.msk.bf16.mxu1 %vm2014_vm9, %v12595_v19  ;;  %v5657_v1 = vld [vmem:[#allocation2 + $0x18] sm:$0xe] }
 0x2e3   : > { %9627 = vmatprep.mubr.msk.bf16.mxu0 %vm650_vm5, %v8897_v51  ;;  %v5332_v40 = vsel %vm10709_vm8, %v5327_v61, %v5331_v21  ;;  %v6910_v10 = vshrl.u32 %v12672_v52, 16  ;;  %v7328_v55 = vsel %vm10939_vm0, %v8882_v13, %v7327_v47  ;;  %v7329_v34 = vrot.slane %v7327_v47, 4  ;;  %v6659_v47 = vld [vmem:[#allocation3 + $0x78] sm:$0xf] }
 0x2e4   : > { %v8803_v51 = vcombine.low %v5322_v27, %v5332_v40  ;;  %v6903_v4 = vrot.slane %v6902_v33, 4  ;;  %v6898_v24 = vsel %vm10709_vm8, %v6893_v2, %v6897_v53  ;;  %v6913_v0 = vshll.u32 %v12672_v52, 16 }
 0x2e5   : > { %v6912_v8 = vrot.slane %v6910_v10, 4  ;;  %v6919_v50 = vshll.u32 %v12681_v20, 16  ;;  %v7177_v11 = vmax.bf16 %v6898_v24, %v12649_v43  ;;  %v7331_v46 = vsel %vm10939_vm0, %v7329_v34, %v7330_v9  ;;  %v6660_v24 = vld [vmem:[#allocation3 + $0x7c] sm:$0xf] }
 0x2e6   : > { %v6908_v23 = vsel %vm10709_vm8, %v6903_v4, %v6907_v44  ;;  %v6923_v59 = vshrl.u32 %v12681_v20, 16  ;;  %v6915_v36 = vrot.slane %v6913_v0, 5  ;;  %v6929_v15 = vshll.u32 %v6684_v31, 16 }
 0x2e7   : > { %v7178_v19 = vmax.bf16 %v6908_v23, %v6656_v54  ;;  %v6921_v32 = vrot.slane %v6919_v50, 5  ;;  %v12704_v48 = vmax.bf16 %v7328_v55, %v7177_v11  ;;  %v8883_v5 = vrot.slane %v7206_v7, 9  ;;  %v400_v54 = vld [vmem:[#allocation2 + $0xd4] sm:$0x1]  ;;  %v10030_v55 = vld [vmem:[#allocation2 + $0x20] sm:$0x1] }
 0x2e8   : > { %v6925_v30 = vrot.slane %v6923_v59, 4  ;;  %v7334_v62 = vrot.slane %v12681_v20, 5  ;;  %v6916_v49 = vor.u32 %v6915_v36, %v6912_v8  ;;  %v6931_v56 = vrot.slane %v6929_v15, 5  ;;  %v6685_v11 = vld [vmem:[#allocation3 + $0x80] sm:$0x1] }
 0x2e9   : > { %v12711_v43 = vmax.bf16 %v7331_v46, %v7178_v19  ;;  %v7337_v21 = vrot.slane %v6684_v31, 5  ;;  %v7511_v22 = vmax.bf16 %v7479_v57, %v12704_v48  ;;  %9576 = vmatmul.mubr.msk.bf16.gmra.mrb[8].mxu1 %vm2014_vm9, %v8802_v58  ;;  %v401_v27 = vsel %vm10396_vm12, 0, %v400_v54 }
 0x2ea   : > { %9628 = vmatmul.mubr.msk.bf16.gmra.mrb[72].mxu0 %vm650_vm5, %v8898_v42  ;;  %v6926_v60 = vor.u32 %v6925_v30, %v6921_v32  ;;  %v7335_v39 = vsel %vm10939_vm0, %v8883_v5, %v7334_v62  ;;  %v7336_v12 = vrot.slane %v7334_v62, 4  ;;  %v6917_v41 = vrot.slane %v6916_v49, 4  ;;  %9579 = vmatprep.mubr.msk.bf16.mxu1 %vm2014_vm9, %v8803_v51  ;;  %402 = vst [vmem:[#allocation2 + $0xd4] sm:$0x1] %v401_v27  ;;  %v10029_v51 = vld [vmem:[#allocation2 + $0x1c] sm:$0xf] }
 0x2eb   : > { %v7512_v35 = vmax.bf16 %v7480_v45, %v12711_v43  ;;  %v7481_v42 = vmax.bf16 %v12704_v48, %v12638_v28  ;;  %v7482_v38 = vmax.bf16 %v12711_v43, %v12640_v14  ;;  %v5334_v53 = vshrl.u32 %v4970_v63, 16 }
 0x2ec   : > { %v6927_v37 = vrot.slane %v6926_v60, 4  ;;  %v7338_v29 = vsel %vm10939_vm0, %v7336_v12, %v7337_v21  ;;  %v6922_v28 = vsel %vm10709_vm8, %v6917_v41, %v6921_v32  ;;  %v5337_v3 = vshll.u32 %v4970_v63, 16  ;;  %v7207_v32 = vld [vmem:[#allocation3 + $0x78] sm:$0xe] }
 0x2ed   : > { %v8899_v61 = vcombine.low %v7511_v22, %v7512_v35  ;;  %v5343_v14 = vshll.u32 %v12716_v26, 16  ;;  %v7179_v44 = vmax.bf16 %v6922_v28, %v12672_v52  ;;  %v5336_v13 = vrot.slane %v5334_v53, 4 }
 0x2ee   : > { %v6932_v58 = vsel %vm10709_vm8, %v6927_v37, %v6931_v56  ;;  %v5347_v33 = vshrl.u32 %v12716_v26, 16  ;;  %v5339_v57 = vrot.slane %v5337_v3, 5  ;;  %v8822_v2 = vrot.slane %v5657_v1, 9  ;;  %v6661_v37 = vld [vmem:[#allocation3 + $0x84] sm:$0xf] }
 0x2ef   : > { %9631 = vmatprep.mubr.msk.bf16.mxu0 %vm650_vm5, %v8899_v61  ;;  %v7180_v9 = vmax.bf16 %v6932_v58, %v12681_v20  ;;  %v5345_v40 = vrot.slane %v5343_v14, 5  ;;  %v12738_v45 = vmax.bf16 %v7335_v39, %v7179_v44  ;;  %v5723_v4 = vrot.slane %v10029_v51, 5  ;;  %v6662_v1 = vld [vmem:[#allocation3 + $0x88] sm:$0xf]  ;;  %v6686_v58 = vld [vmem:[#allocation3 + $0x8c] sm:$0x1] }
 0x2f0   : > { %v5349_v10 = vrot.slane %v5347_v33, 4  ;;  %v5726_v34 = vrot.slane %v10030_v55, 5  ;;  %v5340_v52 = vor.u32 %v5339_v57, %v5336_v13  ;;  %v6934_v8 = vshrl.u32 %v6659_v47, 16 }
 0x2f1   : > { %v12740_v31 = vmax.bf16 %v7338_v29, %v7180_v9  ;;  %v6937_v0 = vshll.u32 %v6659_v47, 16  ;;  %v7513_v50 = vmax.bf16 %v7481_v42, %v12738_v45  ;;  %v5724_v20 = vsel %vm10939_vm0, %v8822_v2, %v5723_v4  ;;  %v12746_v15 = vld [vmem:[#allocation2 + $0xd4] sm:$0x1] }
 0x2f2   : > { %v5350_v7 = vor.u32 %v5349_v10, %v5345_v40  ;;  %v5725_v23 = vrot.slane %v5723_v4, 4  ;;  %v5341_v59 = vrot.slane %v5340_v52, 4  ;;  %v6936_v19 = vrot.slane %v6934_v8, 4  ;;  %v7208_v10 = vld [vmem:[#allocation3 + $0x84] sm:$0xe] }
 0x2f3   : > { %v7514_v46 = vmax.bf16 %v7482_v38, %v12740_v31  ;;  %v6939_v36 = vrot.slane %v6937_v0, 5  ;;  %v6943_v62 = vshll.u32 %v6660_v24, 16  ;;  %v6947_v49 = vshrl.u32 %v6660_v24, 16 }
 0x2f4   : > { %v5351_v30 = vrot.slane %v5350_v7, 4  ;;  %v5727_v5 = vsel %vm10939_vm0, %v5725_v23, %v5726_v34  ;;  %v5346_v21 = vsel %vm10709_vm8, %v5341_v59, %v5345_v40  ;;  %v5353_v54 = vshll.u32 %v12746_v15, 16  ;;  %v5658_v23 = vld [vmem:[#allocation2 + $0x24] sm:$0xe] }
 0x2f5   : > { %v8900_v56 = vcombine.low %v7513_v50, %v7514_v46  ;;  %v8840_v63 = vcombine.low %v5724_v20, %v5727_v5  ;;  %v6940_v22 = vor.u32 %v6939_v36, %v6936_v19  ;;  %v6945_v60 = vrot.slane %v6943_v62, 5  ;;  %v5659_v5 = vld [vmem:[#allocation2 + $0x30] sm:$0xe] }
 0x2f6   : > { %v6949_v39 = vrot.slane %v6947_v49, 4  ;;  %v6953_v12 = vshll.u32 %v6685_v11, 16  ;;  %v5355_v35 = vrot.slane %v5353_v54, 5  ;;  %v8884_v41 = vrot.slane %v7207_v32, 9 }
 0x2f7   : > { %9632 = vmatmul.mubr.msk.bf16.gmra.mrb[76].mxu0 %vm650_vm5, %v8900_v56  ;;  %v7341_v42 = vrot.slane %v6660_v24, 5  ;;  %v7344_v38 = vrot.slane %v6685_v11, 5  ;;  %v6941_v29 = vrot.slane %v6940_v22, 4  ;;  %v7483_v53 = vmax.bf16 %v12738_v45, %v12704_v48  ;;  %v10031_v22 = vld [vmem:[#allocation2 + $0x28] sm:$0xf] }
 0x2f8   : > { %v6950_v16 = vor.u32 %v6949_v39, %v6945_v60  ;;  %v6955_v27 = vrot.slane %v6953_v12, 5  ;;  %v5356_v61 = vsel %vm10709_vm8, %v5351_v30, %v5355_v35  ;;  %v7484_v14 = vmax.bf16 %v12740_v31, %v12711_v43  ;;  %v10032_v39 = vld [vmem:[#allocation2 + $0x2c] sm:$0x1] }
 0x2f9   : > { %v7342_v28 = vsel %vm10939_vm0, %v8884_v41, %v7341_v42  ;;  %v7343_v3 = vrot.slane %v7341_v42, 4  ;;  %v8804_v44 = vcombine.low %v5346_v21, %v5356_v61  ;;  %v6946_v13 = vsel %vm10709_vm8, %v6941_v29, %v6945_v60  ;;  %v10033_v42 = vld [vmem:[#allocation2 + $0x34] sm:$0xf]  ;;  %v6663_v29 = vld [vmem:[#allocation3 + $0x90] sm:$0xf] }
 0x2fa   : > { %v6951_v33 = vrot.slane %v6950_v16, 4  ;;  %v6958_v9 = vshrl.u32 %v6661_v37, 16  ;;  %v7181_v57 = vmax.bf16 %v6946_v13, %v6659_v47  ;;  %v6961_v40 = vshll.u32 %v6661_v37, 16  ;;  %v12790_v61 = vld [vmem:[#allocation3 + $0x94] sm:$0xf] }
 0x2fb   : > { %v7345_v48 = vsel %vm10939_vm0, %v7343_v3, %v7344_v38  ;;  %v6967_v2 = vshll.u32 %v6662_v1, 16  ;;  %9580 = vmatmul.mubr.msk.bf16.gmra.mrb[12].mxu1 %vm2014_vm9, %v8804_v44  ;;  %v6971_v4 = vshrl.u32 %v6662_v1, 16  ;;  %v6977_v55 = vshll.u32 %v6686_v58, 16 }
 0x2fc   : > { %v6956_v51 = vsel %vm10709_vm8, %v6951_v33, %v6955_v27  ;;  %v6960_v43 = vrot.slane %v6958_v9, 4  ;;  %9585 = vmatprep.mubr.msk.bf16.mxu1 %vm2014_vm9, %v8840_v63  ;;  %v12770_v52 = vmax.bf16 %v7342_v28, %v7181_v57  ;;  %v6963_v47 = vrot.slane %v6961_v40, 5  ;;  %v6687_v33 = vld [vmem:[#allocation3 + $0x98] sm:$0x1] }
 0x2fd   : > { %v7182_v34 = vmax.bf16 %v6956_v51, %v6660_v24  ;;  %v6969_v8 = vrot.slane %v6967_v2, 5  ;;  %v6973_v0 = vrot.slane %v6971_v4, 4  ;;  %v6979_v50 = vrot.slane %v6977_v55, 5 }
 0x2fe   : > { %v8885_v7 = vrot.slane %v7208_v10, 9  ;;  %v7348_v20 = vrot.slane %v6662_v1, 5  ;;  %v7515_v46 = vmax.bf16 %v7483_v53, %v12770_v52  ;;  %v6964_v59 = vor.u32 %v6963_v47, %v6960_v43  ;;  %v7209_v10 = vld [vmem:[#allocation3 + $0x90] sm:$0xe] }
 0x2ff   : > { %v12772_v11 = vmax.bf16 %v7345_v48, %v7182_v34  ;;  %v7351_v19 = vrot.slane %v6686_v58, 5  ;;  %v6974_v36 = vor.u32 %v6973_v0, %v6969_v8  ;;  %v7485_v30 = vmax.bf16 %v12770_v52, %v12738_v45  ;;  %v10034_v58 = vld [vmem:[#allocation2 + $0x38] sm:$0x1] }
 0x300   : > { %v7349_v32 = vsel %vm10939_vm0, %v8885_v7, %v7348_v20  ;;  %v7350_v24 = vrot.slane %v7348_v20, 4  ;;  %v6965_v49 = vrot.slane %v6964_v59, 4  ;;  %v8823_v21 = vrot.slane %v5658_v23, 9  ;;  %v6666_v59 = vld [vmem:[#allocation3 + $0xa0] sm:$0xf] }
 0x301   : > { %v7516_v62 = vmax.bf16 %v7484_v14, %v12772_v11  ;;  %v7486_v56 = vmax.bf16 %v12772_v11, %v12740_v31  ;;  %v6975_v54 = vrot.slane %v6974_v36, 4  ;;  %v5730_v60 = vrot.slane %v10031_v22, 5 }
 0x302   : > { %v7352_v63 = vsel %vm10939_vm0, %v7350_v24, %v7351_v19  ;;  %v5733_v12 = vrot.slane %v10032_v39, 5  ;;  %v6970_v45 = vsel %vm10709_vm8, %v6965_v49, %v6969_v8  ;;  %v8824_v41 = vrot.slane %v5659_v5, 9 }
 0x303   : > { %v8901_v35 = vcombine.low %v7515_v46, %v7516_v62  ;;  %v5737_v38 = vrot.slane %v10033_v42, 5  ;;  %v6980_v31 = vsel %vm10709_vm8, %v6975_v54, %v6979_v50  ;;  %v7183_v16 = vmax.bf16 %v6970_v45, %v6661_v37  ;;  %v6665_v50 = vld [vmem:[#allocation3 + $0x9c] sm:$0xf] }
 0x304   : > { %v5731_v27 = vsel %vm10939_vm0, %v8823_v21, %v5730_v60  ;;  %v5732_v53 = vrot.slane %v5730_v60, 4  ;;  %v7184_v28 = vmax.bf16 %v6980_v31, %v6662_v1  ;;  %v5740_v44 = vrot.slane %v10034_v58, 5  ;;  %v7210_v60 = vld [vmem:[#allocation3 + $0x9c] sm:$0xe] }
 0x305   : > { %9635 = vmatprep.mubr.msk.bf16.mxu0 %vm650_vm5, %v8901_v35  ;;  %v5738_v3 = vsel %vm10939_vm0, %v8824_v41, %v5737_v38  ;;  %v5739_v14 = vrot.slane %v5737_v38, 4  ;;  %v12795_v13 = vmax.bf16 %v7349_v32, %v7183_v16  ;;  %v6982_v9 = vshrl.u32 %v6663_v29, 16 }
 0x306   : > { %v5734_v37 = vsel %vm10939_vm0, %v5732_v53, %v5733_v12  ;;  %v6985_v57 = vshll.u32 %v6663_v29, 16  ;;  %v12799_v48 = vmax.bf16 %v7352_v63, %v7184_v28  ;;  %v6991_v2 = vshll.u32 %v12790_v61, 16 }
 0x307   : > { %v8841_v40 = vcombine.low %v5731_v27, %v5734_v37  ;;  %v5741_v1 = vsel %vm10939_vm0, %v5739_v14, %v5740_v44  ;;  %v7517_v51 = vmax.bf16 %v7485_v30, %v12795_v13  ;;  %v6984_v4 = vrot.slane %v6982_v9, 4  ;;  %v6688_v30 = vld [vmem:[#allocation3 + $0xa4] sm:$0x1] }
 0x308   : > { %v8842_v43 = vcombine.low %v5738_v3, %v5741_v1  ;;  %v6987_v55 = vrot.slane %v6985_v57, 5  ;;  %v7518_v34 = vmax.bf16 %v7486_v56, %v12799_v48  ;;  %v6993_v47 = vrot.slane %v6991_v2, 5 }
 0x309   : > { %9586 = vmatmul.mubr.msk.bf16.vlgmr.msra.gmra.mrb[16].mxu1 %vm2014_vm9, %v8841_v40  ;;  %v6995_v8 = vshrl.u32 %v12790_v61, 16  ;;  %v7001_v0 = vshll.u32 %v6687_v33, 16  ;;  %v8886_v20 = vrot.slane %v7209_v10, 9  ;;  %v7355_v23 = vrot.slane %v12790_v61, 5 }
 0x30a   : > { %9589 = vmatprep.mubr.msk.bf16.mxu1 %vm2014_vm9, %v8842_v43  ;;  %v6988_v7 = vor.u32 %v6987_v55, %v6984_v4  ;;  %v7358_v46 = vrot.slane %v6687_v33, 5  ;;  %v8902_v19 = vcombine.low %v7517_v51, %v7518_v34  ;;  %v7487_v24 = vmax.bf16 %v12795_v13, %v12770_v52  ;;  %v10035_v4 = vld [vmem:[#allocation2 + $0x40] sm:$0xf] }
 0x30b   : > { %v6997_v36 = vrot.slane %v6995_v8, 4  ;;  %v7003_v32 = vrot.slane %v7001_v0, 5  ;;  %v7356_v62 = vsel %vm10939_vm0, %v8886_v20, %v7355_v23  ;;  %v7357_v49 = vrot.slane %v7355_v23, 4 }
 0x30c   : > { %v6989_v5 = vrot.slane %v6988_v7, 4  ;;  %v7488_v56 = vmax.bf16 %v12799_v48, %v12772_v11  ;;  %9636 = vmatmul.mubr.msk.bf16.gmra.mrb[80].mxu0 %vm650_vm5, %v8902_v19  ;;  %v7006_v54 = vshrl.u32 %v6665_v50, 16  ;;  %v7009_v63 = vshll.u32 %v6665_v50, 16  ;;  %v5660_v11 = vld [vmem:[#allocation2 + $0x3c] sm:$0xe] }
 0x30d   : > { %v6998_v21 = vor.u32 %v6997_v36, %v6993_v47  ;;  %v7015_v22 = vshll.u32 %v6666_v59, 16  ;;  %v7359_v52 = vsel %vm10939_vm0, %v7357_v49, %v7358_v46  ;;  %v7019_v12 = vshrl.u32 %v6666_v59, 16  ;;  %v12837_v7 = vld [vmem:[#allocation3 + $0xa8] sm:$0xf]  ;;  %v10038_v49 = vld [vmem:[#allocation2 + $0x50] sm:$0x1] }
 0x30e   : > { %v6994_v39 = vsel %vm10709_vm8, %v6989_v5, %v6993_v47  ;;  %v7025_v35 = vshll.u32 %v6688_v30, 16  ;;  %v7008_v42 = vrot.slane %v7006_v54, 4  ;;  %v7011_v38 = vrot.slane %v7009_v63, 5  ;;  %v10036_v47 = vld [vmem:[#allocation2 + $0x44] sm:$0x1] }
 0x30f   : > { %v6999_v45 = vrot.slane %v6998_v21, 4  ;;  %v7185_v41 = vmax.bf16 %v6994_v39, %v6663_v29  ;;  %v7017_v31 = vrot.slane %v7015_v22, 5  ;;  %v7021_v16 = vrot.slane %v7019_v12, 4  ;;  %v5661_v29 = vld [vmem:[#allocation2 + $0x48] sm:$0xe] }
 0x310   : > { %v7027_v27 = vrot.slane %v7025_v35, 5  ;;  %v8887_v53 = vrot.slane %v7210_v60, 9  ;;  %v7012_v14 = vor.u32 %v7011_v38, %v7008_v42  ;;  %v7362_v58 = vrot.slane %v6666_v59, 5  ;;  %v6689_v22 = vld [vmem:[#allocation3 + $0xb0] sm:$0x1] }
 0x311   : > { %v7004_v28 = vsel %vm10709_vm8, %v6999_v45, %v7003_v32  ;;  %v12823_v3 = vmax.bf16 %v7356_v62, %v7185_v41  ;;  %v7022_v37 = vor.u32 %v7021_v16, %v7017_v31  ;;  %v7365_v33 = vrot.slane %v6688_v30, 5  ;;  %v7211_v60 = vld [vmem:[#allocation3 + $0xa8] sm:$0xe] }
 0x312   : > { %v7186_v44 = vmax.bf16 %v7004_v28, %v12790_v61  ;;  %v8825_v9 = vrot.slane %v5660_v11, 9  ;;  %v7013_v40 = vrot.slane %v7012_v14, 4  ;;  %v7363_v1 = vsel %vm10939_vm0, %v8887_v53, %v7362_v58  ;;  %v6669_v53 = vld [vmem:[#allocation3 + $0xb4] sm:$0xf] }
 0x313   : > { %v7519_v57 = vmax.bf16 %v7487_v24, %v12823_v3  ;;  %v7364_v2 = vrot.slane %v7362_v58, 4  ;;  %v7023_v51 = vrot.slane %v7022_v37, 4  ;;  %v7489_v43 = vmax.bf16 %v12823_v3, %v12795_v13  ;;  %v10037_v24 = vld [vmem:[#allocation2 + $0x4c] sm:$0xf]  ;;  %v6670_v37 = vld [vmem:[#allocation3 + $0xb8] sm:$0xf] }
 0x314   : > { %v12829_v10 = vmax.bf16 %v7359_v52, %v7186_v44  ;;  %v5744_v55 = vrot.slane %v10035_v4, 5  ;;  %v7018_v61 = vsel %vm10709_vm8, %v7013_v40, %v7017_v31  ;;  %v5747_v8 = vrot.slane %v10036_v47, 5  ;;  %v6690_v40 = vld [vmem:[#allocation3 + $0xbc] sm:$0x1] }
 0x315   : > { %v7366_v34 = vsel %vm10939_vm0, %v7364_v2, %v7365_v33  ;;  %v8826_v0 = vrot.slane %v5661_v29, 9  ;;  %v7028_v23 = vsel %vm10709_vm8, %v7023_v51, %v7027_v27  ;;  %v7187_v46 = vmax.bf16 %v7018_v61, %v6665_v50 }
 0x316   : > { %v7520_v20 = vmax.bf16 %v7488_v56, %v12829_v10  ;;  %v7490_v13 = vmax.bf16 %v12829_v10, %v12799_v48  ;;  %v7188_v19 = vmax.bf16 %v7028_v23, %v6666_v59  ;;  %v5745_v36 = vsel %vm10939_vm0, %v8825_v9, %v5744_v55  ;;  %v6668_v56 = vld [vmem:[#allocation3 + $0xac] sm:$0xf] }
 0x317   : > { %v5746_v32 = vrot.slane %v5744_v55, 4  ;;  %v5751_v30 = vrot.slane %v10037_v24, 5  ;;  %v12846_v62 = vmax.bf16 %v7363_v1, %v7187_v46  ;;  %v5754_v21 = vrot.slane %v10038_v49, 5 }
 0x318   : > { %v8903_v5 = vcombine.low %v7519_v57, %v7520_v20  ;;  %v7030_v54 = vshrl.u32 %v12837_v7, 16  ;;  %v12849_v63 = vmax.bf16 %v7366_v34, %v7188_v19  ;;  %v7033_v35 = vshll.u32 %v12837_v7, 16  ;;  %v7212_v20 = vld [vmem:[#allocation3 + $0xb4] sm:$0xe] }
 0x319   : > { %v5748_v48 = vsel %vm10939_vm0, %v5746_v32, %v5747_v8  ;;  %v5752_v50 = vsel %vm10939_vm0, %v8826_v0, %v5751_v30  ;;  %v5753_v59 = vrot.slane %v5751_v30, 4  ;;  %v7521_v39 = vmax.bf16 %v7489_v43, %v12846_v62 }
 0x31a   : > { %9639 = vmatprep.mubr.msk.bf16.mxu0 %vm650_vm5, %v8903_v5  ;;  %v8843_v52 = vcombine.low %v5745_v36, %v5748_v48  ;;  %v7032_v12 = vrot.slane %v7030_v54, 4  ;;  %v7522_v45 = vmax.bf16 %v7490_v13, %v12849_v63  ;;  %v7039_v42 = vshll.u32 %v6668_v56, 16  ;;  %v5662_v36 = vld [vmem:[#allocation2 + $0x54] sm:$0xe] }
 0x31b   : > { %v5755_v41 = vsel %vm10939_vm0, %v5753_v59, %v5754_v21  ;;  %v7043_v38 = vshrl.u32 %v6668_v56, 16  ;;  %v7035_v31 = vrot.slane %v7033_v35, 5  ;;  %v7049_v16 = vshll.u32 %v6689_v22, 16 }
 0x31c   : > { %9590 = vmatmul.mubr.msk.bf16.gmra.mrb[20].mxu1 %vm2014_vm9, %v8843_v52  ;;  %v8844_v11 = vcombine.low %v5752_v50, %v5755_v41  ;;  %v8888_v27 = vrot.slane %v7211_v60, 9  ;;  %v8904_v28 = vcombine.low %v7521_v39, %v7522_v45  ;;  %v7041_v14 = vrot.slane %v7039_v42, 5  ;;  %v10039_v45 = vld [vmem:[#allocation2 + $0x58] sm:$0xf]  ;;  %v5663_v42 = vld [vmem:[#allocation2 + $0x60] sm:$0xe] }
 0x31d   : > { %v7045_v58 = vrot.slane %v7043_v38, 4  ;;  %v7369_v44 = vrot.slane %v6668_v56, 5  ;;  %v7036_v33 = vor.u32 %v7035_v31, %v7032_v12  ;;  %v7051_v9 = vrot.slane %v7049_v16, 5 }
 0x31e   : > { %9593 = vmatprep.mubr.msk.bf16.mxu1 %vm2014_vm9, %v8844_v11  ;;  %v7372_v29 = vrot.slane %v6689_v22, 5  ;;  %v7491_v57 = vmax.bf16 %v12846_v62, %v12823_v3  ;;  %9640 = vmatmul.mubr.msk.bf16.gmra.mrb[84].mxu0 %vm650_vm5, %v8904_v28  ;;  %v7492_v43 = vmax.bf16 %v12849_v63, %v12829_v10  ;;  %v7054_v55 = vshrl.u32 %v6669_v53, 16 }
 0x31f   : > { %v7046_v1 = vor.u32 %v7045_v58, %v7041_v14  ;;  %v7370_v2 = vsel %vm10939_vm0, %v8888_v27, %v7369_v44  ;;  %v7371_v51 = vrot.slane %v7369_v44, 4  ;;  %v7037_v4 = vrot.slane %v7036_v33, 4  ;;  %v6671_v27 = vld [vmem:[#allocation3 + $0xc0] sm:$0xf]  ;;  %v12897_v44 = vld [vmem:[#allocation3 + $0xc4] sm:$0xf] }
 0x320   : > { %v7057_v61 = vshll.u32 %v6669_v53, 16  ;;  %v7063_v34 = vshll.u32 %v6670_v37, 16  ;;  %v7067_v3 = vshrl.u32 %v6670_v37, 16  ;;  %v7073_v0 = vshll.u32 %v6690_v40, 16 }
 0x321   : > { %v7047_v47 = vrot.slane %v7046_v1, 4  ;;  %v7373_v8 = vsel %vm10939_vm0, %v7371_v51, %v7372_v29  ;;  %v7042_v23 = vsel %vm10709_vm8, %v7037_v4, %v7041_v14  ;;  %v7056_v46 = vrot.slane %v7054_v55, 4  ;;  %v10040_v29 = vld [vmem:[#allocation2 + $0x5c] sm:$0x1]  ;;  %v10042_v51 = vld [vmem:[#allocation2 + $0x68] sm:$0x1] }
 0x322   : > { %v7059_v13 = vrot.slane %v7057_v61, 5  ;;  %v7065_v19 = vrot.slane %v7063_v34, 5  ;;  %v7189_v32 = vmax.bf16 %v7042_v23, %v12837_v7  ;;  %v7069_v24 = vrot.slane %v7067_v3, 4  ;;  %v6691_v61 = vld [vmem:[#allocation3 + $0xc8] sm:$0x1] }
 0x323   : > { %v7052_v10 = vsel %vm10709_vm8, %v7047_v47, %v7051_v9  ;;  %v7075_v30 = vrot.slane %v7073_v0, 5  ;;  %v8889_v21 = vrot.slane %v7212_v20, 9  ;;  %v7376_v54 = vrot.slane %v6670_v37, 5  ;;  %v7213_v47 = vld [vmem:[#allocation3 + $0xc0] sm:$0xe] }
 0x324   : > { %v7190_v5 = vmax.bf16 %v7052_v10, %v6668_v56  ;;  %v7060_v49 = vor.u32 %v7059_v13, %v7056_v46  ;;  %v12877_v48 = vmax.bf16 %v7370_v2, %v7189_v32  ;;  %v7070_v50 = vor.u32 %v7069_v24, %v7065_v19  ;;  %v10041_v2 = vld [vmem:[#allocation2 + $0x64] sm:$0xf] }
 0x325   : > { %v7379_v59 = vrot.slane %v6690_v40, 5  ;;  %v8827_v22 = vrot.slane %v5662_v36, 9  ;;  %v7377_v52 = vsel %vm10939_vm0, %v8889_v21, %v7376_v54  ;;  %v7378_v12 = vrot.slane %v7376_v54, 4 }
 0x326   : > { %v12879_v60 = vmax.bf16 %v7373_v8, %v7190_v5  ;;  %v7061_v39 = vrot.slane %v7060_v49, 4  ;;  %v7523_v7 = vmax.bf16 %v7491_v57, %v12877_v48  ;;  %v7071_v35 = vrot.slane %v7070_v50, 4  ;;  %v520_v50 = vld [vmem:[#allocation3 + $0xd4] sm:$0x1] }
 0x327   : > { %v7493_v56 = vmax.bf16 %v12877_v48, %v12846_v62  ;;  %v5758_v41 = vrot.slane %v10039_v45, 5  ;;  %v7380_v31 = vsel %vm10939_vm0, %v7378_v12, %v7379_v59  ;;  %v5761_v57 = vrot.slane %v10040_v29, 5  ;;  %v12916_v59 = vld [vmem:[#allocation3 + $0xd0] sm:$0xf] }
 0x328   : > { %v7524_v38 = vmax.bf16 %v7492_v43, %v12879_v60  ;;  %v7066_v11 = vsel %vm10709_vm8, %v7061_v39, %v7065_v19  ;;  %v7494_v16 = vmax.bf16 %v12879_v60, %v12849_v63  ;;  %v7076_v28 = vsel %vm10709_vm8, %v7071_v35, %v7075_v30  ;;  %v465_v30 = vld [vmem:[#allocation3 + $0xcc] sm:$0x1] }
 0x329   : > { %v7191_v14 = vmax.bf16 %v7066_v11, %v6669_v53  ;;  %v5759_v62 = vsel %vm10939_vm0, %v8827_v22, %v5758_v41  ;;  %v5760_v58 = vrot.slane %v5758_v41, 4  ;;  %v7192_v9 = vmax.bf16 %v7076_v28, %v6670_v37 }
 0x32a   : > { %v8905_v33 = vcombine.low %v7523_v7, %v7524_v38  ;;  %v8828_v40 = vrot.slane %v5663_v42, 9  ;;  %v5765_v63 = vrot.slane %v10041_v2, 5  ;;  %v5768_v43 = vrot.slane %v10042_v51, 5 }
 0x32b   : > { %v12899_v1 = vmax.bf16 %v7377_v52, %v7191_v14  ;;  %v7078_v4 = vshrl.u32 %v6671_v27, 16  ;;  %v12902_v53 = vmax.bf16 %v7380_v31, %v7192_v9  ;;  %v5762_v55 = vsel %vm10939_vm0, %v5760_v58, %v5761_v57  ;;  %v5664_v31 = vld [vmem:[#allocation2 + $0x6c] sm:$0xe]  ;;  %v10043_v58 = vld [vmem:[#allocation2 + $0x70] sm:$0xf] }
 0x32c   : > { %9643 = vmatprep.mubr.msk.bf16.mxu0 %vm650_vm5, %v8905_v33  ;;  %v7081_v34 = vshll.u32 %v6671_v27, 16  ;;  %v7087_v37 = vshll.u32 %v12897_v44, 16  ;;  %v8845_v3 = vcombine.low %v5759_v62, %v5762_v55  ;;  %v5766_v0 = vsel %vm10939_vm0, %v8828_v40, %v5765_v63  ;;  %v10044_v9 = vld [vmem:[#allocation2 + $0x74] sm:$0x1]  ;;  %v5665_v57 = vld [vmem:[#allocation2 + $0x78] sm:$0xe] }
 0x32d   : > { %v7525_v8 = vmax.bf16 %v7493_v56, %v12899_v1  ;;  %v5767_v20 = vrot.slane %v5765_v63, 4  ;;  %v7526_v23 = vmax.bf16 %v7494_v16, %v12902_v53  ;;  %v7080_v46 = vrot.slane %v7078_v4, 4 }
 0x32e   : > { %v7083_v13 = vrot.slane %v7081_v34, 5  ;;  %v7089_v19 = vrot.slane %v7087_v37, 5  ;;  %9594 = vmatmul.mubr.msk.bf16.gmra.mrb[24].mxu1 %vm2014_vm9, %v8845_v3  ;;  %v7091_v10 = vshrl.u32 %v12897_v44, 16  ;;  %v7097_v32 = vshll.u32 %v6691_v61, 16  ;;  %v10045_v37 = vld [vmem:[#allocation2 + $0x7c] sm:$0xf] }
 0x32f   : > { %v5769_v36 = vsel %vm10939_vm0, %v5767_v20, %v5768_v43  ;;  %v8890_v24 = vrot.slane %v7213_v47, 9  ;;  %v8906_v5 = vcombine.low %v7525_v8, %v7526_v23  ;;  %v7383_v54 = vrot.slane %v12897_v44, 5  ;;  %v5666_v20 = vld [vmem:[#allocation2 + $0x84] sm:$0xe] }
 0x330   : > { %v8846_v49 = vcombine.low %v5766_v0, %v5769_v36  ;;  %v7084_v21 = vor.u32 %v7083_v13, %v7080_v46  ;;  %v7093_v22 = vrot.slane %v7091_v10, 4  ;;  %v7099_v52 = vrot.slane %v7097_v32, 5 }
 0x331   : > { %9644 = vmatmul.mubr.msk.bf16.gmra.mrb[88].mxu0 %vm650_vm5, %v8906_v5  ;;  %v7385_v12 = vrot.slane %v7383_v54, 4  ;;  %v7386_v7 = vrot.slane %v6691_v61, 5  ;;  %v466_v56 = vsel %vm10127_vm3, 4286644096, %v465_v30  ;;  %v521_v45 = vsel %vm10135_vm4, 4286644096, %v520_v50 }
 0x332   : > { %9597 = vmatprep.mubr.msk.bf16.mxu1 %vm2014_vm9, %v8846_v49  ;;  %v7085_v39 = vrot.slane %v7084_v21, 4  ;;  %v7094_v35 = vor.u32 %v7093_v22, %v7089_v19  ;;  %v7111_v41 = vshll.u32 %v12916_v59, 16  ;;  %v7384_v38 = vsel %vm10939_vm0, %v8890_v24, %v7383_v54  ;;  %467 = vst [vmem:[#allocation3 + $0xcc] sm:$0x1] %v466_v56  ;;  %522 = vst [vmem:[#allocation3 + $0xd4] sm:$0x1] %v521_v45 }
 0x333   : > { %v7115_v11 = vshrl.u32 %v12916_v59, 16  ;;  %v7390_v18 = vrot.slane %v12916_v59, 5  ;;  %v7495_v14 = vmax.bf16 %v12899_v1, %v12877_v48  ;;  %v5772_v33 = vrot.slane %v10043_v58, 5  ;;  %v7214_v49 = vld [vmem:[#allocation3 + $0xcc] sm:$0xe] }
 0x334   : > { %v7090_v42 = vsel %vm10709_vm8, %v7085_v39, %v7089_v19  ;;  %v7095_v16 = vrot.slane %v7094_v35, 4  ;;  %v12930_v17 = vrot.slane %v7111_v41, 5  ;;  %v5775_v29 = vrot.slane %v10044_v9, 5  ;;  %v10047_v22 = vld [vmem:[#allocation2 + $0x88] sm:$0xf] }
 0x335   : > { %v7193_v28 = vmax.bf16 %v7090_v42, %v6671_v27  ;;  %v7117_v62 = vrot.slane %v7115_v11, 4  ;;  %v7387_v2 = vsel %vm10939_vm0, %v7385_v12, %v7386_v7  ;;  %v8829_v63 = vrot.slane %v5664_v31, 9  ;;  %v5667_v56 = vld [vmem:[#allocation2 + $0x90] sm:$0xe]  ;;  %v10049_v58 = vld [vmem:[#allocation2 + $0x94] sm:$0xf] }
 0x336   : > { %v7100_v40 = vsel %vm10709_vm8, %v7095_v16, %v7099_v52  ;;  %v7496_v48 = vmax.bf16 %v12902_v53, %v12879_v60  ;;  %v5774_v4 = vrot.slane %v5772_v33, 4  ;;  %v7392_v55 = vrot.slane %v7390_v18, 4  ;;  %v10046_v60 = vld [vmem:[#allocation2 + $0x80] sm:$0x1]  ;;  %v10048_v16 = vld [vmem:[#allocation2 + $0x8c] sm:$0x1] }
 0x337   : > { %v12939_v27 = vmax.bf16 %v7384_v38, %v7193_v28  ;;  %v7194_v51 = vmax.bf16 %v7100_v40, %v12897_v44  ;;  %v7118_v43 = vor.u32 %v7117_v62, %v12930_v17  ;;  %v5773_v61 = vsel %vm10939_vm0, %v8829_v63, %v5772_v33  ;;  %v10050_v9 = vld [vmem:[#allocation2 + $0x98] sm:$0x1]  ;;  %v10051_v63 = vld [vmem:[#allocation2 + $0xa0] sm:$0xf] }
 0x338   : > { %v8830_v34 = vrot.slane %v5665_v57, 9  ;;  %v5779_v47 = vrot.slane %v10045_v37, 5  ;;  %v5776_v44 = vsel %vm10939_vm0, %v5774_v4, %v5775_v29  ;;  %v5782_v0 = vrot.slane %v10046_v60, 5 }
 0x339   : > { %v12949_v8 = vmax.bf16 %v7387_v2, %v7194_v51  ;;  %v7527_v3 = vmax.bf16 %v7495_v14, %v12939_v27  ;;  %v6673_v23 = vld [vmem:[#allocation3 + $0xcc] sm:$0xf]  ;;  %v6692_v46 = vld [vmem:[#allocation3 + $0xd4] sm:$0x1]  ;;  %v7119_v13 = vrot.slane %v7118_v43, 4  ;;  %v8847_v19 = vcombine.low %v5773_v61, %v5776_v44 }
 0x33a   : > { %v5780_v36 = vsel %vm10939_vm0, %v8830_v34, %v5779_v47  ;;  %v5781_v10 = vrot.slane %v5779_v47, 4  ;;  %v7102_v24 = vshrl.u32 %v6673_v23, 16  ;;  %v7105_v30 = vshll.u32 %v6673_v23, 16  ;;  %v10052_v47 = vld [vmem:[#allocation2 + $0xa4] sm:$0x1] }
 0x33b   : > { %v7528_v32 = vmax.bf16 %v7496_v48, %v12949_v8  ;;  %v7121_v5 = vshll.u32 %v6692_v46, 16  ;;  %v7393_v21 = vrot.slane %v6692_v46, 5  ;;  %9598 = vmatmul.mubr.msk.bf16.gmra.mrb[28].mxu1 %vm2014_vm9, %v8847_v19  ;;  %v8831_v50 = vrot.slane %v5666_v20, 9  ;;  %v10054_v20 = vld [vmem:[#allocation2 + $0xb0] sm:$0x1] }
 0x33c   : > { %v5783_v54 = vsel %vm10939_vm0, %v5781_v10, %v5782_v0  ;;  %v5786_v39 = vrot.slane %v10047_v22, 5  ;;  %v7104_v12 = vrot.slane %v7102_v24, 4  ;;  %v7107_v7 = vrot.slane %v7105_v30, 5  ;;  %v10055_v30 = vld [vmem:[#allocation2 + $0xb8] sm:$0xf] }
 0x33d   : > { %v8907_v52 = vcombine.low %v7527_v3, %v7528_v32  ;;  %v7123_v35 = vrot.slane %v7121_v5, 5  ;;  %v8891_v45 = vrot.slane %v7214_v49, 9  ;;  %v7394_v41 = vsel %vm10939_vm0, %v7392_v55, %v7393_v21 }
 0x33e   : > { %v8848_v42 = vcombine.low %v5780_v36, %v5783_v54  ;;  %v7108_v38 = vor.u32 %v7107_v7, %v7104_v12  ;;  %v5788_v31 = vrot.slane %v5786_v39, 4  ;;  %v5789_v28 = vrot.slane %v10048_v16, 5  ;;  %v5670_v7 = vld [vmem:[#allocation2 + $0xb4] sm:$0xe] }
 0x33f   : > { %9647 = vmatprep.mubr.msk.bf16.mxu0 %vm650_vm5, %v8907_v52  ;;  %v7124_v11 = vsel %vm10709_vm8, %v7119_v13, %v7123_v35  ;;  %v8832_v62 = vrot.slane %v5667_v56, 9  ;;  %v5793_v33 = vrot.slane %v10049_v58, 5  ;;  %v5796_v29 = vrot.slane %v10050_v9, 5  ;;  %v10057_v52 = vld [vmem:[#allocation2 + $0xbc] sm:$0x1] }
 0x340   : > { %v7196_v14 = vmax.bf16 %v7124_v11, %v12916_v59  ;;  %9601 = vmatprep.mubr.msk.bf16.mxu1 %vm2014_vm9, %v8848_v42  ;;  %v7109_v57 = vrot.slane %v7108_v38, 4  ;;  %v5787_v40 = vsel %vm10939_vm0, %v8831_v50, %v5786_v39  ;;  %v5790_v2 = vsel %vm10939_vm0, %v5788_v31, %v5789_v28  ;;  %v10056_v50 = vld [vmem:[#allocation2 + $0xc4] sm:$0xf]  ;;  %v10058_v35 = vld [vmem:[#allocation2 + $0xc8] sm:$0x1] }
 0x341   : > { %v5800_v51 = vrot.slane %v10051_v63, 5  ;;  %v7498_v43 = vmax.bf16 %v12949_v8, %v12902_v53  ;;  %v8849_v4 = vcombine.low %v5787_v40, %v5790_v2  ;;  %v5795_v55 = vrot.slane %v5793_v33, 4  ;;  %v10053_v8 = vld [vmem:[#allocation2 + $0xac] sm:$0xf] }
 0x342   : > { %v7466_v48 = vmax.bf16 %v7394_v41, %v7196_v14  ;;  %v7114_v61 = vsel %vm10709_vm8, %v7109_v57, %v12930_v17  ;;  %v7391_v34 = vsel %vm10939_vm0, %v8891_v45, %v7390_v18  ;;  %v7497_v37 = vmax.bf16 %v12939_v27, %v12899_v1  ;;  %v5668_v17 = vld [vmem:[#allocation2 + $0x9c] sm:$0xe]  ;;  %v5669_v18 = vld [vmem:[#allocation2 + $0xa8] sm:$0xe]  ;;  %v5671_v41 = vld [vmem:[#allocation2 + $0xc0] sm:$0xe] }
 0x343   : > { %v5803_v3 = vrot.slane %v10052_v47, 5  ;;  %v7195_v44 = vmax.bf16 %v7114_v61, %v6673_v23  ;;  %9602 = vmatmul.mubr.msk.bf16.gmra.mrb[0].mxu1 %vm2014_vm9, %v8849_v4  ;;  %v5794_v53 = vsel %vm10939_vm0, %v8832_v62, %v5793_v33  ;;  %v5797_v6 = vsel %vm10939_vm0, %v5795_v55, %v5796_v29  ;;  %v5672_v11 = vld [vmem:[#allocation2 + $0xcc] sm:$0xe] }
 0x344   : > { %v5807_v59 = vrot.slane %v10053_v8, 5  ;;  %v8850_v60 = vcombine.low %v5794_v53, %v5797_v6  ;;  %v5802_v0 = vrot.slane %v5800_v51, 4  ;;  %v5810_v46 = vrot.slane %v10054_v20, 5 }
 0x345   : > { %v7465_v1 = vmax.bf16 %v7391_v34, %v7195_v44  ;;  %v7530_v27 = vmax.bf16 %v7498_v43, %v7466_v48  ;;  %v8833_v23 = vrot.slane %v5668_v17, 9  ;;  %v8834_v10 = vrot.slane %v5669_v18, 9 }
 0x346   : > { %v5809_v13 = vrot.slane %v5807_v59, 4  ;;  %9605 = vmatprep.mubr.msk.bf16.mxu1 %vm2014_vm9, %v8850_v60  ;;  %v5804_v19 = vsel %vm10939_vm0, %v5802_v0, %v5803_v3  ;;  %v5814_v5 = vrot.slane %v10055_v30, 5  ;;  %v5821_v22 = vrot.slane %v10056_v50, 5  ;;  %v13083_v30 = vld [vmem:[%s13570_s6] ss:$0 sm:$0xff] }
 0x347   : > { %v7529_v36 = vmax.bf16 %v7497_v37, %v7465_v1  ;;  %v5801_v24 = vsel %vm10939_vm0, %v8833_v23, %v5800_v51  ;;  %v5808_v54 = vsel %vm10939_vm0, %v8834_v10, %v5807_v59  ;;  %v5817_v12 = vrot.slane %v10057_v52, 5 }
 0x348   : > { %v5811_v32 = vsel %vm10939_vm0, %v5809_v13, %v5810_v46  ;;  %v8851_v21 = vcombine.low %v5801_v24, %v5804_v19  ;;  %v5824_v56 = vrot.slane %v10058_v35, 5  ;;  %v5816_v45 = vrot.slane %v5814_v5, 4 }
 0x349   : > { %v8908_v49 = vcombine.low %v7529_v36, %v7530_v27  ;;  %v8852_v39 = vcombine.low %v5808_v54, %v5811_v32  ;;  %v5828_v42 = vrot.slane %v12716_v26, 5  ;;  %v5823_v38 = vrot.slane %v5821_v22, 4 }
 0x34a   : > { %v8835_v31 = vrot.slane %v5670_v7, 9  ;;  %v5818_v16 = vsel %vm10939_vm0, %v5816_v45, %v5817_v12  ;;  %v8836_v28 = vrot.slane %v5671_v41, 9  ;;  %v8837_v58 = vrot.slane %v5672_v11, 9 }
 0x34b   : > { %9648 = vmatmul.mubr.msk.bf16.gmra.mrb[92].mxu0 %vm650_vm5, %v8908_v49  ;;  %9606 = vmatmul.mubr.msk.bf16.gmra.mrb[4].mxu1 %vm2014_vm9, %v8851_v21  ;;  %v5825_v14 = vsel %vm10939_vm0, %v5823_v38, %v5824_v56  ;;  %v5830_v33 = vrot.slane %v5828_v42, 4  ;;  %v5831_v9 = vrot.slane %v12746_v15, 5  ;;  %vm8124_vm2 = vcmask 257088  }
 0x34c   : > { %9609 = vmatprep.mubr.msk.bf16.mxu1 %vm2014_vm9, %v8852_v39  ;;  %v5815_v62 = vsel %vm10939_vm0, %v8835_v31, %v5814_v5  ;;  %v5822_v26 = vsel %vm10939_vm0, %v8836_v28, %v5821_v22  ;;  %v5829_v40 = vsel %vm10939_vm0, %v8837_v58, %v5828_v42  ;;  %vm8349_vm3 = vcmask 322816  }
 0x34d   : > { %v8853_v29 = vcombine.low %v5815_v62, %v5818_v16  ;;  %v8854_v57 = vcombine.low %v5822_v26, %v5825_v14  ;;  %v5832_v2 = vsel %vm10939_vm0, %v5830_v33, %v5831_v9 }
 0x34e   : > { %v8855_v63 = vcombine.low %v5829_v40, %v5832_v2 }
 0x353   : > { %9610 = vmatmul.mubr.msk.bf16.gmra.mrb[8].mxu1 %vm2014_vm9, %v8853_v29 }
 0x354   : > { %9613 = vmatprep.mubr.msk.bf16.mxu1 %vm2014_vm9, %v8854_v57 }
 0x35b   : > { %9614 = vmatmul.mubr.msk.bf16.gmra.mrb[12].mxu1 %vm2014_vm9, %v8855_v63 }
 0x36c   : > { %v13016_v51 = vpop.f32.mrb[48].mxu0 }
 0x36d   : > { %v13018_v15 = vpop.f32.mrb[49].mxu0 }
 0x36e   : > { %v13020_v48 = vpop.f32.mrb[50].mxu0 }
 0x36f   : > { %v13022_v43 = vpop.f32.mrb[51].mxu0 }
 0x374   : > { %v13024_v4 = vpop.f32.mrb[52].mxu0 }
 0x375   : > { %v13026_v55 = vpop.f32.mrb[53].mxu0 }
 0x376   : > { %v13028_v61 = vpop.f32.mrb[54].mxu0 }
 0x377   : > { %v13030_v34 = vpop.f32.mrb[55].mxu0 }
 0x37d   : > { %v13032_v25 = vpop.f32.mrb[56].mxu0 }
 0x37e   : > { %v13034_v37 = vpop.f32.mrb[57].mxu0 }
 0x37f   : > { %v13036_v47 = vpop.f32.mrb[58].mxu0 }
 0x380   : > { %v13038_v3 = vpop.f32.mrb[59].mxu0 }
 0x385   : > { %v13040_v44 = vpop.f32.mrb[60].mxu0 }
 0x386   : > { %v13042_v53 = vpop.f32.mrb[61].mxu0 }
 0x387   : > { %v13044_v6 = vpop.f32.mrb[62].mxu0 }
 0x388   : > { %v13046_v17 = vpop.f32.mrb[63].mxu0 }
 0x38d   : > { %v13048_v8 = vpop.f32.mrb[32].mxu0 }
 0x38e   : > { %v13050_v59 = vpop.f32.mrb[33].mxu0 }
 0x38f   : > { %v13052_v60 = vpop.f32.mrb[34].mxu0 }
 0x390   : > { %v13054_v0 = vpop.f32.mrb[35].mxu0 }
 0x395   : > { %v13056_v18 = vpop.f32.mrb[36].mxu0 }
 0x396   : > { %v13058_v20 = vpop.f32.mrb[37].mxu0 }
 0x397   : > { %v13060_v46 = vpop.f32.mrb[38].mxu0 }
 0x398   : > { %v13062_v1 = vpop.f32.mrb[39].mxu0 }
 0x39d   : > { %v13064_v27 = vpop.f32.mrb[40].mxu0 }
 0x39e   : > { %v13066_v13 = vpop.f32.mrb[41].mxu0 }
 0x39f   : > { %v13068_v23 = vpop.f32.mrb[42].mxu0 }
 0x3a0   : > { %v13070_v19 = vpop.f32.mrb[43].mxu0 }
 0x3a5   : > { %v13072_v36 = vpop.f32.mrb[44].mxu0 }
 0x3a6   : > { %v13074_v10 = vpop.f32.mrb[45].mxu0 }
 0x3a7   : > { %v13076_v32 = vpop.f32.mrb[46].mxu0 }
 0x3a8   : > { %v13078_v24 = vpop.f32.mrb[47].mxu0 }
 0x3ad   : > { %v9621_v5 = vpop.f32.mrb[64].mxu0 }
 0x3ae   : > { %v7717_v49 = vadd.f32 %v9621_v5, %v13083_v30  ;;  %v7708_v21 = vpop.f32.mrb[65].mxu0 }
 0x3af   : > { %v7709_v54 = vadd.f32 %v13083_v30, %v7708_v21  ;;  %v9622_v50 = vpop.f32.mrb[66].mxu0 }
 0x3b0   : > { %v7837_v22 = vmax.f32 %v7717_v49, 0.0  ;;  %v7720_v39 = vadd.f32 %v9622_v50, %v13083_v30  ;;  %v7711_v52 = vpop.f32.mrb[67].mxu0 }
 0x3b1   : > { %v7712_v12 = vadd.f32 %v13083_v30, %v7711_v52  ;;  %v7835_v35 = vmax.f32 %v7709_v54, 0.0 }
 0x3b2   : > { %v9060_v7 = vpack.c.bf16 %v7837_v22, %v7837_v22  ;;  %v7838_v56 = vmax.f32 %v7720_v39, 0.0 }
 0x3b3   : > { %v7836_v41 = vmax.f32 %v7712_v12, 0.0  ;;  %v9058_v38 = vpack.c.bf16 %v7835_v35, %v7835_v35 }
 0x3b4   : > { %v9061_v45 = vpack.c.bf16 %v7838_v56, %v7838_v56  ;;  %8257 = vrot.lane.b32.xlu0 %v9060_v7, %s10070_s20 }
 0x3b5   : > { %v9625_v42 = vpop.f32.mrb[68].mxu0  ;;  %v9059_v14 = vpack.c.bf16 %v7836_v41, %v7836_v41 }
 0x3b6   : > { %v7733_v11 = vadd.f32 %v9625_v42, %v13083_v30  ;;  %8259 = vrot.lane.b32.xlu1 %v9061_v45, %s10070_s20  ;;  %v7724_v31 = vpop.f32.mrb[69].mxu0 }
 0x3b7   : > { %v7725_v16 = vadd.f32 %v13083_v30, %v7724_v31  ;;  %v9626_v28 = vpop.f32.mrb[70].mxu0 }
 0x3b8   : > { %v7841_v62 = vmax.f32 %v7733_v11, 0.0  ;;  %v7736_v58 = vadd.f32 %v9626_v28, %v13083_v30  ;;  %v7727_v33 = vpop.f32.mrb[71].mxu0  ;;  %8253 = vrot.lane.b32.xlu0 %v9058_v38, %s10070_s20 }
 0x3b9   : > { %v7728_v9 = vadd.f32 %v13083_v30, %v7727_v33  ;;  %v7839_v26 = vmax.f32 %v7725_v16, 0.0 }
 0x3ba   : > { %v9064_v29 = vpack.c.bf16 %v7841_v62, %v7841_v62  ;;  %v7842_v57 = vmax.f32 %v7736_v58, 0.0  ;;  %8255 = vrot.lane.b32.xlu1 %v9059_v14, %s10070_s20 }
 0x3bb   : > { %v7840_v2 = vmax.f32 %v7728_v9, 0.0  ;;  %v9062_v5 = vpack.c.bf16 %v7839_v26, %v7839_v26 }
 0x3bc   : > { %v9065_v40 = vpack.c.bf16 %v7842_v57, %v7842_v57  ;;  %8265 = vrot.lane.b32.xlu0 %v9064_v29, %s10070_s20 }
 0x3bd   : > { %v9629_v63 = vpop.f32.mrb[72].mxu0  ;;  %v9063_v22 = vpack.c.bf16 %v7840_v2, %v7840_v2 }
 0x3be   : > { %v7749_v49 = vadd.f32 %v9629_v63, %v13083_v30  ;;  %v7740_v21 = vpop.f32.mrb[73].mxu0  ;;  %8267 = vrot.lane.b32.xlu1 %v9065_v40, %s10070_s20 }
 0x3bf   : > { %v7741_v54 = vadd.f32 %v13083_v30, %v7740_v21  ;;  %v9630_v50 = vpop.f32.mrb[74].mxu0 }
 0x3c0   : > { %v7845_v39 = vmax.f32 %v7749_v49, 0.0  ;;  %v7752_v52 = vadd.f32 %v9630_v50, %v13083_v30  ;;  %v7743_v12 = vpop.f32.mrb[75].mxu0  ;;  %8261 = vrot.lane.b32.xlu0 %v9062_v5, %s10070_s20 }
 0x3c1   : > { %v7744_v7 = vadd.f32 %v13083_v30, %v7743_v12  ;;  %v7843_v56 = vmax.f32 %v7741_v54, 0.0 }
 0x3c2   : > { %v9068_v35 = vpack.c.bf16 %v7845_v39, %v7845_v39  ;;  %v7846_v45 = vmax.f32 %v7752_v52, 0.0  ;;  %8263 = vrot.lane.b32.xlu1 %v9063_v22, %s10070_s20 }
 0x3c3   : > { %v7844_v42 = vmax.f32 %v7744_v7, 0.0  ;;  %v9066_v38 = vpack.c.bf16 %v7843_v56, %v7843_v56 }
 0x3c4   : > { %v9069_v41 = vpack.c.bf16 %v7846_v45, %v7846_v45  ;;  %8273 = vrot.lane.b32.xlu0 %v9068_v35, %s10070_s20 }
 0x3c5   : > { %v9067_v11 = vpack.c.bf16 %v7844_v42, %v7844_v42 }
 0x3c6   : > { %8275 = vrot.lane.b32.xlu1 %v9069_v41, %s10070_s20 }
 0x3c8   : > { %8269 = vrot.lane.b32.xlu0 %v9066_v38, %s10070_s20 }
 0x3ca   : > { %8271 = vrot.lane.b32.xlu1 %v9067_v11, %s10070_s20  ;;  %v9633_v31 = vpop.f32.mrb[76].mxu0 }
 0x3cb   : > { %v7765_v16 = vadd.f32 %v9633_v31, %v13083_v30  ;;  %v7756_v28 = vpop.f32.mrb[77].mxu0 }
 0x3cc   : > { %v7757_v14 = vadd.f32 %v13083_v30, %v7756_v28  ;;  %v9634_v62 = vpop.f32.mrb[78].mxu0 }
 0x3cd   : > { %v7849_v58 = vmax.f32 %v7765_v16, 0.0  ;;  %v7768_v33 = vadd.f32 %v9634_v62, %v13083_v30  ;;  %v7759_v9 = vpop.f32.mrb[79].mxu0 }
 0x3ce   : > { %v7760_v29 = vadd.f32 %v13083_v30, %v7759_v9  ;;  %v7847_v57 = vmax.f32 %v7757_v14, 0.0 }
 0x3cf   : > { %v9072_v26 = vpack.c.bf16 %v7849_v58, %v7849_v58  ;;  %v7850_v40 = vmax.f32 %v7768_v33, 0.0 }
 0x3d0   : > { %v7848_v63 = vmax.f32 %v7760_v29, 0.0  ;;  %v9070_v5 = vpack.c.bf16 %v7847_v57, %v7847_v57 }
 0x3d1   : > { %v9073_v2 = vpack.c.bf16 %v7850_v40, %v7850_v40  ;;  %8281 = vrot.lane.b32.xlu0 %v9072_v26, %s10070_s20 }
 0x3d2   : > { %v9071_v49 = vpack.c.bf16 %v7848_v63, %v7848_v63 }
 0x3d3   : > { %8283 = vrot.lane.b32.xlu1 %v9073_v2, %s10070_s20 }
 0x3d5   : > { %8277 = vrot.lane.b32.xlu0 %v9070_v5, %s10070_s20 }
 0x3d7   : > { %8279 = vrot.lane.b32.xlu1 %v9071_v49, %s10070_s20 }
 0x3dc   : > { %v9587_v21 = vpop.f32.mrb[16].mxu1 }
 0x3dd   : > { %v13118_v54 = vadd.f32 %v9587_v21, %v13048_v8  ;;  %v5974_v50 = vpop.f32.mrb[17].mxu1 }
 0x3de   : > { %v13121_v22 = vadd.f32 %v5974_v50, %v13050_v59  ;;  %v9588_v39 = vpop.f32.mrb[18].mxu1 }
 0x3df   : > { %v13124_v52 = vadd.f32 %v9588_v39, %v13052_v60  ;;  %v5977_v12 = vpop.f32.mrb[19].mxu1  ;;  %v9637_v7 = vpop.f32.mrb[80].mxu0 }
 0x3e0   : > { %v13127_v35 = vadd.f32 %v5977_v12, %v13054_v0  ;;  %v7781_v56 = vadd.f32 %v9637_v7, %v13083_v30  ;;  %v7772_v45 = vpop.f32.mrb[81].mxu0 }
 0x3e1   : > { %v7773_v41 = vadd.f32 %v13083_v30, %v7772_v45  ;;  %v9638_v8 = vpop.f32.mrb[82].mxu0 }
 0x3e2   : > { %v7853_v42 = vmax.f32 %v7781_v56, 0.0  ;;  %v7784_v38 = vadd.f32 %v9638_v8, %v13083_v30  ;;  %v7775_v59 = vpop.f32.mrb[83].mxu0 }
 0x3e3   : > { %v7776_v11 = vadd.f32 %v13083_v30, %v7775_v59  ;;  %v7851_v60 = vmax.f32 %v7773_v41, 0.0 }
 0x3e4   : > { %v9076_v31 = vpack.c.bf16 %v7853_v42, %v7853_v42  ;;  %v7854_v16 = vmax.f32 %v7784_v38, 0.0 }
 0x3e5   : > { %v7852_v14 = vmax.f32 %v7776_v11, 0.0  ;;  %v9074_v0 = vpack.c.bf16 %v7851_v60, %v7851_v60 }
 0x3e6   : > { %v9077_v28 = vpack.c.bf16 %v7854_v16, %v7854_v16  ;;  %8289 = vrot.lane.b32.xlu0 %v9076_v31, %s10070_s20 }
 0x3e7   : > { %v9075_v62 = vpack.c.bf16 %v7852_v14, %v7852_v14 }
 0x3e8   : > { %8291 = vrot.lane.b32.xlu1 %v9077_v28, %s10070_s20 }
 0x3ea   : > { %8285 = vrot.lane.b32.xlu0 %v9074_v0, %s10070_s20 }
 0x3ec   : > { %8287 = vrot.lane.b32.xlu1 %v9075_v62, %s10070_s20 }
 0x3ef   : > { %v9591_v58 = vpop.f32.mrb[20].mxu1 }
 0x3f0   : > { %v13138_v33 = vadd.f32 %v9591_v58, %v13056_v18  ;;  %v5990_v9 = vpop.f32.mrb[21].mxu1 }
 0x3f1   : > { %v13141_v29 = vadd.f32 %v5990_v9, %v13058_v20  ;;  %v9592_v26 = vpop.f32.mrb[22].mxu1  ;;  %v9641_v57 = vpop.f32.mrb[84].mxu0 }
 0x3f2   : > { %v13144_v40 = vadd.f32 %v9592_v26, %v13060_v46  ;;  %v5993_v2 = vpop.f32.mrb[23].mxu1  ;;  %v7797_v63 = vadd.f32 %v9641_v57, %v13083_v30  ;;  %v7788_v5 = vpop.f32.mrb[85].mxu0 }
 0x3f3   : > { %v13148_v49 = vadd.f32 %v5993_v2, %v13062_v1  ;;  %v7789_v21 = vadd.f32 %v13083_v30, %v7788_v5  ;;  %v9642_v18 = vpop.f32.mrb[86].mxu0 }
 0x3f4   : > { %v7857_v50 = vmax.f32 %v7797_v63, 0.0  ;;  %v7800_v39 = vadd.f32 %v9642_v18, %v13083_v30  ;;  %v7791_v20 = vpop.f32.mrb[87].mxu0 }
 0x3f5   : > { %v7792_v12 = vadd.f32 %v13083_v30, %v7791_v20  ;;  %v7855_v56 = vmax.f32 %v7789_v21, 0.0 }
 0x3f6   : > { %v9080_v7 = vpack.c.bf16 %v7857_v50, %v7857_v50  ;;  %v7858_v46 = vmax.f32 %v7800_v39, 0.0 }
 0x3f7   : > { %v7856_v41 = vmax.f32 %v7792_v12, 0.0  ;;  %v9078_v8 = vpack.c.bf16 %v7855_v56, %v7855_v56 }
 0x3f8   : > { %v9081_v45 = vpack.c.bf16 %v7858_v46, %v7858_v46  ;;  %8297 = vrot.lane.b32.xlu0 %v9080_v7, %s10070_s20 }
 0x3f9   : > { %v9079_v1 = vpack.c.bf16 %v7856_v41, %v7856_v41 }
 0x3fa   : > { %8299 = vrot.lane.b32.xlu1 %v9081_v45, %s10070_s20 }
 0x3fc   : > { %8293 = vrot.lane.b32.xlu0 %v9078_v8, %s10070_s20 }
 0x3fe   : > { %8295 = vrot.lane.b32.xlu1 %v9079_v1, %s10070_s20 }
 0x401   : > { %v9595_v42 = vpop.f32.mrb[24].mxu1 }
 0x402   : > { %v13158_v38 = vadd.f32 %v9595_v42, %v13064_v27  ;;  %v6006_v59 = vpop.f32.mrb[25].mxu1 }
 0x403   : > { %v13161_v11 = vadd.f32 %v6006_v59, %v13066_v13  ;;  %v9596_v31 = vpop.f32.mrb[26].mxu1 }
 0x404   : > { %v9645_v60 = vpop.f32.mrb[88].mxu0  ;;  %v13164_v16 = vadd.f32 %v9596_v31, %v13068_v23  ;;  %v6009_v28 = vpop.f32.mrb[27].mxu1 }
 0x405   : > { %v7813_v14 = vadd.f32 %v9645_v60, %v13083_v30  ;;  %v7804_v0 = vpop.f32.mrb[89].mxu0  ;;  %v13168_v62 = vadd.f32 %v6009_v28, %v13070_v19 }
 0x406   : > { %v7805_v58 = vadd.f32 %v13083_v30, %v7804_v0  ;;  %v9646_v27 = vpop.f32.mrb[90].mxu0 }
 0x407   : > { %v7861_v9 = vmax.f32 %v7813_v14, 0.0  ;;  %v7816_v26 = vadd.f32 %v9646_v27, %v13083_v30  ;;  %v7807_v13 = vpop.f32.mrb[91].mxu0 }
 0x408   : > { %v7808_v57 = vadd.f32 %v13083_v30, %v7807_v13  ;;  %v7859_v63 = vmax.f32 %v7805_v58, 0.0 }
 0x409   : > { %v9084_v2 = vpack.c.bf16 %v7861_v9, %v7861_v9  ;;  %v7862_v23 = vmax.f32 %v7816_v26, 0.0 }
 0x40a   : > { %v7860_v21 = vmax.f32 %v7808_v57, 0.0  ;;  %v9082_v18 = vpack.c.bf16 %v7859_v63, %v7859_v63 }
 0x40b   : > { %v9085_v5 = vpack.c.bf16 %v7862_v23, %v7862_v23  ;;  %8305 = vrot.lane.b32.xlu0 %v9084_v2, %s10070_s20 }
 0x40c   : > { %v9083_v19 = vpack.c.bf16 %v7860_v21, %v7860_v21 }
 0x40d   : > { %8307 = vrot.lane.b32.xlu1 %v9085_v5, %s10070_s20 }
 0x40e   : > { %v9599_v50 = vpop.f32.mrb[28].mxu1 }
 0x40f   : > { %8301 = vrot.lane.b32.xlu0 %v9082_v18, %s10070_s20  ;;  %v13177_v39 = vadd.f32 %v9599_v50, %v13072_v36  ;;  %v6022_v20 = vpop.f32.mrb[29].mxu1 }
 0x410   : > { %v13181_v12 = vadd.f32 %v6022_v20, %v13074_v10  ;;  %v9600_v7 = vpop.f32.mrb[30].mxu1 }
 0x411   : > { %8303 = vrot.lane.b32.xlu1 %v9083_v19, %s10070_s20  ;;  %v13184_v56 = vadd.f32 %v9600_v7, %v13076_v32  ;;  %v6025_v46 = vpop.f32.mrb[31].mxu1 }
 0x412   : > { %v13187_v45 = vadd.f32 %v6025_v46, %v13078_v24  ;;  %v13204_v24 = vld [vmem:[%s13568_s4] ss:$0 sm:$0xff] }
 0x413   : > { %v6146_v20 = vadd.f32 %v13138_v33, %v13204_v24 }
 0x416   : > { %v9603_v41 = vpop.f32.mrb[0].mxu1 }
 0x417   : > { %v13190_v8 = vadd.f32 %v9603_v41, %v13016_v51  ;;  %v6038_v36 = vpop.f32.mrb[1].mxu1 }
 0x418   : > { %v13193_v1 = vadd.f32 %v6038_v36, %v13018_v15  ;;  %v9604_v42 = vpop.f32.mrb[2].mxu1 }
 0x419   : > { %v13196_v10 = vadd.f32 %v9604_v42, %v13020_v48  ;;  %v6041_v59 = vpop.f32.mrb[3].mxu1  ;;  %v6142_v48 = vadd.f32 %v13118_v54, %v13204_v24 }
 0x41a   : > { %v13199_v32 = vadd.f32 %v6041_v59, %v13022_v43  ;;  %v6178_v59 = vmax.f32 %v6146_v20, 0.0 }
 0x41b   : > { %v6174_v2 = vmax.f32 %v6142_v48, 0.0 }
 0x41c   : > { %v9032_v48 = vpack.c.bf16 %v6178_v59, %v6178_v59  ;;  %v6157_v59 = vadd.f32 %v13199_v32, %v13204_v24 }
 0x41e   : > { %v13206_v31 = vpop.f32.mrb[92].mxu0  ;;  %v9607_v51 = vpop.f32.mrb[4].mxu1 }
 0x41f   : > { %v7820_v60 = vpop.f32.mrb[93].mxu0  ;;  %v13209_v15 = vadd.f32 %v9607_v51, %v13024_v4  ;;  %v6054_v28 = vpop.f32.mrb[5].mxu1  ;;  %v6143_v4 = vadd.f32 %v13124_v52, %v13204_v24 }
 0x420   : > { %v7821_v14 = vadd.f32 %v13083_v30, %v7820_v60  ;;  %v13214_v43 = vpop.f32.mrb[94].mxu0  ;;  %v13217_v0 = vadd.f32 %v6054_v28, %v13026_v55  ;;  %v9608_v58 = vpop.f32.mrb[6].mxu1  ;;  %v6140_v55 = vadd.f32 %v13121_v22, %v13204_v24  ;;  %v6145_v60 = vadd.f32 %v13148_v49, %v13204_v24 }
 0x421   : > { %v7823_v27 = vpop.f32.mrb[95].mxu0  ;;  %v13220_v9 = vadd.f32 %v9608_v58, %v13028_v61  ;;  %v6057_v26 = vpop.f32.mrb[7].mxu1  ;;  %v6175_v5 = vmax.f32 %v6143_v4, 0.0  ;;  %v6141_v61 = vadd.f32 %v13127_v35, %v13204_v24  ;;  %v6150_v58 = vadd.f32 %v13158_v38, %v13204_v24 }
 0x422   : > { %v7863_v13 = vmax.f32 %v7821_v14, 0.0  ;;  %v7824_v57 = vadd.f32 %v13083_v30, %v7823_v27  ;;  %v13226_v54 = vadd.f32 %v6057_v26, %v13030_v34  ;;  %v9028_v34 = vpack.c.bf16 %v6174_v2, %v6174_v2 }
 0x423   : > { %v6172_v50 = vmax.f32 %v6140_v55, 0.0  ;;  %v9029_v41 = vpack.c.bf16 %v6175_v5, %v6175_v5  ;;  %v6173_v36 = vmax.f32 %v6141_v61, 0.0  ;;  %v6182_v2 = vmax.f32 %v6150_v58, 0.0 }
 0x424   : > { %v9086_v63 = vpack.c.bf16 %v7863_v13, %v7863_v13  ;;  %v7864_v23 = vmax.f32 %v7824_v57, 0.0  ;;  %v6177_v13 = vmax.f32 %v6145_v60, 0.0  ;;  %v6189_v60 = vmax.f32 %v6157_v59, 0.0 }
 0x425   : > { %v9026_v42 = vpack.c.bf16 %v6172_v50, %v6172_v50 }
 0x426   : > { %v9087_v21 = vpack.c.bf16 %v7864_v23, %v7864_v23  ;;  %8309 = vrot.lane.b32.xlu0 %v9086_v63, %s10070_s20  ;;  %v9611_v52 = vpop.f32.mrb[8].mxu1  ;;  %v6149_v63 = vadd.f32 %v13168_v62, %v13204_v24  ;;  %v6152_v62 = vadd.f32 %v13181_v12, %v13204_v24  ;;  %v6159_v12 = vadd.f32 %v13196_v10, %v13204_v24 }
 0x427   : > { %v13234_v18 = vadd.f32 %v9611_v52, %v13032_v25  ;;  %v6070_v19 = vpop.f32.mrb[9].mxu1  ;;  %v6147_v25 = vadd.f32 %v13144_v40, %v13204_v24 }
 0x428   : > { %8311 = vrot.lane.b32.xlu1 %v9087_v21, %s10070_s20  ;;  %v13240_v22 = vadd.f32 %v6070_v19, %v13034_v37  ;;  %v9612_v7 = vpop.f32.mrb[10].mxu1  ;;  %v6144_v37 = vadd.f32 %v13141_v29, %v13204_v24  ;;  %v6181_v61 = vmax.f32 %v6149_v63, 0.0  ;;  %v6184_v20 = vmax.f32 %v6152_v62, 0.0 }
 0x429   : > { %v13243_v35 = vadd.f32 %v9612_v7, %v13036_v47  ;;  %v6073_v46 = vpop.f32.mrb[11].mxu1  ;;  %v9027_v47 = vpack.c.bf16 %v6173_v36, %v6173_v36  ;;  %v6179_v51 = vmax.f32 %v6147_v25, 0.0  ;;  %v13302_v25 = vpop.permute.xlu0 %8257 }
 0x42a   : > { %8032 = vrot.lane.b32.xlu0 %v9028_v34, %s10071_s23  ;;  %v13249_v33 = vadd.f32 %v6073_v46, %v13038_v3  ;;  %v6176_v14 = vmax.f32 %v6144_v37, 0.0  ;;  %v9035_v19 = vpack.c.bf16 %v6181_v61, %v6181_v61  ;;  %v13307_v37 = vpop.permute.xlu1 %8259 }
 0x42b   : > { %v9033_v4 = vpack.c.bf16 %v6179_v51, %v6179_v51  ;;  %v6162_v51 = vadd.f32 %v13209_v15, %v13204_v24  ;;  %v9043_v15 = vpack.c.bf16 %v6189_v60, %v6189_v60 }
 0x42c   : > { %8034 = vrot.lane.b32.xlu1 %v9029_v41, %s10071_s23  ;;  %v9030_v38 = vpack.c.bf16 %v6176_v14, %v6176_v14  ;;  %v9038_v41 = vpack.c.bf16 %v6184_v20, %v6184_v20  ;;  %v6160_v14 = vadd.f32 %v13217_v0, %v13204_v24 }
 0x42e   : > { %8028 = vrot.lane.b32.xlu0 %v9026_v42, %s10071_s23  ;;  %v9615_v40 = vpop.f32.mrb[12].mxu1  ;;  %v13320_v58 = vpop.permute.xlu1 %8255 }
 0x42f   : > { %v13258_v28 = vadd.f32 %v9615_v40, %v13040_v44  ;;  %v6086_v3 = vpop.f32.mrb[13].mxu1  ;;  %v6151_v44 = vadd.f32 %v13164_v16, %v13204_v24  ;;  %v9036_v16 = vpack.c.bf16 %v6182_v2, %v6182_v2  ;;  %v6163_v40 = vadd.f32 %v13220_v9, %v13204_v24 }
 0x430   : > { %8030 = vrot.lane.b32.xlu1 %v9027_v47, %s10071_s23  ;;  %v13264_v29 = vadd.f32 %v6086_v3, %v13042_v53  ;;  %v9616_v27 = vpop.f32.mrb[14].mxu1  ;;  %v6148_v53 = vadd.f32 %v13161_v11, %v13204_v24  ;;  %v6155_v11 = vadd.f32 %v13184_v56, %v13204_v24  ;;  %v6158_v56 = vadd.f32 %v13190_v8, %v13204_v24  ;;  %v13315_v3 = vpop.permute.xlu0 %8253 }
 0x431   : > { %v13267_v49 = vadd.f32 %v9616_v27, %v13044_v6  ;;  %v6089_v26 = vpop.f32.mrb[15].mxu1  ;;  %v9031_v6 = vpack.c.bf16 %v6177_v13, %v6177_v13  ;;  %v6183_v55 = vmax.f32 %v6151_v44, 0.0  ;;  %v6191_v8 = vmax.f32 %v6159_v12, 0.0 }
 0x432   : > { %8040 = vrot.lane.b32.xlu0 %v9032_v48, %s10071_s23  ;;  %v13273_v57 = vadd.f32 %v6089_v26, %v13046_v17  ;;  %v6180_v23 = vmax.f32 %v6148_v53, 0.0  ;;  %v6154_v17 = vadd.f32 %v13177_v39, %v13204_v24  ;;  %v6187_v34 = vmax.f32 %v6155_v11, 0.0  ;;  %v13333_v53 = vpop.permute.xlu1 %8267 }
 0x433   : > { %v9037_v5 = vpack.c.bf16 %v6183_v55, %v6183_v55  ;;  %v6153_v39 = vadd.f32 %v13187_v45, %v13204_v24  ;;  %v6190_v36 = vmax.f32 %v6158_v56, 0.0  ;;  %v6156_v45 = vadd.f32 %v13193_v1, %v13204_v24 }
 0x434   : > { %8042 = vrot.lane.b32.xlu1 %v9033_v4, %s10071_s23  ;;  %v9034_v21 = vpack.c.bf16 %v6180_v23, %v6180_v23  ;;  %v6186_v52 = vmax.f32 %v6154_v17, 0.0  ;;  %v9041_v7 = vpack.c.bf16 %v6187_v34, %v6187_v34  ;;  %v9045_v1 = vpack.c.bf16 %v6191_v8, %v6191_v8  ;;  %v13328_v44 = vpop.permute.xlu0 %8265 }
 0x435   : > { %v6185_v46 = vmax.f32 %v6153_v39, 0.0  ;;  %v9044_v10 = vpack.c.bf16 %v6190_v36, %v6190_v36  ;;  %v6188_v47 = vmax.f32 %v6156_v45, 0.0  ;;  %v6194_v48 = vmax.f32 %v6162_v51, 0.0 }
 0x436   : > { %8036 = vrot.lane.b32.xlu0 %v9030_v38, %s10071_s23  ;;  %v9040_v50 = vpack.c.bf16 %v6186_v52, %v6186_v52  ;;  %v6195_v27 = vmax.f32 %v6163_v40, 0.0  ;;  %v6161_v26 = vadd.f32 %v13226_v54, %v13204_v24  ;;  %v6192_v4 = vmax.f32 %v6160_v14, 0.0  ;;  %v13346_v61 = vpop.permute.xlu1 %8263 }
 0x437   : > { %v9039_v42 = vpack.c.bf16 %v6185_v46, %v6185_v46  ;;  %v9042_v32 = vpack.c.bf16 %v6188_v47, %v6188_v47  ;;  %v9048_v9 = vpack.c.bf16 %v6194_v48, %v6194_v48  ;;  %v6166_v13 = vadd.f32 %v13234_v18, %v13204_v24 }
 0x438   : > { %8038 = vrot.lane.b32.xlu1 %v9031_v6, %s10071_s23  ;;  %v9049_v0 = vpack.c.bf16 %v6195_v27, %v6195_v27  ;;  %v6193_v38 = vmax.f32 %v6161_v26, 0.0  ;;  %v6167_v2 = vadd.f32 %v13243_v35, %v13204_v24  ;;  %v9046_v54 = vpack.c.bf16 %v6192_v4, %v6192_v4  ;;  %v13341_v23 = vpop.permute.xlu0 %8261 }
 0x439   : > { %v6198_v6 = vmax.f32 %v6166_v13, 0.0  ;;  %v6164_v55 = vadd.f32 %v13240_v22, %v13204_v24  ;;  %v6168_v62 = vadd.f32 %v13264_v29, %v13204_v24  ;;  %v6169_v39 = vadd.f32 %v13273_v57, %v13204_v24 }
 0x43a   : > { %8048 = vrot.lane.b32.xlu0 %v9036_v16, %s10071_s23  ;;  %v9047_v18 = vpack.c.bf16 %v6193_v38, %v6193_v38  ;;  %v6199_v63 = vmax.f32 %v6167_v2, 0.0  ;;  %v6165_v16 = vadd.f32 %v13249_v33, %v13204_v24  ;;  %v7832_v29 = vadd.f32 %v13214_v43, %v13083_v30 }
 0x43b   : > { %v9052_v35 = vpack.c.bf16 %v6198_v6, %v6198_v6  ;;  %v6196_v17 = vmax.f32 %v6164_v55, 0.0  ;;  %v6200_v56 = vmax.f32 %v6168_v62, 0.0  ;;  %v6201_v46 = vmax.f32 %v6169_v39, 0.0 }
 0x43c   : > { %8050 = vrot.lane.b32.xlu1 %v9037_v5, %s10071_s23  ;;  %v6170_v5 = vadd.f32 %v13258_v28, %v13204_v24  ;;  %v9053_v22 = vpack.c.bf16 %v6199_v63, %v6199_v63  ;;  %v6197_v11 = vmax.f32 %v6165_v16, 0.0 }
 0x43d   : > { %v9050_v33 = vpack.c.bf16 %v6196_v17, %v6196_v17  ;;  %v9054_v57 = vpack.c.bf16 %v6200_v56, %v6200_v56  ;;  %v9055_v36 = vpack.c.bf16 %v6201_v46, %v6201_v46 }
 0x43e   : > { %8044 = vrot.lane.b32.xlu0 %v9034_v21, %s10071_s23  ;;  %v6171_v21 = vadd.f32 %v13267_v49, %v13204_v24  ;;  %v6202_v52 = vmax.f32 %v6170_v5, 0.0  ;;  %v9051_v28 = vpack.c.bf16 %v6197_v11, %v6197_v11  ;;  %v7829_v49 = vadd.f32 %v13206_v31, %v13083_v30 }
 0x43f   : > { %v7866_v31 = vmax.f32 %v7832_v29, 0.0 }
 0x440   : > { %8046 = vrot.lane.b32.xlu1 %v9035_v19, %s10071_s23  ;;  %v13354_v19 = vpop.permute.xlu0 %8273  ;;  %v6203_v34 = vmax.f32 %v6171_v21, 0.0  ;;  %v9056_v20 = vpack.c.bf16 %v6202_v52, %v6202_v52  ;;  %v7865_v24 = vmax.f32 %v7829_v49, 0.0 }
 0x441   : > { %v9089_v43 = vpack.c.bf16 %v7866_v31, %v7866_v31 }
 0x442   : > { %8056 = vrot.lane.b32.xlu0 %v9040_v50, %s10071_s23  ;;  %v13359_v50 = vpop.permute.xlu1 %8275  ;;  %v9088_v45 = vpack.c.bf16 %v7865_v24, %v7865_v24 }
 0x444   : > { %8058 = vrot.lane.b32.xlu1 %v9041_v7, %s10071_s23  ;;  %v9057_v7 = vpack.c.bf16 %v6203_v34, %v6203_v34  ;;  %v13367_v12 = vpop.permute.xlu0 %8269 }
 0x446   : > { %8052 = vrot.lane.b32.xlu0 %v9038_v41, %s10071_s23  ;;  %v13370_v41 = vpop.permute.xlu1 %8271 }
 0x448   : > { %8054 = vrot.lane.b32.xlu1 %v9039_v42, %s10071_s23  ;;  %v8282_v30 = vpop.permute.xlu0 %8281 }
 0x44a   : > { %8064 = vrot.lane.b32.xlu0 %v9044_v10, %s10071_s23  ;;  %v8284_v42 = vpop.permute.xlu1 %8283 }
 0x44c   : > { %8066 = vrot.lane.b32.xlu1 %v9045_v1, %s10071_s23  ;;  %v8278_v8 = vpop.permute.xlu0 %8277 }
 0x44e   : > { %8060 = vrot.lane.b32.xlu0 %v9042_v32, %s10071_s23  ;;  %v13376_v59 = vpop.permute.xlu1 %8279 }
 0x450   : > { %8062 = vrot.lane.b32.xlu1 %v9043_v15, %s10071_s23 }
 0x452   : > { %8072 = vrot.lane.b32.xlu0 %v9048_v9, %s10071_s23 }
 0x454   : > { %8074 = vrot.lane.b32.xlu1 %v9049_v0, %s10071_s23 }
 0x456   : > { %8068 = vrot.lane.b32.xlu0 %v9046_v54, %s10071_s23 }
 0x458   : > { %8070 = vrot.lane.b32.xlu1 %v9047_v18, %s10071_s23  ;;  %v13378_v10 = vpop.permute.xlu0 %8289 }
 0x45a   : > { %8080 = vrot.lane.b32.xlu0 %v9052_v35, %s10071_s23  ;;  %v13380_v47 = vpop.permute.xlu1 %8291 }
 0x45c   : > { %8082 = vrot.lane.b32.xlu1 %v9053_v22, %s10071_s23  ;;  %v13382_v51 = vpop.permute.xlu0 %8285 }
 0x45e   : > { %8076 = vrot.lane.b32.xlu0 %v9050_v33, %s10071_s23  ;;  %v13384_v1 = vpop.permute.xlu1 %8287 }
 0x460   : > { %8078 = vrot.lane.b32.xlu1 %v9051_v28, %s10071_s23 }
 0x462   : > { %8088 = vrot.lane.b32.xlu0 %v9056_v20, %s10071_s23 }
 0x464   : > { %8090 = vrot.lane.b32.xlu1 %v9057_v7, %s10071_s23 }
 0x466   : > { %8084 = vrot.lane.b32.xlu0 %v9054_v57, %s10071_s23 }
 0x468   : > { %8086 = vrot.lane.b32.xlu1 %v9055_v36, %s10071_s23 }
 0x46a   : > { %8313 = vrot.lane.b32.xlu0 %v9088_v45, %s10070_s20  ;;  %v13386_v60 = vpop.permute.xlu0 %8297 }
 0x46c   : > { %8315 = vrot.lane.b32.xlu1 %v9089_v43, %s10070_s20  ;;  %v13388_v40 = vpop.permute.xlu1 %8299 }
 0x46e   : > { %v13390_v32 = vpop.permute.xlu0 %8293 }
 0x470   : > { %v13392_v48 = vpop.permute.xlu1 %8295 }
 0x47d   : > { %v13394_v14 = vpop.permute.xlu0 %8305 }
 0x47f   : > { %v13396_v15 = vpop.permute.xlu1 %8307 }
 0x481   : > { %v13398_v27 = vpop.permute.xlu0 %8301 }
 0x483   : > { %v13400_v26 = vpop.permute.xlu1 %8303 }
 0x498   : > { %v13402_v9 = vpop.permute.xlu0 %8309 }
 0x49a   : > { %v13404_v4 = vpop.permute.xlu1 %8311 }
 0x49c   : > { %v8033_v13 = vpop.permute.xlu0 %8032 }
 0x49d   : > { %8127 = vst.msk [vmem:[%s10412_s13 + $0x8] sm:$0xf] %vm8124_vm2, %v8033_v13 }
 0x49e   : > { %8352 = vst.msk [vmem:[%s10412_s13 + $0x8] sm:$0xf] %vm8349_vm3, %v13302_v25  ;;  %v8035_v0 = vpop.permute.xlu1 %8034 }
 0x49f   : > { %8128 = vst.msk [vmem:[%s10412_s13 + $0xc] sm:$0xf] %vm8124_vm2, %v8035_v0 }
 0x4a0   : > { %8353 = vst.msk [vmem:[%s10412_s13 + $0xc] sm:$0xf] %vm8349_vm3, %v13307_v37  ;;  %v8029_v38 = vpop.permute.xlu0 %8028 }
 0x4a1   : > { %8125 = vst.msk [vmem:[%s10412_s13] sm:$0xf] %vm8124_vm2, %v8029_v38 }
 0x4a2   : > { %8350 = vst.msk [vmem:[%s10412_s13] sm:$0xf] %vm8349_vm3, %v13315_v3  ;;  %v8031_v2 = vpop.permute.xlu1 %8030 }
 0x4a3   : > { %8126 = vst.msk [vmem:[%s10412_s13 + $0x4] sm:$0xf] %vm8124_vm2, %v8031_v2 }
 0x4a4   : > { %8351 = vst.msk [vmem:[%s10412_s13 + $0x4] sm:$0xf] %vm8349_vm3, %v13320_v58  ;;  %v8041_v25 = vpop.permute.xlu0 %8040 }
 0x4a5   : > { %8131 = vst.msk [vmem:[%s10412_s13 + $0x18] sm:$0xf] %vm8124_vm2, %v8041_v25 }
 0x4a6   : > { %8356 = vst.msk [vmem:[%s10412_s13 + $0x18] sm:$0xf] %vm8349_vm3, %v13328_v44  ;;  %v8043_v37 = vpop.permute.xlu1 %8042 }
 0x4a7   : > { %8132 = vst.msk [vmem:[%s10412_s13 + $0x1c] sm:$0xf] %vm8124_vm2, %v8043_v37 }
 0x4a8   : > { %8357 = vst.msk [vmem:[%s10412_s13 + $0x1c] sm:$0xf] %vm8349_vm3, %v13333_v53  ;;  %v8037_v3 = vpop.permute.xlu0 %8036 }
 0x4a9   : > { %8129 = vst.msk [vmem:[%s10412_s13 + $0x10] sm:$0xf] %vm8124_vm2, %v8037_v3 }
 0x4aa   : > { %8354 = vst.msk [vmem:[%s10412_s13 + $0x10] sm:$0xf] %vm8349_vm3, %v13341_v23  ;;  %v8039_v58 = vpop.permute.xlu1 %8038 }
 0x4ab   : > { %8130 = vst.msk [vmem:[%s10412_s13 + $0x14] sm:$0xf] %vm8124_vm2, %v8039_v58 }
 0x4ac   : > { %8355 = vst.msk [vmem:[%s10412_s13 + $0x14] sm:$0xf] %vm8349_vm3, %v13346_v61  ;;  %v8049_v44 = vpop.permute.xlu0 %8048 }
 0x4ad   : > { %8135 = vst.msk [vmem:[%s10412_s13 + $0x28] sm:$0xf] %vm8124_vm2, %v8049_v44 }
 0x4ae   : > { %8360 = vst.msk [vmem:[%s10412_s13 + $0x28] sm:$0xf] %vm8349_vm3, %v13354_v19  ;;  %v8051_v53 = vpop.permute.xlu1 %8050 }
 0x4af   : > { %8136 = vst.msk [vmem:[%s10412_s13 + $0x2c] sm:$0xf] %vm8124_vm2, %v8051_v53 }
 0x4b0   : > { %8361 = vst.msk [vmem:[%s10412_s13 + $0x2c] sm:$0xf] %vm8349_vm3, %v13359_v50  ;;  %v8045_v54 = vpop.permute.xlu0 %8044 }
 0x4b1   : > { %8133 = vst.msk [vmem:[%s10412_s13 + $0x20] sm:$0xf] %vm8124_vm2, %v8045_v54 }
 0x4b2   : > { %8358 = vst.msk [vmem:[%s10412_s13 + $0x20] sm:$0xf] %vm8349_vm3, %v13367_v12  ;;  %v8047_v6 = vpop.permute.xlu1 %8046 }
 0x4b3   : > { %8134 = vst.msk [vmem:[%s10412_s13 + $0x24] sm:$0xf] %vm8124_vm2, %v8047_v6 }
 0x4b4   : > { %8359 = vst.msk [vmem:[%s10412_s13 + $0x24] sm:$0xf] %vm8349_vm3, %v13370_v41  ;;  %v8057_v55 = vpop.permute.xlu0 %8056 }
 0x4b5   : > { %8139 = vst.msk [vmem:[%s10412_s13 + $0x38] sm:$0xf] %vm8124_vm2, %v8057_v55 }
 0x4b6   : > { %8364 = vst.msk [vmem:[%s10412_s13 + $0x38] sm:$0xf] %vm8349_vm3, %v8282_v30  ;;  %v8059_v18 = vpop.permute.xlu1 %8058 }
 0x4b7   : > { %8140 = vst.msk [vmem:[%s10412_s13 + $0x3c] sm:$0xf] %vm8124_vm2, %v8059_v18 }
 0x4b8   : > { %8365 = vst.msk [vmem:[%s10412_s13 + $0x3c] sm:$0xf] %vm8349_vm3, %v8284_v42  ;;  %v8053_v63 = vpop.permute.xlu0 %8052 }
 0x4b9   : > { %8137 = vst.msk [vmem:[%s10412_s13 + $0x30] sm:$0xf] %vm8124_vm2, %v8053_v63 }
 0x4ba   : > { %8362 = vst.msk [vmem:[%s10412_s13 + $0x30] sm:$0xf] %vm8349_vm3, %v8278_v8  ;;  %v8055_v16 = vpop.permute.xlu1 %8054 }
 0x4bb   : > { %8138 = vst.msk [vmem:[%s10412_s13 + $0x34] sm:$0xf] %vm8124_vm2, %v8055_v16 }
 0x4bc   : > { %8363 = vst.msk [vmem:[%s10412_s13 + $0x34] sm:$0xf] %vm8349_vm3, %v13376_v59  ;;  %v8065_v23 = vpop.permute.xlu0 %8064 }
 0x4bd   : > { %8143 = vst.msk [vmem:[%s10412_s13 + $0x48] sm:$0xf] %vm8124_vm2, %v8065_v23 }
 0x4be   : > { %8368 = vst.msk [vmem:[%s10412_s13 + $0x48] sm:$0xf] %vm8349_vm3, %v13378_v10  ;;  %v8067_v35 = vpop.permute.xlu1 %8066 }
 0x4bf   : > { %8144 = vst.msk [vmem:[%s10412_s13 + $0x4c] sm:$0xf] %vm8124_vm2, %v8067_v35 }
 0x4c0   : > { %8369 = vst.msk [vmem:[%s10412_s13 + $0x4c] sm:$0xf] %vm8349_vm3, %v13380_v47  ;;  %v8061_v17 = vpop.permute.xlu0 %8060 }
 0x4c1   : > { %8141 = vst.msk [vmem:[%s10412_s13 + $0x40] sm:$0xf] %vm8124_vm2, %v8061_v17 }
 0x4c2   : > { %8366 = vst.msk [vmem:[%s10412_s13 + $0x40] sm:$0xf] %vm8349_vm3, %v13382_v51  ;;  %v8063_v5 = vpop.permute.xlu1 %8062 }
 0x4c3   : > { %8142 = vst.msk [vmem:[%s10412_s13 + $0x44] sm:$0xf] %vm8124_vm2, %v8063_v5 }
 0x4c4   : > { %8367 = vst.msk [vmem:[%s10412_s13 + $0x44] sm:$0xf] %vm8349_vm3, %v13384_v1  ;;  %v8073_v61 = vpop.permute.xlu0 %8072 }
 0x4c5   : > { %8147 = vst.msk [vmem:[%s10412_s13 + $0x58] sm:$0xf] %vm8124_vm2, %v8073_v61 }
 0x4c6   : > { %8372 = vst.msk [vmem:[%s10412_s13 + $0x58] sm:$0xf] %vm8349_vm3, %v13386_v60  ;;  %v8075_v22 = vpop.permute.xlu1 %8074 }
 0x4c7   : > { %8148 = vst.msk [vmem:[%s10412_s13 + $0x5c] sm:$0xf] %vm8124_vm2, %v8075_v22 }
 0x4c8   : > { %8373 = vst.msk [vmem:[%s10412_s13 + $0x5c] sm:$0xf] %vm8349_vm3, %v13388_v40  ;;  %v8069_v11 = vpop.permute.xlu0 %8068 }
 0x4c9   : > { %8145 = vst.msk [vmem:[%s10412_s13 + $0x50] sm:$0xf] %vm8124_vm2, %v8069_v11 }
 0x4ca   : > { %8370 = vst.msk [vmem:[%s10412_s13 + $0x50] sm:$0xf] %vm8349_vm3, %v13390_v32  ;;  %v8071_v21 = vpop.permute.xlu1 %8070 }
 0x4cb   : > { %8146 = vst.msk [vmem:[%s10412_s13 + $0x54] sm:$0xf] %vm8124_vm2, %v8071_v21 }
 0x4cc   : > { %8371 = vst.msk [vmem:[%s10412_s13 + $0x54] sm:$0xf] %vm8349_vm3, %v13392_v48  ;;  %v8081_v33 = vpop.permute.xlu0 %8080 }
 0x4cd   : > { %8151 = vst.msk [vmem:[%s10412_s13 + $0x68] sm:$0xf] %vm8124_vm2, %v8081_v33 }
 0x4ce   : > { %8376 = vst.msk [vmem:[%s10412_s13 + $0x68] sm:$0xf] %vm8349_vm3, %v13394_v14  ;;  %v8083_v52 = vpop.permute.xlu1 %8082 }
 0x4cf   : > { %8152 = vst.msk [vmem:[%s10412_s13 + $0x6c] sm:$0xf] %vm8124_vm2, %v8083_v52 }
 0x4d0   : > { %8377 = vst.msk [vmem:[%s10412_s13 + $0x6c] sm:$0xf] %vm8349_vm3, %v13396_v15  ;;  %v8077_v62 = vpop.permute.xlu0 %8076 }
 0x4d1   : > { %8149 = vst.msk [vmem:[%s10412_s13 + $0x60] sm:$0xf] %vm8124_vm2, %v8077_v62 }
 0x4d2   : > { %8374 = vst.msk [vmem:[%s10412_s13 + $0x60] sm:$0xf] %vm8349_vm3, %v13398_v27  ;;  %v8079_v19 = vpop.permute.xlu1 %8078 }
 0x4d3   : > { %8150 = vst.msk [vmem:[%s10412_s13 + $0x64] sm:$0xf] %vm8124_vm2, %v8079_v19 }
 0x4d4   : > { %8375 = vst.msk [vmem:[%s10412_s13 + $0x64] sm:$0xf] %vm8349_vm3, %v13400_v26  ;;  %v8089_v28 = vpop.permute.xlu0 %8088 }
 0x4d5   : > { %8155 = vst.msk [vmem:[%s10412_s13 + $0x78] sm:$0xf] %vm8124_vm2, %v8089_v28 }
 0x4d6   : > { %v8091_v34 = vpop.permute.xlu1 %8090 }
 0x4d7   : > { %8156 = vst.msk [vmem:[%s10412_s13 + $0x7c] sm:$0xf] %vm8124_vm2, %v8091_v34 }
 0x4d8   : > { %v8085_v39 = vpop.permute.xlu0 %8084 }
 0x4d9   : > { %8153 = vst.msk [vmem:[%s10412_s13 + $0x70] sm:$0xf] %vm8124_vm2, %v8085_v39 }
 0x4da   : > { %8378 = vst.msk [vmem:[%s10412_s13 + $0x70] sm:$0xf] %vm8349_vm3, %v13402_v9  ;;  %v8087_v50 = vpop.permute.xlu1 %8086 }
 0x4db   : > { %8154 = vst.msk [vmem:[%s10412_s13 + $0x74] sm:$0xf] %vm8124_vm2, %v8087_v50 }
 0x4dc   : > { %8379 = vst.msk [vmem:[%s10412_s13 + $0x74] sm:$0xf] %vm8349_vm3, %v13404_v4  ;;  %v8314_v49 = vpop.permute.xlu0 %8313 }
 0x4dd   : > { %8380 = vst.msk [vmem:[%s10412_s13 + $0x78] sm:$0xf] %vm8349_vm3, %v8314_v49 }
 0x4de   : > { %v8316_v20 = vpop.permute.xlu1 %8315 }
 0x4df   : > { %8381 = vst.msk [vmem:[%s10412_s13 + $0x7c] sm:$0xf] %vm8349_vm3, %v8316_v20 }
 0x4e0 PF: > { %s17_s24 = sadd.s32 1, %s10065_s24  }
 0x4e1   : > { %p14_p4 = scmp.ge.s32.totalorder %s17_s24, 4  }
 0x4e3   :  { %16 = sbr.rel (!%p14_p4) target bundleno = 1 (0x1), region = 91 }

</bundles_post_ra>
